<compile_context>
chip_gen: v7x
topology: tpu7x:2x2x1
jax: 0.10.0
libtpu: 0.0.40
codegen_flags: <defaults>
</compile_context>

<pallas_src>
import jax
import jax.numpy as jnp
from jax.experimental import pallas as pl
from jax.experimental.pallas import tpu as pltpu


# ----------------------------------------------------------------------------
# Fused per-image kernel.
# ----------------------------------------------------------------------------
def _gcss_fused_kernel(a1_ref, w1_ref, b1_ref, w2m_ref, b2_ref,
                       wfc1_ref, bfc1_ref, wfc2_ref, bfc2_ref,
                       o_ref, y1q_scr, b_scr, y2_scr):
    f32 = jnp.float32
    bf16 = jnp.bfloat16

    # ---- conv1(k5,p2) + bias + ReLU + maxpool2, per (row,col)-parity quarter --
    # y1q_scr[q = 2*pi+pj][7*alpha + beta, c] = pooled conv1 output at spatial
    # position (2*alpha + pi, 2*beta + pj).  Each quarter is the max over the
    # 4 pool taps of an im2col matmul (bias/ReLU commute with the max).
    w1 = w1_ref[...]                                  # (25, 32) bf16
    b1 = b1_ref[...]                                  # (1, 32) f32
    for q in range(4):
        best = None
        for t in range(4):
            cand = jnp.dot(a1_ref[0, q, t], w1,
                           preferred_element_type=f32)          # (49, 32)
            best = cand if best is None else jnp.maximum(best, cand)
        y1q_scr[q] = jnp.maximum(best + b1, 0.0)

    # ---- build conv2 "im2col-lite" parity planes in VMEM ----------------------
    # b_scr[p][a*9 + b, dx*32 + ci] = y1_pad[2a + (p>>1), 2b + (p&1) + dx, ci],
    # where y1_pad is conv1's pooled output zero-padded by 2.  Borders stay zero
    # from the memset; only interior row-runs are copied (contiguous on both
    # sides, no strided access).
    b_scr[...] = jnp.zeros(b_scr.shape, f32)
    for p in range(4):
        pi, pj = p >> 1, p & 1
        for dx in range(5):
            qcol = 2 * pi + ((pj + dx) & 1)   # source quarter of conv1 output
            qwd = (pj + dx) >> 1              # column half-offset
            b_lo = 1 if qwd == 0 else 0
            b_hi = 8 - qwd
            nb = b_hi - b_lo
            c0 = b_lo - 1 + qwd               # first source column (beta)
            for a in range(1, 8):
                src0 = 7 * (a - 1) + c0
                b_scr[p, a * 9 + b_lo: a * 9 + b_lo + nb,
                      dx * 32:(dx + 1) * 32] = y1q_scr[qcol, src0: src0 + nb, :]

    # ---- conv2(k5,p2) + bias + ReLU + maxpool2 via pool-tap decomposition -----
    # One (63,160)x(160,64) MXU matmul per (dy, tap).  dy is the outer loop so
    # the (160,64) weight slab can stay latched across the 4 taps.
    accs = [jnp.zeros((63, 64), f32) for _ in range(4)]
    for dy in range(5):
        w_dy = w2m_ref[dy]                            # (160, 64) bf16
        for di in range(2):
            for dj in range(2):
                rp = (di + dy) & 1
                qh = (di + dy) >> 1
                lhs = b_scr[2 * rp + dj, 9 * qh: 9 * qh + 63, :].astype(bf16)
                t = 2 * di + dj
                accs[t] = accs[t] + jnp.dot(lhs, w_dy,
                                            preferred_element_type=f32)
    pooled = jnp.maximum(jnp.maximum(accs[0], accs[1]),
                         jnp.maximum(accs[2], accs[3]))
    # rows r = g*9 + h; only h < 7 are valid (h in {7,8} are harmless junk).
    y2_scr[...] = jnp.maximum(pooled + b2_ref[...], 0.0)        # (63, 64) f32

    # ---- fc1 (3136 -> 128) + ReLU + fc2 (128 -> 1) ----------------------------
    # fc1 weights were permuted at init to (spatial=49, cin=64, hidden=128) in
    # NHWC order, so no runtime flatten/transpose of the activation is needed.
    hid = jnp.zeros((1, 128), f32)
    for g in range(7):
        for h in range(7):
            xrow = y2_scr[g * 9 + h: g * 9 + h + 1, :].astype(bf16)   # (1, 64)
            hid = hid + jnp.dot(xrow, wfc1_ref[g * 7 + h],
                                preferred_element_type=f32)
    hid = jnp.maximum(hid + bfc1_ref[...], 0.0)                       # (1, 128)
    # fc2: N=1 -> VPU multiply + lane reduction instead of a 1-column matmul.
    out = jnp.sum(hid * wfc2_ref[...], axis=1, keepdims=True) + bfc2_ref[...]
    o_ref[0] = out


# ----------------------------------------------------------------------------
# Full forward pass (PyTorch NCHW convention in, (1, B, 1) out).
# ----------------------------------------------------------------------------
def gcss_net_forward(x_nchw, params):
    B, Cin, H, W = x_nchw.shape
    assert (Cin, H, W) == (1, 28, 28)

    # Glue on the tiny raw input only: pad + gather the per-(quarter, pool-tap)
    # im2col patches for conv1.  a1[b, q=2pi+pj, t=2di+dj, 7a+b', 5dy+dx]
    #   = x_pad[b, 4a + 2pi + di + dy, 4b' + 2pj + dj + dx]
    x = x_nchw[:, 0]
    xpad = jnp.pad(x, ((0, 0), (2, 2), (2, 2)))                 # (B, 32, 32)
    par = jnp.arange(2)     # pi / pj
    tap = jnp.arange(2)     # di / dj
    ker = jnp.arange(5)     # dy / dx
    pos = jnp.arange(7)     # alpha / beta
    idx = (4 * pos[None, None, None, :] + 2 * par[:, None, None, None]
           + tap[None, :, None, None] + ker[None, None, :, None])   # (2,2,5,7)
    a1 = xpad[:, idx[:, :, :, :, None, None, None, None],
              idx[None, None, None, None, :, :, :, :]]
    # (B, pi, di, dy, alpha, pj, dj, dx, beta) -> (B, pi, pj, di, dj, a, b, dy, dx)
    a1 = a1.transpose(0, 1, 5, 2, 6, 4, 8, 3, 7).reshape(B, 4, 4, 49, 25)
    a1 = a1.astype(jnp.bfloat16)

    out = pl.pallas_call(
        _gcss_fused_kernel,
        out_shape=jax.ShapeDtypeStruct((B, 1, 1), jnp.float32),
        grid=(B,),
        in_specs=[
            pl.BlockSpec((1, 4, 4, 49, 25), lambda b: (b, 0, 0, 0, 0)),  # a1
            pl.BlockSpec((25, 32), lambda b: (0, 0)),                    # w1col
            pl.BlockSpec((1, 32), lambda b: (0, 0)),                     # b1
            pl.BlockSpec((5, 160, 64), lambda b: (0, 0, 0)),             # w2m
            pl.BlockSpec((1, 64), lambda b: (0, 0)),                     # b2
            pl.BlockSpec((49, 64, 128), lambda b: (0, 0, 0)),            # wfc1
            pl.BlockSpec((1, 128), lambda b: (0, 0)),                    # bfc1
            pl.BlockSpec((1, 128), lambda b: (0, 0)),                    # wfc2
            pl.BlockSpec((1, 1), lambda b: (0, 0)),                      # bfc2
        ],
        out_specs=pl.BlockSpec((1, 1, 1), lambda b: (b, 0, 0)),
        scratch_shapes=[
            pltpu.VMEM((4, 49, 32), jnp.float32),    # conv1 pooled output (quarters)
            pltpu.VMEM((4, 81, 160), jnp.float32),   # conv2 im2col-lite planes
            pltpu.VMEM((63, 64), jnp.float32),       # conv2 pooled output
        ],
        compiler_params=pltpu.CompilerParams(
            dimension_semantics=("parallel",)),
    )(a1, params["w1col"], params["b1"], params["w2m"], params["b2"],
      params["wfc1"], params["bfc1"], params["wfc2"], params["bfc2"])

    return out.reshape(1, B, 1)            # torch.unsqueeze(out(x), dim=0)


# ----------------------------------------------------------------------------
# Deterministic synthetic parameters (PyTorch-conventional shapes), repacked
# once into the layouts the fused kernel expects (bf16 matmul operands).
# ----------------------------------------------------------------------------
def init_params(key):
    ks = jax.random.split(key, 8)
    c1 = 0.10 * jax.random.normal(ks[0], (32, 1, 5, 5), jnp.float32)      # (Cout,Cin,kh,kw)
    c2 = 0.05 * jax.random.normal(ks[1], (64, 32, 5, 5), jnp.float32)
    f1 = 0.02 * jax.random.normal(ks[2], (128, 64 * 7 * 7), jnp.float32)  # (out,in)
    f2 = 0.05 * jax.random.normal(ks[3], (1, 128), jnp.float32)
    b1 = 0.1 * jax.random.normal(ks[4], (32,), jnp.float32)
    b2 = 0.1 * jax.random.normal(ks[5], (64,), jnp.float32)
    bf1 = 0.1 * jax.random.normal(ks[6], (128,), jnp.float32)
    bf2 = 0.1 * jax.random.normal(ks[7], (1,), jnp.float32)

    # conv1: (5dy+dx, cout)
    w1col = c1.transpose(2, 3, 1, 0).reshape(25, 32).astype(jnp.bfloat16)
    # conv2: (dy, 32*dx + cin, cout)  -- matches the in-kernel im2col-lite planes
    w2m = c2.transpose(2, 3, 1, 0).reshape(5, 160, 64).astype(jnp.bfloat16)
    # fc1: permuted so NHWC spatial-major activation rows hit the right weights
    # (torch flatten order is c*49 + g*7 + h).
    wfc1 = f1.reshape(128, 64, 49).transpose(2, 1, 0).astype(jnp.bfloat16)  # (49,64,128)

    return {
        "w1col": w1col, "b1": b1.reshape(1, 32),
        "w2m": w2m, "b2": b2.reshape(1, 64),
        "wfc1": wfc1, "bfc1": bf1.reshape(1, 128),
        "wfc2": f2,                      # (1, 128) f32 (VPU path)
        "bfc2": bf2.reshape(1, 1),
    }


if __name__ == "__main__":
    key = jax.random.PRNGKey(0)
    pkey, xkey = jax.random.split(key)
    params = init_params(pkey)

    # sample_num = 1 -> 1 input channel; MNIST-like 28x28 spatial; batch = 2.
    x = jax.random.normal(xkey, (2, 1, 28, 28), jnp.float32)

    out = jax.jit(gcss_net_forward)(x, params)
    out = jax.block_until_ready(out)
    assert out.shape == (1, 2, 1), out.shape
    assert jnp.all(jnp.isfinite(out))
    print("KERNEL_OK")
</pallas_src>

<mosaic_0001>
module attributes {stable_mosaic.version = 11 : i64} {
  func.func @_gcss_fused_kernel(%arg0: i32, %arg1: memref<1x4x4x49x25xbf16, #tpu.memory_space<vmem>>, %arg2: memref<25x32xbf16, #tpu.memory_space<vmem>>, %arg3: memref<1x32xf32, #tpu.memory_space<vmem>>, %arg4: memref<5x160x64xbf16, #tpu.memory_space<vmem>>, %arg5: memref<1x64xf32, #tpu.memory_space<vmem>>, %arg6: memref<49x64x128xbf16, #tpu.memory_space<vmem>>, %arg7: memref<1x128xf32, #tpu.memory_space<vmem>>, %arg8: memref<1x128xf32, #tpu.memory_space<vmem>>, %arg9: memref<1x1xf32, #tpu.memory_space<vmem>>, %arg10: memref<1x1x1xf32, #tpu.memory_space<vmem>>, %arg11: memref<4x49x32xf32, #tpu.memory_space<vmem>>, %arg12: memref<4x81x160xf32, #tpu.memory_space<vmem>>, %arg13: memref<63x64xf32, #tpu.memory_space<vmem>>) attributes {dimension_semantics = [#tpu.dimension_semantics<parallel>], iteration_bounds = array<i64: 2>, scalar_prefetch = 0 : i64, scratch_operands = 3 : i64, tpu.core_type = #tpu.core_type<tc>, window_params = [{transform_indices = @transform_0, window_bounds = array<i64: 1, 4, 4, 49, 25>}, {pipeline_mode = #tpu.pipeline_mode<synchronous>, transform_indices = @transform_1, window_bounds = array<i64: 25, 32>}, {pipeline_mode = #tpu.pipeline_mode<synchronous>, transform_indices = @transform_2, window_bounds = array<i64: 1, 32>}, {pipeline_mode = #tpu.pipeline_mode<synchronous>, transform_indices = @transform_3, window_bounds = array<i64: 5, 160, 64>}, {pipeline_mode = #tpu.pipeline_mode<synchronous>, transform_indices = @transform_4, window_bounds = array<i64: 1, 64>}, {pipeline_mode = #tpu.pipeline_mode<synchronous>, transform_indices = @transform_5, window_bounds = array<i64: 49, 64, 128>}, {pipeline_mode = #tpu.pipeline_mode<synchronous>, transform_indices = @transform_6, window_bounds = array<i64: 1, 128>}, {pipeline_mode = #tpu.pipeline_mode<synchronous>, transform_indices = @transform_7, window_bounds = array<i64: 1, 128>}, {pipeline_mode = #tpu.pipeline_mode<synchronous>, transform_indices = @transform_8, window_bounds = array<i64: 1, 1>}, {transform_indices = @transform_9, window_bounds = array<i64: 1, 1, 1>}]} {
    %c0 = arith.constant 0 : index
    %c0_0 = arith.constant 0 : index
    %0 = vector.load %arg2[%c0, %c0_0] : memref<25x32xbf16, #tpu.memory_space<vmem>>, vector<25x32xbf16>
    %c0_1 = arith.constant 0 : index
    %c0_2 = arith.constant 0 : index
    %1 = vector.load %arg3[%c0_1, %c0_2] : memref<1x32xf32, #tpu.memory_space<vmem>>, vector<1x32xf32>
    %c0_3 = arith.constant 0 : index
    %c0_4 = arith.constant 0 : index
    %c0_5 = arith.constant 0 : index
    %c0_6 = arith.constant 0 : index
    %c0_7 = arith.constant 0 : index
    %2 = vector.load %arg1[%c0_3, %c0_4, %c0_5, %c0_6, %c0_7] : memref<1x4x4x49x25xbf16, #tpu.memory_space<vmem>>, vector<1x1x1x49x25xbf16>
    %3 = vector.shape_cast %2 : vector<1x1x1x49x25xbf16> to vector<49x25xbf16>
    %cst = arith.constant dense<0.000000e+00> : vector<49x32xf32>
    %4 = tpu.matmul %3, %0, %cst {dimension_numbers = #tpu.dot_dimension_numbers<[1], [0], [0], [1], [0, 0, 1, 1], [], []>} : vector<49x25xbf16>, vector<25x32xbf16>, vector<49x32xf32> -> vector<49x32xf32>
    %c0_8 = arith.constant 0 : index
    %c0_9 = arith.constant 0 : index
    %c1 = arith.constant 1 : index
    %c0_10 = arith.constant 0 : index
    %c0_11 = arith.constant 0 : index
    %5 = vector.load %arg1[%c0_8, %c0_9, %c1, %c0_10, %c0_11] : memref<1x4x4x49x25xbf16, #tpu.memory_space<vmem>>, vector<1x1x1x49x25xbf16>
    %6 = vector.shape_cast %5 : vector<1x1x1x49x25xbf16> to vector<49x25xbf16>
    %cst_12 = arith.constant dense<0.000000e+00> : vector<49x32xf32>
    %7 = tpu.matmul %6, %0, %cst_12 {dimension_numbers = #tpu.dot_dimension_numbers<[1], [0], [0], [1], [0, 0, 1, 1], [], []>} : vector<49x25xbf16>, vector<25x32xbf16>, vector<49x32xf32> -> vector<49x32xf32>
    %8 = arith.maximumf %4, %7 : vector<49x32xf32>
    %c0_13 = arith.constant 0 : index
    %c0_14 = arith.constant 0 : index
    %c2 = arith.constant 2 : index
    %c0_15 = arith.constant 0 : index
    %c0_16 = arith.constant 0 : index
    %9 = vector.load %arg1[%c0_13, %c0_14, %c2, %c0_15, %c0_16] : memref<1x4x4x49x25xbf16, #tpu.memory_space<vmem>>, vector<1x1x1x49x25xbf16>
    %10 = vector.shape_cast %9 : vector<1x1x1x49x25xbf16> to vector<49x25xbf16>
    %cst_17 = arith.constant dense<0.000000e+00> : vector<49x32xf32>
    %11 = tpu.matmul %10, %0, %cst_17 {dimension_numbers = #tpu.dot_dimension_numbers<[1], [0], [0], [1], [0, 0, 1, 1], [], []>} : vector<49x25xbf16>, vector<25x32xbf16>, vector<49x32xf32> -> vector<49x32xf32>
    %12 = arith.maximumf %8, %11 : vector<49x32xf32>
    %c0_18 = arith.constant 0 : index
    %c0_19 = arith.constant 0 : index
    %c3 = arith.constant 3 : index
    %c0_20 = arith.constant 0 : index
    %c0_21 = arith.constant 0 : index
    %13 = vector.load %arg1[%c0_18, %c0_19, %c3, %c0_20, %c0_21] : memref<1x4x4x49x25xbf16, #tpu.memory_space<vmem>>, vector<1x1x1x49x25xbf16>
    %14 = vector.shape_cast %13 : vector<1x1x1x49x25xbf16> to vector<49x25xbf16>
    %cst_22 = arith.constant dense<0.000000e+00> : vector<49x32xf32>
    %15 = tpu.matmul %14, %0, %cst_22 {dimension_numbers = #tpu.dot_dimension_numbers<[1], [0], [0], [1], [0, 0, 1, 1], [], []>} : vector<49x25xbf16>, vector<25x32xbf16>, vector<49x32xf32> -> vector<49x32xf32>
    %16 = arith.maximumf %12, %15 : vector<49x32xf32>
    %17 = vector.broadcast %1 : vector<1x32xf32> to vector<49x32xf32>
    %18 = arith.addf %16, %17 : vector<49x32xf32>
    %cst_23 = arith.constant 0.000000e+00 : f32
    %19 = vector.broadcast %cst_23 : f32 to vector<49x32xf32>
    %20 = arith.maximumf %18, %19 : vector<49x32xf32>
    %c0_24 = arith.constant 0 : index
    %c0_25 = arith.constant 0 : index
    %c0_26 = arith.constant 0 : index
    %21 = vector.load %arg11[%c0_24, %c0_25, %c0_26] : memref<4x49x32xf32, #tpu.memory_space<vmem>>, vector<1x49x32xf32>
    %22 = vector.shape_cast %21 : vector<1x49x32xf32> to vector<49x32xf32>
    %23 = vector.shape_cast %20 : vector<49x32xf32> to vector<1x49x32xf32>
    tpu.vector_store %arg11[%c0_24, %c0_25, %c0_26], %23 {strides = array<i32>} : memref<4x49x32xf32, #tpu.memory_space<vmem>>, vector<1x49x32xf32>,
    %c0_27 = arith.constant 0 : index
    %c1_28 = arith.constant 1 : index
    %c0_29 = arith.constant 0 : index
    %c0_30 = arith.constant 0 : index
    %c0_31 = arith.constant 0 : index
    %24 = vector.load %arg1[%c0_27, %c1_28, %c0_29, %c0_30, %c0_31] : memref<1x4x4x49x25xbf16, #tpu.memory_space<vmem>>, vector<1x1x1x49x25xbf16>
    %25 = vector.shape_cast %24 : vector<1x1x1x49x25xbf16> to vector<49x25xbf16>
    %cst_32 = arith.constant dense<0.000000e+00> : vector<49x32xf32>
    %26 = tpu.matmul %25, %0, %cst_32 {dimension_numbers = #tpu.dot_dimension_numbers<[1], [0], [0], [1], [0, 0, 1, 1], [], []>} : vector<49x25xbf16>, vector<25x32xbf16>, vector<49x32xf32> -> vector<49x32xf32>
    %c0_33 = arith.constant 0 : index
    %c1_34 = arith.constant 1 : index
    %c1_35 = arith.constant 1 : index
    %c0_36 = arith.constant 0 : index
    %c0_37 = arith.constant 0 : index
    %27 = vector.load %arg1[%c0_33, %c1_34, %c1_35, %c0_36, %c0_37] : memref<1x4x4x49x25xbf16, #tpu.memory_space<vmem>>, vector<1x1x1x49x25xbf16>
    %28 = vector.shape_cast %27 : vector<1x1x1x49x25xbf16> to vector<49x25xbf16>
    %cst_38 = arith.constant dense<0.000000e+00> : vector<49x32xf32>
    %29 = tpu.matmul %28, %0, %cst_38 {dimension_numbers = #tpu.dot_dimension_numbers<[1], [0], [0], [1], [0, 0, 1, 1], [], []>} : vector<49x25xbf16>, vector<25x32xbf16>, vector<49x32xf32> -> vector<49x32xf32>
    %30 = arith.maximumf %26, %29 : vector<49x32xf32>
    %c0_39 = arith.constant 0 : index
    %c1_40 = arith.constant 1 : index
    %c2_41 = arith.constant 2 : index
    %c0_42 = arith.constant 0 : index
    %c0_43 = arith.constant 0 : index
    %31 = vector.load %arg1[%c0_39, %c1_40, %c2_41, %c0_42, %c0_43] : memref<1x4x4x49x25xbf16, #tpu.memory_space<vmem>>, vector<1x1x1x49x25xbf16>
    %32 = vector.shape_cast %31 : vector<1x1x1x49x25xbf16> to vector<49x25xbf16>
    %cst_44 = arith.constant dense<0.000000e+00> : vector<49x32xf32>
    %33 = tpu.matmul %32, %0, %cst_44 {dimension_numbers = #tpu.dot_dimension_numbers<[1], [0], [0], [1], [0, 0, 1, 1], [], []>} : vector<49x25xbf16>, vector<25x32xbf16>, vector<49x32xf32> -> vector<49x32xf32>
    %34 = arith.maximumf %30, %33 : vector<49x32xf32>
    %c0_45 = arith.constant 0 : index
    %c1_46 = arith.constant 1 : index
    %c3_47 = arith.constant 3 : index
    %c0_48 = arith.constant 0 : index
    %c0_49 = arith.constant 0 : index
    %35 = vector.load %arg1[%c0_45, %c1_46, %c3_47, %c0_48, %c0_49] : memref<1x4x4x49x25xbf16, #tpu.memory_space<vmem>>, vector<1x1x1x49x25xbf16>
    %36 = vector.shape_cast %35 : vector<1x1x1x49x25xbf16> to vector<49x25xbf16>
    %cst_50 = arith.constant dense<0.000000e+00> : vector<49x32xf32>
    %37 = tpu.matmul %36, %0, %cst_50 {dimension_numbers = #tpu.dot_dimension_numbers<[1], [0], [0], [1], [0, 0, 1, 1], [], []>} : vector<49x25xbf16>, vector<25x32xbf16>, vector<49x32xf32> -> vector<49x32xf32>
    %38 = arith.maximumf %34, %37 : vector<49x32xf32>
    %39 = vector.broadcast %1 : vector<1x32xf32> to vector<49x32xf32>
    %40 = arith.addf %38, %39 : vector<49x32xf32>
    %cst_51 = arith.constant 0.000000e+00 : f32
    %41 = vector.broadcast %cst_51 : f32 to vector<49x32xf32>
    %42 = arith.maximumf %40, %41 : vector<49x32xf32>
    %c1_52 = arith.constant 1 : index
    %c0_53 = arith.constant 0 : index
    %c0_54 = arith.constant 0 : index
    %43 = vector.load %arg11[%c1_52, %c0_53, %c0_54] : memref<4x49x32xf32, #tpu.memory_space<vmem>>, vector<1x49x32xf32>
    %44 = vector.shape_cast %43 : vector<1x49x32xf32> to vector<49x32xf32>
    %45 = vector.shape_cast %42 : vector<49x32xf32> to vector<1x49x32xf32>
    tpu.vector_store %arg11[%c1_52, %c0_53, %c0_54], %45 {strides = array<i32>} : memref<4x49x32xf32, #tpu.memory_space<vmem>>, vector<1x49x32xf32>,
    %c0_55 = arith.constant 0 : index
    %c2_56 = arith.constant 2 : index
    %c0_57 = arith.constant 0 : index
    %c0_58 = arith.constant 0 : index
    %c0_59 = arith.constant 0 : index
    %46 = vector.load %arg1[%c0_55, %c2_56, %c0_57, %c0_58, %c0_59] : memref<1x4x4x49x25xbf16, #tpu.memory_space<vmem>>, vector<1x1x1x49x25xbf16>
    %47 = vector.shape_cast %46 : vector<1x1x1x49x25xbf16> to vector<49x25xbf16>
    %cst_60 = arith.constant dense<0.000000e+00> : vector<49x32xf32>
    %48 = tpu.matmul %47, %0, %cst_60 {dimension_numbers = #tpu.dot_dimension_numbers<[1], [0], [0], [1], [0, 0, 1, 1], [], []>} : vector<49x25xbf16>, vector<25x32xbf16>, vector<49x32xf32> -> vector<49x32xf32>
    %c0_61 = arith.constant 0 : index
    %c2_62 = arith.constant 2 : index
    %c1_63 = arith.constant 1 : index
    %c0_64 = arith.constant 0 : index
    %c0_65 = arith.constant 0 : index
    %49 = vector.load %arg1[%c0_61, %c2_62, %c1_63, %c0_64, %c0_65] : memref<1x4x4x49x25xbf16, #tpu.memory_space<vmem>>, vector<1x1x1x49x25xbf16>
    %50 = vector.shape_cast %49 : vector<1x1x1x49x25xbf16> to vector<49x25xbf16>
    %cst_66 = arith.constant dense<0.000000e+00> : vector<49x32xf32>
    %51 = tpu.matmul %50, %0, %cst_66 {dimension_numbers = #tpu.dot_dimension_numbers<[1], [0], [0], [1], [0, 0, 1, 1], [], []>} : vector<49x25xbf16>, vector<25x32xbf16>, vector<49x32xf32> -> vector<49x32xf32>
    %52 = arith.maximumf %48, %51 : vector<49x32xf32>
    %c0_67 = arith.constant 0 : index
    %c2_68 = arith.constant 2 : index
    %c2_69 = arith.constant 2 : index
    %c0_70 = arith.constant 0 : index
    %c0_71 = arith.constant 0 : index
    %53 = vector.load %arg1[%c0_67, %c2_68, %c2_69, %c0_70, %c0_71] : memref<1x4x4x49x25xbf16, #tpu.memory_space<vmem>>, vector<1x1x1x49x25xbf16>
    %54 = vector.shape_cast %53 : vector<1x1x1x49x25xbf16> to vector<49x25xbf16>
    %cst_72 = arith.constant dense<0.000000e+00> : vector<49x32xf32>
    %55 = tpu.matmul %54, %0, %cst_72 {dimension_numbers = #tpu.dot_dimension_numbers<[1], [0], [0], [1], [0, 0, 1, 1], [], []>} : vector<49x25xbf16>, vector<25x32xbf16>, vector<49x32xf32> -> vector<49x32xf32>
    %56 = arith.maximumf %52, %55 : vector<49x32xf32>
    %c0_73 = arith.constant 0 : index
    %c2_74 = arith.constant 2 : index
    %c3_75 = arith.constant 3 : index
    %c0_76 = arith.constant 0 : index
    %c0_77 = arith.constant 0 : index
    %57 = vector.load %arg1[%c0_73, %c2_74, %c3_75, %c0_76, %c0_77] : memref<1x4x4x49x25xbf16, #tpu.memory_space<vmem>>, vector<1x1x1x49x25xbf16>
    %58 = vector.shape_cast %57 : vector<1x1x1x49x25xbf16> to vector<49x25xbf16>
    %cst_78 = arith.constant dense<0.000000e+00> : vector<49x32xf32>
    %59 = tpu.matmul %58, %0, %cst_78 {dimension_numbers = #tpu.dot_dimension_numbers<[1], [0], [0], [1], [0, 0, 1, 1], [], []>} : vector<49x25xbf16>, vector<25x32xbf16>, vector<49x32xf32> -> vector<49x32xf32>
    %60 = arith.maximumf %56, %59 : vector<49x32xf32>
    %61 = vector.broadcast %1 : vector<1x32xf32> to vector<49x32xf32>
    %62 = arith.addf %60, %61 : vector<49x32xf32>
    %cst_79 = arith.constant 0.000000e+00 : f32
    %63 = vector.broadcast %cst_79 : f32 to vector<49x32xf32>
    %64 = arith.maximumf %62, %63 : vector<49x32xf32>
    %c2_80 = arith.constant 2 : index
    %c0_81 = arith.constant 0 : index
    %c0_82 = arith.constant 0 : index
    %65 = vector.load %arg11[%c2_80, %c0_81, %c0_82] : memref<4x49x32xf32, #tpu.memory_space<vmem>>, vector<1x49x32xf32>
    %66 = vector.shape_cast %65 : vector<1x49x32xf32> to vector<49x32xf32>
    %67 = vector.shape_cast %64 : vector<49x32xf32> to vector<1x49x32xf32>
    tpu.vector_store %arg11[%c2_80, %c0_81, %c0_82], %67 {strides = array<i32>} : memref<4x49x32xf32, #tpu.memory_space<vmem>>, vector<1x49x32xf32>,
    %c0_83 = arith.constant 0 : index
    %c3_84 = arith.constant 3 : index
    %c0_85 = arith.constant 0 : index
    %c0_86 = arith.constant 0 : index
    %c0_87 = arith.constant 0 : index
    %68 = vector.load %arg1[%c0_83, %c3_84, %c0_85, %c0_86, %c0_87] : memref<1x4x4x49x25xbf16, #tpu.memory_space<vmem>>, vector<1x1x1x49x25xbf16>
    %69 = vector.shape_cast %68 : vector<1x1x1x49x25xbf16> to vector<49x25xbf16>
    %cst_88 = arith.constant dense<0.000000e+00> : vector<49x32xf32>
    %70 = tpu.matmul %69, %0, %cst_88 {dimension_numbers = #tpu.dot_dimension_numbers<[1], [0], [0], [1], [0, 0, 1, 1], [], []>} : vector<49x25xbf16>, vector<25x32xbf16>, vector<49x32xf32> -> vector<49x32xf32>
    %c0_89 = arith.constant 0 : index
    %c3_90 = arith.constant 3 : index
    %c1_91 = arith.constant 1 : index
    %c0_92 = arith.constant 0 : index
    %c0_93 = arith.constant 0 : index
    %71 = vector.load %arg1[%c0_89, %c3_90, %c1_91, %c0_92, %c0_93] : memref<1x4x4x49x25xbf16, #tpu.memory_space<vmem>>, vector<1x1x1x49x25xbf16>
    %72 = vector.shape_cast %71 : vector<1x1x1x49x25xbf16> to vector<49x25xbf16>
    %cst_94 = arith.constant dense<0.000000e+00> : vector<49x32xf32>
    %73 = tpu.matmul %72, %0, %cst_94 {dimension_numbers = #tpu.dot_dimension_numbers<[1], [0], [0], [1], [0, 0, 1, 1], [], []>} : vector<49x25xbf16>, vector<25x32xbf16>, vector<49x32xf32> -> vector<49x32xf32>
    %74 = arith.maximumf %70, %73 : vector<49x32xf32>
    %c0_95 = arith.constant 0 : index
    %c3_96 = arith.constant 3 : index
    %c2_97 = arith.constant 2 : index
    %c0_98 = arith.constant 0 : index
    %c0_99 = arith.constant 0 : index
    %75 = vector.load %arg1[%c0_95, %c3_96, %c2_97, %c0_98, %c0_99] : memref<1x4x4x49x25xbf16, #tpu.memory_space<vmem>>, vector<1x1x1x49x25xbf16>
    %76 = vector.shape_cast %75 : vector<1x1x1x49x25xbf16> to vector<49x25xbf16>
    %cst_100 = arith.constant dense<0.000000e+00> : vector<49x32xf32>
    %77 = tpu.matmul %76, %0, %cst_100 {dimension_numbers = #tpu.dot_dimension_numbers<[1], [0], [0], [1], [0, 0, 1, 1], [], []>} : vector<49x25xbf16>, vector<25x32xbf16>, vector<49x32xf32> -> vector<49x32xf32>
    %78 = arith.maximumf %74, %77 : vector<49x32xf32>
    %c0_101 = arith.constant 0 : index
    %c3_102 = arith.constant 3 : index
    %c3_103 = arith.constant 3 : index
    %c0_104 = arith.constant 0 : index
    %c0_105 = arith.constant 0 : index
    %79 = vector.load %arg1[%c0_101, %c3_102, %c3_103, %c0_104, %c0_105] : memref<1x4x4x49x25xbf16, #tpu.memory_space<vmem>>, vector<1x1x1x49x25xbf16>
    %80 = vector.shape_cast %79 : vector<1x1x1x49x25xbf16> to vector<49x25xbf16>
    %cst_106 = arith.constant dense<0.000000e+00> : vector<49x32xf32>
    %81 = tpu.matmul %80, %0, %cst_106 {dimension_numbers = #tpu.dot_dimension_numbers<[1], [0], [0], [1], [0, 0, 1, 1], [], []>} : vector<49x25xbf16>, vector<25x32xbf16>, vector<49x32xf32> -> vector<49x32xf32>
    %82 = arith.maximumf %78, %81 : vector<49x32xf32>
    %83 = vector.broadcast %1 : vector<1x32xf32> to vector<49x32xf32>
    %84 = arith.addf %82, %83 : vector<49x32xf32>
    %cst_107 = arith.constant 0.000000e+00 : f32
    %85 = vector.broadcast %cst_107 : f32 to vector<49x32xf32>
    %86 = arith.maximumf %84, %85 : vector<49x32xf32>
    %c3_108 = arith.constant 3 : index
    %c0_109 = arith.constant 0 : index
    %c0_110 = arith.constant 0 : index
    %87 = vector.load %arg11[%c3_108, %c0_109, %c0_110] : memref<4x49x32xf32, #tpu.memory_space<vmem>>, vector<1x49x32xf32>
    %88 = vector.shape_cast %87 : vector<1x49x32xf32> to vector<49x32xf32>
    %89 = vector.shape_cast %86 : vector<49x32xf32> to vector<1x49x32xf32>
    tpu.vector_store %arg11[%c3_108, %c0_109, %c0_110], %89 {strides = array<i32>} : memref<4x49x32xf32, #tpu.memory_space<vmem>>, vector<1x49x32xf32>,
    %cst_111 = arith.constant 0.000000e+00 : f32
    %90 = vector.broadcast %cst_111 : f32 to vector<4x81x160xf32>
    %c0_112 = arith.constant 0 : index
    %c0_113 = arith.constant 0 : index
    %c0_114 = arith.constant 0 : index
    %91 = vector.load %arg12[%c0_112, %c0_113, %c0_114] : memref<4x81x160xf32, #tpu.memory_space<vmem>>, vector<4x81x160xf32>
    tpu.vector_store %arg12[%c0_112, %c0_113, %c0_114], %90 {strides = array<i32>} : memref<4x81x160xf32, #tpu.memory_space<vmem>>, vector<4x81x160xf32>,
    %c0_115 = arith.constant 0 : index
    %c0_116 = arith.constant 0 : index
    %c0_117 = arith.constant 0 : index
    %92 = vector.load %arg11[%c0_115, %c0_116, %c0_117] : memref<4x49x32xf32, #tpu.memory_space<vmem>>, vector<1x7x32xf32>
    %93 = vector.shape_cast %92 : vector<1x7x32xf32> to vector<7x32xf32>
    %c0_118 = arith.constant 0 : index
    %c10 = arith.constant 10 : index
    %c0_119 = arith.constant 0 : index
    %94 = vector.load %arg12[%c0_118, %c10, %c0_119] : memref<4x81x160xf32, #tpu.memory_space<vmem>>, vector<1x7x32xf32>
    %95 = vector.shape_cast %94 : vector<1x7x32xf32> to vector<7x32xf32>
    %96 = vector.shape_cast %93 : vector<7x32xf32> to vector<1x7x32xf32>
    tpu.vector_store %arg12[%c0_118, %c10, %c0_119], %96 {strides = array<i32>} : memref<4x81x160xf32, #tpu.memory_space<vmem>>, vector<1x7x32xf32>,
    %c0_120 = arith.constant 0 : index
    %c7 = arith.constant 7 : index
    %c0_121 = arith.constant 0 : index
    %97 = vector.load %arg11[%c0_120, %c7, %c0_121] : memref<4x49x32xf32, #tpu.memory_space<vmem>>, vector<1x7x32xf32>
    %98 = vector.shape_cast %97 : vector<1x7x32xf32> to vector<7x32xf32>
    %c0_122 = arith.constant 0 : index
    %c19 = arith.constant 19 : index
    %c0_123 = arith.constant 0 : index
    %99 = vector.load %arg12[%c0_122, %c19, %c0_123] : memref<4x81x160xf32, #tpu.memory_space<vmem>>, vector<1x7x32xf32>
    %100 = vector.shape_cast %99 : vector<1x7x32xf32> to vector<7x32xf32>
    %101 = vector.shape_cast %98 : vector<7x32xf32> to vector<1x7x32xf32>
    tpu.vector_store %arg12[%c0_122, %c19, %c0_123], %101 {strides = array<i32>} : memref<4x81x160xf32, #tpu.memory_space<vmem>>, vector<1x7x32xf32>,
    %c0_124 = arith.constant 0 : index
    %c14 = arith.constant 14 : index
    %c0_125 = arith.constant 0 : index
    %102 = vector.load %arg11[%c0_124, %c14, %c0_125] : memref<4x49x32xf32, #tpu.memory_space<vmem>>, vector<1x7x32xf32>
    %103 = vector.shape_cast %102 : vector<1x7x32xf32> to vector<7x32xf32>
    %c0_126 = arith.constant 0 : index
    %c28 = arith.constant 28 : index
    %c0_127 = arith.constant 0 : index
    %104 = vector.load %arg12[%c0_126, %c28, %c0_127] : memref<4x81x160xf32, #tpu.memory_space<vmem>>, vector<1x7x32xf32>
    %105 = vector.shape_cast %104 : vector<1x7x32xf32> to vector<7x32xf32>
    %106 = vector.shape_cast %103 : vector<7x32xf32> to vector<1x7x32xf32>
    tpu.vector_store %arg12[%c0_126, %c28, %c0_127], %106 {strides = array<i32>} : memref<4x81x160xf32, #tpu.memory_space<vmem>>, vector<1x7x32xf32>,
    %c0_128 = arith.constant 0 : index
    %c21 = arith.constant 21 : index
    %c0_129 = arith.constant 0 : index
    %107 = vector.load %arg11[%c0_128, %c21, %c0_129] : memref<4x49x32xf32, #tpu.memory_space<vmem>>, vector<1x7x32xf32>
    %108 = vector.shape_cast %107 : vector<1x7x32xf32> to vector<7x32xf32>
    %c0_130 = arith.constant 0 : index
    %c37 = arith.constant 37 : index
    %c0_131 = arith.constant 0 : index
    %109 = vector.load %arg12[%c0_130, %c37, %c0_131] : memref<4x81x160xf32, #tpu.memory_space<vmem>>, vector<1x7x32xf32>
    %110 = vector.shape_cast %109 : vector<1x7x32xf32> to vector<7x32xf32>
    %111 = vector.shape_cast %108 : vector<7x32xf32> to vector<1x7x32xf32>
    tpu.vector_store %arg12[%c0_130, %c37, %c0_131], %111 {strides = array<i32>} : memref<4x81x160xf32, #tpu.memory_space<vmem>>, vector<1x7x32xf32>,
    %c0_132 = arith.constant 0 : index
    %c28_133 = arith.constant 28 : index
    %c0_134 = arith.constant 0 : index
    %112 = vector.load %arg11[%c0_132, %c28_133, %c0_134] : memref<4x49x32xf32, #tpu.memory_space<vmem>>, vector<1x7x32xf32>
    %113 = vector.shape_cast %112 : vector<1x7x32xf32> to vector<7x32xf32>
    %c0_135 = arith.constant 0 : index
    %c46 = arith.constant 46 : index
    %c0_136 = arith.constant 0 : index
    %114 = vector.load %arg12[%c0_135, %c46, %c0_136] : memref<4x81x160xf32, #tpu.memory_space<vmem>>, vector<1x7x32xf32>
    %115 = vector.shape_cast %114 : vector<1x7x32xf32> to vector<7x32xf32>
    %116 = vector.shape_cast %113 : vector<7x32xf32> to vector<1x7x32xf32>
    tpu.vector_store %arg12[%c0_135, %c46, %c0_136], %116 {strides = array<i32>} : memref<4x81x160xf32, #tpu.memory_space<vmem>>, vector<1x7x32xf32>,
    %c0_137 = arith.constant 0 : index
    %c35 = arith.constant 35 : index
    %c0_138 = arith.constant 0 : index
    %117 = vector.load %arg11[%c0_137, %c35, %c0_138] : memref<4x49x32xf32, #tpu.memory_space<vmem>>, vector<1x7x32xf32>
    %118 = vector.shape_cast %117 : vector<1x7x32xf32> to vector<7x32xf32>
    %c0_139 = arith.constant 0 : index
    %c55 = arith.constant 55 : index
    %c0_140 = arith.constant 0 : index
    %119 = vector.load %arg12[%c0_139, %c55, %c0_140] : memref<4x81x160xf32, #tpu.memory_space<vmem>>, vector<1x7x32xf32>
    %120 = vector.shape_cast %119 : vector<1x7x32xf32> to vector<7x32xf32>
    %121 = vector.shape_cast %118 : vector<7x32xf32> to vector<1x7x32xf32>
    tpu.vector_store %arg12[%c0_139, %c55, %c0_140], %121 {strides = array<i32>} : memref<4x81x160xf32, #tpu.memory_space<vmem>>, vector<1x7x32xf32>,
    %c0_141 = arith.constant 0 : index
    %c42 = arith.constant 42 : index
    %c0_142 = arith.constant 0 : index
    %122 = vector.load %arg11[%c0_141, %c42, %c0_142] : memref<4x49x32xf32, #tpu.memory_space<vmem>>, vector<1x7x32xf32>
    %123 = vector.shape_cast %122 : vector<1x7x32xf32> to vector<7x32xf32>
    %c0_143 = arith.constant 0 : index
    %c64 = arith.constant 64 : index
    %c0_144 = arith.constant 0 : index
    %124 = vector.load %arg12[%c0_143, %c64, %c0_144] : memref<4x81x160xf32, #tpu.memory_space<vmem>>, vector<1x7x32xf32>
    %125 = vector.shape_cast %124 : vector<1x7x32xf32> to vector<7x32xf32>
    %126 = vector.shape_cast %123 : vector<7x32xf32> to vector<1x7x32xf32>
    tpu.vector_store %arg12[%c0_143, %c64, %c0_144], %126 {strides = array<i32>} : memref<4x81x160xf32, #tpu.memory_space<vmem>>, vector<1x7x32xf32>,
    %c1_145 = arith.constant 1 : index
    %c0_146 = arith.constant 0 : index
    %c0_147 = arith.constant 0 : index
    %127 = vector.load %arg11[%c1_145, %c0_146, %c0_147] : memref<4x49x32xf32, #tpu.memory_space<vmem>>, vector<1x7x32xf32>
    %128 = vector.shape_cast %127 : vector<1x7x32xf32> to vector<7x32xf32>
    %c0_148 = arith.constant 0 : index
    %c10_149 = arith.constant 10 : index
    %c32 = arith.constant 32 : index
    %129 = vector.load %arg12[%c0_148, %c10_149, %c32] : memref<4x81x160xf32, #tpu.memory_space<vmem>>, vector<1x7x32xf32>
    %130 = vector.shape_cast %129 : vector<1x7x32xf32> to vector<7x32xf32>
    %131 = vector.shape_cast %128 : vector<7x32xf32> to vector<1x7x32xf32>
    tpu.vector_store %arg12[%c0_148, %c10_149, %c32], %131 {strides = array<i32>} : memref<4x81x160xf32, #tpu.memory_space<vmem>>, vector<1x7x32xf32>,
    %c1_150 = arith.constant 1 : index
    %c7_151 = arith.constant 7 : index
    %c0_152 = arith.constant 0 : index
    %132 = vector.load %arg11[%c1_150, %c7_151, %c0_152] : memref<4x49x32xf32, #tpu.memory_space<vmem>>, vector<1x7x32xf32>
    %133 = vector.shape_cast %132 : vector<1x7x32xf32> to vector<7x32xf32>
    %c0_153 = arith.constant 0 : index
    %c19_154 = arith.constant 19 : index
    %c32_155 = arith.constant 32 : index
    %134 = vector.load %arg12[%c0_153, %c19_154, %c32_155] : memref<4x81x160xf32, #tpu.memory_space<vmem>>, vector<1x7x32xf32>
    %135 = vector.shape_cast %134 : vector<1x7x32xf32> to vector<7x32xf32>
    %136 = vector.shape_cast %133 : vector<7x32xf32> to vector<1x7x32xf32>
    tpu.vector_store %arg12[%c0_153, %c19_154, %c32_155], %136 {strides = array<i32>} : memref<4x81x160xf32, #tpu.memory_space<vmem>>, vector<1x7x32xf32>,
    %c1_156 = arith.constant 1 : index
    %c14_157 = arith.constant 14 : index
    %c0_158 = arith.constant 0 : index
    %137 = vector.load %arg11[%c1_156, %c14_157, %c0_158] : memref<4x49x32xf32, #tpu.memory_space<vmem>>, vector<1x7x32xf32>
    %138 = vector.shape_cast %137 : vector<1x7x32xf32> to vector<7x32xf32>
    %c0_159 = arith.constant 0 : index
    %c28_160 = arith.constant 28 : index
    %c32_161 = arith.constant 32 : index
    %139 = vector.load %arg12[%c0_159, %c28_160, %c32_161] : memref<4x81x160xf32, #tpu.memory_space<vmem>>, vector<1x7x32xf32>
    %140 = vector.shape_cast %139 : vector<1x7x32xf32> to vector<7x32xf32>
    %141 = vector.shape_cast %138 : vector<7x32xf32> to vector<1x7x32xf32>
    tpu.vector_store %arg12[%c0_159, %c28_160, %c32_161], %141 {strides = array<i32>} : memref<4x81x160xf32, #tpu.memory_space<vmem>>, vector<1x7x32xf32>,
    %c1_162 = arith.constant 1 : index
    %c21_163 = arith.constant 21 : index
    %c0_164 = arith.constant 0 : index
    %142 = vector.load %arg11[%c1_162, %c21_163, %c0_164] : memref<4x49x32xf32, #tpu.memory_space<vmem>>, vector<1x7x32xf32>
    %143 = vector.shape_cast %142 : vector<1x7x32xf32> to vector<7x32xf32>
    %c0_165 = arith.constant 0 : index
    %c37_166 = arith.constant 37 : index
    %c32_167 = arith.constant 32 : index
    %144 = vector.load %arg12[%c0_165, %c37_166, %c32_167] : memref<4x81x160xf32, #tpu.memory_space<vmem>>, vector<1x7x32xf32>
    %145 = vector.shape_cast %144 : vector<1x7x32xf32> to vector<7x32xf32>
    %146 = vector.shape_cast %143 : vector<7x32xf32> to vector<1x7x32xf32>
    tpu.vector_store %arg12[%c0_165, %c37_166, %c32_167], %146 {strides = array<i32>} : memref<4x81x160xf32, #tpu.memory_space<vmem>>, vector<1x7x32xf32>,
    %c1_168 = arith.constant 1 : index
    %c28_169 = arith.constant 28 : index
    %c0_170 = arith.constant 0 : index
    %147 = vector.load %arg11[%c1_168, %c28_169, %c0_170] : memref<4x49x32xf32, #tpu.memory_space<vmem>>, vector<1x7x32xf32>
    %148 = vector.shape_cast %147 : vector<1x7x32xf32> to vector<7x32xf32>
    %c0_171 = arith.constant 0 : index
    %c46_172 = arith.constant 46 : index
    %c32_173 = arith.constant 32 : index
    %149 = vector.load %arg12[%c0_171, %c46_172, %c32_173] : memref<4x81x160xf32, #tpu.memory_space<vmem>>, vector<1x7x32xf32>
    %150 = vector.shape_cast %149 : vector<1x7x32xf32> to vector<7x32xf32>
    %151 = vector.shape_cast %148 : vector<7x32xf32> to vector<1x7x32xf32>
    tpu.vector_store %arg12[%c0_171, %c46_172, %c32_173], %151 {strides = array<i32>} : memref<4x81x160xf32, #tpu.memory_space<vmem>>, vector<1x7x32xf32>,
    %c1_174 = arith.constant 1 : index
    %c35_175 = arith.constant 35 : index
    %c0_176 = arith.constant 0 : index
    %152 = vector.load %arg11[%c1_174, %c35_175, %c0_176] : memref<4x49x32xf32, #tpu.memory_space<vmem>>, vector<1x7x32xf32>
    %153 = vector.shape_cast %152 : vector<1x7x32xf32> to vector<7x32xf32>
    %c0_177 = arith.constant 0 : index
    %c55_178 = arith.constant 55 : index
    %c32_179 = arith.constant 32 : index
    %154 = vector.load %arg12[%c0_177, %c55_178, %c32_179] : memref<4x81x160xf32, #tpu.memory_space<vmem>>, vector<1x7x32xf32>
    %155 = vector.shape_cast %154 : vector<1x7x32xf32> to vector<7x32xf32>
    %156 = vector.shape_cast %153 : vector<7x32xf32> to vector<1x7x32xf32>
    tpu.vector_store %arg12[%c0_177, %c55_178, %c32_179], %156 {strides = array<i32>} : memref<4x81x160xf32, #tpu.memory_space<vmem>>, vector<1x7x32xf32>,
    %c1_180 = arith.constant 1 : index
    %c42_181 = arith.constant 42 : index
    %c0_182 = arith.constant 0 : index
    %157 = vector.load %arg11[%c1_180, %c42_181, %c0_182] : memref<4x49x32xf32, #tpu.memory_space<vmem>>, vector<1x7x32xf32>
    %158 = vector.shape_cast %157 : vector<1x7x32xf32> to vector<7x32xf32>
    %c0_183 = arith.constant 0 : index
    %c64_184 = arith.constant 64 : index
    %c32_185 = arith.constant 32 : index
    %159 = vector.load %arg12[%c0_183, %c64_184, %c32_185] : memref<4x81x160xf32, #tpu.memory_space<vmem>>, vector<1x7x32xf32>
    %160 = vector.shape_cast %159 : vector<1x7x32xf32> to vector<7x32xf32>
    %161 = vector.shape_cast %158 : vector<7x32xf32> to vector<1x7x32xf32>
    tpu.vector_store %arg12[%c0_183, %c64_184, %c32_185], %161 {strides = array<i32>} : memref<4x81x160xf32, #tpu.memory_space<vmem>>, vector<1x7x32xf32>,
    %c0_186 = arith.constant 0 : index
    %c0_187 = arith.constant 0 : index
    %c0_188 = arith.constant 0 : index
    %162 = vector.load %arg11[%c0_186, %c0_187, %c0_188] : memref<4x49x32xf32, #tpu.memory_space<vmem>>, vector<1x7x32xf32>
    %163 = vector.shape_cast %162 : vector<1x7x32xf32> to vector<7x32xf32>
    %c0_189 = arith.constant 0 : index
    %c9 = arith.constant 9 : index
    %c64_190 = arith.constant 64 : index
    %164 = vector.load %arg12[%c0_189, %c9, %c64_190] : memref<4x81x160xf32, #tpu.memory_space<vmem>>, vector<1x7x32xf32>
    %165 = vector.shape_cast %164 : vector<1x7x32xf32> to vector<7x32xf32>
    %166 = vector.shape_cast %163 : vector<7x32xf32> to vector<1x7x32xf32>
    tpu.vector_store %arg12[%c0_189, %c9, %c64_190], %166 {strides = array<i32>} : memref<4x81x160xf32, #tpu.memory_space<vmem>>, vector<1x7x32xf32>,
    %c0_191 = arith.constant 0 : index
    %c7_192 = arith.constant 7 : index
    %c0_193 = arith.constant 0 : index
    %167 = vector.load %arg11[%c0_191, %c7_192, %c0_193] : memref<4x49x32xf32, #tpu.memory_space<vmem>>, vector<1x7x32xf32>
    %168 = vector.shape_cast %167 : vector<1x7x32xf32> to vector<7x32xf32>
    %c0_194 = arith.constant 0 : index
    %c18 = arith.constant 18 : index
    %c64_195 = arith.constant 64 : index
    %169 = vector.load %arg12[%c0_194, %c18, %c64_195] : memref<4x81x160xf32, #tpu.memory_space<vmem>>, vector<1x7x32xf32>
    %170 = vector.shape_cast %169 : vector<1x7x32xf32> to vector<7x32xf32>
    %171 = vector.shape_cast %168 : vector<7x32xf32> to vector<1x7x32xf32>
    tpu.vector_store %arg12[%c0_194, %c18, %c64_195], %171 {strides = array<i32>} : memref<4x81x160xf32, #tpu.memory_space<vmem>>, vector<1x7x32xf32>,
    %c0_196 = arith.constant 0 : index
    %c14_197 = arith.constant 14 : index
    %c0_198 = arith.constant 0 : index
    %172 = vector.load %arg11[%c0_196, %c14_197, %c0_198] : memref<4x49x32xf32, #tpu.memory_space<vmem>>, vector<1x7x32xf32>
    %173 = vector.shape_cast %172 : vector<1x7x32xf32> to vector<7x32xf32>
    %c0_199 = arith.constant 0 : index
    %c27 = arith.constant 27 : index
    %c64_200 = arith.constant 64 : index
    %174 = vector.load %arg12[%c0_199, %c27, %c64_200] : memref<4x81x160xf32, #tpu.memory_space<vmem>>, vector<1x7x32xf32>
    %175 = vector.shape_cast %174 : vector<1x7x32xf32> to vector<7x32xf32>
    %176 = vector.shape_cast %173 : vector<7x32xf32> to vector<1x7x32xf32>
    tpu.vector_store %arg12[%c0_199, %c27, %c64_200], %176 {strides = array<i32>} : memref<4x81x160xf32, #tpu.memory_space<vmem>>, vector<1x7x32xf32>,
    %c0_201 = arith.constant 0 : index
    %c21_202 = arith.constant 21 : index
    %c0_203 = arith.constant 0 : index
    %177 = vector.load %arg11[%c0_201, %c21_202, %c0_203] : memref<4x49x32xf32, #tpu.memory_space<vmem>>, vector<1x7x32xf32>
    %178 = vector.shape_cast %177 : vector<1x7x32xf32> to vector<7x32xf32>
    %c0_204 = arith.constant 0 : index
    %c36 = arith.constant 36 : index
    %c64_205 = arith.constant 64 : index
    %179 = vector.load %arg12[%c0_204, %c36, %c64_205] : memref<4x81x160xf32, #tpu.memory_space<vmem>>, vector<1x7x32xf32>
    %180 = vector.shape_cast %179 : vector<1x7x32xf32> to vector<7x32xf32>
    %181 = vector.shape_cast %178 : vector<7x32xf32> to vector<1x7x32xf32>
    tpu.vector_store %arg12[%c0_204, %c36, %c64_205], %181 {strides = array<i32>} : memref<4x81x160xf32, #tpu.memory_space<vmem>>, vector<1x7x32xf32>,
    %c0_206 = arith.constant 0 : index
    %c28_207 = arith.constant 28 : index
    %c0_208 = arith.constant 0 : index
    %182 = vector.load %arg11[%c0_206, %c28_207, %c0_208] : memref<4x49x32xf32, #tpu.memory_space<vmem>>, vector<1x7x32xf32>
    %183 = vector.shape_cast %182 : vector<1x7x32xf32> to vector<7x32xf32>
    %c0_209 = arith.constant 0 : index
    %c45 = arith.constant 45 : index
    %c64_210 = arith.constant 64 : index
    %184 = vector.load %arg12[%c0_209, %c45, %c64_210] : memref<4x81x160xf32, #tpu.memory_space<vmem>>, vector<1x7x32xf32>
    %185 = vector.shape_cast %184 : vector<1x7x32xf32> to vector<7x32xf32>
    %186 = vector.shape_cast %183 : vector<7x32xf32> to vector<1x7x32xf32>
    tpu.vector_store %arg12[%c0_209, %c45, %c64_210], %186 {strides = array<i32>} : memref<4x81x160xf32, #tpu.memory_space<vmem>>, vector<1x7x32xf32>,
    %c0_211 = arith.constant 0 : index
    %c35_212 = arith.constant 35 : index
    %c0_213 = arith.constant 0 : index
    %187 = vector.load %arg11[%c0_211, %c35_212, %c0_213] : memref<4x49x32xf32, #tpu.memory_space<vmem>>, vector<1x7x32xf32>
    %188 = vector.shape_cast %187 : vector<1x7x32xf32> to vector<7x32xf32>
    %c0_214 = arith.constant 0 : index
    %c54 = arith.constant 54 : index
    %c64_215 = arith.constant 64 : index
    %189 = vector.load %arg12[%c0_214, %c54, %c64_215] : memref<4x81x160xf32, #tpu.memory_space<vmem>>, vector<1x7x32xf32>
    %190 = vector.shape_cast %189 : vector<1x7x32xf32> to vector<7x32xf32>
    %191 = vector.shape_cast %188 : vector<7x32xf32> to vector<1x7x32xf32>
    tpu.vector_store %arg12[%c0_214, %c54, %c64_215], %191 {strides = array<i32>} : memref<4x81x160xf32, #tpu.memory_space<vmem>>, vector<1x7x32xf32>,
    %c0_216 = arith.constant 0 : index
    %c42_217 = arith.constant 42 : index
    %c0_218 = arith.constant 0 : index
    %192 = vector.load %arg11[%c0_216, %c42_217, %c0_218] : memref<4x49x32xf32, #tpu.memory_space<vmem>>, vector<1x7x32xf32>
    %193 = vector.shape_cast %192 : vector<1x7x32xf32> to vector<7x32xf32>
    %c0_219 = arith.constant 0 : index
    %c63 = arith.constant 63 : index
    %c64_220 = arith.constant 64 : index
    %194 = vector.load %arg12[%c0_219, %c63, %c64_220] : memref<4x81x160xf32, #tpu.memory_space<vmem>>, vector<1x7x32xf32>
    %195 = vector.shape_cast %194 : vector<1x7x32xf32> to vector<7x32xf32>
    %196 = vector.shape_cast %193 : vector<7x32xf32> to vector<1x7x32xf32>
    tpu.vector_store %arg12[%c0_219, %c63, %c64_220], %196 {strides = array<i32>} : memref<4x81x160xf32, #tpu.memory_space<vmem>>, vector<1x7x32xf32>,
    %c1_221 = arith.constant 1 : index
    %c0_222 = arith.constant 0 : index
    %c0_223 = arith.constant 0 : index
    %197 = vector.load %arg11[%c1_221, %c0_222, %c0_223] : memref<4x49x32xf32, #tpu.memory_space<vmem>>, vector<1x7x32xf32>
    %198 = vector.shape_cast %197 : vector<1x7x32xf32> to vector<7x32xf32>
    %c0_224 = arith.constant 0 : index
    %c9_225 = arith.constant 9 : index
    %c96 = arith.constant 96 : index
    %199 = vector.load %arg12[%c0_224, %c9_225, %c96] : memref<4x81x160xf32, #tpu.memory_space<vmem>>, vector<1x7x32xf32>
    %200 = vector.shape_cast %199 : vector<1x7x32xf32> to vector<7x32xf32>
    %201 = vector.shape_cast %198 : vector<7x32xf32> to vector<1x7x32xf32>
    tpu.vector_store %arg12[%c0_224, %c9_225, %c96], %201 {strides = array<i32>} : memref<4x81x160xf32, #tpu.memory_space<vmem>>, vector<1x7x32xf32>,
    %c1_226 = arith.constant 1 : index
    %c7_227 = arith.constant 7 : index
    %c0_228 = arith.constant 0 : index
    %202 = vector.load %arg11[%c1_226, %c7_227, %c0_228] : memref<4x49x32xf32, #tpu.memory_space<vmem>>, vector<1x7x32xf32>
    %203 = vector.shape_cast %202 : vector<1x7x32xf32> to vector<7x32xf32>
    %c0_229 = arith.constant 0 : index
    %c18_230 = arith.constant 18 : index
    %c96_231 = arith.constant 96 : index
    %204 = vector.load %arg12[%c0_229, %c18_230, %c96_231] : memref<4x81x160xf32, #tpu.memory_space<vmem>>, vector<1x7x32xf32>
    %205 = vector.shape_cast %204 : vector<1x7x32xf32> to vector<7x32xf32>
    %206 = vector.shape_cast %203 : vector<7x32xf32> to vector<1x7x32xf32>
    tpu.vector_store %arg12[%c0_229, %c18_230, %c96_231], %206 {strides = array<i32>} : memref<4x81x160xf32, #tpu.memory_space<vmem>>, vector<1x7x32xf32>,
    %c1_232 = arith.constant 1 : index
    %c14_233 = arith.constant 14 : index
    %c0_234 = arith.constant 0 : index
    %207 = vector.load %arg11[%c1_232, %c14_233, %c0_234] : memref<4x49x32xf32, #tpu.memory_space<vmem>>, vector<1x7x32xf32>
    %208 = vector.shape_cast %207 : vector<1x7x32xf32> to vector<7x32xf32>
    %c0_235 = arith.constant 0 : index
    %c27_236 = arith.constant 27 : index
    %c96_237 = arith.constant 96 : index
    %209 = vector.load %arg12[%c0_235, %c27_236, %c96_237] : memref<4x81x160xf32, #tpu.memory_space<vmem>>, vector<1x7x32xf32>
    %210 = vector.shape_cast %209 : vector<1x7x32xf32> to vector<7x32xf32>
    %211 = vector.shape_cast %208 : vector<7x32xf32> to vector<1x7x32xf32>
    tpu.vector_store %arg12[%c0_235, %c27_236, %c96_237], %211 {strides = array<i32>} : memref<4x81x160xf32, #tpu.memory_space<vmem>>, vector<1x7x32xf32>,
    %c1_238 = arith.constant 1 : index
    %c21_239 = arith.constant 21 : index
    %c0_240 = arith.constant 0 : index
    %212 = vector.load %arg11[%c1_238, %c21_239, %c0_240] : memref<4x49x32xf32, #tpu.memory_space<vmem>>, vector<1x7x32xf32>
    %213 = vector.shape_cast %212 : vector<1x7x32xf32> to vector<7x32xf32>
    %c0_241 = arith.constant 0 : index
    %c36_242 = arith.constant 36 : index
    %c96_243 = arith.constant 96 : index
    %214 = vector.load %arg12[%c0_241, %c36_242, %c96_243] : memref<4x81x160xf32, #tpu.memory_space<vmem>>, vector<1x7x32xf32>
    %215 = vector.shape_cast %214 : vector<1x7x32xf32> to vector<7x32xf32>
    %216 = vector.shape_cast %213 : vector<7x32xf32> to vector<1x7x32xf32>
    tpu.vector_store %arg12[%c0_241, %c36_242, %c96_243], %216 {strides = array<i32>} : memref<4x81x160xf32, #tpu.memory_space<vmem>>, vector<1x7x32xf32>,
    %c1_244 = arith.constant 1 : index
    %c28_245 = arith.constant 28 : index
    %c0_246 = arith.constant 0 : index
    %217 = vector.load %arg11[%c1_244, %c28_245, %c0_246] : memref<4x49x32xf32, #tpu.memory_space<vmem>>, vector<1x7x32xf32>
    %218 = vector.shape_cast %217 : vector<1x7x32xf32> to vector<7x32xf32>
    %c0_247 = arith.constant 0 : index
    %c45_248 = arith.constant 45 : index
    %c96_249 = arith.constant 96 : index
    %219 = vector.load %arg12[%c0_247, %c45_248, %c96_249] : memref<4x81x160xf32, #tpu.memory_space<vmem>>, vector<1x7x32xf32>
    %220 = vector.shape_cast %219 : vector<1x7x32xf32> to vector<7x32xf32>
    %221 = vector.shape_cast %218 : vector<7x32xf32> to vector<1x7x32xf32>
    tpu.vector_store %arg12[%c0_247, %c45_248, %c96_249], %221 {strides = array<i32>} : memref<4x81x160xf32, #tpu.memory_space<vmem>>, vector<1x7x32xf32>,
    %c1_250 = arith.constant 1 : index
    %c35_251 = arith.constant 35 : index
    %c0_252 = arith.constant 0 : index
    %222 = vector.load %arg11[%c1_250, %c35_251, %c0_252] : memref<4x49x32xf32, #tpu.memory_space<vmem>>, vector<1x7x32xf32>
    %223 = vector.shape_cast %222 : vector<1x7x32xf32> to vector<7x32xf32>
    %c0_253 = arith.constant 0 : index
    %c54_254 = arith.constant 54 : index
    %c96_255 = arith.constant 96 : index
    %224 = vector.load %arg12[%c0_253, %c54_254, %c96_255] : memref<4x81x160xf32, #tpu.memory_space<vmem>>, vector<1x7x32xf32>
    %225 = vector.shape_cast %224 : vector<1x7x32xf32> to vector<7x32xf32>
    %226 = vector.shape_cast %223 : vector<7x32xf32> to vector<1x7x32xf32>
    tpu.vector_store %arg12[%c0_253, %c54_254, %c96_255], %226 {strides = array<i32>} : memref<4x81x160xf32, #tpu.memory_space<vmem>>, vector<1x7x32xf32>,
    %c1_256 = arith.constant 1 : index
    %c42_257 = arith.constant 42 : index
    %c0_258 = arith.constant 0 : index
    %227 = vector.load %arg11[%c1_256, %c42_257, %c0_258] : memref<4x49x32xf32, #tpu.memory_space<vmem>>, vector<1x7x32xf32>
    %228 = vector.shape_cast %227 : vector<1x7x32xf32> to vector<7x32xf32>
    %c0_259 = arith.constant 0 : index
    %c63_260 = arith.constant 63 : index
    %c96_261 = arith.constant 96 : index
    %229 = vector.load %arg12[%c0_259, %c63_260, %c96_261] : memref<4x81x160xf32, #tpu.memory_space<vmem>>, vector<1x7x32xf32>
    %230 = vector.shape_cast %229 : vector<1x7x32xf32> to vector<7x32xf32>
    %231 = vector.shape_cast %228 : vector<7x32xf32> to vector<1x7x32xf32>
    tpu.vector_store %arg12[%c0_259, %c63_260, %c96_261], %231 {strides = array<i32>} : memref<4x81x160xf32, #tpu.memory_space<vmem>>, vector<1x7x32xf32>,
    %c0_262 = arith.constant 0 : index
    %c1_263 = arith.constant 1 : index
    %c0_264 = arith.constant 0 : index
    %232 = vector.load %arg11[%c0_262, %c1_263, %c0_264] : memref<4x49x32xf32, #tpu.memory_space<vmem>>, vector<1x6x32xf32>
    %233 = vector.shape_cast %232 : vector<1x6x32xf32> to vector<6x32xf32>
    %c0_265 = arith.constant 0 : index
    %c9_266 = arith.constant 9 : index
    %c128 = arith.constant 128 : index
    %234 = vector.load %arg12[%c0_265, %c9_266, %c128] : memref<4x81x160xf32, #tpu.memory_space<vmem>>, vector<1x6x32xf32>
    %235 = vector.shape_cast %234 : vector<1x6x32xf32> to vector<6x32xf32>
    %236 = vector.shape_cast %233 : vector<6x32xf32> to vector<1x6x32xf32>
    tpu.vector_store %arg12[%c0_265, %c9_266, %c128], %236 {strides = array<i32>} : memref<4x81x160xf32, #tpu.memory_space<vmem>>, vector<1x6x32xf32>,
    %c0_267 = arith.constant 0 : index
    %c8 = arith.constant 8 : index
    %c0_268 = arith.constant 0 : index
    %237 = vector.load %arg11[%c0_267, %c8, %c0_268] : memref<4x49x32xf32, #tpu.memory_space<vmem>>, vector<1x6x32xf32>
    %238 = vector.shape_cast %237 : vector<1x6x32xf32> to vector<6x32xf32>
    %c0_269 = arith.constant 0 : index
    %c18_270 = arith.constant 18 : index
    %c128_271 = arith.constant 128 : index
    %239 = vector.load %arg12[%c0_269, %c18_270, %c128_271] : memref<4x81x160xf32, #tpu.memory_space<vmem>>, vector<1x6x32xf32>
    %240 = vector.shape_cast %239 : vector<1x6x32xf32> to vector<6x32xf32>
    %241 = vector.shape_cast %238 : vector<6x32xf32> to vector<1x6x32xf32>
    tpu.vector_store %arg12[%c0_269, %c18_270, %c128_271], %241 {strides = array<i32>} : memref<4x81x160xf32, #tpu.memory_space<vmem>>, vector<1x6x32xf32>,
    %c0_272 = arith.constant 0 : index
    %c15 = arith.constant 15 : index
    %c0_273 = arith.constant 0 : index
    %242 = vector.load %arg11[%c0_272, %c15, %c0_273] : memref<4x49x32xf32, #tpu.memory_space<vmem>>, vector<1x6x32xf32>
    %243 = vector.shape_cast %242 : vector<1x6x32xf32> to vector<6x32xf32>
    %c0_274 = arith.constant 0 : index
    %c27_275 = arith.constant 27 : index
    %c128_276 = arith.constant 128 : index
    %244 = vector.load %arg12[%c0_274, %c27_275, %c128_276] : memref<4x81x160xf32, #tpu.memory_space<vmem>>, vector<1x6x32xf32>
    %245 = vector.shape_cast %244 : vector<1x6x32xf32> to vector<6x32xf32>
    %246 = vector.shape_cast %243 : vector<6x32xf32> to vector<1x6x32xf32>
    tpu.vector_store %arg12[%c0_274, %c27_275, %c128_276], %246 {strides = array<i32>} : memref<4x81x160xf32, #tpu.memory_space<vmem>>, vector<1x6x32xf32>,
    %c0_277 = arith.constant 0 : index
    %c22 = arith.constant 22 : index
    %c0_278 = arith.constant 0 : index
    %247 = vector.load %arg11[%c0_277, %c22, %c0_278] : memref<4x49x32xf32, #tpu.memory_space<vmem>>, vector<1x6x32xf32>
    %248 = vector.shape_cast %247 : vector<1x6x32xf32> to vector<6x32xf32>
    %c0_279 = arith.constant 0 : index
    %c36_280 = arith.constant 36 : index
    %c128_281 = arith.constant 128 : index
    %249 = vector.load %arg12[%c0_279, %c36_280, %c128_281] : memref<4x81x160xf32, #tpu.memory_space<vmem>>, vector<1x6x32xf32>
    %250 = vector.shape_cast %249 : vector<1x6x32xf32> to vector<6x32xf32>
    %251 = vector.shape_cast %248 : vector<6x32xf32> to vector<1x6x32xf32>
    tpu.vector_store %arg12[%c0_279, %c36_280, %c128_281], %251 {strides = array<i32>} : memref<4x81x160xf32, #tpu.memory_space<vmem>>, vector<1x6x32xf32>,
    %c0_282 = arith.constant 0 : index
    %c29 = arith.constant 29 : index
    %c0_283 = arith.constant 0 : index
    %252 = vector.load %arg11[%c0_282, %c29, %c0_283] : memref<4x49x32xf32, #tpu.memory_space<vmem>>, vector<1x6x32xf32>
    %253 = vector.shape_cast %252 : vector<1x6x32xf32> to vector<6x32xf32>
    %c0_284 = arith.constant 0 : index
    %c45_285 = arith.constant 45 : index
    %c128_286 = arith.constant 128 : index
    %254 = vector.load %arg12[%c0_284, %c45_285, %c128_286] : memref<4x81x160xf32, #tpu.memory_space<vmem>>, vector<1x6x32xf32>
    %255 = vector.shape_cast %254 : vector<1x6x32xf32> to vector<6x32xf32>
    %256 = vector.shape_cast %253 : vector<6x32xf32> to vector<1x6x32xf32>
    tpu.vector_store %arg12[%c0_284, %c45_285, %c128_286], %256 {strides = array<i32>} : memref<4x81x160xf32, #tpu.memory_space<vmem>>, vector<1x6x32xf32>,
    %c0_287 = arith.constant 0 : index
    %c36_288 = arith.constant 36 : index
    %c0_289 = arith.constant 0 : index
    %257 = vector.load %arg11[%c0_287, %c36_288, %c0_289] : memref<4x49x32xf32, #tpu.memory_space<vmem>>, vector<1x6x32xf32>
    %258 = vector.shape_cast %257 : vector<1x6x32xf32> to vector<6x32xf32>
    %c0_290 = arith.constant 0 : index
    %c54_291 = arith.constant 54 : index
    %c128_292 = arith.constant 128 : index
    %259 = vector.load %arg12[%c0_290, %c54_291, %c128_292] : memref<4x81x160xf32, #tpu.memory_space<vmem>>, vector<1x6x32xf32>
    %260 = vector.shape_cast %259 : vector<1x6x32xf32> to vector<6x32xf32>
    %261 = vector.shape_cast %258 : vector<6x32xf32> to vector<1x6x32xf32>
    tpu.vector_store %arg12[%c0_290, %c54_291, %c128_292], %261 {strides = array<i32>} : memref<4x81x160xf32, #tpu.memory_space<vmem>>, vector<1x6x32xf32>,
    %c0_293 = arith.constant 0 : index
    %c43 = arith.constant 43 : index
    %c0_294 = arith.constant 0 : index
    %262 = vector.load %arg11[%c0_293, %c43, %c0_294] : memref<4x49x32xf32, #tpu.memory_space<vmem>>, vector<1x6x32xf32>
    %263 = vector.shape_cast %262 : vector<1x6x32xf32> to vector<6x32xf32>
    %c0_295 = arith.constant 0 : index
    %c63_296 = arith.constant 63 : index
    %c128_297 = arith.constant 128 : index
    %264 = vector.load %arg12[%c0_295, %c63_296, %c128_297] : memref<4x81x160xf32, #tpu.memory_space<vmem>>, vector<1x6x32xf32>
    %265 = vector.shape_cast %264 : vector<1x6x32xf32> to vector<6x32xf32>
    %266 = vector.shape_cast %263 : vector<6x32xf32> to vector<1x6x32xf32>
    tpu.vector_store %arg12[%c0_295, %c63_296, %c128_297], %266 {strides = array<i32>} : memref<4x81x160xf32, #tpu.memory_space<vmem>>, vector<1x6x32xf32>,
    %c1_298 = arith.constant 1 : index
    %c0_299 = arith.constant 0 : index
    %c0_300 = arith.constant 0 : index
    %267 = vector.load %arg11[%c1_298, %c0_299, %c0_300] : memref<4x49x32xf32, #tpu.memory_space<vmem>>, vector<1x7x32xf32>
    %268 = vector.shape_cast %267 : vector<1x7x32xf32> to vector<7x32xf32>
    %c1_301 = arith.constant 1 : index
    %c10_302 = arith.constant 10 : index
    %c0_303 = arith.constant 0 : index
    %269 = vector.load %arg12[%c1_301, %c10_302, %c0_303] : memref<4x81x160xf32, #tpu.memory_space<vmem>>, vector<1x7x32xf32>
    %270 = vector.shape_cast %269 : vector<1x7x32xf32> to vector<7x32xf32>
    %271 = vector.shape_cast %268 : vector<7x32xf32> to vector<1x7x32xf32>
    tpu.vector_store %arg12[%c1_301, %c10_302, %c0_303], %271 {strides = array<i32>} : memref<4x81x160xf32, #tpu.memory_space<vmem>>, vector<1x7x32xf32>,
    %c1_304 = arith.constant 1 : index
    %c7_305 = arith.constant 7 : index
    %c0_306 = arith.constant 0 : index
    %272 = vector.load %arg11[%c1_304, %c7_305, %c0_306] : memref<4x49x32xf32, #tpu.memory_space<vmem>>, vector<1x7x32xf32>
    %273 = vector.shape_cast %272 : vector<1x7x32xf32> to vector<7x32xf32>
    %c1_307 = arith.constant 1 : index
    %c19_308 = arith.constant 19 : index
    %c0_309 = arith.constant 0 : index
    %274 = vector.load %arg12[%c1_307, %c19_308, %c0_309] : memref<4x81x160xf32, #tpu.memory_space<vmem>>, vector<1x7x32xf32>
    %275 = vector.shape_cast %274 : vector<1x7x32xf32> to vector<7x32xf32>
    %276 = vector.shape_cast %273 : vector<7x32xf32> to vector<1x7x32xf32>
    tpu.vector_store %arg12[%c1_307, %c19_308, %c0_309], %276 {strides = array<i32>} : memref<4x81x160xf32, #tpu.memory_space<vmem>>, vector<1x7x32xf32>,
    %c1_310 = arith.constant 1 : index
    %c14_311 = arith.constant 14 : index
    %c0_312 = arith.constant 0 : index
    %277 = vector.load %arg11[%c1_310, %c14_311, %c0_312] : memref<4x49x32xf32, #tpu.memory_space<vmem>>, vector<1x7x32xf32>
    %278 = vector.shape_cast %277 : vector<1x7x32xf32> to vector<7x32xf32>
    %c1_313 = arith.constant 1 : index
    %c28_314 = arith.constant 28 : index
    %c0_315 = arith.constant 0 : index
    %279 = vector.load %arg12[%c1_313, %c28_314, %c0_315] : memref<4x81x160xf32, #tpu.memory_space<vmem>>, vector<1x7x32xf32>
    %280 = vector.shape_cast %279 : vector<1x7x32xf32> to vector<7x32xf32>
    %281 = vector.shape_cast %278 : vector<7x32xf32> to vector<1x7x32xf32>
    tpu.vector_store %arg12[%c1_313, %c28_314, %c0_315], %281 {strides = array<i32>} : memref<4x81x160xf32, #tpu.memory_space<vmem>>, vector<1x7x32xf32>,
    %c1_316 = arith.constant 1 : index
    %c21_317 = arith.constant 21 : index
    %c0_318 = arith.constant 0 : index
    %282 = vector.load %arg11[%c1_316, %c21_317, %c0_318] : memref<4x49x32xf32, #tpu.memory_space<vmem>>, vector<1x7x32xf32>
    %283 = vector.shape_cast %282 : vector<1x7x32xf32> to vector<7x32xf32>
    %c1_319 = arith.constant 1 : index
    %c37_320 = arith.constant 37 : index
    %c0_321 = arith.constant 0 : index
    %284 = vector.load %arg12[%c1_319, %c37_320, %c0_321] : memref<4x81x160xf32, #tpu.memory_space<vmem>>, vector<1x7x32xf32>
    %285 = vector.shape_cast %284 : vector<1x7x32xf32> to vector<7x32xf32>
    %286 = vector.shape_cast %283 : vector<7x32xf32> to vector<1x7x32xf32>
    tpu.vector_store %arg12[%c1_319, %c37_320, %c0_321], %286 {strides = array<i32>} : memref<4x81x160xf32, #tpu.memory_space<vmem>>, vector<1x7x32xf32>,
    %c1_322 = arith.constant 1 : index
    %c28_323 = arith.constant 28 : index
    %c0_324 = arith.constant 0 : index
    %287 = vector.load %arg11[%c1_322, %c28_323, %c0_324] : memref<4x49x32xf32, #tpu.memory_space<vmem>>, vector<1x7x32xf32>
    %288 = vector.shape_cast %287 : vector<1x7x32xf32> to vector<7x32xf32>
    %c1_325 = arith.constant 1 : index
    %c46_326 = arith.constant 46 : index
    %c0_327 = arith.constant 0 : index
    %289 = vector.load %arg12[%c1_325, %c46_326, %c0_327] : memref<4x81x160xf32, #tpu.memory_space<vmem>>, vector<1x7x32xf32>
    %290 = vector.shape_cast %289 : vector<1x7x32xf32> to vector<7x32xf32>
    %291 = vector.shape_cast %288 : vector<7x32xf32> to vector<1x7x32xf32>
    tpu.vector_store %arg12[%c1_325, %c46_326, %c0_327], %291 {strides = array<i32>} : memref<4x81x160xf32, #tpu.memory_space<vmem>>, vector<1x7x32xf32>,
    %c1_328 = arith.constant 1 : index
    %c35_329 = arith.constant 35 : index
    %c0_330 = arith.constant 0 : index
    %292 = vector.load %arg11[%c1_328, %c35_329, %c0_330] : memref<4x49x32xf32, #tpu.memory_space<vmem>>, vector<1x7x32xf32>
    %293 = vector.shape_cast %292 : vector<1x7x32xf32> to vector<7x32xf32>
    %c1_331 = arith.constant 1 : index
    %c55_332 = arith.constant 55 : index
    %c0_333 = arith.constant 0 : index
    %294 = vector.load %arg12[%c1_331, %c55_332, %c0_333] : memref<4x81x160xf32, #tpu.memory_space<vmem>>, vector<1x7x32xf32>
    %295 = vector.shape_cast %294 : vector<1x7x32xf32> to vector<7x32xf32>
    %296 = vector.shape_cast %293 : vector<7x32xf32> to vector<1x7x32xf32>
    tpu.vector_store %arg12[%c1_331, %c55_332, %c0_333], %296 {strides = array<i32>} : memref<4x81x160xf32, #tpu.memory_space<vmem>>, vector<1x7x32xf32>,
    %c1_334 = arith.constant 1 : index
    %c42_335 = arith.constant 42 : index
    %c0_336 = arith.constant 0 : index
    %297 = vector.load %arg11[%c1_334, %c42_335, %c0_336] : memref<4x49x32xf32, #tpu.memory_space<vmem>>, vector<1x7x32xf32>
    %298 = vector.shape_cast %297 : vector<1x7x32xf32> to vector<7x32xf32>
    %c1_337 = arith.constant 1 : index
    %c64_338 = arith.constant 64 : index
    %c0_339 = arith.constant 0 : index
    %299 = vector.load %arg12[%c1_337, %c64_338, %c0_339] : memref<4x81x160xf32, #tpu.memory_space<vmem>>, vector<1x7x32xf32>
    %300 = vector.shape_cast %299 : vector<1x7x32xf32> to vector<7x32xf32>
    %301 = vector.shape_cast %298 : vector<7x32xf32> to vector<1x7x32xf32>
    tpu.vector_store %arg12[%c1_337, %c64_338, %c0_339], %301 {strides = array<i32>} : memref<4x81x160xf32, #tpu.memory_space<vmem>>, vector<1x7x32xf32>,
    %c0_340 = arith.constant 0 : index
    %c0_341 = arith.constant 0 : index
    %c0_342 = arith.constant 0 : index
    %302 = vector.load %arg11[%c0_340, %c0_341, %c0_342] : memref<4x49x32xf32, #tpu.memory_space<vmem>>, vector<1x7x32xf32>
    %303 = vector.shape_cast %302 : vector<1x7x32xf32> to vector<7x32xf32>
    %c1_343 = arith.constant 1 : index
    %c9_344 = arith.constant 9 : index
    %c32_345 = arith.constant 32 : index
    %304 = vector.load %arg12[%c1_343, %c9_344, %c32_345] : memref<4x81x160xf32, #tpu.memory_space<vmem>>, vector<1x7x32xf32>
    %305 = vector.shape_cast %304 : vector<1x7x32xf32> to vector<7x32xf32>
    %306 = vector.shape_cast %303 : vector<7x32xf32> to vector<1x7x32xf32>
    tpu.vector_store %arg12[%c1_343, %c9_344, %c32_345], %306 {strides = array<i32>} : memref<4x81x160xf32, #tpu.memory_space<vmem>>, vector<1x7x32xf32>,
    %c0_346 = arith.constant 0 : index
    %c7_347 = arith.constant 7 : index
    %c0_348 = arith.constant 0 : index
    %307 = vector.load %arg11[%c0_346, %c7_347, %c0_348] : memref<4x49x32xf32, #tpu.memory_space<vmem>>, vector<1x7x32xf32>
    %308 = vector.shape_cast %307 : vector<1x7x32xf32> to vector<7x32xf32>
    %c1_349 = arith.constant 1 : index
    %c18_350 = arith.constant 18 : index
    %c32_351 = arith.constant 32 : index
    %309 = vector.load %arg12[%c1_349, %c18_350, %c32_351] : memref<4x81x160xf32, #tpu.memory_space<vmem>>, vector<1x7x32xf32>
    %310 = vector.shape_cast %309 : vector<1x7x32xf32> to vector<7x32xf32>
    %311 = vector.shape_cast %308 : vector<7x32xf32> to vector<1x7x32xf32>
    tpu.vector_store %arg12[%c1_349, %c18_350, %c32_351], %311 {strides = array<i32>} : memref<4x81x160xf32, #tpu.memory_space<vmem>>, vector<1x7x32xf32>,
    %c0_352 = arith.constant 0 : index
    %c14_353 = arith.constant 14 : index
    %c0_354 = arith.constant 0 : index
    %312 = vector.load %arg11[%c0_352, %c14_353, %c0_354] : memref<4x49x32xf32, #tpu.memory_space<vmem>>, vector<1x7x32xf32>
    %313 = vector.shape_cast %312 : vector<1x7x32xf32> to vector<7x32xf32>
    %c1_355 = arith.constant 1 : index
    %c27_356 = arith.constant 27 : index
    %c32_357 = arith.constant 32 : index
    %314 = vector.load %arg12[%c1_355, %c27_356, %c32_357] : memref<4x81x160xf32, #tpu.memory_space<vmem>>, vector<1x7x32xf32>
    %315 = vector.shape_cast %314 : vector<1x7x32xf32> to vector<7x32xf32>
    %316 = vector.shape_cast %313 : vector<7x32xf32> to vector<1x7x32xf32>
    tpu.vector_store %arg12[%c1_355, %c27_356, %c32_357], %316 {strides = array<i32>} : memref<4x81x160xf32, #tpu.memory_space<vmem>>, vector<1x7x32xf32>,
    %c0_358 = arith.constant 0 : index
    %c21_359 = arith.constant 21 : index
    %c0_360 = arith.constant 0 : index
    %317 = vector.load %arg11[%c0_358, %c21_359, %c0_360] : memref<4x49x32xf32, #tpu.memory_space<vmem>>, vector<1x7x32xf32>
    %318 = vector.shape_cast %317 : vector<1x7x32xf32> to vector<7x32xf32>
    %c1_361 = arith.constant 1 : index
    %c36_362 = arith.constant 36 : index
    %c32_363 = arith.constant 32 : index
    %319 = vector.load %arg12[%c1_361, %c36_362, %c32_363] : memref<4x81x160xf32, #tpu.memory_space<vmem>>, vector<1x7x32xf32>
    %320 = vector.shape_cast %319 : vector<1x7x32xf32> to vector<7x32xf32>
    %321 = vector.shape_cast %318 : vector<7x32xf32> to vector<1x7x32xf32>
    tpu.vector_store %arg12[%c1_361, %c36_362, %c32_363], %321 {strides = array<i32>} : memref<4x81x160xf32, #tpu.memory_space<vmem>>, vector<1x7x32xf32>,
    %c0_364 = arith.constant 0 : index
    %c28_365 = arith.constant 28 : index
    %c0_366 = arith.constant 0 : index
    %322 = vector.load %arg11[%c0_364, %c28_365, %c0_366] : memref<4x49x32xf32, #tpu.memory_space<vmem>>, vector<1x7x32xf32>
    %323 = vector.shape_cast %322 : vector<1x7x32xf32> to vector<7x32xf32>
    %c1_367 = arith.constant 1 : index
    %c45_368 = arith.constant 45 : index
    %c32_369 = arith.constant 32 : index
    %324 = vector.load %arg12[%c1_367, %c45_368, %c32_369] : memref<4x81x160xf32, #tpu.memory_space<vmem>>, vector<1x7x32xf32>
    %325 = vector.shape_cast %324 : vector<1x7x32xf32> to vector<7x32xf32>
    %326 = vector.shape_cast %323 : vector<7x32xf32> to vector<1x7x32xf32>
    tpu.vector_store %arg12[%c1_367, %c45_368, %c32_369], %326 {strides = array<i32>} : memref<4x81x160xf32, #tpu.memory_space<vmem>>, vector<1x7x32xf32>,
    %c0_370 = arith.constant 0 : index
    %c35_371 = arith.constant 35 : index
    %c0_372 = arith.constant 0 : index
    %327 = vector.load %arg11[%c0_370, %c35_371, %c0_372] : memref<4x49x32xf32, #tpu.memory_space<vmem>>, vector<1x7x32xf32>
    %328 = vector.shape_cast %327 : vector<1x7x32xf32> to vector<7x32xf32>
    %c1_373 = arith.constant 1 : index
    %c54_374 = arith.constant 54 : index
    %c32_375 = arith.constant 32 : index
    %329 = vector.load %arg12[%c1_373, %c54_374, %c32_375] : memref<4x81x160xf32, #tpu.memory_space<vmem>>, vector<1x7x32xf32>
    %330 = vector.shape_cast %329 : vector<1x7x32xf32> to vector<7x32xf32>
    %331 = vector.shape_cast %328 : vector<7x32xf32> to vector<1x7x32xf32>
    tpu.vector_store %arg12[%c1_373, %c54_374, %c32_375], %331 {strides = array<i32>} : memref<4x81x160xf32, #tpu.memory_space<vmem>>, vector<1x7x32xf32>,
    %c0_376 = arith.constant 0 : index
    %c42_377 = arith.constant 42 : index
    %c0_378 = arith.constant 0 : index
    %332 = vector.load %arg11[%c0_376, %c42_377, %c0_378] : memref<4x49x32xf32, #tpu.memory_space<vmem>>, vector<1x7x32xf32>
    %333 = vector.shape_cast %332 : vector<1x7x32xf32> to vector<7x32xf32>
    %c1_379 = arith.constant 1 : index
    %c63_380 = arith.constant 63 : index
    %c32_381 = arith.constant 32 : index
    %334 = vector.load %arg12[%c1_379, %c63_380, %c32_381] : memref<4x81x160xf32, #tpu.memory_space<vmem>>, vector<1x7x32xf32>
    %335 = vector.shape_cast %334 : vector<1x7x32xf32> to vector<7x32xf32>
    %336 = vector.shape_cast %333 : vector<7x32xf32> to vector<1x7x32xf32>
    tpu.vector_store %arg12[%c1_379, %c63_380, %c32_381], %336 {strides = array<i32>} : memref<4x81x160xf32, #tpu.memory_space<vmem>>, vector<1x7x32xf32>,
    %c1_382 = arith.constant 1 : index
    %c0_383 = arith.constant 0 : index
    %c0_384 = arith.constant 0 : index
    %337 = vector.load %arg11[%c1_382, %c0_383, %c0_384] : memref<4x49x32xf32, #tpu.memory_space<vmem>>, vector<1x7x32xf32>
    %338 = vector.shape_cast %337 : vector<1x7x32xf32> to vector<7x32xf32>
    %c1_385 = arith.constant 1 : index
    %c9_386 = arith.constant 9 : index
    %c64_387 = arith.constant 64 : index
    %339 = vector.load %arg12[%c1_385, %c9_386, %c64_387] : memref<4x81x160xf32, #tpu.memory_space<vmem>>, vector<1x7x32xf32>
    %340 = vector.shape_cast %339 : vector<1x7x32xf32> to vector<7x32xf32>
    %341 = vector.shape_cast %338 : vector<7x32xf32> to vector<1x7x32xf32>
    tpu.vector_store %arg12[%c1_385, %c9_386, %c64_387], %341 {strides = array<i32>} : memref<4x81x160xf32, #tpu.memory_space<vmem>>, vector<1x7x32xf32>,
    %c1_388 = arith.constant 1 : index
    %c7_389 = arith.constant 7 : index
    %c0_390 = arith.constant 0 : index
    %342 = vector.load %arg11[%c1_388, %c7_389, %c0_390] : memref<4x49x32xf32, #tpu.memory_space<vmem>>, vector<1x7x32xf32>
    %343 = vector.shape_cast %342 : vector<1x7x32xf32> to vector<7x32xf32>
    %c1_391 = arith.constant 1 : index
    %c18_392 = arith.constant 18 : index
    %c64_393 = arith.constant 64 : index
    %344 = vector.load %arg12[%c1_391, %c18_392, %c64_393] : memref<4x81x160xf32, #tpu.memory_space<vmem>>, vector<1x7x32xf32>
    %345 = vector.shape_cast %344 : vector<1x7x32xf32> to vector<7x32xf32>
    %346 = vector.shape_cast %343 : vector<7x32xf32> to vector<1x7x32xf32>
    tpu.vector_store %arg12[%c1_391, %c18_392, %c64_393], %346 {strides = array<i32>} : memref<4x81x160xf32, #tpu.memory_space<vmem>>, vector<1x7x32xf32>,
    %c1_394 = arith.constant 1 : index
    %c14_395 = arith.constant 14 : index
    %c0_396 = arith.constant 0 : index
    %347 = vector.load %arg11[%c1_394, %c14_395, %c0_396] : memref<4x49x32xf32, #tpu.memory_space<vmem>>, vector<1x7x32xf32>
    %348 = vector.shape_cast %347 : vector<1x7x32xf32> to vector<7x32xf32>
    %c1_397 = arith.constant 1 : index
    %c27_398 = arith.constant 27 : index
    %c64_399 = arith.constant 64 : index
    %349 = vector.load %arg12[%c1_397, %c27_398, %c64_399] : memref<4x81x160xf32, #tpu.memory_space<vmem>>, vector<1x7x32xf32>
    %350 = vector.shape_cast %349 : vector<1x7x32xf32> to vector<7x32xf32>
    %351 = vector.shape_cast %348 : vector<7x32xf32> to vector<1x7x32xf32>
    tpu.vector_store %arg12[%c1_397, %c27_398, %c64_399], %351 {strides = array<i32>} : memref<4x81x160xf32, #tpu.memory_space<vmem>>, vector<1x7x32xf32>,
    %c1_400 = arith.constant 1 : index
    %c21_401 = arith.constant 21 : index
    %c0_402 = arith.constant 0 : index
    %352 = vector.load %arg11[%c1_400, %c21_401, %c0_402] : memref<4x49x32xf32, #tpu.memory_space<vmem>>, vector<1x7x32xf32>
    %353 = vector.shape_cast %352 : vector<1x7x32xf32> to vector<7x32xf32>
    %c1_403 = arith.constant 1 : index
    %c36_404 = arith.constant 36 : index
    %c64_405 = arith.constant 64 : index
    %354 = vector.load %arg12[%c1_403, %c36_404, %c64_405] : memref<4x81x160xf32, #tpu.memory_space<vmem>>, vector<1x7x32xf32>
    %355 = vector.shape_cast %354 : vector<1x7x32xf32> to vector<7x32xf32>
    %356 = vector.shape_cast %353 : vector<7x32xf32> to vector<1x7x32xf32>
    tpu.vector_store %arg12[%c1_403, %c36_404, %c64_405], %356 {strides = array<i32>} : memref<4x81x160xf32, #tpu.memory_space<vmem>>, vector<1x7x32xf32>,
    %c1_406 = arith.constant 1 : index
    %c28_407 = arith.constant 28 : index
    %c0_408 = arith.constant 0 : index
    %357 = vector.load %arg11[%c1_406, %c28_407, %c0_408] : memref<4x49x32xf32, #tpu.memory_space<vmem>>, vector<1x7x32xf32>
    %358 = vector.shape_cast %357 : vector<1x7x32xf32> to vector<7x32xf32>
    %c1_409 = arith.constant 1 : index
    %c45_410 = arith.constant 45 : index
    %c64_411 = arith.constant 64 : index
    %359 = vector.load %arg12[%c1_409, %c45_410, %c64_411] : memref<4x81x160xf32, #tpu.memory_space<vmem>>, vector<1x7x32xf32>
    %360 = vector.shape_cast %359 : vector<1x7x32xf32> to vector<7x32xf32>
    %361 = vector.shape_cast %358 : vector<7x32xf32> to vector<1x7x32xf32>
    tpu.vector_store %arg12[%c1_409, %c45_410, %c64_411], %361 {strides = array<i32>} : memref<4x81x160xf32, #tpu.memory_space<vmem>>, vector<1x7x32xf32>,
    %c1_412 = arith.constant 1 : index
    %c35_413 = arith.constant 35 : index
    %c0_414 = arith.constant 0 : index
    %362 = vector.load %arg11[%c1_412, %c35_413, %c0_414] : memref<4x49x32xf32, #tpu.memory_space<vmem>>, vector<1x7x32xf32>
    %363 = vector.shape_cast %362 : vector<1x7x32xf32> to vector<7x32xf32>
    %c1_415 = arith.constant 1 : index
    %c54_416 = arith.constant 54 : index
    %c64_417 = arith.constant 64 : index
    %364 = vector.load %arg12[%c1_415, %c54_416, %c64_417] : memref<4x81x160xf32, #tpu.memory_space<vmem>>, vector<1x7x32xf32>
    %365 = vector.shape_cast %364 : vector<1x7x32xf32> to vector<7x32xf32>
    %366 = vector.shape_cast %363 : vector<7x32xf32> to vector<1x7x32xf32>
    tpu.vector_store %arg12[%c1_415, %c54_416, %c64_417], %366 {strides = array<i32>} : memref<4x81x160xf32, #tpu.memory_space<vmem>>, vector<1x7x32xf32>,
    %c1_418 = arith.constant 1 : index
    %c42_419 = arith.constant 42 : index
    %c0_420 = arith.constant 0 : index
    %367 = vector.load %arg11[%c1_418, %c42_419, %c0_420] : memref<4x49x32xf32, #tpu.memory_space<vmem>>, vector<1x7x32xf32>
    %368 = vector.shape_cast %367 : vector<1x7x32xf32> to vector<7x32xf32>
    %c1_421 = arith.constant 1 : index
    %c63_422 = arith.constant 63 : index
    %c64_423 = arith.constant 64 : index
    %369 = vector.load %arg12[%c1_421, %c63_422, %c64_423] : memref<4x81x160xf32, #tpu.memory_space<vmem>>, vector<1x7x32xf32>
    %370 = vector.shape_cast %369 : vector<1x7x32xf32> to vector<7x32xf32>
    %371 = vector.shape_cast %368 : vector<7x32xf32> to vector<1x7x32xf32>
    tpu.vector_store %arg12[%c1_421, %c63_422, %c64_423], %371 {strides = array<i32>} : memref<4x81x160xf32, #tpu.memory_space<vmem>>, vector<1x7x32xf32>,
    %c0_424 = arith.constant 0 : index
    %c1_425 = arith.constant 1 : index
    %c0_426 = arith.constant 0 : index
    %372 = vector.load %arg11[%c0_424, %c1_425, %c0_426] : memref<4x49x32xf32, #tpu.memory_space<vmem>>, vector<1x6x32xf32>
    %373 = vector.shape_cast %372 : vector<1x6x32xf32> to vector<6x32xf32>
    %c1_427 = arith.constant 1 : index
    %c9_428 = arith.constant 9 : index
    %c96_429 = arith.constant 96 : index
    %374 = vector.load %arg12[%c1_427, %c9_428, %c96_429] : memref<4x81x160xf32, #tpu.memory_space<vmem>>, vector<1x6x32xf32>
    %375 = vector.shape_cast %374 : vector<1x6x32xf32> to vector<6x32xf32>
    %376 = vector.shape_cast %373 : vector<6x32xf32> to vector<1x6x32xf32>
    tpu.vector_store %arg12[%c1_427, %c9_428, %c96_429], %376 {strides = array<i32>} : memref<4x81x160xf32, #tpu.memory_space<vmem>>, vector<1x6x32xf32>,
    %c0_430 = arith.constant 0 : index
    %c8_431 = arith.constant 8 : index
    %c0_432 = arith.constant 0 : index
    %377 = vector.load %arg11[%c0_430, %c8_431, %c0_432] : memref<4x49x32xf32, #tpu.memory_space<vmem>>, vector<1x6x32xf32>
    %378 = vector.shape_cast %377 : vector<1x6x32xf32> to vector<6x32xf32>
    %c1_433 = arith.constant 1 : index
    %c18_434 = arith.constant 18 : index
    %c96_435 = arith.constant 96 : index
    %379 = vector.load %arg12[%c1_433, %c18_434, %c96_435] : memref<4x81x160xf32, #tpu.memory_space<vmem>>, vector<1x6x32xf32>
    %380 = vector.shape_cast %379 : vector<1x6x32xf32> to vector<6x32xf32>
    %381 = vector.shape_cast %378 : vector<6x32xf32> to vector<1x6x32xf32>
    tpu.vector_store %arg12[%c1_433, %c18_434, %c96_435], %381 {strides = array<i32>} : memref<4x81x160xf32, #tpu.memory_space<vmem>>, vector<1x6x32xf32>,
    %c0_436 = arith.constant 0 : index
    %c15_437 = arith.constant 15 : index
    %c0_438 = arith.constant 0 : index
    %382 = vector.load %arg11[%c0_436, %c15_437, %c0_438] : memref<4x49x32xf32, #tpu.memory_space<vmem>>, vector<1x6x32xf32>
    %383 = vector.shape_cast %382 : vector<1x6x32xf32> to vector<6x32xf32>
    %c1_439 = arith.constant 1 : index
    %c27_440 = arith.constant 27 : index
    %c96_441 = arith.constant 96 : index
    %384 = vector.load %arg12[%c1_439, %c27_440, %c96_441] : memref<4x81x160xf32, #tpu.memory_space<vmem>>, vector<1x6x32xf32>
    %385 = vector.shape_cast %384 : vector<1x6x32xf32> to vector<6x32xf32>
    %386 = vector.shape_cast %383 : vector<6x32xf32> to vector<1x6x32xf32>
    tpu.vector_store %arg12[%c1_439, %c27_440, %c96_441], %386 {strides = array<i32>} : memref<4x81x160xf32, #tpu.memory_space<vmem>>, vector<1x6x32xf32>,
    %c0_442 = arith.constant 0 : index
    %c22_443 = arith.constant 22 : index
    %c0_444 = arith.constant 0 : index
    %387 = vector.load %arg11[%c0_442, %c22_443, %c0_444] : memref<4x49x32xf32, #tpu.memory_space<vmem>>, vector<1x6x32xf32>
    %388 = vector.shape_cast %387 : vector<1x6x32xf32> to vector<6x32xf32>
    %c1_445 = arith.constant 1 : index
    %c36_446 = arith.constant 36 : index
    %c96_447 = arith.constant 96 : index
    %389 = vector.load %arg12[%c1_445, %c36_446, %c96_447] : memref<4x81x160xf32, #tpu.memory_space<vmem>>, vector<1x6x32xf32>
    %390 = vector.shape_cast %389 : vector<1x6x32xf32> to vector<6x32xf32>
    %391 = vector.shape_cast %388 : vector<6x32xf32> to vector<1x6x32xf32>
    tpu.vector_store %arg12[%c1_445, %c36_446, %c96_447], %391 {strides = array<i32>} : memref<4x81x160xf32, #tpu.memory_space<vmem>>, vector<1x6x32xf32>,
    %c0_448 = arith.constant 0 : index
    %c29_449 = arith.constant 29 : index
    %c0_450 = arith.constant 0 : index
    %392 = vector.load %arg11[%c0_448, %c29_449, %c0_450] : memref<4x49x32xf32, #tpu.memory_space<vmem>>, vector<1x6x32xf32>
    %393 = vector.shape_cast %392 : vector<1x6x32xf32> to vector<6x32xf32>
    %c1_451 = arith.constant 1 : index
    %c45_452 = arith.constant 45 : index
    %c96_453 = arith.constant 96 : index
    %394 = vector.load %arg12[%c1_451, %c45_452, %c96_453] : memref<4x81x160xf32, #tpu.memory_space<vmem>>, vector<1x6x32xf32>
    %395 = vector.shape_cast %394 : vector<1x6x32xf32> to vector<6x32xf32>
    %396 = vector.shape_cast %393 : vector<6x32xf32> to vector<1x6x32xf32>
    tpu.vector_store %arg12[%c1_451, %c45_452, %c96_453], %396 {strides = array<i32>} : memref<4x81x160xf32, #tpu.memory_space<vmem>>, vector<1x6x32xf32>,
    %c0_454 = arith.constant 0 : index
    %c36_455 = arith.constant 36 : index
    %c0_456 = arith.constant 0 : index
    %397 = vector.load %arg11[%c0_454, %c36_455, %c0_456] : memref<4x49x32xf32, #tpu.memory_space<vmem>>, vector<1x6x32xf32>
    %398 = vector.shape_cast %397 : vector<1x6x32xf32> to vector<6x32xf32>
    %c1_457 = arith.constant 1 : index
    %c54_458 = arith.constant 54 : index
    %c96_459 = arith.constant 96 : index
    %399 = vector.load %arg12[%c1_457, %c54_458, %c96_459] : memref<4x81x160xf32, #tpu.memory_space<vmem>>, vector<1x6x32xf32>
    %400 = vector.shape_cast %399 : vector<1x6x32xf32> to vector<6x32xf32>
    %401 = vector.shape_cast %398 : vector<6x32xf32> to vector<1x6x32xf32>
    tpu.vector_store %arg12[%c1_457, %c54_458, %c96_459], %401 {strides = array<i32>} : memref<4x81x160xf32, #tpu.memory_space<vmem>>, vector<1x6x32xf32>,
    %c0_460 = arith.constant 0 : index
    %c43_461 = arith.constant 43 : index
    %c0_462 = arith.constant 0 : index
    %402 = vector.load %arg11[%c0_460, %c43_461, %c0_462] : memref<4x49x32xf32, #tpu.memory_space<vmem>>, vector<1x6x32xf32>
    %403 = vector.shape_cast %402 : vector<1x6x32xf32> to vector<6x32xf32>
    %c1_463 = arith.constant 1 : index
    %c63_464 = arith.constant 63 : index
    %c96_465 = arith.constant 96 : index
    %404 = vector.load %arg12[%c1_463, %c63_464, %c96_465] : memref<4x81x160xf32, #tpu.memory_space<vmem>>, vector<1x6x32xf32>
    %405 = vector.shape_cast %404 : vector<1x6x32xf32> to vector<6x32xf32>
    %406 = vector.shape_cast %403 : vector<6x32xf32> to vector<1x6x32xf32>
    tpu.vector_store %arg12[%c1_463, %c63_464, %c96_465], %406 {strides = array<i32>} : memref<4x81x160xf32, #tpu.memory_space<vmem>>, vector<1x6x32xf32>,
    %c1_466 = arith.constant 1 : index
    %c1_467 = arith.constant 1 : index
    %c0_468 = arith.constant 0 : index
    %407 = vector.load %arg11[%c1_466, %c1_467, %c0_468] : memref<4x49x32xf32, #tpu.memory_space<vmem>>, vector<1x6x32xf32>
    %408 = vector.shape_cast %407 : vector<1x6x32xf32> to vector<6x32xf32>
    %c1_469 = arith.constant 1 : index
    %c9_470 = arith.constant 9 : index
    %c128_471 = arith.constant 128 : index
    %409 = vector.load %arg12[%c1_469, %c9_470, %c128_471] : memref<4x81x160xf32, #tpu.memory_space<vmem>>, vector<1x6x32xf32>
    %410 = vector.shape_cast %409 : vector<1x6x32xf32> to vector<6x32xf32>
    %411 = vector.shape_cast %408 : vector<6x32xf32> to vector<1x6x32xf32>
    tpu.vector_store %arg12[%c1_469, %c9_470, %c128_471], %411 {strides = array<i32>} : memref<4x81x160xf32, #tpu.memory_space<vmem>>, vector<1x6x32xf32>,
    %c1_472 = arith.constant 1 : index
    %c8_473 = arith.constant 8 : index
    %c0_474 = arith.constant 0 : index
    %412 = vector.load %arg11[%c1_472, %c8_473, %c0_474] : memref<4x49x32xf32, #tpu.memory_space<vmem>>, vector<1x6x32xf32>
    %413 = vector.shape_cast %412 : vector<1x6x32xf32> to vector<6x32xf32>
    %c1_475 = arith.constant 1 : index
    %c18_476 = arith.constant 18 : index
    %c128_477 = arith.constant 128 : index
    %414 = vector.load %arg12[%c1_475, %c18_476, %c128_477] : memref<4x81x160xf32, #tpu.memory_space<vmem>>, vector<1x6x32xf32>
    %415 = vector.shape_cast %414 : vector<1x6x32xf32> to vector<6x32xf32>
    %416 = vector.shape_cast %413 : vector<6x32xf32> to vector<1x6x32xf32>
    tpu.vector_store %arg12[%c1_475, %c18_476, %c128_477], %416 {strides = array<i32>} : memref<4x81x160xf32, #tpu.memory_space<vmem>>, vector<1x6x32xf32>,
    %c1_478 = arith.constant 1 : index
    %c15_479 = arith.constant 15 : index
    %c0_480 = arith.constant 0 : index
    %417 = vector.load %arg11[%c1_478, %c15_479, %c0_480] : memref<4x49x32xf32, #tpu.memory_space<vmem>>, vector<1x6x32xf32>
    %418 = vector.shape_cast %417 : vector<1x6x32xf32> to vector<6x32xf32>
    %c1_481 = arith.constant 1 : index
    %c27_482 = arith.constant 27 : index
    %c128_483 = arith.constant 128 : index
    %419 = vector.load %arg12[%c1_481, %c27_482, %c128_483] : memref<4x81x160xf32, #tpu.memory_space<vmem>>, vector<1x6x32xf32>
    %420 = vector.shape_cast %419 : vector<1x6x32xf32> to vector<6x32xf32>
    %421 = vector.shape_cast %418 : vector<6x32xf32> to vector<1x6x32xf32>
    tpu.vector_store %arg12[%c1_481, %c27_482, %c128_483], %421 {strides = array<i32>} : memref<4x81x160xf32, #tpu.memory_space<vmem>>, vector<1x6x32xf32>,
    %c1_484 = arith.constant 1 : index
    %c22_485 = arith.constant 22 : index
    %c0_486 = arith.constant 0 : index
    %422 = vector.load %arg11[%c1_484, %c22_485, %c0_486] : memref<4x49x32xf32, #tpu.memory_space<vmem>>, vector<1x6x32xf32>
    %423 = vector.shape_cast %422 : vector<1x6x32xf32> to vector<6x32xf32>
    %c1_487 = arith.constant 1 : index
    %c36_488 = arith.constant 36 : index
    %c128_489 = arith.constant 128 : index
    %424 = vector.load %arg12[%c1_487, %c36_488, %c128_489] : memref<4x81x160xf32, #tpu.memory_space<vmem>>, vector<1x6x32xf32>
    %425 = vector.shape_cast %424 : vector<1x6x32xf32> to vector<6x32xf32>
    %426 = vector.shape_cast %423 : vector<6x32xf32> to vector<1x6x32xf32>
    tpu.vector_store %arg12[%c1_487, %c36_488, %c128_489], %426 {strides = array<i32>} : memref<4x81x160xf32, #tpu.memory_space<vmem>>, vector<1x6x32xf32>,
    %c1_490 = arith.constant 1 : index
    %c29_491 = arith.constant 29 : index
    %c0_492 = arith.constant 0 : index
    %427 = vector.load %arg11[%c1_490, %c29_491, %c0_492] : memref<4x49x32xf32, #tpu.memory_space<vmem>>, vector<1x6x32xf32>
    %428 = vector.shape_cast %427 : vector<1x6x32xf32> to vector<6x32xf32>
    %c1_493 = arith.constant 1 : index
    %c45_494 = arith.constant 45 : index
    %c128_495 = arith.constant 128 : index
    %429 = vector.load %arg12[%c1_493, %c45_494, %c128_495] : memref<4x81x160xf32, #tpu.memory_space<vmem>>, vector<1x6x32xf32>
    %430 = vector.shape_cast %429 : vector<1x6x32xf32> to vector<6x32xf32>
    %431 = vector.shape_cast %428 : vector<6x32xf32> to vector<1x6x32xf32>
    tpu.vector_store %arg12[%c1_493, %c45_494, %c128_495], %431 {strides = array<i32>} : memref<4x81x160xf32, #tpu.memory_space<vmem>>, vector<1x6x32xf32>,
    %c1_496 = arith.constant 1 : index
    %c36_497 = arith.constant 36 : index
    %c0_498 = arith.constant 0 : index
    %432 = vector.load %arg11[%c1_496, %c36_497, %c0_498] : memref<4x49x32xf32, #tpu.memory_space<vmem>>, vector<1x6x32xf32>
    %433 = vector.shape_cast %432 : vector<1x6x32xf32> to vector<6x32xf32>
    %c1_499 = arith.constant 1 : index
    %c54_500 = arith.constant 54 : index
    %c128_501 = arith.constant 128 : index
    %434 = vector.load %arg12[%c1_499, %c54_500, %c128_501] : memref<4x81x160xf32, #tpu.memory_space<vmem>>, vector<1x6x32xf32>
    %435 = vector.shape_cast %434 : vector<1x6x32xf32> to vector<6x32xf32>
    %436 = vector.shape_cast %433 : vector<6x32xf32> to vector<1x6x32xf32>
    tpu.vector_store %arg12[%c1_499, %c54_500, %c128_501], %436 {strides = array<i32>} : memref<4x81x160xf32, #tpu.memory_space<vmem>>, vector<1x6x32xf32>,
    %c1_502 = arith.constant 1 : index
    %c43_503 = arith.constant 43 : index
    %c0_504 = arith.constant 0 : index
    %437 = vector.load %arg11[%c1_502, %c43_503, %c0_504] : memref<4x49x32xf32, #tpu.memory_space<vmem>>, vector<1x6x32xf32>
    %438 = vector.shape_cast %437 : vector<1x6x32xf32> to vector<6x32xf32>
    %c1_505 = arith.constant 1 : index
    %c63_506 = arith.constant 63 : index
    %c128_507 = arith.constant 128 : index
    %439 = vector.load %arg12[%c1_505, %c63_506, %c128_507] : memref<4x81x160xf32, #tpu.memory_space<vmem>>, vector<1x6x32xf32>
    %440 = vector.shape_cast %439 : vector<1x6x32xf32> to vector<6x32xf32>
    %441 = vector.shape_cast %438 : vector<6x32xf32> to vector<1x6x32xf32>
    tpu.vector_store %arg12[%c1_505, %c63_506, %c128_507], %441 {strides = array<i32>} : memref<4x81x160xf32, #tpu.memory_space<vmem>>, vector<1x6x32xf32>,
    %c2_508 = arith.constant 2 : index
    %c0_509 = arith.constant 0 : index
    %c0_510 = arith.constant 0 : index
    %442 = vector.load %arg11[%c2_508, %c0_509, %c0_510] : memref<4x49x32xf32, #tpu.memory_space<vmem>>, vector<1x7x32xf32>
    %443 = vector.shape_cast %442 : vector<1x7x32xf32> to vector<7x32xf32>
    %c2_511 = arith.constant 2 : index
    %c10_512 = arith.constant 10 : index
    %c0_513 = arith.constant 0 : index
    %444 = vector.load %arg12[%c2_511, %c10_512, %c0_513] : memref<4x81x160xf32, #tpu.memory_space<vmem>>, vector<1x7x32xf32>
    %445 = vector.shape_cast %444 : vector<1x7x32xf32> to vector<7x32xf32>
    %446 = vector.shape_cast %443 : vector<7x32xf32> to vector<1x7x32xf32>
    tpu.vector_store %arg12[%c2_511, %c10_512, %c0_513], %446 {strides = array<i32>} : memref<4x81x160xf32, #tpu.memory_space<vmem>>, vector<1x7x32xf32>,
    %c2_514 = arith.constant 2 : index
    %c7_515 = arith.constant 7 : index
    %c0_516 = arith.constant 0 : index
    %447 = vector.load %arg11[%c2_514, %c7_515, %c0_516] : memref<4x49x32xf32, #tpu.memory_space<vmem>>, vector<1x7x32xf32>
    %448 = vector.shape_cast %447 : vector<1x7x32xf32> to vector<7x32xf32>
    %c2_517 = arith.constant 2 : index
    %c19_518 = arith.constant 19 : index
    %c0_519 = arith.constant 0 : index
    %449 = vector.load %arg12[%c2_517, %c19_518, %c0_519] : memref<4x81x160xf32, #tpu.memory_space<vmem>>, vector<1x7x32xf32>
    %450 = vector.shape_cast %449 : vector<1x7x32xf32> to vector<7x32xf32>
    %451 = vector.shape_cast %448 : vector<7x32xf32> to vector<1x7x32xf32>
    tpu.vector_store %arg12[%c2_517, %c19_518, %c0_519], %451 {strides = array<i32>} : memref<4x81x160xf32, #tpu.memory_space<vmem>>, vector<1x7x32xf32>,
    %c2_520 = arith.constant 2 : index
    %c14_521 = arith.constant 14 : index
    %c0_522 = arith.constant 0 : index
    %452 = vector.load %arg11[%c2_520, %c14_521, %c0_522] : memref<4x49x32xf32, #tpu.memory_space<vmem>>, vector<1x7x32xf32>
    %453 = vector.shape_cast %452 : vector<1x7x32xf32> to vector<7x32xf32>
    %c2_523 = arith.constant 2 : index
    %c28_524 = arith.constant 28 : index
    %c0_525 = arith.constant 0 : index
    %454 = vector.load %arg12[%c2_523, %c28_524, %c0_525] : memref<4x81x160xf32, #tpu.memory_space<vmem>>, vector<1x7x32xf32>
    %455 = vector.shape_cast %454 : vector<1x7x32xf32> to vector<7x32xf32>
    %456 = vector.shape_cast %453 : vector<7x32xf32> to vector<1x7x32xf32>
    tpu.vector_store %arg12[%c2_523, %c28_524, %c0_525], %456 {strides = array<i32>} : memref<4x81x160xf32, #tpu.memory_space<vmem>>, vector<1x7x32xf32>,
    %c2_526 = arith.constant 2 : index
    %c21_527 = arith.constant 21 : index
    %c0_528 = arith.constant 0 : index
    %457 = vector.load %arg11[%c2_526, %c21_527, %c0_528] : memref<4x49x32xf32, #tpu.memory_space<vmem>>, vector<1x7x32xf32>
    %458 = vector.shape_cast %457 : vector<1x7x32xf32> to vector<7x32xf32>
    %c2_529 = arith.constant 2 : index
    %c37_530 = arith.constant 37 : index
    %c0_531 = arith.constant 0 : index
    %459 = vector.load %arg12[%c2_529, %c37_530, %c0_531] : memref<4x81x160xf32, #tpu.memory_space<vmem>>, vector<1x7x32xf32>
    %460 = vector.shape_cast %459 : vector<1x7x32xf32> to vector<7x32xf32>
    %461 = vector.shape_cast %458 : vector<7x32xf32> to vector<1x7x32xf32>
    tpu.vector_store %arg12[%c2_529, %c37_530, %c0_531], %461 {strides = array<i32>} : memref<4x81x160xf32, #tpu.memory_space<vmem>>, vector<1x7x32xf32>,
    %c2_532 = arith.constant 2 : index
    %c28_533 = arith.constant 28 : index
    %c0_534 = arith.constant 0 : index
    %462 = vector.load %arg11[%c2_532, %c28_533, %c0_534] : memref<4x49x32xf32, #tpu.memory_space<vmem>>, vector<1x7x32xf32>
    %463 = vector.shape_cast %462 : vector<1x7x32xf32> to vector<7x32xf32>
    %c2_535 = arith.constant 2 : index
    %c46_536 = arith.constant 46 : index
    %c0_537 = arith.constant 0 : index
    %464 = vector.load %arg12[%c2_535, %c46_536, %c0_537] : memref<4x81x160xf32, #tpu.memory_space<vmem>>, vector<1x7x32xf32>
    %465 = vector.shape_cast %464 : vector<1x7x32xf32> to vector<7x32xf32>
    %466 = vector.shape_cast %463 : vector<7x32xf32> to vector<1x7x32xf32>
    tpu.vector_store %arg12[%c2_535, %c46_536, %c0_537], %466 {strides = array<i32>} : memref<4x81x160xf32, #tpu.memory_space<vmem>>, vector<1x7x32xf32>,
    %c2_538 = arith.constant 2 : index
    %c35_539 = arith.constant 35 : index
    %c0_540 = arith.constant 0 : index
    %467 = vector.load %arg11[%c2_538, %c35_539, %c0_540] : memref<4x49x32xf32, #tpu.memory_space<vmem>>, vector<1x7x32xf32>
    %468 = vector.shape_cast %467 : vector<1x7x32xf32> to vector<7x32xf32>
    %c2_541 = arith.constant 2 : index
    %c55_542 = arith.constant 55 : index
    %c0_543 = arith.constant 0 : index
    %469 = vector.load %arg12[%c2_541, %c55_542, %c0_543] : memref<4x81x160xf32, #tpu.memory_space<vmem>>, vector<1x7x32xf32>
    %470 = vector.shape_cast %469 : vector<1x7x32xf32> to vector<7x32xf32>
    %471 = vector.shape_cast %468 : vector<7x32xf32> to vector<1x7x32xf32>
    tpu.vector_store %arg12[%c2_541, %c55_542, %c0_543], %471 {strides = array<i32>} : memref<4x81x160xf32, #tpu.memory_space<vmem>>, vector<1x7x32xf32>,
    %c2_544 = arith.constant 2 : index
    %c42_545 = arith.constant 42 : index
    %c0_546 = arith.constant 0 : index
    %472 = vector.load %arg11[%c2_544, %c42_545, %c0_546] : memref<4x49x32xf32, #tpu.memory_space<vmem>>, vector<1x7x32xf32>
    %473 = vector.shape_cast %472 : vector<1x7x32xf32> to vector<7x32xf32>
    %c2_547 = arith.constant 2 : index
    %c64_548 = arith.constant 64 : index
    %c0_549 = arith.constant 0 : index
    %474 = vector.load %arg12[%c2_547, %c64_548, %c0_549] : memref<4x81x160xf32, #tpu.memory_space<vmem>>, vector<1x7x32xf32>
    %475 = vector.shape_cast %474 : vector<1x7x32xf32> to vector<7x32xf32>
    %476 = vector.shape_cast %473 : vector<7x32xf32> to vector<1x7x32xf32>
    tpu.vector_store %arg12[%c2_547, %c64_548, %c0_549], %476 {strides = array<i32>} : memref<4x81x160xf32, #tpu.memory_space<vmem>>, vector<1x7x32xf32>,
    %c3_550 = arith.constant 3 : index
    %c0_551 = arith.constant 0 : index
    %c0_552 = arith.constant 0 : index
    %477 = vector.load %arg11[%c3_550, %c0_551, %c0_552] : memref<4x49x32xf32, #tpu.memory_space<vmem>>, vector<1x7x32xf32>
    %478 = vector.shape_cast %477 : vector<1x7x32xf32> to vector<7x32xf32>
    %c2_553 = arith.constant 2 : index
    %c10_554 = arith.constant 10 : index
    %c32_555 = arith.constant 32 : index
    %479 = vector.load %arg12[%c2_553, %c10_554, %c32_555] : memref<4x81x160xf32, #tpu.memory_space<vmem>>, vector<1x7x32xf32>
    %480 = vector.shape_cast %479 : vector<1x7x32xf32> to vector<7x32xf32>
    %481 = vector.shape_cast %478 : vector<7x32xf32> to vector<1x7x32xf32>
    tpu.vector_store %arg12[%c2_553, %c10_554, %c32_555], %481 {strides = array<i32>} : memref<4x81x160xf32, #tpu.memory_space<vmem>>, vector<1x7x32xf32>,
    %c3_556 = arith.constant 3 : index
    %c7_557 = arith.constant 7 : index
    %c0_558 = arith.constant 0 : index
    %482 = vector.load %arg11[%c3_556, %c7_557, %c0_558] : memref<4x49x32xf32, #tpu.memory_space<vmem>>, vector<1x7x32xf32>
    %483 = vector.shape_cast %482 : vector<1x7x32xf32> to vector<7x32xf32>
    %c2_559 = arith.constant 2 : index
    %c19_560 = arith.constant 19 : index
    %c32_561 = arith.constant 32 : index
    %484 = vector.load %arg12[%c2_559, %c19_560, %c32_561] : memref<4x81x160xf32, #tpu.memory_space<vmem>>, vector<1x7x32xf32>
    %485 = vector.shape_cast %484 : vector<1x7x32xf32> to vector<7x32xf32>
    %486 = vector.shape_cast %483 : vector<7x32xf32> to vector<1x7x32xf32>
    tpu.vector_store %arg12[%c2_559, %c19_560, %c32_561], %486 {strides = array<i32>} : memref<4x81x160xf32, #tpu.memory_space<vmem>>, vector<1x7x32xf32>,
    %c3_562 = arith.constant 3 : index
    %c14_563 = arith.constant 14 : index
    %c0_564 = arith.constant 0 : index
    %487 = vector.load %arg11[%c3_562, %c14_563, %c0_564] : memref<4x49x32xf32, #tpu.memory_space<vmem>>, vector<1x7x32xf32>
    %488 = vector.shape_cast %487 : vector<1x7x32xf32> to vector<7x32xf32>
    %c2_565 = arith.constant 2 : index
    %c28_566 = arith.constant 28 : index
    %c32_567 = arith.constant 32 : index
    %489 = vector.load %arg12[%c2_565, %c28_566, %c32_567] : memref<4x81x160xf32, #tpu.memory_space<vmem>>, vector<1x7x32xf32>
    %490 = vector.shape_cast %489 : vector<1x7x32xf32> to vector<7x32xf32>
    %491 = vector.shape_cast %488 : vector<7x32xf32> to vector<1x7x32xf32>
    tpu.vector_store %arg12[%c2_565, %c28_566, %c32_567], %491 {strides = array<i32>} : memref<4x81x160xf32, #tpu.memory_space<vmem>>, vector<1x7x32xf32>,
    %c3_568 = arith.constant 3 : index
    %c21_569 = arith.constant 21 : index
    %c0_570 = arith.constant 0 : index
    %492 = vector.load %arg11[%c3_568, %c21_569, %c0_570] : memref<4x49x32xf32, #tpu.memory_space<vmem>>, vector<1x7x32xf32>
    %493 = vector.shape_cast %492 : vector<1x7x32xf32> to vector<7x32xf32>
    %c2_571 = arith.constant 2 : index
    %c37_572 = arith.constant 37 : index
    %c32_573 = arith.constant 32 : index
    %494 = vector.load %arg12[%c2_571, %c37_572, %c32_573] : memref<4x81x160xf32, #tpu.memory_space<vmem>>, vector<1x7x32xf32>
    %495 = vector.shape_cast %494 : vector<1x7x32xf32> to vector<7x32xf32>
    %496 = vector.shape_cast %493 : vector<7x32xf32> to vector<1x7x32xf32>
    tpu.vector_store %arg12[%c2_571, %c37_572, %c32_573], %496 {strides = array<i32>} : memref<4x81x160xf32, #tpu.memory_space<vmem>>, vector<1x7x32xf32>,
    %c3_574 = arith.constant 3 : index
    %c28_575 = arith.constant 28 : index
    %c0_576 = arith.constant 0 : index
    %497 = vector.load %arg11[%c3_574, %c28_575, %c0_576] : memref<4x49x32xf32, #tpu.memory_space<vmem>>, vector<1x7x32xf32>
    %498 = vector.shape_cast %497 : vector<1x7x32xf32> to vector<7x32xf32>
    %c2_577 = arith.constant 2 : index
    %c46_578 = arith.constant 46 : index
    %c32_579 = arith.constant 32 : index
    %499 = vector.load %arg12[%c2_577, %c46_578, %c32_579] : memref<4x81x160xf32, #tpu.memory_space<vmem>>, vector<1x7x32xf32>
    %500 = vector.shape_cast %499 : vector<1x7x32xf32> to vector<7x32xf32>
    %501 = vector.shape_cast %498 : vector<7x32xf32> to vector<1x7x32xf32>
    tpu.vector_store %arg12[%c2_577, %c46_578, %c32_579], %501 {strides = array<i32>} : memref<4x81x160xf32, #tpu.memory_space<vmem>>, vector<1x7x32xf32>,
    %c3_580 = arith.constant 3 : index
    %c35_581 = arith.constant 35 : index
    %c0_582 = arith.constant 0 : index
    %502 = vector.load %arg11[%c3_580, %c35_581, %c0_582] : memref<4x49x32xf32, #tpu.memory_space<vmem>>, vector<1x7x32xf32>
    %503 = vector.shape_cast %502 : vector<1x7x32xf32> to vector<7x32xf32>
    %c2_583 = arith.constant 2 : index
    %c55_584 = arith.constant 55 : index
    %c32_585 = arith.constant 32 : index
    %504 = vector.load %arg12[%c2_583, %c55_584, %c32_585] : memref<4x81x160xf32, #tpu.memory_space<vmem>>, vector<1x7x32xf32>
    %505 = vector.shape_cast %504 : vector<1x7x32xf32> to vector<7x32xf32>
    %506 = vector.shape_cast %503 : vector<7x32xf32> to vector<1x7x32xf32>
    tpu.vector_store %arg12[%c2_583, %c55_584, %c32_585], %506 {strides = array<i32>} : memref<4x81x160xf32, #tpu.memory_space<vmem>>, vector<1x7x32xf32>,
    %c3_586 = arith.constant 3 : index
    %c42_587 = arith.constant 42 : index
    %c0_588 = arith.constant 0 : index
    %507 = vector.load %arg11[%c3_586, %c42_587, %c0_588] : memref<4x49x32xf32, #tpu.memory_space<vmem>>, vector<1x7x32xf32>
    %508 = vector.shape_cast %507 : vector<1x7x32xf32> to vector<7x32xf32>
    %c2_589 = arith.constant 2 : index
    %c64_590 = arith.constant 64 : index
    %c32_591 = arith.constant 32 : index
    %509 = vector.load %arg12[%c2_589, %c64_590, %c32_591] : memref<4x81x160xf32, #tpu.memory_space<vmem>>, vector<1x7x32xf32>
    %510 = vector.shape_cast %509 : vector<1x7x32xf32> to vector<7x32xf32>
    %511 = vector.shape_cast %508 : vector<7x32xf32> to vector<1x7x32xf32>
    tpu.vector_store %arg12[%c2_589, %c64_590, %c32_591], %511 {strides = array<i32>} : memref<4x81x160xf32, #tpu.memory_space<vmem>>, vector<1x7x32xf32>,
    %c2_592 = arith.constant 2 : index
    %c0_593 = arith.constant 0 : index
    %c0_594 = arith.constant 0 : index
    %512 = vector.load %arg11[%c2_592, %c0_593, %c0_594] : memref<4x49x32xf32, #tpu.memory_space<vmem>>, vector<1x7x32xf32>
    %513 = vector.shape_cast %512 : vector<1x7x32xf32> to vector<7x32xf32>
    %c2_595 = arith.constant 2 : index
    %c9_596 = arith.constant 9 : index
    %c64_597 = arith.constant 64 : index
    %514 = vector.load %arg12[%c2_595, %c9_596, %c64_597] : memref<4x81x160xf32, #tpu.memory_space<vmem>>, vector<1x7x32xf32>
    %515 = vector.shape_cast %514 : vector<1x7x32xf32> to vector<7x32xf32>
    %516 = vector.shape_cast %513 : vector<7x32xf32> to vector<1x7x32xf32>
    tpu.vector_store %arg12[%c2_595, %c9_596, %c64_597], %516 {strides = array<i32>} : memref<4x81x160xf32, #tpu.memory_space<vmem>>, vector<1x7x32xf32>,
    %c2_598 = arith.constant 2 : index
    %c7_599 = arith.constant 7 : index
    %c0_600 = arith.constant 0 : index
    %517 = vector.load %arg11[%c2_598, %c7_599, %c0_600] : memref<4x49x32xf32, #tpu.memory_space<vmem>>, vector<1x7x32xf32>
    %518 = vector.shape_cast %517 : vector<1x7x32xf32> to vector<7x32xf32>
    %c2_601 = arith.constant 2 : index
    %c18_602 = arith.constant 18 : index
    %c64_603 = arith.constant 64 : index
    %519 = vector.load %arg12[%c2_601, %c18_602, %c64_603] : memref<4x81x160xf32, #tpu.memory_space<vmem>>, vector<1x7x32xf32>
    %520 = vector.shape_cast %519 : vector<1x7x32xf32> to vector<7x32xf32>
    %521 = vector.shape_cast %518 : vector<7x32xf32> to vector<1x7x32xf32>
    tpu.vector_store %arg12[%c2_601, %c18_602, %c64_603], %521 {strides = array<i32>} : memref<4x81x160xf32, #tpu.memory_space<vmem>>, vector<1x7x32xf32>,
    %c2_604 = arith.constant 2 : index
    %c14_605 = arith.constant 14 : index
    %c0_606 = arith.constant 0 : index
    %522 = vector.load %arg11[%c2_604, %c14_605, %c0_606] : memref<4x49x32xf32, #tpu.memory_space<vmem>>, vector<1x7x32xf32>
    %523 = vector.shape_cast %522 : vector<1x7x32xf32> to vector<7x32xf32>
    %c2_607 = arith.constant 2 : index
    %c27_608 = arith.constant 27 : index
    %c64_609 = arith.constant 64 : index
    %524 = vector.load %arg12[%c2_607, %c27_608, %c64_609] : memref<4x81x160xf32, #tpu.memory_space<vmem>>, vector<1x7x32xf32>
    %525 = vector.shape_cast %524 : vector<1x7x32xf32> to vector<7x32xf32>
    %526 = vector.shape_cast %523 : vector<7x32xf32> to vector<1x7x32xf32>
    tpu.vector_store %arg12[%c2_607, %c27_608, %c64_609], %526 {strides = array<i32>} : memref<4x81x160xf32, #tpu.memory_space<vmem>>, vector<1x7x32xf32>,
    %c2_610 = arith.constant 2 : index
    %c21_611 = arith.constant 21 : index
    %c0_612 = arith.constant 0 : index
    %527 = vector.load %arg11[%c2_610, %c21_611, %c0_612] : memref<4x49x32xf32, #tpu.memory_space<vmem>>, vector<1x7x32xf32>
    %528 = vector.shape_cast %527 : vector<1x7x32xf32> to vector<7x32xf32>
    %c2_613 = arith.constant 2 : index
    %c36_614 = arith.constant 36 : index
    %c64_615 = arith.constant 64 : index
    %529 = vector.load %arg12[%c2_613, %c36_614, %c64_615] : memref<4x81x160xf32, #tpu.memory_space<vmem>>, vector<1x7x32xf32>
    %530 = vector.shape_cast %529 : vector<1x7x32xf32> to vector<7x32xf32>
    %531 = vector.shape_cast %528 : vector<7x32xf32> to vector<1x7x32xf32>
    tpu.vector_store %arg12[%c2_613, %c36_614, %c64_615], %531 {strides = array<i32>} : memref<4x81x160xf32, #tpu.memory_space<vmem>>, vector<1x7x32xf32>,
    %c2_616 = arith.constant 2 : index
    %c28_617 = arith.constant 28 : index
    %c0_618 = arith.constant 0 : index
    %532 = vector.load %arg11[%c2_616, %c28_617, %c0_618] : memref<4x49x32xf32, #tpu.memory_space<vmem>>, vector<1x7x32xf32>
    %533 = vector.shape_cast %532 : vector<1x7x32xf32> to vector<7x32xf32>
    %c2_619 = arith.constant 2 : index
    %c45_620 = arith.constant 45 : index
    %c64_621 = arith.constant 64 : index
    %534 = vector.load %arg12[%c2_619, %c45_620, %c64_621] : memref<4x81x160xf32, #tpu.memory_space<vmem>>, vector<1x7x32xf32>
    %535 = vector.shape_cast %534 : vector<1x7x32xf32> to vector<7x32xf32>
    %536 = vector.shape_cast %533 : vector<7x32xf32> to vector<1x7x32xf32>
    tpu.vector_store %arg12[%c2_619, %c45_620, %c64_621], %536 {strides = array<i32>} : memref<4x81x160xf32, #tpu.memory_space<vmem>>, vector<1x7x32xf32>,
    %c2_622 = arith.constant 2 : index
    %c35_623 = arith.constant 35 : index
    %c0_624 = arith.constant 0 : index
    %537 = vector.load %arg11[%c2_622, %c35_623, %c0_624] : memref<4x49x32xf32, #tpu.memory_space<vmem>>, vector<1x7x32xf32>
    %538 = vector.shape_cast %537 : vector<1x7x32xf32> to vector<7x32xf32>
    %c2_625 = arith.constant 2 : index
    %c54_626 = arith.constant 54 : index
    %c64_627 = arith.constant 64 : index
    %539 = vector.load %arg12[%c2_625, %c54_626, %c64_627] : memref<4x81x160xf32, #tpu.memory_space<vmem>>, vector<1x7x32xf32>
    %540 = vector.shape_cast %539 : vector<1x7x32xf32> to vector<7x32xf32>
    %541 = vector.shape_cast %538 : vector<7x32xf32> to vector<1x7x32xf32>
    tpu.vector_store %arg12[%c2_625, %c54_626, %c64_627], %541 {strides = array<i32>} : memref<4x81x160xf32, #tpu.memory_space<vmem>>, vector<1x7x32xf32>,
    %c2_628 = arith.constant 2 : index
    %c42_629 = arith.constant 42 : index
    %c0_630 = arith.constant 0 : index
    %542 = vector.load %arg11[%c2_628, %c42_629, %c0_630] : memref<4x49x32xf32, #tpu.memory_space<vmem>>, vector<1x7x32xf32>
    %543 = vector.shape_cast %542 : vector<1x7x32xf32> to vector<7x32xf32>
    %c2_631 = arith.constant 2 : index
    %c63_632 = arith.constant 63 : index
    %c64_633 = arith.constant 64 : index
    %544 = vector.load %arg12[%c2_631, %c63_632, %c64_633] : memref<4x81x160xf32, #tpu.memory_space<vmem>>, vector<1x7x32xf32>
    %545 = vector.shape_cast %544 : vector<1x7x32xf32> to vector<7x32xf32>
    %546 = vector.shape_cast %543 : vector<7x32xf32> to vector<1x7x32xf32>
    tpu.vector_store %arg12[%c2_631, %c63_632, %c64_633], %546 {strides = array<i32>} : memref<4x81x160xf32, #tpu.memory_space<vmem>>, vector<1x7x32xf32>,
    %c3_634 = arith.constant 3 : index
    %c0_635 = arith.constant 0 : index
    %c0_636 = arith.constant 0 : index
    %547 = vector.load %arg11[%c3_634, %c0_635, %c0_636] : memref<4x49x32xf32, #tpu.memory_space<vmem>>, vector<1x7x32xf32>
    %548 = vector.shape_cast %547 : vector<1x7x32xf32> to vector<7x32xf32>
    %c2_637 = arith.constant 2 : index
    %c9_638 = arith.constant 9 : index
    %c96_639 = arith.constant 96 : index
    %549 = vector.load %arg12[%c2_637, %c9_638, %c96_639] : memref<4x81x160xf32, #tpu.memory_space<vmem>>, vector<1x7x32xf32>
    %550 = vector.shape_cast %549 : vector<1x7x32xf32> to vector<7x32xf32>
    %551 = vector.shape_cast %548 : vector<7x32xf32> to vector<1x7x32xf32>
    tpu.vector_store %arg12[%c2_637, %c9_638, %c96_639], %551 {strides = array<i32>} : memref<4x81x160xf32, #tpu.memory_space<vmem>>, vector<1x7x32xf32>,
    %c3_640 = arith.constant 3 : index
    %c7_641 = arith.constant 7 : index
    %c0_642 = arith.constant 0 : index
    %552 = vector.load %arg11[%c3_640, %c7_641, %c0_642] : memref<4x49x32xf32, #tpu.memory_space<vmem>>, vector<1x7x32xf32>
    %553 = vector.shape_cast %552 : vector<1x7x32xf32> to vector<7x32xf32>
    %c2_643 = arith.constant 2 : index
    %c18_644 = arith.constant 18 : index
    %c96_645 = arith.constant 96 : index
    %554 = vector.load %arg12[%c2_643, %c18_644, %c96_645] : memref<4x81x160xf32, #tpu.memory_space<vmem>>, vector<1x7x32xf32>
    %555 = vector.shape_cast %554 : vector<1x7x32xf32> to vector<7x32xf32>
    %556 = vector.shape_cast %553 : vector<7x32xf32> to vector<1x7x32xf32>
    tpu.vector_store %arg12[%c2_643, %c18_644, %c96_645], %556 {strides = array<i32>} : memref<4x81x160xf32, #tpu.memory_space<vmem>>, vector<1x7x32xf32>,
    %c3_646 = arith.constant 3 : index
    %c14_647 = arith.constant 14 : index
    %c0_648 = arith.constant 0 : index
    %557 = vector.load %arg11[%c3_646, %c14_647, %c0_648] : memref<4x49x32xf32, #tpu.memory_space<vmem>>, vector<1x7x32xf32>
    %558 = vector.shape_cast %557 : vector<1x7x32xf32> to vector<7x32xf32>
    %c2_649 = arith.constant 2 : index
    %c27_650 = arith.constant 27 : index
    %c96_651 = arith.constant 96 : index
    %559 = vector.load %arg12[%c2_649, %c27_650, %c96_651] : memref<4x81x160xf32, #tpu.memory_space<vmem>>, vector<1x7x32xf32>
    %560 = vector.shape_cast %559 : vector<1x7x32xf32> to vector<7x32xf32>
    %561 = vector.shape_cast %558 : vector<7x32xf32> to vector<1x7x32xf32>
    tpu.vector_store %arg12[%c2_649, %c27_650, %c96_651], %561 {strides = array<i32>} : memref<4x81x160xf32, #tpu.memory_space<vmem>>, vector<1x7x32xf32>,
    %c3_652 = arith.constant 3 : index
    %c21_653 = arith.constant 21 : index
    %c0_654 = arith.constant 0 : index
    %562 = vector.load %arg11[%c3_652, %c21_653, %c0_654] : memref<4x49x32xf32, #tpu.memory_space<vmem>>, vector<1x7x32xf32>
    %563 = vector.shape_cast %562 : vector<1x7x32xf32> to vector<7x32xf32>
    %c2_655 = arith.constant 2 : index
    %c36_656 = arith.constant 36 : index
    %c96_657 = arith.constant 96 : index
    %564 = vector.load %arg12[%c2_655, %c36_656, %c96_657] : memref<4x81x160xf32, #tpu.memory_space<vmem>>, vector<1x7x32xf32>
    %565 = vector.shape_cast %564 : vector<1x7x32xf32> to vector<7x32xf32>
    %566 = vector.shape_cast %563 : vector<7x32xf32> to vector<1x7x32xf32>
    tpu.vector_store %arg12[%c2_655, %c36_656, %c96_657], %566 {strides = array<i32>} : memref<4x81x160xf32, #tpu.memory_space<vmem>>, vector<1x7x32xf32>,
    %c3_658 = arith.constant 3 : index
    %c28_659 = arith.constant 28 : index
    %c0_660 = arith.constant 0 : index
    %567 = vector.load %arg11[%c3_658, %c28_659, %c0_660] : memref<4x49x32xf32, #tpu.memory_space<vmem>>, vector<1x7x32xf32>
    %568 = vector.shape_cast %567 : vector<1x7x32xf32> to vector<7x32xf32>
    %c2_661 = arith.constant 2 : index
    %c45_662 = arith.constant 45 : index
    %c96_663 = arith.constant 96 : index
    %569 = vector.load %arg12[%c2_661, %c45_662, %c96_663] : memref<4x81x160xf32, #tpu.memory_space<vmem>>, vector<1x7x32xf32>
    %570 = vector.shape_cast %569 : vector<1x7x32xf32> to vector<7x32xf32>
    %571 = vector.shape_cast %568 : vector<7x32xf32> to vector<1x7x32xf32>
    tpu.vector_store %arg12[%c2_661, %c45_662, %c96_663], %571 {strides = array<i32>} : memref<4x81x160xf32, #tpu.memory_space<vmem>>, vector<1x7x32xf32>,
    %c3_664 = arith.constant 3 : index
    %c35_665 = arith.constant 35 : index
    %c0_666 = arith.constant 0 : index
    %572 = vector.load %arg11[%c3_664, %c35_665, %c0_666] : memref<4x49x32xf32, #tpu.memory_space<vmem>>, vector<1x7x32xf32>
    %573 = vector.shape_cast %572 : vector<1x7x32xf32> to vector<7x32xf32>
    %c2_667 = arith.constant 2 : index
    %c54_668 = arith.constant 54 : index
    %c96_669 = arith.constant 96 : index
    %574 = vector.load %arg12[%c2_667, %c54_668, %c96_669] : memref<4x81x160xf32, #tpu.memory_space<vmem>>, vector<1x7x32xf32>
    %575 = vector.shape_cast %574 : vector<1x7x32xf32> to vector<7x32xf32>
    %576 = vector.shape_cast %573 : vector<7x32xf32> to vector<1x7x32xf32>
    tpu.vector_store %arg12[%c2_667, %c54_668, %c96_669], %576 {strides = array<i32>} : memref<4x81x160xf32, #tpu.memory_space<vmem>>, vector<1x7x32xf32>,
    %c3_670 = arith.constant 3 : index
    %c42_671 = arith.constant 42 : index
    %c0_672 = arith.constant 0 : index
    %577 = vector.load %arg11[%c3_670, %c42_671, %c0_672] : memref<4x49x32xf32, #tpu.memory_space<vmem>>, vector<1x7x32xf32>
    %578 = vector.shape_cast %577 : vector<1x7x32xf32> to vector<7x32xf32>
    %c2_673 = arith.constant 2 : index
    %c63_674 = arith.constant 63 : index
    %c96_675 = arith.constant 96 : index
    %579 = vector.load %arg12[%c2_673, %c63_674, %c96_675] : memref<4x81x160xf32, #tpu.memory_space<vmem>>, vector<1x7x32xf32>
    %580 = vector.shape_cast %579 : vector<1x7x32xf32> to vector<7x32xf32>
    %581 = vector.shape_cast %578 : vector<7x32xf32> to vector<1x7x32xf32>
    tpu.vector_store %arg12[%c2_673, %c63_674, %c96_675], %581 {strides = array<i32>} : memref<4x81x160xf32, #tpu.memory_space<vmem>>, vector<1x7x32xf32>,
    %c2_676 = arith.constant 2 : index
    %c1_677 = arith.constant 1 : index
    %c0_678 = arith.constant 0 : index
    %582 = vector.load %arg11[%c2_676, %c1_677, %c0_678] : memref<4x49x32xf32, #tpu.memory_space<vmem>>, vector<1x6x32xf32>
    %583 = vector.shape_cast %582 : vector<1x6x32xf32> to vector<6x32xf32>
    %c2_679 = arith.constant 2 : index
    %c9_680 = arith.constant 9 : index
    %c128_681 = arith.constant 128 : index
    %584 = vector.load %arg12[%c2_679, %c9_680, %c128_681] : memref<4x81x160xf32, #tpu.memory_space<vmem>>, vector<1x6x32xf32>
    %585 = vector.shape_cast %584 : vector<1x6x32xf32> to vector<6x32xf32>
    %586 = vector.shape_cast %583 : vector<6x32xf32> to vector<1x6x32xf32>
    tpu.vector_store %arg12[%c2_679, %c9_680, %c128_681], %586 {strides = array<i32>} : memref<4x81x160xf32, #tpu.memory_space<vmem>>, vector<1x6x32xf32>,
    %c2_682 = arith.constant 2 : index
    %c8_683 = arith.constant 8 : index
    %c0_684 = arith.constant 0 : index
    %587 = vector.load %arg11[%c2_682, %c8_683, %c0_684] : memref<4x49x32xf32, #tpu.memory_space<vmem>>, vector<1x6x32xf32>
    %588 = vector.shape_cast %587 : vector<1x6x32xf32> to vector<6x32xf32>
    %c2_685 = arith.constant 2 : index
    %c18_686 = arith.constant 18 : index
    %c128_687 = arith.constant 128 : index
    %589 = vector.load %arg12[%c2_685, %c18_686, %c128_687] : memref<4x81x160xf32, #tpu.memory_space<vmem>>, vector<1x6x32xf32>
    %590 = vector.shape_cast %589 : vector<1x6x32xf32> to vector<6x32xf32>
    %591 = vector.shape_cast %588 : vector<6x32xf32> to vector<1x6x32xf32>
    tpu.vector_store %arg12[%c2_685, %c18_686, %c128_687], %591 {strides = array<i32>} : memref<4x81x160xf32, #tpu.memory_space<vmem>>, vector<1x6x32xf32>,
    %c2_688 = arith.constant 2 : index
    %c15_689 = arith.constant 15 : index
    %c0_690 = arith.constant 0 : index
    %592 = vector.load %arg11[%c2_688, %c15_689, %c0_690] : memref<4x49x32xf32, #tpu.memory_space<vmem>>, vector<1x6x32xf32>
    %593 = vector.shape_cast %592 : vector<1x6x32xf32> to vector<6x32xf32>
    %c2_691 = arith.constant 2 : index
    %c27_692 = arith.constant 27 : index
    %c128_693 = arith.constant 128 : index
    %594 = vector.load %arg12[%c2_691, %c27_692, %c128_693] : memref<4x81x160xf32, #tpu.memory_space<vmem>>, vector<1x6x32xf32>
    %595 = vector.shape_cast %594 : vector<1x6x32xf32> to vector<6x32xf32>
    %596 = vector.shape_cast %593 : vector<6x32xf32> to vector<1x6x32xf32>
    tpu.vector_store %arg12[%c2_691, %c27_692, %c128_693], %596 {strides = array<i32>} : memref<4x81x160xf32, #tpu.memory_space<vmem>>, vector<1x6x32xf32>,
    %c2_694 = arith.constant 2 : index
    %c22_695 = arith.constant 22 : index
    %c0_696 = arith.constant 0 : index
    %597 = vector.load %arg11[%c2_694, %c22_695, %c0_696] : memref<4x49x32xf32, #tpu.memory_space<vmem>>, vector<1x6x32xf32>
    %598 = vector.shape_cast %597 : vector<1x6x32xf32> to vector<6x32xf32>
    %c2_697 = arith.constant 2 : index
    %c36_698 = arith.constant 36 : index
    %c128_699 = arith.constant 128 : index
    %599 = vector.load %arg12[%c2_697, %c36_698, %c128_699] : memref<4x81x160xf32, #tpu.memory_space<vmem>>, vector<1x6x32xf32>
    %600 = vector.shape_cast %599 : vector<1x6x32xf32> to vector<6x32xf32>
    %601 = vector.shape_cast %598 : vector<6x32xf32> to vector<1x6x32xf32>
    tpu.vector_store %arg12[%c2_697, %c36_698, %c128_699], %601 {strides = array<i32>} : memref<4x81x160xf32, #tpu.memory_space<vmem>>, vector<1x6x32xf32>,
    %c2_700 = arith.constant 2 : index
    %c29_701 = arith.constant 29 : index
    %c0_702 = arith.constant 0 : index
    %602 = vector.load %arg11[%c2_700, %c29_701, %c0_702] : memref<4x49x32xf32, #tpu.memory_space<vmem>>, vector<1x6x32xf32>
    %603 = vector.shape_cast %602 : vector<1x6x32xf32> to vector<6x32xf32>
    %c2_703 = arith.constant 2 : index
    %c45_704 = arith.constant 45 : index
    %c128_705 = arith.constant 128 : index
    %604 = vector.load %arg12[%c2_703, %c45_704, %c128_705] : memref<4x81x160xf32, #tpu.memory_space<vmem>>, vector<1x6x32xf32>
    %605 = vector.shape_cast %604 : vector<1x6x32xf32> to vector<6x32xf32>
    %606 = vector.shape_cast %603 : vector<6x32xf32> to vector<1x6x32xf32>
    tpu.vector_store %arg12[%c2_703, %c45_704, %c128_705], %606 {strides = array<i32>} : memref<4x81x160xf32, #tpu.memory_space<vmem>>, vector<1x6x32xf32>,
    %c2_706 = arith.constant 2 : index
    %c36_707 = arith.constant 36 : index
    %c0_708 = arith.constant 0 : index
    %607 = vector.load %arg11[%c2_706, %c36_707, %c0_708] : memref<4x49x32xf32, #tpu.memory_space<vmem>>, vector<1x6x32xf32>
    %608 = vector.shape_cast %607 : vector<1x6x32xf32> to vector<6x32xf32>
    %c2_709 = arith.constant 2 : index
    %c54_710 = arith.constant 54 : index
    %c128_711 = arith.constant 128 : index
    %609 = vector.load %arg12[%c2_709, %c54_710, %c128_711] : memref<4x81x160xf32, #tpu.memory_space<vmem>>, vector<1x6x32xf32>
    %610 = vector.shape_cast %609 : vector<1x6x32xf32> to vector<6x32xf32>
    %611 = vector.shape_cast %608 : vector<6x32xf32> to vector<1x6x32xf32>
    tpu.vector_store %arg12[%c2_709, %c54_710, %c128_711], %611 {strides = array<i32>} : memref<4x81x160xf32, #tpu.memory_space<vmem>>, vector<1x6x32xf32>,
    %c2_712 = arith.constant 2 : index
    %c43_713 = arith.constant 43 : index
    %c0_714 = arith.constant 0 : index
    %612 = vector.load %arg11[%c2_712, %c43_713, %c0_714] : memref<4x49x32xf32, #tpu.memory_space<vmem>>, vector<1x6x32xf32>
    %613 = vector.shape_cast %612 : vector<1x6x32xf32> to vector<6x32xf32>
    %c2_715 = arith.constant 2 : index
    %c63_716 = arith.constant 63 : index
    %c128_717 = arith.constant 128 : index
    %614 = vector.load %arg12[%c2_715, %c63_716, %c128_717] : memref<4x81x160xf32, #tpu.memory_space<vmem>>, vector<1x6x32xf32>
    %615 = vector.shape_cast %614 : vector<1x6x32xf32> to vector<6x32xf32>
    %616 = vector.shape_cast %613 : vector<6x32xf32> to vector<1x6x32xf32>
    tpu.vector_store %arg12[%c2_715, %c63_716, %c128_717], %616 {strides = array<i32>} : memref<4x81x160xf32, #tpu.memory_space<vmem>>, vector<1x6x32xf32>,
    %c3_718 = arith.constant 3 : index
    %c0_719 = arith.constant 0 : index
    %c0_720 = arith.constant 0 : index
    %617 = vector.load %arg11[%c3_718, %c0_719, %c0_720] : memref<4x49x32xf32, #tpu.memory_space<vmem>>, vector<1x7x32xf32>
    %618 = vector.shape_cast %617 : vector<1x7x32xf32> to vector<7x32xf32>
    %c3_721 = arith.constant 3 : index
    %c10_722 = arith.constant 10 : index
    %c0_723 = arith.constant 0 : index
    %619 = vector.load %arg12[%c3_721, %c10_722, %c0_723] : memref<4x81x160xf32, #tpu.memory_space<vmem>>, vector<1x7x32xf32>
    %620 = vector.shape_cast %619 : vector<1x7x32xf32> to vector<7x32xf32>
    %621 = vector.shape_cast %618 : vector<7x32xf32> to vector<1x7x32xf32>
    tpu.vector_store %arg12[%c3_721, %c10_722, %c0_723], %621 {strides = array<i32>} : memref<4x81x160xf32, #tpu.memory_space<vmem>>, vector<1x7x32xf32>,
    %c3_724 = arith.constant 3 : index
    %c7_725 = arith.constant 7 : index
    %c0_726 = arith.constant 0 : index
    %622 = vector.load %arg11[%c3_724, %c7_725, %c0_726] : memref<4x49x32xf32, #tpu.memory_space<vmem>>, vector<1x7x32xf32>
    %623 = vector.shape_cast %622 : vector<1x7x32xf32> to vector<7x32xf32>
    %c3_727 = arith.constant 3 : index
    %c19_728 = arith.constant 19 : index
    %c0_729 = arith.constant 0 : index
    %624 = vector.load %arg12[%c3_727, %c19_728, %c0_729] : memref<4x81x160xf32, #tpu.memory_space<vmem>>, vector<1x7x32xf32>
    %625 = vector.shape_cast %624 : vector<1x7x32xf32> to vector<7x32xf32>
    %626 = vector.shape_cast %623 : vector<7x32xf32> to vector<1x7x32xf32>
    tpu.vector_store %arg12[%c3_727, %c19_728, %c0_729], %626 {strides = array<i32>} : memref<4x81x160xf32, #tpu.memory_space<vmem>>, vector<1x7x32xf32>,
    %c3_730 = arith.constant 3 : index
    %c14_731 = arith.constant 14 : index
    %c0_732 = arith.constant 0 : index
    %627 = vector.load %arg11[%c3_730, %c14_731, %c0_732] : memref<4x49x32xf32, #tpu.memory_space<vmem>>, vector<1x7x32xf32>
    %628 = vector.shape_cast %627 : vector<1x7x32xf32> to vector<7x32xf32>
    %c3_733 = arith.constant 3 : index
    %c28_734 = arith.constant 28 : index
    %c0_735 = arith.constant 0 : index
    %629 = vector.load %arg12[%c3_733, %c28_734, %c0_735] : memref<4x81x160xf32, #tpu.memory_space<vmem>>, vector<1x7x32xf32>
    %630 = vector.shape_cast %629 : vector<1x7x32xf32> to vector<7x32xf32>
    %631 = vector.shape_cast %628 : vector<7x32xf32> to vector<1x7x32xf32>
    tpu.vector_store %arg12[%c3_733, %c28_734, %c0_735], %631 {strides = array<i32>} : memref<4x81x160xf32, #tpu.memory_space<vmem>>, vector<1x7x32xf32>,
    %c3_736 = arith.constant 3 : index
    %c21_737 = arith.constant 21 : index
    %c0_738 = arith.constant 0 : index
    %632 = vector.load %arg11[%c3_736, %c21_737, %c0_738] : memref<4x49x32xf32, #tpu.memory_space<vmem>>, vector<1x7x32xf32>
    %633 = vector.shape_cast %632 : vector<1x7x32xf32> to vector<7x32xf32>
    %c3_739 = arith.constant 3 : index
    %c37_740 = arith.constant 37 : index
    %c0_741 = arith.constant 0 : index
    %634 = vector.load %arg12[%c3_739, %c37_740, %c0_741] : memref<4x81x160xf32, #tpu.memory_space<vmem>>, vector<1x7x32xf32>
    %635 = vector.shape_cast %634 : vector<1x7x32xf32> to vector<7x32xf32>
    %636 = vector.shape_cast %633 : vector<7x32xf32> to vector<1x7x32xf32>
    tpu.vector_store %arg12[%c3_739, %c37_740, %c0_741], %636 {strides = array<i32>} : memref<4x81x160xf32, #tpu.memory_space<vmem>>, vector<1x7x32xf32>,
    %c3_742 = arith.constant 3 : index
    %c28_743 = arith.constant 28 : index
    %c0_744 = arith.constant 0 : index
    %637 = vector.load %arg11[%c3_742, %c28_743, %c0_744] : memref<4x49x32xf32, #tpu.memory_space<vmem>>, vector<1x7x32xf32>
    %638 = vector.shape_cast %637 : vector<1x7x32xf32> to vector<7x32xf32>
    %c3_745 = arith.constant 3 : index
    %c46_746 = arith.constant 46 : index
    %c0_747 = arith.constant 0 : index
    %639 = vector.load %arg12[%c3_745, %c46_746, %c0_747] : memref<4x81x160xf32, #tpu.memory_space<vmem>>, vector<1x7x32xf32>
    %640 = vector.shape_cast %639 : vector<1x7x32xf32> to vector<7x32xf32>
    %641 = vector.shape_cast %638 : vector<7x32xf32> to vector<1x7x32xf32>
    tpu.vector_store %arg12[%c3_745, %c46_746, %c0_747], %641 {strides = array<i32>} : memref<4x81x160xf32, #tpu.memory_space<vmem>>, vector<1x7x32xf32>,
    %c3_748 = arith.constant 3 : index
    %c35_749 = arith.constant 35 : index
    %c0_750 = arith.constant 0 : index
    %642 = vector.load %arg11[%c3_748, %c35_749, %c0_750] : memref<4x49x32xf32, #tpu.memory_space<vmem>>, vector<1x7x32xf32>
    %643 = vector.shape_cast %642 : vector<1x7x32xf32> to vector<7x32xf32>
    %c3_751 = arith.constant 3 : index
    %c55_752 = arith.constant 55 : index
    %c0_753 = arith.constant 0 : index
    %644 = vector.load %arg12[%c3_751, %c55_752, %c0_753] : memref<4x81x160xf32, #tpu.memory_space<vmem>>, vector<1x7x32xf32>
    %645 = vector.shape_cast %644 : vector<1x7x32xf32> to vector<7x32xf32>
    %646 = vector.shape_cast %643 : vector<7x32xf32> to vector<1x7x32xf32>
    tpu.vector_store %arg12[%c3_751, %c55_752, %c0_753], %646 {strides = array<i32>} : memref<4x81x160xf32, #tpu.memory_space<vmem>>, vector<1x7x32xf32>,
    %c3_754 = arith.constant 3 : index
    %c42_755 = arith.constant 42 : index
    %c0_756 = arith.constant 0 : index
    %647 = vector.load %arg11[%c3_754, %c42_755, %c0_756] : memref<4x49x32xf32, #tpu.memory_space<vmem>>, vector<1x7x32xf32>
    %648 = vector.shape_cast %647 : vector<1x7x32xf32> to vector<7x32xf32>
    %c3_757 = arith.constant 3 : index
    %c64_758 = arith.constant 64 : index
    %c0_759 = arith.constant 0 : index
    %649 = vector.load %arg12[%c3_757, %c64_758, %c0_759] : memref<4x81x160xf32, #tpu.memory_space<vmem>>, vector<1x7x32xf32>
    %650 = vector.shape_cast %649 : vector<1x7x32xf32> to vector<7x32xf32>
    %651 = vector.shape_cast %648 : vector<7x32xf32> to vector<1x7x32xf32>
    tpu.vector_store %arg12[%c3_757, %c64_758, %c0_759], %651 {strides = array<i32>} : memref<4x81x160xf32, #tpu.memory_space<vmem>>, vector<1x7x32xf32>,
    %c2_760 = arith.constant 2 : index
    %c0_761 = arith.constant 0 : index
    %c0_762 = arith.constant 0 : index
    %652 = vector.load %arg11[%c2_760, %c0_761, %c0_762] : memref<4x49x32xf32, #tpu.memory_space<vmem>>, vector<1x7x32xf32>
    %653 = vector.shape_cast %652 : vector<1x7x32xf32> to vector<7x32xf32>
    %c3_763 = arith.constant 3 : index
    %c9_764 = arith.constant 9 : index
    %c32_765 = arith.constant 32 : index
    %654 = vector.load %arg12[%c3_763, %c9_764, %c32_765] : memref<4x81x160xf32, #tpu.memory_space<vmem>>, vector<1x7x32xf32>
    %655 = vector.shape_cast %654 : vector<1x7x32xf32> to vector<7x32xf32>
    %656 = vector.shape_cast %653 : vector<7x32xf32> to vector<1x7x32xf32>
    tpu.vector_store %arg12[%c3_763, %c9_764, %c32_765], %656 {strides = array<i32>} : memref<4x81x160xf32, #tpu.memory_space<vmem>>, vector<1x7x32xf32>,
    %c2_766 = arith.constant 2 : index
    %c7_767 = arith.constant 7 : index
    %c0_768 = arith.constant 0 : index
    %657 = vector.load %arg11[%c2_766, %c7_767, %c0_768] : memref<4x49x32xf32, #tpu.memory_space<vmem>>, vector<1x7x32xf32>
    %658 = vector.shape_cast %657 : vector<1x7x32xf32> to vector<7x32xf32>
    %c3_769 = arith.constant 3 : index
    %c18_770 = arith.constant 18 : index
    %c32_771 = arith.constant 32 : index
    %659 = vector.load %arg12[%c3_769, %c18_770, %c32_771] : memref<4x81x160xf32, #tpu.memory_space<vmem>>, vector<1x7x32xf32>
    %660 = vector.shape_cast %659 : vector<1x7x32xf32> to vector<7x32xf32>
    %661 = vector.shape_cast %658 : vector<7x32xf32> to vector<1x7x32xf32>
    tpu.vector_store %arg12[%c3_769, %c18_770, %c32_771], %661 {strides = array<i32>} : memref<4x81x160xf32, #tpu.memory_space<vmem>>, vector<1x7x32xf32>,
    %c2_772 = arith.constant 2 : index
    %c14_773 = arith.constant 14 : index
    %c0_774 = arith.constant 0 : index
    %662 = vector.load %arg11[%c2_772, %c14_773, %c0_774] : memref<4x49x32xf32, #tpu.memory_space<vmem>>, vector<1x7x32xf32>
    %663 = vector.shape_cast %662 : vector<1x7x32xf32> to vector<7x32xf32>
    %c3_775 = arith.constant 3 : index
    %c27_776 = arith.constant 27 : index
    %c32_777 = arith.constant 32 : index
    %664 = vector.load %arg12[%c3_775, %c27_776, %c32_777] : memref<4x81x160xf32, #tpu.memory_space<vmem>>, vector<1x7x32xf32>
    %665 = vector.shape_cast %664 : vector<1x7x32xf32> to vector<7x32xf32>
    %666 = vector.shape_cast %663 : vector<7x32xf32> to vector<1x7x32xf32>
    tpu.vector_store %arg12[%c3_775, %c27_776, %c32_777], %666 {strides = array<i32>} : memref<4x81x160xf32, #tpu.memory_space<vmem>>, vector<1x7x32xf32>,
    %c2_778 = arith.constant 2 : index
    %c21_779 = arith.constant 21 : index
    %c0_780 = arith.constant 0 : index
    %667 = vector.load %arg11[%c2_778, %c21_779, %c0_780] : memref<4x49x32xf32, #tpu.memory_space<vmem>>, vector<1x7x32xf32>
    %668 = vector.shape_cast %667 : vector<1x7x32xf32> to vector<7x32xf32>
    %c3_781 = arith.constant 3 : index
    %c36_782 = arith.constant 36 : index
    %c32_783 = arith.constant 32 : index
    %669 = vector.load %arg12[%c3_781, %c36_782, %c32_783] : memref<4x81x160xf32, #tpu.memory_space<vmem>>, vector<1x7x32xf32>
    %670 = vector.shape_cast %669 : vector<1x7x32xf32> to vector<7x32xf32>
    %671 = vector.shape_cast %668 : vector<7x32xf32> to vector<1x7x32xf32>
    tpu.vector_store %arg12[%c3_781, %c36_782, %c32_783], %671 {strides = array<i32>} : memref<4x81x160xf32, #tpu.memory_space<vmem>>, vector<1x7x32xf32>,
    %c2_784 = arith.constant 2 : index
    %c28_785 = arith.constant 28 : index
    %c0_786 = arith.constant 0 : index
    %672 = vector.load %arg11[%c2_784, %c28_785, %c0_786] : memref<4x49x32xf32, #tpu.memory_space<vmem>>, vector<1x7x32xf32>
    %673 = vector.shape_cast %672 : vector<1x7x32xf32> to vector<7x32xf32>
    %c3_787 = arith.constant 3 : index
    %c45_788 = arith.constant 45 : index
    %c32_789 = arith.constant 32 : index
    %674 = vector.load %arg12[%c3_787, %c45_788, %c32_789] : memref<4x81x160xf32, #tpu.memory_space<vmem>>, vector<1x7x32xf32>
    %675 = vector.shape_cast %674 : vector<1x7x32xf32> to vector<7x32xf32>
    %676 = vector.shape_cast %673 : vector<7x32xf32> to vector<1x7x32xf32>
    tpu.vector_store %arg12[%c3_787, %c45_788, %c32_789], %676 {strides = array<i32>} : memref<4x81x160xf32, #tpu.memory_space<vmem>>, vector<1x7x32xf32>,
    %c2_790 = arith.constant 2 : index
    %c35_791 = arith.constant 35 : index
    %c0_792 = arith.constant 0 : index
    %677 = vector.load %arg11[%c2_790, %c35_791, %c0_792] : memref<4x49x32xf32, #tpu.memory_space<vmem>>, vector<1x7x32xf32>
    %678 = vector.shape_cast %677 : vector<1x7x32xf32> to vector<7x32xf32>
    %c3_793 = arith.constant 3 : index
    %c54_794 = arith.constant 54 : index
    %c32_795 = arith.constant 32 : index
    %679 = vector.load %arg12[%c3_793, %c54_794, %c32_795] : memref<4x81x160xf32, #tpu.memory_space<vmem>>, vector<1x7x32xf32>
    %680 = vector.shape_cast %679 : vector<1x7x32xf32> to vector<7x32xf32>
    %681 = vector.shape_cast %678 : vector<7x32xf32> to vector<1x7x32xf32>
    tpu.vector_store %arg12[%c3_793, %c54_794, %c32_795], %681 {strides = array<i32>} : memref<4x81x160xf32, #tpu.memory_space<vmem>>, vector<1x7x32xf32>,
    %c2_796 = arith.constant 2 : index
    %c42_797 = arith.constant 42 : index
    %c0_798 = arith.constant 0 : index
    %682 = vector.load %arg11[%c2_796, %c42_797, %c0_798] : memref<4x49x32xf32, #tpu.memory_space<vmem>>, vector<1x7x32xf32>
    %683 = vector.shape_cast %682 : vector<1x7x32xf32> to vector<7x32xf32>
    %c3_799 = arith.constant 3 : index
    %c63_800 = arith.constant 63 : index
    %c32_801 = arith.constant 32 : index
    %684 = vector.load %arg12[%c3_799, %c63_800, %c32_801] : memref<4x81x160xf32, #tpu.memory_space<vmem>>, vector<1x7x32xf32>
    %685 = vector.shape_cast %684 : vector<1x7x32xf32> to vector<7x32xf32>
    %686 = vector.shape_cast %683 : vector<7x32xf32> to vector<1x7x32xf32>
    tpu.vector_store %arg12[%c3_799, %c63_800, %c32_801], %686 {strides = array<i32>} : memref<4x81x160xf32, #tpu.memory_space<vmem>>, vector<1x7x32xf32>,
    %c3_802 = arith.constant 3 : index
    %c0_803 = arith.constant 0 : index
    %c0_804 = arith.constant 0 : index
    %687 = vector.load %arg11[%c3_802, %c0_803, %c0_804] : memref<4x49x32xf32, #tpu.memory_space<vmem>>, vector<1x7x32xf32>
    %688 = vector.shape_cast %687 : vector<1x7x32xf32> to vector<7x32xf32>
    %c3_805 = arith.constant 3 : index
    %c9_806 = arith.constant 9 : index
    %c64_807 = arith.constant 64 : index
    %689 = vector.load %arg12[%c3_805, %c9_806, %c64_807] : memref<4x81x160xf32, #tpu.memory_space<vmem>>, vector<1x7x32xf32>
    %690 = vector.shape_cast %689 : vector<1x7x32xf32> to vector<7x32xf32>
    %691 = vector.shape_cast %688 : vector<7x32xf32> to vector<1x7x32xf32>
    tpu.vector_store %arg12[%c3_805, %c9_806, %c64_807], %691 {strides = array<i32>} : memref<4x81x160xf32, #tpu.memory_space<vmem>>, vector<1x7x32xf32>,
    %c3_808 = arith.constant 3 : index
    %c7_809 = arith.constant 7 : index
    %c0_810 = arith.constant 0 : index
    %692 = vector.load %arg11[%c3_808, %c7_809, %c0_810] : memref<4x49x32xf32, #tpu.memory_space<vmem>>, vector<1x7x32xf32>
    %693 = vector.shape_cast %692 : vector<1x7x32xf32> to vector<7x32xf32>
    %c3_811 = arith.constant 3 : index
    %c18_812 = arith.constant 18 : index
    %c64_813 = arith.constant 64 : index
    %694 = vector.load %arg12[%c3_811, %c18_812, %c64_813] : memref<4x81x160xf32, #tpu.memory_space<vmem>>, vector<1x7x32xf32>
    %695 = vector.shape_cast %694 : vector<1x7x32xf32> to vector<7x32xf32>
    %696 = vector.shape_cast %693 : vector<7x32xf32> to vector<1x7x32xf32>
    tpu.vector_store %arg12[%c3_811, %c18_812, %c64_813], %696 {strides = array<i32>} : memref<4x81x160xf32, #tpu.memory_space<vmem>>, vector<1x7x32xf32>,
    %c3_814 = arith.constant 3 : index
    %c14_815 = arith.constant 14 : index
    %c0_816 = arith.constant 0 : index
    %697 = vector.load %arg11[%c3_814, %c14_815, %c0_816] : memref<4x49x32xf32, #tpu.memory_space<vmem>>, vector<1x7x32xf32>
    %698 = vector.shape_cast %697 : vector<1x7x32xf32> to vector<7x32xf32>
    %c3_817 = arith.constant 3 : index
    %c27_818 = arith.constant 27 : index
    %c64_819 = arith.constant 64 : index
    %699 = vector.load %arg12[%c3_817, %c27_818, %c64_819] : memref<4x81x160xf32, #tpu.memory_space<vmem>>, vector<1x7x32xf32>
    %700 = vector.shape_cast %699 : vector<1x7x32xf32> to vector<7x32xf32>
    %701 = vector.shape_cast %698 : vector<7x32xf32> to vector<1x7x32xf32>
    tpu.vector_store %arg12[%c3_817, %c27_818, %c64_819], %701 {strides = array<i32>} : memref<4x81x160xf32, #tpu.memory_space<vmem>>, vector<1x7x32xf32>,
    %c3_820 = arith.constant 3 : index
    %c21_821 = arith.constant 21 : index
    %c0_822 = arith.constant 0 : index
    %702 = vector.load %arg11[%c3_820, %c21_821, %c0_822] : memref<4x49x32xf32, #tpu.memory_space<vmem>>, vector<1x7x32xf32>
    %703 = vector.shape_cast %702 : vector<1x7x32xf32> to vector<7x32xf32>
    %c3_823 = arith.constant 3 : index
    %c36_824 = arith.constant 36 : index
    %c64_825 = arith.constant 64 : index
    %704 = vector.load %arg12[%c3_823, %c36_824, %c64_825] : memref<4x81x160xf32, #tpu.memory_space<vmem>>, vector<1x7x32xf32>
    %705 = vector.shape_cast %704 : vector<1x7x32xf32> to vector<7x32xf32>
    %706 = vector.shape_cast %703 : vector<7x32xf32> to vector<1x7x32xf32>
    tpu.vector_store %arg12[%c3_823, %c36_824, %c64_825], %706 {strides = array<i32>} : memref<4x81x160xf32, #tpu.memory_space<vmem>>, vector<1x7x32xf32>,
    %c3_826 = arith.constant 3 : index
    %c28_827 = arith.constant 28 : index
    %c0_828 = arith.constant 0 : index
    %707 = vector.load %arg11[%c3_826, %c28_827, %c0_828] : memref<4x49x32xf32, #tpu.memory_space<vmem>>, vector<1x7x32xf32>
    %708 = vector.shape_cast %707 : vector<1x7x32xf32> to vector<7x32xf32>
    %c3_829 = arith.constant 3 : index
    %c45_830 = arith.constant 45 : index
    %c64_831 = arith.constant 64 : index
    %709 = vector.load %arg12[%c3_829, %c45_830, %c64_831] : memref<4x81x160xf32, #tpu.memory_space<vmem>>, vector<1x7x32xf32>
    %710 = vector.shape_cast %709 : vector<1x7x32xf32> to vector<7x32xf32>
    %711 = vector.shape_cast %708 : vector<7x32xf32> to vector<1x7x32xf32>
    tpu.vector_store %arg12[%c3_829, %c45_830, %c64_831], %711 {strides = array<i32>} : memref<4x81x160xf32, #tpu.memory_space<vmem>>, vector<1x7x32xf32>,
    %c3_832 = arith.constant 3 : index
    %c35_833 = arith.constant 35 : index
    %c0_834 = arith.constant 0 : index
    %712 = vector.load %arg11[%c3_832, %c35_833, %c0_834] : memref<4x49x32xf32, #tpu.memory_space<vmem>>, vector<1x7x32xf32>
    %713 = vector.shape_cast %712 : vector<1x7x32xf32> to vector<7x32xf32>
    %c3_835 = arith.constant 3 : index
    %c54_836 = arith.constant 54 : index
    %c64_837 = arith.constant 64 : index
    %714 = vector.load %arg12[%c3_835, %c54_836, %c64_837] : memref<4x81x160xf32, #tpu.memory_space<vmem>>, vector<1x7x32xf32>
    %715 = vector.shape_cast %714 : vector<1x7x32xf32> to vector<7x32xf32>
    %716 = vector.shape_cast %713 : vector<7x32xf32> to vector<1x7x32xf32>
    tpu.vector_store %arg12[%c3_835, %c54_836, %c64_837], %716 {strides = array<i32>} : memref<4x81x160xf32, #tpu.memory_space<vmem>>, vector<1x7x32xf32>,
    %c3_838 = arith.constant 3 : index
    %c42_839 = arith.constant 42 : index
    %c0_840 = arith.constant 0 : index
    %717 = vector.load %arg11[%c3_838, %c42_839, %c0_840] : memref<4x49x32xf32, #tpu.memory_space<vmem>>, vector<1x7x32xf32>
    %718 = vector.shape_cast %717 : vector<1x7x32xf32> to vector<7x32xf32>
    %c3_841 = arith.constant 3 : index
    %c63_842 = arith.constant 63 : index
    %c64_843 = arith.constant 64 : index
    %719 = vector.load %arg12[%c3_841, %c63_842, %c64_843] : memref<4x81x160xf32, #tpu.memory_space<vmem>>, vector<1x7x32xf32>
    %720 = vector.shape_cast %719 : vector<1x7x32xf32> to vector<7x32xf32>
    %721 = vector.shape_cast %718 : vector<7x32xf32> to vector<1x7x32xf32>
    tpu.vector_store %arg12[%c3_841, %c63_842, %c64_843], %721 {strides = array<i32>} : memref<4x81x160xf32, #tpu.memory_space<vmem>>, vector<1x7x32xf32>,
    %c2_844 = arith.constant 2 : index
    %c1_845 = arith.constant 1 : index
    %c0_846 = arith.constant 0 : index
    %722 = vector.load %arg11[%c2_844, %c1_845, %c0_846] : memref<4x49x32xf32, #tpu.memory_space<vmem>>, vector<1x6x32xf32>
    %723 = vector.shape_cast %722 : vector<1x6x32xf32> to vector<6x32xf32>
    %c3_847 = arith.constant 3 : index
    %c9_848 = arith.constant 9 : index
    %c96_849 = arith.constant 96 : index
    %724 = vector.load %arg12[%c3_847, %c9_848, %c96_849] : memref<4x81x160xf32, #tpu.memory_space<vmem>>, vector<1x6x32xf32>
    %725 = vector.shape_cast %724 : vector<1x6x32xf32> to vector<6x32xf32>
    %726 = vector.shape_cast %723 : vector<6x32xf32> to vector<1x6x32xf32>
    tpu.vector_store %arg12[%c3_847, %c9_848, %c96_849], %726 {strides = array<i32>} : memref<4x81x160xf32, #tpu.memory_space<vmem>>, vector<1x6x32xf32>,
    %c2_850 = arith.constant 2 : index
    %c8_851 = arith.constant 8 : index
    %c0_852 = arith.constant 0 : index
    %727 = vector.load %arg11[%c2_850, %c8_851, %c0_852] : memref<4x49x32xf32, #tpu.memory_space<vmem>>, vector<1x6x32xf32>
    %728 = vector.shape_cast %727 : vector<1x6x32xf32> to vector<6x32xf32>
    %c3_853 = arith.constant 3 : index
    %c18_854 = arith.constant 18 : index
    %c96_855 = arith.constant 96 : index
    %729 = vector.load %arg12[%c3_853, %c18_854, %c96_855] : memref<4x81x160xf32, #tpu.memory_space<vmem>>, vector<1x6x32xf32>
    %730 = vector.shape_cast %729 : vector<1x6x32xf32> to vector<6x32xf32>
    %731 = vector.shape_cast %728 : vector<6x32xf32> to vector<1x6x32xf32>
    tpu.vector_store %arg12[%c3_853, %c18_854, %c96_855], %731 {strides = array<i32>} : memref<4x81x160xf32, #tpu.memory_space<vmem>>, vector<1x6x32xf32>,
    %c2_856 = arith.constant 2 : index
    %c15_857 = arith.constant 15 : index
    %c0_858 = arith.constant 0 : index
    %732 = vector.load %arg11[%c2_856, %c15_857, %c0_858] : memref<4x49x32xf32, #tpu.memory_space<vmem>>, vector<1x6x32xf32>
    %733 = vector.shape_cast %732 : vector<1x6x32xf32> to vector<6x32xf32>
    %c3_859 = arith.constant 3 : index
    %c27_860 = arith.constant 27 : index
    %c96_861 = arith.constant 96 : index
    %734 = vector.load %arg12[%c3_859, %c27_860, %c96_861] : memref<4x81x160xf32, #tpu.memory_space<vmem>>, vector<1x6x32xf32>
    %735 = vector.shape_cast %734 : vector<1x6x32xf32> to vector<6x32xf32>
    %736 = vector.shape_cast %733 : vector<6x32xf32> to vector<1x6x32xf32>
    tpu.vector_store %arg12[%c3_859, %c27_860, %c96_861], %736 {strides = array<i32>} : memref<4x81x160xf32, #tpu.memory_space<vmem>>, vector<1x6x32xf32>,
    %c2_862 = arith.constant 2 : index
    %c22_863 = arith.constant 22 : index
    %c0_864 = arith.constant 0 : index
    %737 = vector.load %arg11[%c2_862, %c22_863, %c0_864] : memref<4x49x32xf32, #tpu.memory_space<vmem>>, vector<1x6x32xf32>
    %738 = vector.shape_cast %737 : vector<1x6x32xf32> to vector<6x32xf32>
    %c3_865 = arith.constant 3 : index
    %c36_866 = arith.constant 36 : index
    %c96_867 = arith.constant 96 : index
    %739 = vector.load %arg12[%c3_865, %c36_866, %c96_867] : memref<4x81x160xf32, #tpu.memory_space<vmem>>, vector<1x6x32xf32>
    %740 = vector.shape_cast %739 : vector<1x6x32xf32> to vector<6x32xf32>
    %741 = vector.shape_cast %738 : vector<6x32xf32> to vector<1x6x32xf32>
    tpu.vector_store %arg12[%c3_865, %c36_866, %c96_867], %741 {strides = array<i32>} : memref<4x81x160xf32, #tpu.memory_space<vmem>>, vector<1x6x32xf32>,
    %c2_868 = arith.constant 2 : index
    %c29_869 = arith.constant 29 : index
    %c0_870 = arith.constant 0 : index
    %742 = vector.load %arg11[%c2_868, %c29_869, %c0_870] : memref<4x49x32xf32, #tpu.memory_space<vmem>>, vector<1x6x32xf32>
    %743 = vector.shape_cast %742 : vector<1x6x32xf32> to vector<6x32xf32>
    %c3_871 = arith.constant 3 : index
    %c45_872 = arith.constant 45 : index
    %c96_873 = arith.constant 96 : index
    %744 = vector.load %arg12[%c3_871, %c45_872, %c96_873] : memref<4x81x160xf32, #tpu.memory_space<vmem>>, vector<1x6x32xf32>
    %745 = vector.shape_cast %744 : vector<1x6x32xf32> to vector<6x32xf32>
    %746 = vector.shape_cast %743 : vector<6x32xf32> to vector<1x6x32xf32>
    tpu.vector_store %arg12[%c3_871, %c45_872, %c96_873], %746 {strides = array<i32>} : memref<4x81x160xf32, #tpu.memory_space<vmem>>, vector<1x6x32xf32>,
    %c2_874 = arith.constant 2 : index
    %c36_875 = arith.constant 36 : index
    %c0_876 = arith.constant 0 : index
    %747 = vector.load %arg11[%c2_874, %c36_875, %c0_876] : memref<4x49x32xf32, #tpu.memory_space<vmem>>, vector<1x6x32xf32>
    %748 = vector.shape_cast %747 : vector<1x6x32xf32> to vector<6x32xf32>
    %c3_877 = arith.constant 3 : index
    %c54_878 = arith.constant 54 : index
    %c96_879 = arith.constant 96 : index
    %749 = vector.load %arg12[%c3_877, %c54_878, %c96_879] : memref<4x81x160xf32, #tpu.memory_space<vmem>>, vector<1x6x32xf32>
    %750 = vector.shape_cast %749 : vector<1x6x32xf32> to vector<6x32xf32>
    %751 = vector.shape_cast %748 : vector<6x32xf32> to vector<1x6x32xf32>
    tpu.vector_store %arg12[%c3_877, %c54_878, %c96_879], %751 {strides = array<i32>} : memref<4x81x160xf32, #tpu.memory_space<vmem>>, vector<1x6x32xf32>,
    %c2_880 = arith.constant 2 : index
    %c43_881 = arith.constant 43 : index
    %c0_882 = arith.constant 0 : index
    %752 = vector.load %arg11[%c2_880, %c43_881, %c0_882] : memref<4x49x32xf32, #tpu.memory_space<vmem>>, vector<1x6x32xf32>
    %753 = vector.shape_cast %752 : vector<1x6x32xf32> to vector<6x32xf32>
    %c3_883 = arith.constant 3 : index
    %c63_884 = arith.constant 63 : index
    %c96_885 = arith.constant 96 : index
    %754 = vector.load %arg12[%c3_883, %c63_884, %c96_885] : memref<4x81x160xf32, #tpu.memory_space<vmem>>, vector<1x6x32xf32>
    %755 = vector.shape_cast %754 : vector<1x6x32xf32> to vector<6x32xf32>
    %756 = vector.shape_cast %753 : vector<6x32xf32> to vector<1x6x32xf32>
    tpu.vector_store %arg12[%c3_883, %c63_884, %c96_885], %756 {strides = array<i32>} : memref<4x81x160xf32, #tpu.memory_space<vmem>>, vector<1x6x32xf32>,
    %c3_886 = arith.constant 3 : index
    %c1_887 = arith.constant 1 : index
    %c0_888 = arith.constant 0 : index
    %757 = vector.load %arg11[%c3_886, %c1_887, %c0_888] : memref<4x49x32xf32, #tpu.memory_space<vmem>>, vector<1x6x32xf32>
    %758 = vector.shape_cast %757 : vector<1x6x32xf32> to vector<6x32xf32>
    %c3_889 = arith.constant 3 : index
    %c9_890 = arith.constant 9 : index
    %c128_891 = arith.constant 128 : index
    %759 = vector.load %arg12[%c3_889, %c9_890, %c128_891] : memref<4x81x160xf32, #tpu.memory_space<vmem>>, vector<1x6x32xf32>
    %760 = vector.shape_cast %759 : vector<1x6x32xf32> to vector<6x32xf32>
    %761 = vector.shape_cast %758 : vector<6x32xf32> to vector<1x6x32xf32>
    tpu.vector_store %arg12[%c3_889, %c9_890, %c128_891], %761 {strides = array<i32>} : memref<4x81x160xf32, #tpu.memory_space<vmem>>, vector<1x6x32xf32>,
    %c3_892 = arith.constant 3 : index
    %c8_893 = arith.constant 8 : index
    %c0_894 = arith.constant 0 : index
    %762 = vector.load %arg11[%c3_892, %c8_893, %c0_894] : memref<4x49x32xf32, #tpu.memory_space<vmem>>, vector<1x6x32xf32>
    %763 = vector.shape_cast %762 : vector<1x6x32xf32> to vector<6x32xf32>
    %c3_895 = arith.constant 3 : index
    %c18_896 = arith.constant 18 : index
    %c128_897 = arith.constant 128 : index
    %764 = vector.load %arg12[%c3_895, %c18_896, %c128_897] : memref<4x81x160xf32, #tpu.memory_space<vmem>>, vector<1x6x32xf32>
    %765 = vector.shape_cast %764 : vector<1x6x32xf32> to vector<6x32xf32>
    %766 = vector.shape_cast %763 : vector<6x32xf32> to vector<1x6x32xf32>
    tpu.vector_store %arg12[%c3_895, %c18_896, %c128_897], %766 {strides = array<i32>} : memref<4x81x160xf32, #tpu.memory_space<vmem>>, vector<1x6x32xf32>,
    %c3_898 = arith.constant 3 : index
    %c15_899 = arith.constant 15 : index
    %c0_900 = arith.constant 0 : index
    %767 = vector.load %arg11[%c3_898, %c15_899, %c0_900] : memref<4x49x32xf32, #tpu.memory_space<vmem>>, vector<1x6x32xf32>
    %768 = vector.shape_cast %767 : vector<1x6x32xf32> to vector<6x32xf32>
    %c3_901 = arith.constant 3 : index
    %c27_902 = arith.constant 27 : index
    %c128_903 = arith.constant 128 : index
    %769 = vector.load %arg12[%c3_901, %c27_902, %c128_903] : memref<4x81x160xf32, #tpu.memory_space<vmem>>, vector<1x6x32xf32>
    %770 = vector.shape_cast %769 : vector<1x6x32xf32> to vector<6x32xf32>
    %771 = vector.shape_cast %768 : vector<6x32xf32> to vector<1x6x32xf32>
    tpu.vector_store %arg12[%c3_901, %c27_902, %c128_903], %771 {strides = array<i32>} : memref<4x81x160xf32, #tpu.memory_space<vmem>>, vector<1x6x32xf32>,
    %c3_904 = arith.constant 3 : index
    %c22_905 = arith.constant 22 : index
    %c0_906 = arith.constant 0 : index
    %772 = vector.load %arg11[%c3_904, %c22_905, %c0_906] : memref<4x49x32xf32, #tpu.memory_space<vmem>>, vector<1x6x32xf32>
    %773 = vector.shape_cast %772 : vector<1x6x32xf32> to vector<6x32xf32>
    %c3_907 = arith.constant 3 : index
    %c36_908 = arith.constant 36 : index
    %c128_909 = arith.constant 128 : index
    %774 = vector.load %arg12[%c3_907, %c36_908, %c128_909] : memref<4x81x160xf32, #tpu.memory_space<vmem>>, vector<1x6x32xf32>
    %775 = vector.shape_cast %774 : vector<1x6x32xf32> to vector<6x32xf32>
    %776 = vector.shape_cast %773 : vector<6x32xf32> to vector<1x6x32xf32>
    tpu.vector_store %arg12[%c3_907, %c36_908, %c128_909], %776 {strides = array<i32>} : memref<4x81x160xf32, #tpu.memory_space<vmem>>, vector<1x6x32xf32>,
    %c3_910 = arith.constant 3 : index
    %c29_911 = arith.constant 29 : index
    %c0_912 = arith.constant 0 : index
    %777 = vector.load %arg11[%c3_910, %c29_911, %c0_912] : memref<4x49x32xf32, #tpu.memory_space<vmem>>, vector<1x6x32xf32>
    %778 = vector.shape_cast %777 : vector<1x6x32xf32> to vector<6x32xf32>
    %c3_913 = arith.constant 3 : index
    %c45_914 = arith.constant 45 : index
    %c128_915 = arith.constant 128 : index
    %779 = vector.load %arg12[%c3_913, %c45_914, %c128_915] : memref<4x81x160xf32, #tpu.memory_space<vmem>>, vector<1x6x32xf32>
    %780 = vector.shape_cast %779 : vector<1x6x32xf32> to vector<6x32xf32>
    %781 = vector.shape_cast %778 : vector<6x32xf32> to vector<1x6x32xf32>
    tpu.vector_store %arg12[%c3_913, %c45_914, %c128_915], %781 {strides = array<i32>} : memref<4x81x160xf32, #tpu.memory_space<vmem>>, vector<1x6x32xf32>,
    %c3_916 = arith.constant 3 : index
    %c36_917 = arith.constant 36 : index
    %c0_918 = arith.constant 0 : index
    %782 = vector.load %arg11[%c3_916, %c36_917, %c0_918] : memref<4x49x32xf32, #tpu.memory_space<vmem>>, vector<1x6x32xf32>
    %783 = vector.shape_cast %782 : vector<1x6x32xf32> to vector<6x32xf32>
    %c3_919 = arith.constant 3 : index
    %c54_920 = arith.constant 54 : index
    %c128_921 = arith.constant 128 : index
    %784 = vector.load %arg12[%c3_919, %c54_920, %c128_921] : memref<4x81x160xf32, #tpu.memory_space<vmem>>, vector<1x6x32xf32>
    %785 = vector.shape_cast %784 : vector<1x6x32xf32> to vector<6x32xf32>
    %786 = vector.shape_cast %783 : vector<6x32xf32> to vector<1x6x32xf32>
    tpu.vector_store %arg12[%c3_919, %c54_920, %c128_921], %786 {strides = array<i32>} : memref<4x81x160xf32, #tpu.memory_space<vmem>>, vector<1x6x32xf32>,
    %c3_922 = arith.constant 3 : index
    %c43_923 = arith.constant 43 : index
    %c0_924 = arith.constant 0 : index
    %787 = vector.load %arg11[%c3_922, %c43_923, %c0_924] : memref<4x49x32xf32, #tpu.memory_space<vmem>>, vector<1x6x32xf32>
    %788 = vector.shape_cast %787 : vector<1x6x32xf32> to vector<6x32xf32>
    %c3_925 = arith.constant 3 : index
    %c63_926 = arith.constant 63 : index
    %c128_927 = arith.constant 128 : index
    %789 = vector.load %arg12[%c3_925, %c63_926, %c128_927] : memref<4x81x160xf32, #tpu.memory_space<vmem>>, vector<1x6x32xf32>
    %790 = vector.shape_cast %789 : vector<1x6x32xf32> to vector<6x32xf32>
    %791 = vector.shape_cast %788 : vector<6x32xf32> to vector<1x6x32xf32>
    tpu.vector_store %arg12[%c3_925, %c63_926, %c128_927], %791 {strides = array<i32>} : memref<4x81x160xf32, #tpu.memory_space<vmem>>, vector<1x6x32xf32>,
    %cst_928 = arith.constant 0.000000e+00 : f32
    %792 = vector.broadcast %cst_928 : f32 to vector<63x64xf32>
    %cst_929 = arith.constant 0.000000e+00 : f32
    %793 = vector.broadcast %cst_929 : f32 to vector<63x64xf32>
    %cst_930 = arith.constant 0.000000e+00 : f32
    %794 = vector.broadcast %cst_930 : f32 to vector<63x64xf32>
    %cst_931 = arith.constant 0.000000e+00 : f32
    %795 = vector.broadcast %cst_931 : f32 to vector<63x64xf32>
    %c0_932 = arith.constant 0 : index
    %c0_933 = arith.constant 0 : index
    %c0_934 = arith.constant 0 : index
    %796 = vector.load %arg4[%c0_932, %c0_933, %c0_934] : memref<5x160x64xbf16, #tpu.memory_space<vmem>>, vector<1x160x64xbf16>
    %797 = vector.shape_cast %796 : vector<1x160x64xbf16> to vector<160x64xbf16>
    %c0_935 = arith.constant 0 : index
    %c0_936 = arith.constant 0 : index
    %c0_937 = arith.constant 0 : index
    %798 = vector.load %arg12[%c0_935, %c0_936, %c0_937] : memref<4x81x160xf32, #tpu.memory_space<vmem>>, vector<1x63x160xf32>
    %799 = vector.shape_cast %798 : vector<1x63x160xf32> to vector<63x160xf32>
    %800 = arith.truncf %799 : vector<63x160xf32> to vector<63x160xbf16>
    %cst_938 = arith.constant dense<0.000000e+00> : vector<63x64xf32>
    %801 = tpu.matmul %800, %797, %cst_938 {dimension_numbers = #tpu.dot_dimension_numbers<[1], [0], [0], [1], [0, 0, 1, 1], [], []>} : vector<63x160xbf16>, vector<160x64xbf16>, vector<63x64xf32> -> vector<63x64xf32>
    %802 = arith.addf %792, %801 : vector<63x64xf32>
    %c1_939 = arith.constant 1 : index
    %c0_940 = arith.constant 0 : index
    %c0_941 = arith.constant 0 : index
    %803 = vector.load %arg12[%c1_939, %c0_940, %c0_941] : memref<4x81x160xf32, #tpu.memory_space<vmem>>, vector<1x63x160xf32>
    %804 = vector.shape_cast %803 : vector<1x63x160xf32> to vector<63x160xf32>
    %805 = arith.truncf %804 : vector<63x160xf32> to vector<63x160xbf16>
    %cst_942 = arith.constant dense<0.000000e+00> : vector<63x64xf32>
    %806 = tpu.matmul %805, %797, %cst_942 {dimension_numbers = #tpu.dot_dimension_numbers<[1], [0], [0], [1], [0, 0, 1, 1], [], []>} : vector<63x160xbf16>, vector<160x64xbf16>, vector<63x64xf32> -> vector<63x64xf32>
    %807 = arith.addf %793, %806 : vector<63x64xf32>
    %c2_943 = arith.constant 2 : index
    %c0_944 = arith.constant 0 : index
    %c0_945 = arith.constant 0 : index
    %808 = vector.load %arg12[%c2_943, %c0_944, %c0_945] : memref<4x81x160xf32, #tpu.memory_space<vmem>>, vector<1x63x160xf32>
    %809 = vector.shape_cast %808 : vector<1x63x160xf32> to vector<63x160xf32>
    %810 = arith.truncf %809 : vector<63x160xf32> to vector<63x160xbf16>
    %cst_946 = arith.constant dense<0.000000e+00> : vector<63x64xf32>
    %811 = tpu.matmul %810, %797, %cst_946 {dimension_numbers = #tpu.dot_dimension_numbers<[1], [0], [0], [1], [0, 0, 1, 1], [], []>} : vector<63x160xbf16>, vector<160x64xbf16>, vector<63x64xf32> -> vector<63x64xf32>
    %812 = arith.addf %794, %811 : vector<63x64xf32>
    %c3_947 = arith.constant 3 : index
    %c0_948 = arith.constant 0 : index
    %c0_949 = arith.constant 0 : index
    %813 = vector.load %arg12[%c3_947, %c0_948, %c0_949] : memref<4x81x160xf32, #tpu.memory_space<vmem>>, vector<1x63x160xf32>
    %814 = vector.shape_cast %813 : vector<1x63x160xf32> to vector<63x160xf32>
    %815 = arith.truncf %814 : vector<63x160xf32> to vector<63x160xbf16>
    %cst_950 = arith.constant dense<0.000000e+00> : vector<63x64xf32>
    %816 = tpu.matmul %815, %797, %cst_950 {dimension_numbers = #tpu.dot_dimension_numbers<[1], [0], [0], [1], [0, 0, 1, 1], [], []>} : vector<63x160xbf16>, vector<160x64xbf16>, vector<63x64xf32> -> vector<63x64xf32>
    %817 = arith.addf %795, %816 : vector<63x64xf32>
    %c1_951 = arith.constant 1 : index
    %c0_952 = arith.constant 0 : index
    %c0_953 = arith.constant 0 : index
    %818 = vector.load %arg4[%c1_951, %c0_952, %c0_953] : memref<5x160x64xbf16, #tpu.memory_space<vmem>>, vector<1x160x64xbf16>
    %819 = vector.shape_cast %818 : vector<1x160x64xbf16> to vector<160x64xbf16>
    %c2_954 = arith.constant 2 : index
    %c0_955 = arith.constant 0 : index
    %c0_956 = arith.constant 0 : index
    %820 = vector.load %arg12[%c2_954, %c0_955, %c0_956] : memref<4x81x160xf32, #tpu.memory_space<vmem>>, vector<1x63x160xf32>
    %821 = vector.shape_cast %820 : vector<1x63x160xf32> to vector<63x160xf32>
    %822 = arith.truncf %821 : vector<63x160xf32> to vector<63x160xbf16>
    %cst_957 = arith.constant dense<0.000000e+00> : vector<63x64xf32>
    %823 = tpu.matmul %822, %819, %cst_957 {dimension_numbers = #tpu.dot_dimension_numbers<[1], [0], [0], [1], [0, 0, 1, 1], [], []>} : vector<63x160xbf16>, vector<160x64xbf16>, vector<63x64xf32> -> vector<63x64xf32>
    %824 = arith.addf %802, %823 : vector<63x64xf32>
    %c3_958 = arith.constant 3 : index
    %c0_959 = arith.constant 0 : index
    %c0_960 = arith.constant 0 : index
    %825 = vector.load %arg12[%c3_958, %c0_959, %c0_960] : memref<4x81x160xf32, #tpu.memory_space<vmem>>, vector<1x63x160xf32>
    %826 = vector.shape_cast %825 : vector<1x63x160xf32> to vector<63x160xf32>
    %827 = arith.truncf %826 : vector<63x160xf32> to vector<63x160xbf16>
    %cst_961 = arith.constant dense<0.000000e+00> : vector<63x64xf32>
    %828 = tpu.matmul %827, %819, %cst_961 {dimension_numbers = #tpu.dot_dimension_numbers<[1], [0], [0], [1], [0, 0, 1, 1], [], []>} : vector<63x160xbf16>, vector<160x64xbf16>, vector<63x64xf32> -> vector<63x64xf32>
    %829 = arith.addf %807, %828 : vector<63x64xf32>
    %c0_962 = arith.constant 0 : index
    %c9_963 = arith.constant 9 : index
    %c0_964 = arith.constant 0 : index
    %830 = vector.load %arg12[%c0_962, %c9_963, %c0_964] : memref<4x81x160xf32, #tpu.memory_space<vmem>>, vector<1x63x160xf32>
    %831 = vector.shape_cast %830 : vector<1x63x160xf32> to vector<63x160xf32>
    %832 = arith.truncf %831 : vector<63x160xf32> to vector<63x160xbf16>
    %cst_965 = arith.constant dense<0.000000e+00> : vector<63x64xf32>
    %833 = tpu.matmul %832, %819, %cst_965 {dimension_numbers = #tpu.dot_dimension_numbers<[1], [0], [0], [1], [0, 0, 1, 1], [], []>} : vector<63x160xbf16>, vector<160x64xbf16>, vector<63x64xf32> -> vector<63x64xf32>
    %834 = arith.addf %812, %833 : vector<63x64xf32>
    %c1_966 = arith.constant 1 : index
    %c9_967 = arith.constant 9 : index
    %c0_968 = arith.constant 0 : index
    %835 = vector.load %arg12[%c1_966, %c9_967, %c0_968] : memref<4x81x160xf32, #tpu.memory_space<vmem>>, vector<1x63x160xf32>
    %836 = vector.shape_cast %835 : vector<1x63x160xf32> to vector<63x160xf32>
    %837 = arith.truncf %836 : vector<63x160xf32> to vector<63x160xbf16>
    %cst_969 = arith.constant dense<0.000000e+00> : vector<63x64xf32>
    %838 = tpu.matmul %837, %819, %cst_969 {dimension_numbers = #tpu.dot_dimension_numbers<[1], [0], [0], [1], [0, 0, 1, 1], [], []>} : vector<63x160xbf16>, vector<160x64xbf16>, vector<63x64xf32> -> vector<63x64xf32>
    %839 = arith.addf %817, %838 : vector<63x64xf32>
    %c2_970 = arith.constant 2 : index
    %c0_971 = arith.constant 0 : index
    %c0_972 = arith.constant 0 : index
    %840 = vector.load %arg4[%c2_970, %c0_971, %c0_972] : memref<5x160x64xbf16, #tpu.memory_space<vmem>>, vector<1x160x64xbf16>
    %841 = vector.shape_cast %840 : vector<1x160x64xbf16> to vector<160x64xbf16>
    %c0_973 = arith.constant 0 : index
    %c9_974 = arith.constant 9 : index
    %c0_975 = arith.constant 0 : index
    %842 = vector.load %arg12[%c0_973, %c9_974, %c0_975] : memref<4x81x160xf32, #tpu.memory_space<vmem>>, vector<1x63x160xf32>
    %843 = vector.shape_cast %842 : vector<1x63x160xf32> to vector<63x160xf32>
    %844 = arith.truncf %843 : vector<63x160xf32> to vector<63x160xbf16>
    %cst_976 = arith.constant dense<0.000000e+00> : vector<63x64xf32>
    %845 = tpu.matmul %844, %841, %cst_976 {dimension_numbers = #tpu.dot_dimension_numbers<[1], [0], [0], [1], [0, 0, 1, 1], [], []>} : vector<63x160xbf16>, vector<160x64xbf16>, vector<63x64xf32> -> vector<63x64xf32>
    %846 = arith.addf %824, %845 : vector<63x64xf32>
    %c1_977 = arith.constant 1 : index
    %c9_978 = arith.constant 9 : index
    %c0_979 = arith.constant 0 : index
    %847 = vector.load %arg12[%c1_977, %c9_978, %c0_979] : memref<4x81x160xf32, #tpu.memory_space<vmem>>, vector<1x63x160xf32>
    %848 = vector.shape_cast %847 : vector<1x63x160xf32> to vector<63x160xf32>
    %849 = arith.truncf %848 : vector<63x160xf32> to vector<63x160xbf16>
    %cst_980 = arith.constant dense<0.000000e+00> : vector<63x64xf32>
    %850 = tpu.matmul %849, %841, %cst_980 {dimension_numbers = #tpu.dot_dimension_numbers<[1], [0], [0], [1], [0, 0, 1, 1], [], []>} : vector<63x160xbf16>, vector<160x64xbf16>, vector<63x64xf32> -> vector<63x64xf32>
    %851 = arith.addf %829, %850 : vector<63x64xf32>
    %c2_981 = arith.constant 2 : index
    %c9_982 = arith.constant 9 : index
    %c0_983 = arith.constant 0 : index
    %852 = vector.load %arg12[%c2_981, %c9_982, %c0_983] : memref<4x81x160xf32, #tpu.memory_space<vmem>>, vector<1x63x160xf32>
    %853 = vector.shape_cast %852 : vector<1x63x160xf32> to vector<63x160xf32>
    %854 = arith.truncf %853 : vector<63x160xf32> to vector<63x160xbf16>
    %cst_984 = arith.constant dense<0.000000e+00> : vector<63x64xf32>
    %855 = tpu.matmul %854, %841, %cst_984 {dimension_numbers = #tpu.dot_dimension_numbers<[1], [0], [0], [1], [0, 0, 1, 1], [], []>} : vector<63x160xbf16>, vector<160x64xbf16>, vector<63x64xf32> -> vector<63x64xf32>
    %856 = arith.addf %834, %855 : vector<63x64xf32>
    %c3_985 = arith.constant 3 : index
    %c9_986 = arith.constant 9 : index
    %c0_987 = arith.constant 0 : index
    %857 = vector.load %arg12[%c3_985, %c9_986, %c0_987] : memref<4x81x160xf32, #tpu.memory_space<vmem>>, vector<1x63x160xf32>
    %858 = vector.shape_cast %857 : vector<1x63x160xf32> to vector<63x160xf32>
    %859 = arith.truncf %858 : vector<63x160xf32> to vector<63x160xbf16>
    %cst_988 = arith.constant dense<0.000000e+00> : vector<63x64xf32>
    %860 = tpu.matmul %859, %841, %cst_988 {dimension_numbers = #tpu.dot_dimension_numbers<[1], [0], [0], [1], [0, 0, 1, 1], [], []>} : vector<63x160xbf16>, vector<160x64xbf16>, vector<63x64xf32> -> vector<63x64xf32>
    %861 = arith.addf %839, %860 : vector<63x64xf32>
    %c3_989 = arith.constant 3 : index
    %c0_990 = arith.constant 0 : index
    %c0_991 = arith.constant 0 : index
    %862 = vector.load %arg4[%c3_989, %c0_990, %c0_991] : memref<5x160x64xbf16, #tpu.memory_space<vmem>>, vector<1x160x64xbf16>
    %863 = vector.shape_cast %862 : vector<1x160x64xbf16> to vector<160x64xbf16>
    %c2_992 = arith.constant 2 : index
    %c9_993 = arith.constant 9 : index
    %c0_994 = arith.constant 0 : index
    %864 = vector.load %arg12[%c2_992, %c9_993, %c0_994] : memref<4x81x160xf32, #tpu.memory_space<vmem>>, vector<1x63x160xf32>
    %865 = vector.shape_cast %864 : vector<1x63x160xf32> to vector<63x160xf32>
    %866 = arith.truncf %865 : vector<63x160xf32> to vector<63x160xbf16>
    %cst_995 = arith.constant dense<0.000000e+00> : vector<63x64xf32>
    %867 = tpu.matmul %866, %863, %cst_995 {dimension_numbers = #tpu.dot_dimension_numbers<[1], [0], [0], [1], [0, 0, 1, 1], [], []>} : vector<63x160xbf16>, vector<160x64xbf16>, vector<63x64xf32> -> vector<63x64xf32>
    %868 = arith.addf %846, %867 : vector<63x64xf32>
    %c3_996 = arith.constant 3 : index
    %c9_997 = arith.constant 9 : index
    %c0_998 = arith.constant 0 : index
    %869 = vector.load %arg12[%c3_996, %c9_997, %c0_998] : memref<4x81x160xf32, #tpu.memory_space<vmem>>, vector<1x63x160xf32>
    %870 = vector.shape_cast %869 : vector<1x63x160xf32> to vector<63x160xf32>
    %871 = arith.truncf %870 : vector<63x160xf32> to vector<63x160xbf16>
    %cst_999 = arith.constant dense<0.000000e+00> : vector<63x64xf32>
    %872 = tpu.matmul %871, %863, %cst_999 {dimension_numbers = #tpu.dot_dimension_numbers<[1], [0], [0], [1], [0, 0, 1, 1], [], []>} : vector<63x160xbf16>, vector<160x64xbf16>, vector<63x64xf32> -> vector<63x64xf32>
    %873 = arith.addf %851, %872 : vector<63x64xf32>
    %c0_1000 = arith.constant 0 : index
    %c18_1001 = arith.constant 18 : index
    %c0_1002 = arith.constant 0 : index
    %874 = vector.load %arg12[%c0_1000, %c18_1001, %c0_1002] : memref<4x81x160xf32, #tpu.memory_space<vmem>>, vector<1x63x160xf32>
    %875 = vector.shape_cast %874 : vector<1x63x160xf32> to vector<63x160xf32>
    %876 = arith.truncf %875 : vector<63x160xf32> to vector<63x160xbf16>
    %cst_1003 = arith.constant dense<0.000000e+00> : vector<63x64xf32>
    %877 = tpu.matmul %876, %863, %cst_1003 {dimension_numbers = #tpu.dot_dimension_numbers<[1], [0], [0], [1], [0, 0, 1, 1], [], []>} : vector<63x160xbf16>, vector<160x64xbf16>, vector<63x64xf32> -> vector<63x64xf32>
    %878 = arith.addf %856, %877 : vector<63x64xf32>
    %c1_1004 = arith.constant 1 : index
    %c18_1005 = arith.constant 18 : index
    %c0_1006 = arith.constant 0 : index
    %879 = vector.load %arg12[%c1_1004, %c18_1005, %c0_1006] : memref<4x81x160xf32, #tpu.memory_space<vmem>>, vector<1x63x160xf32>
    %880 = vector.shape_cast %879 : vector<1x63x160xf32> to vector<63x160xf32>
    %881 = arith.truncf %880 : vector<63x160xf32> to vector<63x160xbf16>
    %cst_1007 = arith.constant dense<0.000000e+00> : vector<63x64xf32>
    %882 = tpu.matmul %881, %863, %cst_1007 {dimension_numbers = #tpu.dot_dimension_numbers<[1], [0], [0], [1], [0, 0, 1, 1], [], []>} : vector<63x160xbf16>, vector<160x64xbf16>, vector<63x64xf32> -> vector<63x64xf32>
    %883 = arith.addf %861, %882 : vector<63x64xf32>
    %c4 = arith.constant 4 : index
    %c0_1008 = arith.constant 0 : index
    %c0_1009 = arith.constant 0 : index
    %884 = vector.load %arg4[%c4, %c0_1008, %c0_1009] : memref<5x160x64xbf16, #tpu.memory_space<vmem>>, vector<1x160x64xbf16>
    %885 = vector.shape_cast %884 : vector<1x160x64xbf16> to vector<160x64xbf16>
    %c0_1010 = arith.constant 0 : index
    %c18_1011 = arith.constant 18 : index
    %c0_1012 = arith.constant 0 : index
    %886 = vector.load %arg12[%c0_1010, %c18_1011, %c0_1012] : memref<4x81x160xf32, #tpu.memory_space<vmem>>, vector<1x63x160xf32>
    %887 = vector.shape_cast %886 : vector<1x63x160xf32> to vector<63x160xf32>
    %888 = arith.truncf %887 : vector<63x160xf32> to vector<63x160xbf16>
    %cst_1013 = arith.constant dense<0.000000e+00> : vector<63x64xf32>
    %889 = tpu.matmul %888, %885, %cst_1013 {dimension_numbers = #tpu.dot_dimension_numbers<[1], [0], [0], [1], [0, 0, 1, 1], [], []>} : vector<63x160xbf16>, vector<160x64xbf16>, vector<63x64xf32> -> vector<63x64xf32>
    %890 = arith.addf %868, %889 : vector<63x64xf32>
    %c1_1014 = arith.constant 1 : index
    %c18_1015 = arith.constant 18 : index
    %c0_1016 = arith.constant 0 : index
    %891 = vector.load %arg12[%c1_1014, %c18_1015, %c0_1016] : memref<4x81x160xf32, #tpu.memory_space<vmem>>, vector<1x63x160xf32>
    %892 = vector.shape_cast %891 : vector<1x63x160xf32> to vector<63x160xf32>
    %893 = arith.truncf %892 : vector<63x160xf32> to vector<63x160xbf16>
    %cst_1017 = arith.constant dense<0.000000e+00> : vector<63x64xf32>
    %894 = tpu.matmul %893, %885, %cst_1017 {dimension_numbers = #tpu.dot_dimension_numbers<[1], [0], [0], [1], [0, 0, 1, 1], [], []>} : vector<63x160xbf16>, vector<160x64xbf16>, vector<63x64xf32> -> vector<63x64xf32>
    %895 = arith.addf %873, %894 : vector<63x64xf32>
    %c2_1018 = arith.constant 2 : index
    %c18_1019 = arith.constant 18 : index
    %c0_1020 = arith.constant 0 : index
    %896 = vector.load %arg12[%c2_1018, %c18_1019, %c0_1020] : memref<4x81x160xf32, #tpu.memory_space<vmem>>, vector<1x63x160xf32>
    %897 = vector.shape_cast %896 : vector<1x63x160xf32> to vector<63x160xf32>
    %898 = arith.truncf %897 : vector<63x160xf32> to vector<63x160xbf16>
    %cst_1021 = arith.constant dense<0.000000e+00> : vector<63x64xf32>
    %899 = tpu.matmul %898, %885, %cst_1021 {dimension_numbers = #tpu.dot_dimension_numbers<[1], [0], [0], [1], [0, 0, 1, 1], [], []>} : vector<63x160xbf16>, vector<160x64xbf16>, vector<63x64xf32> -> vector<63x64xf32>
    %900 = arith.addf %878, %899 : vector<63x64xf32>
    %c3_1022 = arith.constant 3 : index
    %c18_1023 = arith.constant 18 : index
    %c0_1024 = arith.constant 0 : index
    %901 = vector.load %arg12[%c3_1022, %c18_1023, %c0_1024] : memref<4x81x160xf32, #tpu.memory_space<vmem>>, vector<1x63x160xf32>
    %902 = vector.shape_cast %901 : vector<1x63x160xf32> to vector<63x160xf32>
    %903 = arith.truncf %902 : vector<63x160xf32> to vector<63x160xbf16>
    %cst_1025 = arith.constant dense<0.000000e+00> : vector<63x64xf32>
    %904 = tpu.matmul %903, %885, %cst_1025 {dimension_numbers = #tpu.dot_dimension_numbers<[1], [0], [0], [1], [0, 0, 1, 1], [], []>} : vector<63x160xbf16>, vector<160x64xbf16>, vector<63x64xf32> -> vector<63x64xf32>
    %905 = arith.addf %883, %904 : vector<63x64xf32>
    %906 = arith.maximumf %890, %895 : vector<63x64xf32>
    %907 = arith.maximumf %900, %905 : vector<63x64xf32>
    %908 = arith.maximumf %906, %907 : vector<63x64xf32>
    %c0_1026 = arith.constant 0 : index
    %c0_1027 = arith.constant 0 : index
    %909 = vector.load %arg5[%c0_1026, %c0_1027] : memref<1x64xf32, #tpu.memory_space<vmem>>, vector<1x64xf32>
    %910 = vector.broadcast %909 : vector<1x64xf32> to vector<63x64xf32>
    %911 = arith.addf %908, %910 : vector<63x64xf32>
    %cst_1028 = arith.constant 0.000000e+00 : f32
    %912 = vector.broadcast %cst_1028 : f32 to vector<63x64xf32>
    %913 = arith.maximumf %911, %912 : vector<63x64xf32>
    %c0_1029 = arith.constant 0 : index
    %c0_1030 = arith.constant 0 : index
    %914 = vector.load %arg13[%c0_1029, %c0_1030] : memref<63x64xf32, #tpu.memory_space<vmem>>, vector<63x64xf32>
    tpu.vector_store %arg13[%c0_1029, %c0_1030], %913 {strides = array<i32>} : memref<63x64xf32, #tpu.memory_space<vmem>>, vector<63x64xf32>,
    %cst_1031 = arith.constant 0.000000e+00 : f32
    %915 = vector.broadcast %cst_1031 : f32 to vector<1x128xf32>
    %c0_1032 = arith.constant 0 : index
    %c0_1033 = arith.constant 0 : index
    %916 = vector.load %arg13[%c0_1032, %c0_1033] : memref<63x64xf32, #tpu.memory_space<vmem>>, vector<1x64xf32>
    %917 = arith.truncf %916 : vector<1x64xf32> to vector<1x64xbf16>
    %c0_1034 = arith.constant 0 : index
    %c0_1035 = arith.constant 0 : index
    %c0_1036 = arith.constant 0 : index
    %918 = vector.load %arg6[%c0_1034, %c0_1035, %c0_1036] : memref<49x64x128xbf16, #tpu.memory_space<vmem>>, vector<1x64x128xbf16>
    %919 = vector.shape_cast %918 : vector<1x64x128xbf16> to vector<64x128xbf16>
    %cst_1037 = arith.constant dense<0.000000e+00> : vector<1x128xf32>
    %920 = tpu.matmul %917, %919, %cst_1037 {dimension_numbers = #tpu.dot_dimension_numbers<[1], [0], [0], [1], [0, 0, 1, 1], [], []>} : vector<1x64xbf16>, vector<64x128xbf16>, vector<1x128xf32> -> vector<1x128xf32>
    %921 = arith.addf %915, %920 : vector<1x128xf32>
    %c1_1038 = arith.constant 1 : index
    %c0_1039 = arith.constant 0 : index
    %922 = vector.load %arg13[%c1_1038, %c0_1039] : memref<63x64xf32, #tpu.memory_space<vmem>>, vector<1x64xf32>
    %923 = arith.truncf %922 : vector<1x64xf32> to vector<1x64xbf16>
    %c1_1040 = arith.constant 1 : index
    %c0_1041 = arith.constant 0 : index
    %c0_1042 = arith.constant 0 : index
    %924 = vector.load %arg6[%c1_1040, %c0_1041, %c0_1042] : memref<49x64x128xbf16, #tpu.memory_space<vmem>>, vector<1x64x128xbf16>
    %925 = vector.shape_cast %924 : vector<1x64x128xbf16> to vector<64x128xbf16>
    %cst_1043 = arith.constant dense<0.000000e+00> : vector<1x128xf32>
    %926 = tpu.matmul %923, %925, %cst_1043 {dimension_numbers = #tpu.dot_dimension_numbers<[1], [0], [0], [1], [0, 0, 1, 1], [], []>} : vector<1x64xbf16>, vector<64x128xbf16>, vector<1x128xf32> -> vector<1x128xf32>
    %927 = arith.addf %921, %926 : vector<1x128xf32>
    %c2_1044 = arith.constant 2 : index
    %c0_1045 = arith.constant 0 : index
    %928 = vector.load %arg13[%c2_1044, %c0_1045] : memref<63x64xf32, #tpu.memory_space<vmem>>, vector<1x64xf32>
    %929 = arith.truncf %928 : vector<1x64xf32> to vector<1x64xbf16>
    %c2_1046 = arith.constant 2 : index
    %c0_1047 = arith.constant 0 : index
    %c0_1048 = arith.constant 0 : index
    %930 = vector.load %arg6[%c2_1046, %c0_1047, %c0_1048] : memref<49x64x128xbf16, #tpu.memory_space<vmem>>, vector<1x64x128xbf16>
    %931 = vector.shape_cast %930 : vector<1x64x128xbf16> to vector<64x128xbf16>
    %cst_1049 = arith.constant dense<0.000000e+00> : vector<1x128xf32>
    %932 = tpu.matmul %929, %931, %cst_1049 {dimension_numbers = #tpu.dot_dimension_numbers<[1], [0], [0], [1], [0, 0, 1, 1], [], []>} : vector<1x64xbf16>, vector<64x128xbf16>, vector<1x128xf32> -> vector<1x128xf32>
    %933 = arith.addf %927, %932 : vector<1x128xf32>
    %c3_1050 = arith.constant 3 : index
    %c0_1051 = arith.constant 0 : index
    %934 = vector.load %arg13[%c3_1050, %c0_1051] : memref<63x64xf32, #tpu.memory_space<vmem>>, vector<1x64xf32>
    %935 = arith.truncf %934 : vector<1x64xf32> to vector<1x64xbf16>
    %c3_1052 = arith.constant 3 : index
    %c0_1053 = arith.constant 0 : index
    %c0_1054 = arith.constant 0 : index
    %936 = vector.load %arg6[%c3_1052, %c0_1053, %c0_1054] : memref<49x64x128xbf16, #tpu.memory_space<vmem>>, vector<1x64x128xbf16>
    %937 = vector.shape_cast %936 : vector<1x64x128xbf16> to vector<64x128xbf16>
    %cst_1055 = arith.constant dense<0.000000e+00> : vector<1x128xf32>
    %938 = tpu.matmul %935, %937, %cst_1055 {dimension_numbers = #tpu.dot_dimension_numbers<[1], [0], [0], [1], [0, 0, 1, 1], [], []>} : vector<1x64xbf16>, vector<64x128xbf16>, vector<1x128xf32> -> vector<1x128xf32>
    %939 = arith.addf %933, %938 : vector<1x128xf32>
    %c4_1056 = arith.constant 4 : index
    %c0_1057 = arith.constant 0 : index
    %940 = vector.load %arg13[%c4_1056, %c0_1057] : memref<63x64xf32, #tpu.memory_space<vmem>>, vector<1x64xf32>
    %941 = arith.truncf %940 : vector<1x64xf32> to vector<1x64xbf16>
    %c4_1058 = arith.constant 4 : index
    %c0_1059 = arith.constant 0 : index
    %c0_1060 = arith.constant 0 : index
    %942 = vector.load %arg6[%c4_1058, %c0_1059, %c0_1060] : memref<49x64x128xbf16, #tpu.memory_space<vmem>>, vector<1x64x128xbf16>
    %943 = vector.shape_cast %942 : vector<1x64x128xbf16> to vector<64x128xbf16>
    %cst_1061 = arith.constant dense<0.000000e+00> : vector<1x128xf32>
    %944 = tpu.matmul %941, %943, %cst_1061 {dimension_numbers = #tpu.dot_dimension_numbers<[1], [0], [0], [1], [0, 0, 1, 1], [], []>} : vector<1x64xbf16>, vector<64x128xbf16>, vector<1x128xf32> -> vector<1x128xf32>
    %945 = arith.addf %939, %944 : vector<1x128xf32>
    %c5 = arith.constant 5 : index
    %c0_1062 = arith.constant 0 : index
    %946 = vector.load %arg13[%c5, %c0_1062] : memref<63x64xf32, #tpu.memory_space<vmem>>, vector<1x64xf32>
    %947 = arith.truncf %946 : vector<1x64xf32> to vector<1x64xbf16>
    %c5_1063 = arith.constant 5 : index
    %c0_1064 = arith.constant 0 : index
    %c0_1065 = arith.constant 0 : index
    %948 = vector.load %arg6[%c5_1063, %c0_1064, %c0_1065] : memref<49x64x128xbf16, #tpu.memory_space<vmem>>, vector<1x64x128xbf16>
    %949 = vector.shape_cast %948 : vector<1x64x128xbf16> to vector<64x128xbf16>
    %cst_1066 = arith.constant dense<0.000000e+00> : vector<1x128xf32>
    %950 = tpu.matmul %947, %949, %cst_1066 {dimension_numbers = #tpu.dot_dimension_numbers<[1], [0], [0], [1], [0, 0, 1, 1], [], []>} : vector<1x64xbf16>, vector<64x128xbf16>, vector<1x128xf32> -> vector<1x128xf32>
    %951 = arith.addf %945, %950 : vector<1x128xf32>
    %c6 = arith.constant 6 : index
    %c0_1067 = arith.constant 0 : index
    %952 = vector.load %arg13[%c6, %c0_1067] : memref<63x64xf32, #tpu.memory_space<vmem>>, vector<1x64xf32>
    %953 = arith.truncf %952 : vector<1x64xf32> to vector<1x64xbf16>
    %c6_1068 = arith.constant 6 : index
    %c0_1069 = arith.constant 0 : index
    %c0_1070 = arith.constant 0 : index
    %954 = vector.load %arg6[%c6_1068, %c0_1069, %c0_1070] : memref<49x64x128xbf16, #tpu.memory_space<vmem>>, vector<1x64x128xbf16>
    %955 = vector.shape_cast %954 : vector<1x64x128xbf16> to vector<64x128xbf16>
    %cst_1071 = arith.constant dense<0.000000e+00> : vector<1x128xf32>
    %956 = tpu.matmul %953, %955, %cst_1071 {dimension_numbers = #tpu.dot_dimension_numbers<[1], [0], [0], [1], [0, 0, 1, 1], [], []>} : vector<1x64xbf16>, vector<64x128xbf16>, vector<1x128xf32> -> vector<1x128xf32>
    %957 = arith.addf %951, %956 : vector<1x128xf32>
    %c9_1072 = arith.constant 9 : index
    %c0_1073 = arith.constant 0 : index
    %958 = vector.load %arg13[%c9_1072, %c0_1073] : memref<63x64xf32, #tpu.memory_space<vmem>>, vector<1x64xf32>
    %959 = arith.truncf %958 : vector<1x64xf32> to vector<1x64xbf16>
    %c7_1074 = arith.constant 7 : index
    %c0_1075 = arith.constant 0 : index
    %c0_1076 = arith.constant 0 : index
    %960 = vector.load %arg6[%c7_1074, %c0_1075, %c0_1076] : memref<49x64x128xbf16, #tpu.memory_space<vmem>>, vector<1x64x128xbf16>
    %961 = vector.shape_cast %960 : vector<1x64x128xbf16> to vector<64x128xbf16>
    %cst_1077 = arith.constant dense<0.000000e+00> : vector<1x128xf32>
    %962 = tpu.matmul %959, %961, %cst_1077 {dimension_numbers = #tpu.dot_dimension_numbers<[1], [0], [0], [1], [0, 0, 1, 1], [], []>} : vector<1x64xbf16>, vector<64x128xbf16>, vector<1x128xf32> -> vector<1x128xf32>
    %963 = arith.addf %957, %962 : vector<1x128xf32>
    %c10_1078 = arith.constant 10 : index
    %c0_1079 = arith.constant 0 : index
    %964 = vector.load %arg13[%c10_1078, %c0_1079] : memref<63x64xf32, #tpu.memory_space<vmem>>, vector<1x64xf32>
    %965 = arith.truncf %964 : vector<1x64xf32> to vector<1x64xbf16>
    %c8_1080 = arith.constant 8 : index
    %c0_1081 = arith.constant 0 : index
    %c0_1082 = arith.constant 0 : index
    %966 = vector.load %arg6[%c8_1080, %c0_1081, %c0_1082] : memref<49x64x128xbf16, #tpu.memory_space<vmem>>, vector<1x64x128xbf16>
    %967 = vector.shape_cast %966 : vector<1x64x128xbf16> to vector<64x128xbf16>
    %cst_1083 = arith.constant dense<0.000000e+00> : vector<1x128xf32>
    %968 = tpu.matmul %965, %967, %cst_1083 {dimension_numbers = #tpu.dot_dimension_numbers<[1], [0], [0], [1], [0, 0, 1, 1], [], []>} : vector<1x64xbf16>, vector<64x128xbf16>, vector<1x128xf32> -> vector<1x128xf32>
    %969 = arith.addf %963, %968 : vector<1x128xf32>
    %c11 = arith.constant 11 : index
    %c0_1084 = arith.constant 0 : index
    %970 = vector.load %arg13[%c11, %c0_1084] : memref<63x64xf32, #tpu.memory_space<vmem>>, vector<1x64xf32>
    %971 = arith.truncf %970 : vector<1x64xf32> to vector<1x64xbf16>
    %c9_1085 = arith.constant 9 : index
    %c0_1086 = arith.constant 0 : index
    %c0_1087 = arith.constant 0 : index
    %972 = vector.load %arg6[%c9_1085, %c0_1086, %c0_1087] : memref<49x64x128xbf16, #tpu.memory_space<vmem>>, vector<1x64x128xbf16>
    %973 = vector.shape_cast %972 : vector<1x64x128xbf16> to vector<64x128xbf16>
    %cst_1088 = arith.constant dense<0.000000e+00> : vector<1x128xf32>
    %974 = tpu.matmul %971, %973, %cst_1088 {dimension_numbers = #tpu.dot_dimension_numbers<[1], [0], [0], [1], [0, 0, 1, 1], [], []>} : vector<1x64xbf16>, vector<64x128xbf16>, vector<1x128xf32> -> vector<1x128xf32>
    %975 = arith.addf %969, %974 : vector<1x128xf32>
    %c12 = arith.constant 12 : index
    %c0_1089 = arith.constant 0 : index
    %976 = vector.load %arg13[%c12, %c0_1089] : memref<63x64xf32, #tpu.memory_space<vmem>>, vector<1x64xf32>
    %977 = arith.truncf %976 : vector<1x64xf32> to vector<1x64xbf16>
    %c10_1090 = arith.constant 10 : index
    %c0_1091 = arith.constant 0 : index
    %c0_1092 = arith.constant 0 : index
    %978 = vector.load %arg6[%c10_1090, %c0_1091, %c0_1092] : memref<49x64x128xbf16, #tpu.memory_space<vmem>>, vector<1x64x128xbf16>
    %979 = vector.shape_cast %978 : vector<1x64x128xbf16> to vector<64x128xbf16>
    %cst_1093 = arith.constant dense<0.000000e+00> : vector<1x128xf32>
    %980 = tpu.matmul %977, %979, %cst_1093 {dimension_numbers = #tpu.dot_dimension_numbers<[1], [0], [0], [1], [0, 0, 1, 1], [], []>} : vector<1x64xbf16>, vector<64x128xbf16>, vector<1x128xf32> -> vector<1x128xf32>
    %981 = arith.addf %975, %980 : vector<1x128xf32>
    %c13 = arith.constant 13 : index
    %c0_1094 = arith.constant 0 : index
    %982 = vector.load %arg13[%c13, %c0_1094] : memref<63x64xf32, #tpu.memory_space<vmem>>, vector<1x64xf32>
    %983 = arith.truncf %982 : vector<1x64xf32> to vector<1x64xbf16>
    %c11_1095 = arith.constant 11 : index
    %c0_1096 = arith.constant 0 : index
    %c0_1097 = arith.constant 0 : index
    %984 = vector.load %arg6[%c11_1095, %c0_1096, %c0_1097] : memref<49x64x128xbf16, #tpu.memory_space<vmem>>, vector<1x64x128xbf16>
    %985 = vector.shape_cast %984 : vector<1x64x128xbf16> to vector<64x128xbf16>
    %cst_1098 = arith.constant dense<0.000000e+00> : vector<1x128xf32>
    %986 = tpu.matmul %983, %985, %cst_1098 {dimension_numbers = #tpu.dot_dimension_numbers<[1], [0], [0], [1], [0, 0, 1, 1], [], []>} : vector<1x64xbf16>, vector<64x128xbf16>, vector<1x128xf32> -> vector<1x128xf32>
    %987 = arith.addf %981, %986 : vector<1x128xf32>
    %c14_1099 = arith.constant 14 : index
    %c0_1100 = arith.constant 0 : index
    %988 = vector.load %arg13[%c14_1099, %c0_1100] : memref<63x64xf32, #tpu.memory_space<vmem>>, vector<1x64xf32>
    %989 = arith.truncf %988 : vector<1x64xf32> to vector<1x64xbf16>
    %c12_1101 = arith.constant 12 : index
    %c0_1102 = arith.constant 0 : index
    %c0_1103 = arith.constant 0 : index
    %990 = vector.load %arg6[%c12_1101, %c0_1102, %c0_1103] : memref<49x64x128xbf16, #tpu.memory_space<vmem>>, vector<1x64x128xbf16>
    %991 = vector.shape_cast %990 : vector<1x64x128xbf16> to vector<64x128xbf16>
    %cst_1104 = arith.constant dense<0.000000e+00> : vector<1x128xf32>
    %992 = tpu.matmul %989, %991, %cst_1104 {dimension_numbers = #tpu.dot_dimension_numbers<[1], [0], [0], [1], [0, 0, 1, 1], [], []>} : vector<1x64xbf16>, vector<64x128xbf16>, vector<1x128xf32> -> vector<1x128xf32>
    %993 = arith.addf %987, %992 : vector<1x128xf32>
    %c15_1105 = arith.constant 15 : index
    %c0_1106 = arith.constant 0 : index
    %994 = vector.load %arg13[%c15_1105, %c0_1106] : memref<63x64xf32, #tpu.memory_space<vmem>>, vector<1x64xf32>
    %995 = arith.truncf %994 : vector<1x64xf32> to vector<1x64xbf16>
    %c13_1107 = arith.constant 13 : index
    %c0_1108 = arith.constant 0 : index
    %c0_1109 = arith.constant 0 : index
    %996 = vector.load %arg6[%c13_1107, %c0_1108, %c0_1109] : memref<49x64x128xbf16, #tpu.memory_space<vmem>>, vector<1x64x128xbf16>
    %997 = vector.shape_cast %996 : vector<1x64x128xbf16> to vector<64x128xbf16>
    %cst_1110 = arith.constant dense<0.000000e+00> : vector<1x128xf32>
    %998 = tpu.matmul %995, %997, %cst_1110 {dimension_numbers = #tpu.dot_dimension_numbers<[1], [0], [0], [1], [0, 0, 1, 1], [], []>} : vector<1x64xbf16>, vector<64x128xbf16>, vector<1x128xf32> -> vector<1x128xf32>
    %999 = arith.addf %993, %998 : vector<1x128xf32>
    %c18_1111 = arith.constant 18 : index
    %c0_1112 = arith.constant 0 : index
    %1000 = vector.load %arg13[%c18_1111, %c0_1112] : memref<63x64xf32, #tpu.memory_space<vmem>>, vector<1x64xf32>
    %1001 = arith.truncf %1000 : vector<1x64xf32> to vector<1x64xbf16>
    %c14_1113 = arith.constant 14 : index
    %c0_1114 = arith.constant 0 : index
    %c0_1115 = arith.constant 0 : index
    %1002 = vector.load %arg6[%c14_1113, %c0_1114, %c0_1115] : memref<49x64x128xbf16, #tpu.memory_space<vmem>>, vector<1x64x128xbf16>
    %1003 = vector.shape_cast %1002 : vector<1x64x128xbf16> to vector<64x128xbf16>
    %cst_1116 = arith.constant dense<0.000000e+00> : vector<1x128xf32>
    %1004 = tpu.matmul %1001, %1003, %cst_1116 {dimension_numbers = #tpu.dot_dimension_numbers<[1], [0], [0], [1], [0, 0, 1, 1], [], []>} : vector<1x64xbf16>, vector<64x128xbf16>, vector<1x128xf32> -> vector<1x128xf32>
    %1005 = arith.addf %999, %1004 : vector<1x128xf32>
    %c19_1117 = arith.constant 19 : index
    %c0_1118 = arith.constant 0 : index
    %1006 = vector.load %arg13[%c19_1117, %c0_1118] : memref<63x64xf32, #tpu.memory_space<vmem>>, vector<1x64xf32>
    %1007 = arith.truncf %1006 : vector<1x64xf32> to vector<1x64xbf16>
    %c15_1119 = arith.constant 15 : index
    %c0_1120 = arith.constant 0 : index
    %c0_1121 = arith.constant 0 : index
    %1008 = vector.load %arg6[%c15_1119, %c0_1120, %c0_1121] : memref<49x64x128xbf16, #tpu.memory_space<vmem>>, vector<1x64x128xbf16>
    %1009 = vector.shape_cast %1008 : vector<1x64x128xbf16> to vector<64x128xbf16>
    %cst_1122 = arith.constant dense<0.000000e+00> : vector<1x128xf32>
    %1010 = tpu.matmul %1007, %1009, %cst_1122 {dimension_numbers = #tpu.dot_dimension_numbers<[1], [0], [0], [1], [0, 0, 1, 1], [], []>} : vector<1x64xbf16>, vector<64x128xbf16>, vector<1x128xf32> -> vector<1x128xf32>
    %1011 = arith.addf %1005, %1010 : vector<1x128xf32>
    %c20 = arith.constant 20 : index
    %c0_1123 = arith.constant 0 : index
    %1012 = vector.load %arg13[%c20, %c0_1123] : memref<63x64xf32, #tpu.memory_space<vmem>>, vector<1x64xf32>
    %1013 = arith.truncf %1012 : vector<1x64xf32> to vector<1x64xbf16>
    %c16 = arith.constant 16 : index
    %c0_1124 = arith.constant 0 : index
    %c0_1125 = arith.constant 0 : index
    %1014 = vector.load %arg6[%c16, %c0_1124, %c0_1125] : memref<49x64x128xbf16, #tpu.memory_space<vmem>>, vector<1x64x128xbf16>
    %1015 = vector.shape_cast %1014 : vector<1x64x128xbf16> to vector<64x128xbf16>
    %cst_1126 = arith.constant dense<0.000000e+00> : vector<1x128xf32>
    %1016 = tpu.matmul %1013, %1015, %cst_1126 {dimension_numbers = #tpu.dot_dimension_numbers<[1], [0], [0], [1], [0, 0, 1, 1], [], []>} : vector<1x64xbf16>, vector<64x128xbf16>, vector<1x128xf32> -> vector<1x128xf32>
    %1017 = arith.addf %1011, %1016 : vector<1x128xf32>
    %c21_1127 = arith.constant 21 : index
    %c0_1128 = arith.constant 0 : index
    %1018 = vector.load %arg13[%c21_1127, %c0_1128] : memref<63x64xf32, #tpu.memory_space<vmem>>, vector<1x64xf32>
    %1019 = arith.truncf %1018 : vector<1x64xf32> to vector<1x64xbf16>
    %c17 = arith.constant 17 : index
    %c0_1129 = arith.constant 0 : index
    %c0_1130 = arith.constant 0 : index
    %1020 = vector.load %arg6[%c17, %c0_1129, %c0_1130] : memref<49x64x128xbf16, #tpu.memory_space<vmem>>, vector<1x64x128xbf16>
    %1021 = vector.shape_cast %1020 : vector<1x64x128xbf16> to vector<64x128xbf16>
    %cst_1131 = arith.constant dense<0.000000e+00> : vector<1x128xf32>
    %1022 = tpu.matmul %1019, %1021, %cst_1131 {dimension_numbers = #tpu.dot_dimension_numbers<[1], [0], [0], [1], [0, 0, 1, 1], [], []>} : vector<1x64xbf16>, vector<64x128xbf16>, vector<1x128xf32> -> vector<1x128xf32>
    %1023 = arith.addf %1017, %1022 : vector<1x128xf32>
    %c22_1132 = arith.constant 22 : index
    %c0_1133 = arith.constant 0 : index
    %1024 = vector.load %arg13[%c22_1132, %c0_1133] : memref<63x64xf32, #tpu.memory_space<vmem>>, vector<1x64xf32>
    %1025 = arith.truncf %1024 : vector<1x64xf32> to vector<1x64xbf16>
    %c18_1134 = arith.constant 18 : index
    %c0_1135 = arith.constant 0 : index
    %c0_1136 = arith.constant 0 : index
    %1026 = vector.load %arg6[%c18_1134, %c0_1135, %c0_1136] : memref<49x64x128xbf16, #tpu.memory_space<vmem>>, vector<1x64x128xbf16>
    %1027 = vector.shape_cast %1026 : vector<1x64x128xbf16> to vector<64x128xbf16>
    %cst_1137 = arith.constant dense<0.000000e+00> : vector<1x128xf32>
    %1028 = tpu.matmul %1025, %1027, %cst_1137 {dimension_numbers = #tpu.dot_dimension_numbers<[1], [0], [0], [1], [0, 0, 1, 1], [], []>} : vector<1x64xbf16>, vector<64x128xbf16>, vector<1x128xf32> -> vector<1x128xf32>
    %1029 = arith.addf %1023, %1028 : vector<1x128xf32>
    %c23 = arith.constant 23 : index
    %c0_1138 = arith.constant 0 : index
    %1030 = vector.load %arg13[%c23, %c0_1138] : memref<63x64xf32, #tpu.memory_space<vmem>>, vector<1x64xf32>
    %1031 = arith.truncf %1030 : vector<1x64xf32> to vector<1x64xbf16>
    %c19_1139 = arith.constant 19 : index
    %c0_1140 = arith.constant 0 : index
    %c0_1141 = arith.constant 0 : index
    %1032 = vector.load %arg6[%c19_1139, %c0_1140, %c0_1141] : memref<49x64x128xbf16, #tpu.memory_space<vmem>>, vector<1x64x128xbf16>
    %1033 = vector.shape_cast %1032 : vector<1x64x128xbf16> to vector<64x128xbf16>
    %cst_1142 = arith.constant dense<0.000000e+00> : vector<1x128xf32>
    %1034 = tpu.matmul %1031, %1033, %cst_1142 {dimension_numbers = #tpu.dot_dimension_numbers<[1], [0], [0], [1], [0, 0, 1, 1], [], []>} : vector<1x64xbf16>, vector<64x128xbf16>, vector<1x128xf32> -> vector<1x128xf32>
    %1035 = arith.addf %1029, %1034 : vector<1x128xf32>
    %c24 = arith.constant 24 : index
    %c0_1143 = arith.constant 0 : index
    %1036 = vector.load %arg13[%c24, %c0_1143] : memref<63x64xf32, #tpu.memory_space<vmem>>, vector<1x64xf32>
    %1037 = arith.truncf %1036 : vector<1x64xf32> to vector<1x64xbf16>
    %c20_1144 = arith.constant 20 : index
    %c0_1145 = arith.constant 0 : index
    %c0_1146 = arith.constant 0 : index
    %1038 = vector.load %arg6[%c20_1144, %c0_1145, %c0_1146] : memref<49x64x128xbf16, #tpu.memory_space<vmem>>, vector<1x64x128xbf16>
    %1039 = vector.shape_cast %1038 : vector<1x64x128xbf16> to vector<64x128xbf16>
    %cst_1147 = arith.constant dense<0.000000e+00> : vector<1x128xf32>
    %1040 = tpu.matmul %1037, %1039, %cst_1147 {dimension_numbers = #tpu.dot_dimension_numbers<[1], [0], [0], [1], [0, 0, 1, 1], [], []>} : vector<1x64xbf16>, vector<64x128xbf16>, vector<1x128xf32> -> vector<1x128xf32>
    %1041 = arith.addf %1035, %1040 : vector<1x128xf32>
    %c27_1148 = arith.constant 27 : index
    %c0_1149 = arith.constant 0 : index
    %1042 = vector.load %arg13[%c27_1148, %c0_1149] : memref<63x64xf32, #tpu.memory_space<vmem>>, vector<1x64xf32>
    %1043 = arith.truncf %1042 : vector<1x64xf32> to vector<1x64xbf16>
    %c21_1150 = arith.constant 21 : index
    %c0_1151 = arith.constant 0 : index
    %c0_1152 = arith.constant 0 : index
    %1044 = vector.load %arg6[%c21_1150, %c0_1151, %c0_1152] : memref<49x64x128xbf16, #tpu.memory_space<vmem>>, vector<1x64x128xbf16>
    %1045 = vector.shape_cast %1044 : vector<1x64x128xbf16> to vector<64x128xbf16>
    %cst_1153 = arith.constant dense<0.000000e+00> : vector<1x128xf32>
    %1046 = tpu.matmul %1043, %1045, %cst_1153 {dimension_numbers = #tpu.dot_dimension_numbers<[1], [0], [0], [1], [0, 0, 1, 1], [], []>} : vector<1x64xbf16>, vector<64x128xbf16>, vector<1x128xf32> -> vector<1x128xf32>
    %1047 = arith.addf %1041, %1046 : vector<1x128xf32>
    %c28_1154 = arith.constant 28 : index
    %c0_1155 = arith.constant 0 : index
    %1048 = vector.load %arg13[%c28_1154, %c0_1155] : memref<63x64xf32, #tpu.memory_space<vmem>>, vector<1x64xf32>
    %1049 = arith.truncf %1048 : vector<1x64xf32> to vector<1x64xbf16>
    %c22_1156 = arith.constant 22 : index
    %c0_1157 = arith.constant 0 : index
    %c0_1158 = arith.constant 0 : index
    %1050 = vector.load %arg6[%c22_1156, %c0_1157, %c0_1158] : memref<49x64x128xbf16, #tpu.memory_space<vmem>>, vector<1x64x128xbf16>
    %1051 = vector.shape_cast %1050 : vector<1x64x128xbf16> to vector<64x128xbf16>
    %cst_1159 = arith.constant dense<0.000000e+00> : vector<1x128xf32>
    %1052 = tpu.matmul %1049, %1051, %cst_1159 {dimension_numbers = #tpu.dot_dimension_numbers<[1], [0], [0], [1], [0, 0, 1, 1], [], []>} : vector<1x64xbf16>, vector<64x128xbf16>, vector<1x128xf32> -> vector<1x128xf32>
    %1053 = arith.addf %1047, %1052 : vector<1x128xf32>
    %c29_1160 = arith.constant 29 : index
    %c0_1161 = arith.constant 0 : index
    %1054 = vector.load %arg13[%c29_1160, %c0_1161] : memref<63x64xf32, #tpu.memory_space<vmem>>, vector<1x64xf32>
    %1055 = arith.truncf %1054 : vector<1x64xf32> to vector<1x64xbf16>
    %c23_1162 = arith.constant 23 : index
    %c0_1163 = arith.constant 0 : index
    %c0_1164 = arith.constant 0 : index
    %1056 = vector.load %arg6[%c23_1162, %c0_1163, %c0_1164] : memref<49x64x128xbf16, #tpu.memory_space<vmem>>, vector<1x64x128xbf16>
    %1057 = vector.shape_cast %1056 : vector<1x64x128xbf16> to vector<64x128xbf16>
    %cst_1165 = arith.constant dense<0.000000e+00> : vector<1x128xf32>
    %1058 = tpu.matmul %1055, %1057, %cst_1165 {dimension_numbers = #tpu.dot_dimension_numbers<[1], [0], [0], [1], [0, 0, 1, 1], [], []>} : vector<1x64xbf16>, vector<64x128xbf16>, vector<1x128xf32> -> vector<1x128xf32>
    %1059 = arith.addf %1053, %1058 : vector<1x128xf32>
    %c30 = arith.constant 30 : index
    %c0_1166 = arith.constant 0 : index
    %1060 = vector.load %arg13[%c30, %c0_1166] : memref<63x64xf32, #tpu.memory_space<vmem>>, vector<1x64xf32>
    %1061 = arith.truncf %1060 : vector<1x64xf32> to vector<1x64xbf16>
    %c24_1167 = arith.constant 24 : index
    %c0_1168 = arith.constant 0 : index
    %c0_1169 = arith.constant 0 : index
    %1062 = vector.load %arg6[%c24_1167, %c0_1168, %c0_1169] : memref<49x64x128xbf16, #tpu.memory_space<vmem>>, vector<1x64x128xbf16>
    %1063 = vector.shape_cast %1062 : vector<1x64x128xbf16> to vector<64x128xbf16>
    %cst_1170 = arith.constant dense<0.000000e+00> : vector<1x128xf32>
    %1064 = tpu.matmul %1061, %1063, %cst_1170 {dimension_numbers = #tpu.dot_dimension_numbers<[1], [0], [0], [1], [0, 0, 1, 1], [], []>} : vector<1x64xbf16>, vector<64x128xbf16>, vector<1x128xf32> -> vector<1x128xf32>
    %1065 = arith.addf %1059, %1064 : vector<1x128xf32>
    %c31 = arith.constant 31 : index
    %c0_1171 = arith.constant 0 : index
    %1066 = vector.load %arg13[%c31, %c0_1171] : memref<63x64xf32, #tpu.memory_space<vmem>>, vector<1x64xf32>
    %1067 = arith.truncf %1066 : vector<1x64xf32> to vector<1x64xbf16>
    %c25 = arith.constant 25 : index
    %c0_1172 = arith.constant 0 : index
    %c0_1173 = arith.constant 0 : index
    %1068 = vector.load %arg6[%c25, %c0_1172, %c0_1173] : memref<49x64x128xbf16, #tpu.memory_space<vmem>>, vector<1x64x128xbf16>
    %1069 = vector.shape_cast %1068 : vector<1x64x128xbf16> to vector<64x128xbf16>
    %cst_1174 = arith.constant dense<0.000000e+00> : vector<1x128xf32>
    %1070 = tpu.matmul %1067, %1069, %cst_1174 {dimension_numbers = #tpu.dot_dimension_numbers<[1], [0], [0], [1], [0, 0, 1, 1], [], []>} : vector<1x64xbf16>, vector<64x128xbf16>, vector<1x128xf32> -> vector<1x128xf32>
    %1071 = arith.addf %1065, %1070 : vector<1x128xf32>
    %c32_1175 = arith.constant 32 : index
    %c0_1176 = arith.constant 0 : index
    %1072 = vector.load %arg13[%c32_1175, %c0_1176] : memref<63x64xf32, #tpu.memory_space<vmem>>, vector<1x64xf32>
    %1073 = arith.truncf %1072 : vector<1x64xf32> to vector<1x64xbf16>
    %c26 = arith.constant 26 : index
    %c0_1177 = arith.constant 0 : index
    %c0_1178 = arith.constant 0 : index
    %1074 = vector.load %arg6[%c26, %c0_1177, %c0_1178] : memref<49x64x128xbf16, #tpu.memory_space<vmem>>, vector<1x64x128xbf16>
    %1075 = vector.shape_cast %1074 : vector<1x64x128xbf16> to vector<64x128xbf16>
    %cst_1179 = arith.constant dense<0.000000e+00> : vector<1x128xf32>
    %1076 = tpu.matmul %1073, %1075, %cst_1179 {dimension_numbers = #tpu.dot_dimension_numbers<[1], [0], [0], [1], [0, 0, 1, 1], [], []>} : vector<1x64xbf16>, vector<64x128xbf16>, vector<1x128xf32> -> vector<1x128xf32>
    %1077 = arith.addf %1071, %1076 : vector<1x128xf32>
    %c33 = arith.constant 33 : index
    %c0_1180 = arith.constant 0 : index
    %1078 = vector.load %arg13[%c33, %c0_1180] : memref<63x64xf32, #tpu.memory_space<vmem>>, vector<1x64xf32>
    %1079 = arith.truncf %1078 : vector<1x64xf32> to vector<1x64xbf16>
    %c27_1181 = arith.constant 27 : index
    %c0_1182 = arith.constant 0 : index
    %c0_1183 = arith.constant 0 : index
    %1080 = vector.load %arg6[%c27_1181, %c0_1182, %c0_1183] : memref<49x64x128xbf16, #tpu.memory_space<vmem>>, vector<1x64x128xbf16>
    %1081 = vector.shape_cast %1080 : vector<1x64x128xbf16> to vector<64x128xbf16>
    %cst_1184 = arith.constant dense<0.000000e+00> : vector<1x128xf32>
    %1082 = tpu.matmul %1079, %1081, %cst_1184 {dimension_numbers = #tpu.dot_dimension_numbers<[1], [0], [0], [1], [0, 0, 1, 1], [], []>} : vector<1x64xbf16>, vector<64x128xbf16>, vector<1x128xf32> -> vector<1x128xf32>
    %1083 = arith.addf %1077, %1082 : vector<1x128xf32>
    %c36_1185 = arith.constant 36 : index
    %c0_1186 = arith.constant 0 : index
    %1084 = vector.load %arg13[%c36_1185, %c0_1186] : memref<63x64xf32, #tpu.memory_space<vmem>>, vector<1x64xf32>
    %1085 = arith.truncf %1084 : vector<1x64xf32> to vector<1x64xbf16>
    %c28_1187 = arith.constant 28 : index
    %c0_1188 = arith.constant 0 : index
    %c0_1189 = arith.constant 0 : index
    %1086 = vector.load %arg6[%c28_1187, %c0_1188, %c0_1189] : memref<49x64x128xbf16, #tpu.memory_space<vmem>>, vector<1x64x128xbf16>
    %1087 = vector.shape_cast %1086 : vector<1x64x128xbf16> to vector<64x128xbf16>
    %cst_1190 = arith.constant dense<0.000000e+00> : vector<1x128xf32>
    %1088 = tpu.matmul %1085, %1087, %cst_1190 {dimension_numbers = #tpu.dot_dimension_numbers<[1], [0], [0], [1], [0, 0, 1, 1], [], []>} : vector<1x64xbf16>, vector<64x128xbf16>, vector<1x128xf32> -> vector<1x128xf32>
    %1089 = arith.addf %1083, %1088 : vector<1x128xf32>
    %c37_1191 = arith.constant 37 : index
    %c0_1192 = arith.constant 0 : index
    %1090 = vector.load %arg13[%c37_1191, %c0_1192] : memref<63x64xf32, #tpu.memory_space<vmem>>, vector<1x64xf32>
    %1091 = arith.truncf %1090 : vector<1x64xf32> to vector<1x64xbf16>
    %c29_1193 = arith.constant 29 : index
    %c0_1194 = arith.constant 0 : index
    %c0_1195 = arith.constant 0 : index
    %1092 = vector.load %arg6[%c29_1193, %c0_1194, %c0_1195] : memref<49x64x128xbf16, #tpu.memory_space<vmem>>, vector<1x64x128xbf16>
    %1093 = vector.shape_cast %1092 : vector<1x64x128xbf16> to vector<64x128xbf16>
    %cst_1196 = arith.constant dense<0.000000e+00> : vector<1x128xf32>
    %1094 = tpu.matmul %1091, %1093, %cst_1196 {dimension_numbers = #tpu.dot_dimension_numbers<[1], [0], [0], [1], [0, 0, 1, 1], [], []>} : vector<1x64xbf16>, vector<64x128xbf16>, vector<1x128xf32> -> vector<1x128xf32>
    %1095 = arith.addf %1089, %1094 : vector<1x128xf32>
    %c38 = arith.constant 38 : index
    %c0_1197 = arith.constant 0 : index
    %1096 = vector.load %arg13[%c38, %c0_1197] : memref<63x64xf32, #tpu.memory_space<vmem>>, vector<1x64xf32>
    %1097 = arith.truncf %1096 : vector<1x64xf32> to vector<1x64xbf16>
    %c30_1198 = arith.constant 30 : index
    %c0_1199 = arith.constant 0 : index
    %c0_1200 = arith.constant 0 : index
    %1098 = vector.load %arg6[%c30_1198, %c0_1199, %c0_1200] : memref<49x64x128xbf16, #tpu.memory_space<vmem>>, vector<1x64x128xbf16>
    %1099 = vector.shape_cast %1098 : vector<1x64x128xbf16> to vector<64x128xbf16>
    %cst_1201 = arith.constant dense<0.000000e+00> : vector<1x128xf32>
    %1100 = tpu.matmul %1097, %1099, %cst_1201 {dimension_numbers = #tpu.dot_dimension_numbers<[1], [0], [0], [1], [0, 0, 1, 1], [], []>} : vector<1x64xbf16>, vector<64x128xbf16>, vector<1x128xf32> -> vector<1x128xf32>
    %1101 = arith.addf %1095, %1100 : vector<1x128xf32>
    %c39 = arith.constant 39 : index
    %c0_1202 = arith.constant 0 : index
    %1102 = vector.load %arg13[%c39, %c0_1202] : memref<63x64xf32, #tpu.memory_space<vmem>>, vector<1x64xf32>
    %1103 = arith.truncf %1102 : vector<1x64xf32> to vector<1x64xbf16>
    %c31_1203 = arith.constant 31 : index
    %c0_1204 = arith.constant 0 : index
    %c0_1205 = arith.constant 0 : index
    %1104 = vector.load %arg6[%c31_1203, %c0_1204, %c0_1205] : memref<49x64x128xbf16, #tpu.memory_space<vmem>>, vector<1x64x128xbf16>
    %1105 = vector.shape_cast %1104 : vector<1x64x128xbf16> to vector<64x128xbf16>
    %cst_1206 = arith.constant dense<0.000000e+00> : vector<1x128xf32>
    %1106 = tpu.matmul %1103, %1105, %cst_1206 {dimension_numbers = #tpu.dot_dimension_numbers<[1], [0], [0], [1], [0, 0, 1, 1], [], []>} : vector<1x64xbf16>, vector<64x128xbf16>, vector<1x128xf32> -> vector<1x128xf32>
    %1107 = arith.addf %1101, %1106 : vector<1x128xf32>
    %c40 = arith.constant 40 : index
    %c0_1207 = arith.constant 0 : index
    %1108 = vector.load %arg13[%c40, %c0_1207] : memref<63x64xf32, #tpu.memory_space<vmem>>, vector<1x64xf32>
    %1109 = arith.truncf %1108 : vector<1x64xf32> to vector<1x64xbf16>
    %c32_1208 = arith.constant 32 : index
    %c0_1209 = arith.constant 0 : index
    %c0_1210 = arith.constant 0 : index
    %1110 = vector.load %arg6[%c32_1208, %c0_1209, %c0_1210] : memref<49x64x128xbf16, #tpu.memory_space<vmem>>, vector<1x64x128xbf16>
    %1111 = vector.shape_cast %1110 : vector<1x64x128xbf16> to vector<64x128xbf16>
    %cst_1211 = arith.constant dense<0.000000e+00> : vector<1x128xf32>
    %1112 = tpu.matmul %1109, %1111, %cst_1211 {dimension_numbers = #tpu.dot_dimension_numbers<[1], [0], [0], [1], [0, 0, 1, 1], [], []>} : vector<1x64xbf16>, vector<64x128xbf16>, vector<1x128xf32> -> vector<1x128xf32>
    %1113 = arith.addf %1107, %1112 : vector<1x128xf32>
    %c41 = arith.constant 41 : index
    %c0_1212 = arith.constant 0 : index
    %1114 = vector.load %arg13[%c41, %c0_1212] : memref<63x64xf32, #tpu.memory_space<vmem>>, vector<1x64xf32>
    %1115 = arith.truncf %1114 : vector<1x64xf32> to vector<1x64xbf16>
    %c33_1213 = arith.constant 33 : index
    %c0_1214 = arith.constant 0 : index
    %c0_1215 = arith.constant 0 : index
    %1116 = vector.load %arg6[%c33_1213, %c0_1214, %c0_1215] : memref<49x64x128xbf16, #tpu.memory_space<vmem>>, vector<1x64x128xbf16>
    %1117 = vector.shape_cast %1116 : vector<1x64x128xbf16> to vector<64x128xbf16>
    %cst_1216 = arith.constant dense<0.000000e+00> : vector<1x128xf32>
    %1118 = tpu.matmul %1115, %1117, %cst_1216 {dimension_numbers = #tpu.dot_dimension_numbers<[1], [0], [0], [1], [0, 0, 1, 1], [], []>} : vector<1x64xbf16>, vector<64x128xbf16>, vector<1x128xf32> -> vector<1x128xf32>
    %1119 = arith.addf %1113, %1118 : vector<1x128xf32>
    %c42_1217 = arith.constant 42 : index
    %c0_1218 = arith.constant 0 : index
    %1120 = vector.load %arg13[%c42_1217, %c0_1218] : memref<63x64xf32, #tpu.memory_space<vmem>>, vector<1x64xf32>
    %1121 = arith.truncf %1120 : vector<1x64xf32> to vector<1x64xbf16>
    %c34 = arith.constant 34 : index
    %c0_1219 = arith.constant 0 : index
    %c0_1220 = arith.constant 0 : index
    %1122 = vector.load %arg6[%c34, %c0_1219, %c0_1220] : memref<49x64x128xbf16, #tpu.memory_space<vmem>>, vector<1x64x128xbf16>
    %1123 = vector.shape_cast %1122 : vector<1x64x128xbf16> to vector<64x128xbf16>
    %cst_1221 = arith.constant dense<0.000000e+00> : vector<1x128xf32>
    %1124 = tpu.matmul %1121, %1123, %cst_1221 {dimension_numbers = #tpu.dot_dimension_numbers<[1], [0], [0], [1], [0, 0, 1, 1], [], []>} : vector<1x64xbf16>, vector<64x128xbf16>, vector<1x128xf32> -> vector<1x128xf32>
    %1125 = arith.addf %1119, %1124 : vector<1x128xf32>
    %c45_1222 = arith.constant 45 : index
    %c0_1223 = arith.constant 0 : index
    %1126 = vector.load %arg13[%c45_1222, %c0_1223] : memref<63x64xf32, #tpu.memory_space<vmem>>, vector<1x64xf32>
    %1127 = arith.truncf %1126 : vector<1x64xf32> to vector<1x64xbf16>
    %c35_1224 = arith.constant 35 : index
    %c0_1225 = arith.constant 0 : index
    %c0_1226 = arith.constant 0 : index
    %1128 = vector.load %arg6[%c35_1224, %c0_1225, %c0_1226] : memref<49x64x128xbf16, #tpu.memory_space<vmem>>, vector<1x64x128xbf16>
    %1129 = vector.shape_cast %1128 : vector<1x64x128xbf16> to vector<64x128xbf16>
    %cst_1227 = arith.constant dense<0.000000e+00> : vector<1x128xf32>
    %1130 = tpu.matmul %1127, %1129, %cst_1227 {dimension_numbers = #tpu.dot_dimension_numbers<[1], [0], [0], [1], [0, 0, 1, 1], [], []>} : vector<1x64xbf16>, vector<64x128xbf16>, vector<1x128xf32> -> vector<1x128xf32>
    %1131 = arith.addf %1125, %1130 : vector<1x128xf32>
    %c46_1228 = arith.constant 46 : index
    %c0_1229 = arith.constant 0 : index
    %1132 = vector.load %arg13[%c46_1228, %c0_1229] : memref<63x64xf32, #tpu.memory_space<vmem>>, vector<1x64xf32>
    %1133 = arith.truncf %1132 : vector<1x64xf32> to vector<1x64xbf16>
    %c36_1230 = arith.constant 36 : index
    %c0_1231 = arith.constant 0 : index
    %c0_1232 = arith.constant 0 : index
    %1134 = vector.load %arg6[%c36_1230, %c0_1231, %c0_1232] : memref<49x64x128xbf16, #tpu.memory_space<vmem>>, vector<1x64x128xbf16>
    %1135 = vector.shape_cast %1134 : vector<1x64x128xbf16> to vector<64x128xbf16>
    %cst_1233 = arith.constant dense<0.000000e+00> : vector<1x128xf32>
    %1136 = tpu.matmul %1133, %1135, %cst_1233 {dimension_numbers = #tpu.dot_dimension_numbers<[1], [0], [0], [1], [0, 0, 1, 1], [], []>} : vector<1x64xbf16>, vector<64x128xbf16>, vector<1x128xf32> -> vector<1x128xf32>
    %1137 = arith.addf %1131, %1136 : vector<1x128xf32>
    %c47 = arith.constant 47 : index
    %c0_1234 = arith.constant 0 : index
    %1138 = vector.load %arg13[%c47, %c0_1234] : memref<63x64xf32, #tpu.memory_space<vmem>>, vector<1x64xf32>
    %1139 = arith.truncf %1138 : vector<1x64xf32> to vector<1x64xbf16>
    %c37_1235 = arith.constant 37 : index
    %c0_1236 = arith.constant 0 : index
    %c0_1237 = arith.constant 0 : index
    %1140 = vector.load %arg6[%c37_1235, %c0_1236, %c0_1237] : memref<49x64x128xbf16, #tpu.memory_space<vmem>>, vector<1x64x128xbf16>
    %1141 = vector.shape_cast %1140 : vector<1x64x128xbf16> to vector<64x128xbf16>
    %cst_1238 = arith.constant dense<0.000000e+00> : vector<1x128xf32>
    %1142 = tpu.matmul %1139, %1141, %cst_1238 {dimension_numbers = #tpu.dot_dimension_numbers<[1], [0], [0], [1], [0, 0, 1, 1], [], []>} : vector<1x64xbf16>, vector<64x128xbf16>, vector<1x128xf32> -> vector<1x128xf32>
    %1143 = arith.addf %1137, %1142 : vector<1x128xf32>
    %c48 = arith.constant 48 : index
    %c0_1239 = arith.constant 0 : index
    %1144 = vector.load %arg13[%c48, %c0_1239] : memref<63x64xf32, #tpu.memory_space<vmem>>, vector<1x64xf32>
    %1145 = arith.truncf %1144 : vector<1x64xf32> to vector<1x64xbf16>
    %c38_1240 = arith.constant 38 : index
    %c0_1241 = arith.constant 0 : index
    %c0_1242 = arith.constant 0 : index
    %1146 = vector.load %arg6[%c38_1240, %c0_1241, %c0_1242] : memref<49x64x128xbf16, #tpu.memory_space<vmem>>, vector<1x64x128xbf16>
    %1147 = vector.shape_cast %1146 : vector<1x64x128xbf16> to vector<64x128xbf16>
    %cst_1243 = arith.constant dense<0.000000e+00> : vector<1x128xf32>
    %1148 = tpu.matmul %1145, %1147, %cst_1243 {dimension_numbers = #tpu.dot_dimension_numbers<[1], [0], [0], [1], [0, 0, 1, 1], [], []>} : vector<1x64xbf16>, vector<64x128xbf16>, vector<1x128xf32> -> vector<1x128xf32>
    %1149 = arith.addf %1143, %1148 : vector<1x128xf32>
    %c49 = arith.constant 49 : index
    %c0_1244 = arith.constant 0 : index
    %1150 = vector.load %arg13[%c49, %c0_1244] : memref<63x64xf32, #tpu.memory_space<vmem>>, vector<1x64xf32>
    %1151 = arith.truncf %1150 : vector<1x64xf32> to vector<1x64xbf16>
    %c39_1245 = arith.constant 39 : index
    %c0_1246 = arith.constant 0 : index
    %c0_1247 = arith.constant 0 : index
    %1152 = vector.load %arg6[%c39_1245, %c0_1246, %c0_1247] : memref<49x64x128xbf16, #tpu.memory_space<vmem>>, vector<1x64x128xbf16>
    %1153 = vector.shape_cast %1152 : vector<1x64x128xbf16> to vector<64x128xbf16>
    %cst_1248 = arith.constant dense<0.000000e+00> : vector<1x128xf32>
    %1154 = tpu.matmul %1151, %1153, %cst_1248 {dimension_numbers = #tpu.dot_dimension_numbers<[1], [0], [0], [1], [0, 0, 1, 1], [], []>} : vector<1x64xbf16>, vector<64x128xbf16>, vector<1x128xf32> -> vector<1x128xf32>
    %1155 = arith.addf %1149, %1154 : vector<1x128xf32>
    %c50 = arith.constant 50 : index
    %c0_1249 = arith.constant 0 : index
    %1156 = vector.load %arg13[%c50, %c0_1249] : memref<63x64xf32, #tpu.memory_space<vmem>>, vector<1x64xf32>
    %1157 = arith.truncf %1156 : vector<1x64xf32> to vector<1x64xbf16>
    %c40_1250 = arith.constant 40 : index
    %c0_1251 = arith.constant 0 : index
    %c0_1252 = arith.constant 0 : index
    %1158 = vector.load %arg6[%c40_1250, %c0_1251, %c0_1252] : memref<49x64x128xbf16, #tpu.memory_space<vmem>>, vector<1x64x128xbf16>
    %1159 = vector.shape_cast %1158 : vector<1x64x128xbf16> to vector<64x128xbf16>
    %cst_1253 = arith.constant dense<0.000000e+00> : vector<1x128xf32>
    %1160 = tpu.matmul %1157, %1159, %cst_1253 {dimension_numbers = #tpu.dot_dimension_numbers<[1], [0], [0], [1], [0, 0, 1, 1], [], []>} : vector<1x64xbf16>, vector<64x128xbf16>, vector<1x128xf32> -> vector<1x128xf32>
    %1161 = arith.addf %1155, %1160 : vector<1x128xf32>
    %c51 = arith.constant 51 : index
    %c0_1254 = arith.constant 0 : index
    %1162 = vector.load %arg13[%c51, %c0_1254] : memref<63x64xf32, #tpu.memory_space<vmem>>, vector<1x64xf32>
    %1163 = arith.truncf %1162 : vector<1x64xf32> to vector<1x64xbf16>
    %c41_1255 = arith.constant 41 : index
    %c0_1256 = arith.constant 0 : index
    %c0_1257 = arith.constant 0 : index
    %1164 = vector.load %arg6[%c41_1255, %c0_1256, %c0_1257] : memref<49x64x128xbf16, #tpu.memory_space<vmem>>, vector<1x64x128xbf16>
    %1165 = vector.shape_cast %1164 : vector<1x64x128xbf16> to vector<64x128xbf16>
    %cst_1258 = arith.constant dense<0.000000e+00> : vector<1x128xf32>
    %1166 = tpu.matmul %1163, %1165, %cst_1258 {dimension_numbers = #tpu.dot_dimension_numbers<[1], [0], [0], [1], [0, 0, 1, 1], [], []>} : vector<1x64xbf16>, vector<64x128xbf16>, vector<1x128xf32> -> vector<1x128xf32>
    %1167 = arith.addf %1161, %1166 : vector<1x128xf32>
    %c54_1259 = arith.constant 54 : index
    %c0_1260 = arith.constant 0 : index
    %1168 = vector.load %arg13[%c54_1259, %c0_1260] : memref<63x64xf32, #tpu.memory_space<vmem>>, vector<1x64xf32>
    %1169 = arith.truncf %1168 : vector<1x64xf32> to vector<1x64xbf16>
    %c42_1261 = arith.constant 42 : index
    %c0_1262 = arith.constant 0 : index
    %c0_1263 = arith.constant 0 : index
    %1170 = vector.load %arg6[%c42_1261, %c0_1262, %c0_1263] : memref<49x64x128xbf16, #tpu.memory_space<vmem>>, vector<1x64x128xbf16>
    %1171 = vector.shape_cast %1170 : vector<1x64x128xbf16> to vector<64x128xbf16>
    %cst_1264 = arith.constant dense<0.000000e+00> : vector<1x128xf32>
    %1172 = tpu.matmul %1169, %1171, %cst_1264 {dimension_numbers = #tpu.dot_dimension_numbers<[1], [0], [0], [1], [0, 0, 1, 1], [], []>} : vector<1x64xbf16>, vector<64x128xbf16>, vector<1x128xf32> -> vector<1x128xf32>
    %1173 = arith.addf %1167, %1172 : vector<1x128xf32>
    %c55_1265 = arith.constant 55 : index
    %c0_1266 = arith.constant 0 : index
    %1174 = vector.load %arg13[%c55_1265, %c0_1266] : memref<63x64xf32, #tpu.memory_space<vmem>>, vector<1x64xf32>
    %1175 = arith.truncf %1174 : vector<1x64xf32> to vector<1x64xbf16>
    %c43_1267 = arith.constant 43 : index
    %c0_1268 = arith.constant 0 : index
    %c0_1269 = arith.constant 0 : index
    %1176 = vector.load %arg6[%c43_1267, %c0_1268, %c0_1269] : memref<49x64x128xbf16, #tpu.memory_space<vmem>>, vector<1x64x128xbf16>
    %1177 = vector.shape_cast %1176 : vector<1x64x128xbf16> to vector<64x128xbf16>
    %cst_1270 = arith.constant dense<0.000000e+00> : vector<1x128xf32>
    %1178 = tpu.matmul %1175, %1177, %cst_1270 {dimension_numbers = #tpu.dot_dimension_numbers<[1], [0], [0], [1], [0, 0, 1, 1], [], []>} : vector<1x64xbf16>, vector<64x128xbf16>, vector<1x128xf32> -> vector<1x128xf32>
    %1179 = arith.addf %1173, %1178 : vector<1x128xf32>
    %c56 = arith.constant 56 : index
    %c0_1271 = arith.constant 0 : index
    %1180 = vector.load %arg13[%c56, %c0_1271] : memref<63x64xf32, #tpu.memory_space<vmem>>, vector<1x64xf32>
    %1181 = arith.truncf %1180 : vector<1x64xf32> to vector<1x64xbf16>
    %c44 = arith.constant 44 : index
    %c0_1272 = arith.constant 0 : index
    %c0_1273 = arith.constant 0 : index
    %1182 = vector.load %arg6[%c44, %c0_1272, %c0_1273] : memref<49x64x128xbf16, #tpu.memory_space<vmem>>, vector<1x64x128xbf16>
    %1183 = vector.shape_cast %1182 : vector<1x64x128xbf16> to vector<64x128xbf16>
    %cst_1274 = arith.constant dense<0.000000e+00> : vector<1x128xf32>
    %1184 = tpu.matmul %1181, %1183, %cst_1274 {dimension_numbers = #tpu.dot_dimension_numbers<[1], [0], [0], [1], [0, 0, 1, 1], [], []>} : vector<1x64xbf16>, vector<64x128xbf16>, vector<1x128xf32> -> vector<1x128xf32>
    %1185 = arith.addf %1179, %1184 : vector<1x128xf32>
    %c57 = arith.constant 57 : index
    %c0_1275 = arith.constant 0 : index
    %1186 = vector.load %arg13[%c57, %c0_1275] : memref<63x64xf32, #tpu.memory_space<vmem>>, vector<1x64xf32>
    %1187 = arith.truncf %1186 : vector<1x64xf32> to vector<1x64xbf16>
    %c45_1276 = arith.constant 45 : index
    %c0_1277 = arith.constant 0 : index
    %c0_1278 = arith.constant 0 : index
    %1188 = vector.load %arg6[%c45_1276, %c0_1277, %c0_1278] : memref<49x64x128xbf16, #tpu.memory_space<vmem>>, vector<1x64x128xbf16>
    %1189 = vector.shape_cast %1188 : vector<1x64x128xbf16> to vector<64x128xbf16>
    %cst_1279 = arith.constant dense<0.000000e+00> : vector<1x128xf32>
    %1190 = tpu.matmul %1187, %1189, %cst_1279 {dimension_numbers = #tpu.dot_dimension_numbers<[1], [0], [0], [1], [0, 0, 1, 1], [], []>} : vector<1x64xbf16>, vector<64x128xbf16>, vector<1x128xf32> -> vector<1x128xf32>
    %1191 = arith.addf %1185, %1190 : vector<1x128xf32>
    %c58 = arith.constant 58 : index
    %c0_1280 = arith.constant 0 : index
    %1192 = vector.load %arg13[%c58, %c0_1280] : memref<63x64xf32, #tpu.memory_space<vmem>>, vector<1x64xf32>
    %1193 = arith.truncf %1192 : vector<1x64xf32> to vector<1x64xbf16>
    %c46_1281 = arith.constant 46 : index
    %c0_1282 = arith.constant 0 : index
    %c0_1283 = arith.constant 0 : index
    %1194 = vector.load %arg6[%c46_1281, %c0_1282, %c0_1283] : memref<49x64x128xbf16, #tpu.memory_space<vmem>>, vector<1x64x128xbf16>
    %1195 = vector.shape_cast %1194 : vector<1x64x128xbf16> to vector<64x128xbf16>
    %cst_1284 = arith.constant dense<0.000000e+00> : vector<1x128xf32>
    %1196 = tpu.matmul %1193, %1195, %cst_1284 {dimension_numbers = #tpu.dot_dimension_numbers<[1], [0], [0], [1], [0, 0, 1, 1], [], []>} : vector<1x64xbf16>, vector<64x128xbf16>, vector<1x128xf32> -> vector<1x128xf32>
    %1197 = arith.addf %1191, %1196 : vector<1x128xf32>
    %c59 = arith.constant 59 : index
    %c0_1285 = arith.constant 0 : index
    %1198 = vector.load %arg13[%c59, %c0_1285] : memref<63x64xf32, #tpu.memory_space<vmem>>, vector<1x64xf32>
    %1199 = arith.truncf %1198 : vector<1x64xf32> to vector<1x64xbf16>
    %c47_1286 = arith.constant 47 : index
    %c0_1287 = arith.constant 0 : index
    %c0_1288 = arith.constant 0 : index
    %1200 = vector.load %arg6[%c47_1286, %c0_1287, %c0_1288] : memref<49x64x128xbf16, #tpu.memory_space<vmem>>, vector<1x64x128xbf16>
    %1201 = vector.shape_cast %1200 : vector<1x64x128xbf16> to vector<64x128xbf16>
    %cst_1289 = arith.constant dense<0.000000e+00> : vector<1x128xf32>
    %1202 = tpu.matmul %1199, %1201, %cst_1289 {dimension_numbers = #tpu.dot_dimension_numbers<[1], [0], [0], [1], [0, 0, 1, 1], [], []>} : vector<1x64xbf16>, vector<64x128xbf16>, vector<1x128xf32> -> vector<1x128xf32>
    %1203 = arith.addf %1197, %1202 : vector<1x128xf32>
    %c60 = arith.constant 60 : index
    %c0_1290 = arith.constant 0 : index
    %1204 = vector.load %arg13[%c60, %c0_1290] : memref<63x64xf32, #tpu.memory_space<vmem>>, vector<1x64xf32>
    %1205 = arith.truncf %1204 : vector<1x64xf32> to vector<1x64xbf16>
    %c48_1291 = arith.constant 48 : index
    %c0_1292 = arith.constant 0 : index
    %c0_1293 = arith.constant 0 : index
    %1206 = vector.load %arg6[%c48_1291, %c0_1292, %c0_1293] : memref<49x64x128xbf16, #tpu.memory_space<vmem>>, vector<1x64x128xbf16>
    %1207 = vector.shape_cast %1206 : vector<1x64x128xbf16> to vector<64x128xbf16>
    %cst_1294 = arith.constant dense<0.000000e+00> : vector<1x128xf32>
    %1208 = tpu.matmul %1205, %1207, %cst_1294 {dimension_numbers = #tpu.dot_dimension_numbers<[1], [0], [0], [1], [0, 0, 1, 1], [], []>} : vector<1x64xbf16>, vector<64x128xbf16>, vector<1x128xf32> -> vector<1x128xf32>
    %1209 = arith.addf %1203, %1208 : vector<1x128xf32>
    %c0_1295 = arith.constant 0 : index
    %c0_1296 = arith.constant 0 : index
    %1210 = vector.load %arg7[%c0_1295, %c0_1296] : memref<1x128xf32, #tpu.memory_space<vmem>>, vector<1x128xf32>
    %1211 = arith.addf %1209, %1210 : vector<1x128xf32>
    %cst_1297 = arith.constant 0.000000e+00 : f32
    %1212 = vector.broadcast %cst_1297 : f32 to vector<1x128xf32>
    %1213 = arith.maximumf %1211, %1212 : vector<1x128xf32>
    %c0_1298 = arith.constant 0 : index
    %c0_1299 = arith.constant 0 : index
    %1214 = vector.load %arg8[%c0_1298, %c0_1299] : memref<1x128xf32, #tpu.memory_space<vmem>>, vector<1x128xf32>
    %1215 = arith.mulf %1213, %1214 : vector<1x128xf32>
    %cst_1300 = arith.constant dense<0.000000e+00> : vector<1xf32>
    %1216 = vector.multi_reduction <add>, %1215, %cst_1300 [1] : vector<1x128xf32> to vector<1xf32>
    %1217 = vector.shape_cast %1216 : vector<1xf32> to vector<1x1xf32>
    %c0_1301 = arith.constant 0 : index
    %c0_1302 = arith.constant 0 : index
    %1218 = vector.load %arg9[%c0_1301, %c0_1302] : memref<1x1xf32, #tpu.memory_space<vmem>>, vector<1x1xf32>
    %1219 = arith.addf %1217, %1218 : vector<1x1xf32>
    %c0_1303 = arith.constant 0 : index
    %c0_1304 = arith.constant 0 : index
    %c0_1305 = arith.constant 0 : index
    %1220 = vector.load %arg10[%c0_1303, %c0_1304, %c0_1305] : memref<1x1x1xf32, #tpu.memory_space<vmem>>, vector<1x1x1xf32>
    %1221 = vector.shape_cast %1220 : vector<1x1x1xf32> to vector<1x1xf32>
    %1222 = vector.shape_cast %1219 : vector<1x1xf32> to vector<1x1x1xf32>
    tpu.vector_store %arg10[%c0_1303, %c0_1304, %c0_1305], %1222 {strides = array<i32>} : memref<1x1x1xf32, #tpu.memory_space<vmem>>, vector<1x1x1xf32>,
    return
  }
  func.func @transform_0(%arg0: i32) -> (i32, i32, i32, i32, i32) {
    %c0_i32 = arith.constant 0 : i32
    %c0_i32_0 = arith.constant 0 : i32
    %c0_i32_1 = arith.constant 0 : i32
    %c0_i32_2 = arith.constant 0 : i32
    %c0_i32_3 = arith.constant 0 : i32
    return %arg0, %c0_i32, %c0_i32_0, %c0_i32_1, %c0_i32_2 : i32, i32, i32, i32, i32
  }
  func.func @transform_1(%arg0: i32) -> (i32, i32) {
    %c0_i32 = arith.constant 0 : i32
    %c0_i32_0 = arith.constant 0 : i32
    %c0_i32_1 = arith.constant 0 : i32
    return %c0_i32, %c0_i32_0 : i32, i32
  }
  func.func @transform_2(%arg0: i32) -> (i32, i32) {
    %c0_i32 = arith.constant 0 : i32
    %c0_i32_0 = arith.constant 0 : i32
    %c0_i32_1 = arith.constant 0 : i32
    return %c0_i32, %c0_i32_0 : i32, i32
  }
  func.func @transform_3(%arg0: i32) -> (i32, i32, i32) {
    %c0_i32 = arith.constant 0 : i32
    %c0_i32_0 = arith.constant 0 : i32
    %c0_i32_1 = arith.constant 0 : i32
    %c0_i32_2 = arith.constant 0 : i32
    return %c0_i32, %c0_i32_0, %c0_i32_1 : i32, i32, i32
  }
  func.func @transform_4(%arg0: i32) -> (i32, i32) {
    %c0_i32 = arith.constant 0 : i32
    %c0_i32_0 = arith.constant 0 : i32
    %c0_i32_1 = arith.constant 0 : i32
    return %c0_i32, %c0_i32_0 : i32, i32
  }
  func.func @transform_5(%arg0: i32) -> (i32, i32, i32) {
    %c0_i32 = arith.constant 0 : i32
    %c0_i32_0 = arith.constant 0 : i32
    %c0_i32_1 = arith.constant 0 : i32
    %c0_i32_2 = arith.constant 0 : i32
    return %c0_i32, %c0_i32_0, %c0_i32_1 : i32, i32, i32
  }
  func.func @transform_6(%arg0: i32) -> (i32, i32) {
    %c0_i32 = arith.constant 0 : i32
    %c0_i32_0 = arith.constant 0 : i32
    %c0_i32_1 = arith.constant 0 : i32
    return %c0_i32, %c0_i32_0 : i32, i32
  }
  func.func @transform_7(%arg0: i32) -> (i32, i32) {
    %c0_i32 = arith.constant 0 : i32
    %c0_i32_0 = arith.constant 0 : i32
    %c0_i32_1 = arith.constant 0 : i32
    return %c0_i32, %c0_i32_0 : i32, i32
  }
  func.func @transform_8(%arg0: i32) -> (i32, i32) {
    %c0_i32 = arith.constant 0 : i32
    %c0_i32_0 = arith.constant 0 : i32
    %c0_i32_1 = arith.constant 0 : i32
    return %c0_i32, %c0_i32_0 : i32, i32
  }
  func.func @transform_9(%arg0: i32) -> (i32, i32, i32) {
    %c0_i32 = arith.constant 0 : i32
    %c0_i32_0 = arith.constant 0 : i32
    %c0_i32_1 = arith.constant 0 : i32
    return %arg0, %c0_i32, %c0_i32_0 : i32, i32, i32
  }
}

</mosaic_0001>

<bundles_post_ra>
// kernel: gcss_net_forward.1
= control target key start
LH: loop header
LB: loop body
LE: loop exit
PB: predicated region body
PF: predicated region fallthrough
CT: control target
= control target key end

     0   :  { %s12801_s11 = smov 0   ;;  %s16019_s0 = inlined_call_operand.vmem [shape: bf16[2,4,4,49,25], index: 0, kind: input, shape index: {}]   ;;  %s16020_s1 = inlined_call_operand.vmem [shape: bf16[25,32], index: 1, kind: input, shape index: {}]   ;;  %s16021_s2 = inlined_call_operand.vmem [shape: f32[1,32], index: 2, kind: input, shape index: {}]   ;;  %s16022_s3 = inlined_call_operand.vmem [shape: bf16[5,160,64], index: 3, kind: input, shape index: {}]   ;;  %s16023_s4 = inlined_call_operand.vmem [shape: f32[1,64], index: 4, kind: input, shape index: {}]   ;;  %s16024_s5 = inlined_call_operand.vmem [shape: bf16[49,64,128], index: 5, kind: input, shape index: {}]   ;;  %s16025_s6 = inlined_call_operand.vmem [shape: f32[1,128], index: 6, kind: input, shape index: {}]   ;;  %s16026_s7 = inlined_call_operand.vmem [shape: f32[1,128], index: 7, kind: input, shape index: {}]   ;;  %s16027_s8 = inlined_call_operand.<no memory space> [shape: f32[1,1], index: 8, kind: input, shape index: {}]   ;;  %s16028_s9 = inlined_call_operand.vmem [shape: f32[2,1,1], index: 9, kind: output, shape index: {}]  }
   0x1   :  { %v14_v0 = vstv %s16027_s8 }
   0x2   :  { %15 = vst [vmem:[#allocation5] sm:$0x1] %v14_v0 }
   0x3 LB: > { %s9906_s12 = sadd.s32 4294967295, %s12739_s11   ;;  %p9910_p0 = scmp.ge.s32.totalorder %s12739_s11, 1  ;;  %s12739_s11 = sphi %s12801_s11, %s21_s11  }
   0x4   : > { %p289_p1 = scmp.lt.s32.totalorder %s12739_s11, 3 }
   0x6   : > { %p290_p2 = pnand %p9910_p0, %p289_p1 }
   0x8   : > { %293 = sbr.rel (%p290_p2) target bundleno = 1868 (0x74c), region = 56 }
   0xf   : > { %v12812_v1 = vld [vmem:[%s16020_s1] sm:$0xff]   ;;  %vm386_vm0 = vcmask 1043456   ;;  %v12388_v2 = vld [vmem:[%s16020_s1 + $0x8] sm:$0x1f]   ;;  %vm387_vm1 = vcmask 1044480   ;;  %p323_p3 = scmp.lt.s32.totalorder %s9906_s12, 1 }
  0x10   : > { %12111 = vmatprep.subr.bf16.mxu1 %v12812_v1  ;;  %11331 = vmatprep.subr.bf16.mxu0 %v12812_v1  ;;  %v12741_v3 = vmov 65535   ;;  %vm373_vm2 = vcmask 203776   ;;  %vm804_vm3 = vcmask 261120   ;;  %vm811_vm4 = vcmask 253952   ;;  %s12743_s22 = smov 32   ;;  %s12744_s23 = smov 64  }
  0x11   : > { %12113 = vmatpush3.bf16.msra.mxu1 %v12812_v1  ;;  %11332 = vmatpush3.bf16.msra.mxu0 %v12812_v1  ;;  %v388_v4 = vsel %vm386_vm0, 4294967295, %v12741_v3  ;;  %s16118_s12 = smov (!%p323_p3, %s9906_s12), 1  ;;  %vm2511_vm5 = vcmask 260097   ;;  %vm2258_vm6 = vcmask 261122   ;;  %vm2267_vm7 = vcmask 254976   ;;  %s12745_s24 = smov 96  }
  0x12   : > { %v389_v5 = vsel %vm387_vm1, %v388_v4, 0  ;;  %s12371_s16 = smul.u32 448, %s16118_s12  ;;  %vm2265_vm8 = vcmask 261123   ;;  %vm2273_vm9 = vcmask 261124   ;;  %vm2275_vm10 = vcmask 256000  }
  0x13   : > { %v12823_v6 = vand.u32 %v12388_v2, %v389_v5  ;;  %vm2281_vm11 = vcmask 261125   ;;  %vm2297_vm12 = vcmask 261127   ;;  %vm2283_vm13 = vcmask 257024  }
  0x14   : > { %s12833_s19 = scalar_lea.vmem %s16019_s0, %s12371_s16  ;;  %vm2289_vm14 = vcmask 261126   ;;  %vm2291_vm15 = vcmask 258048   ;;  %vm2299_vm0 = vcmask 259072   ;;  %vm2302_vm1 = vcmask 260096  }
  0x15   : > { %12112 = vmatprep.subr.bf16.mxu1 %v12823_v6  ;;  %11333 = vmatprep.subr.bf16.mxu0 %v12823_v6  ;;  %v12389_v7 = vld [vmem:[%s12833_s19 + $0x10] sm:$0xff]   ;;  %v12390_v8 = vld [vmem:[%s12833_s19 + $0x18] ss:$0 sps:$4 sm:$0x11]   ;;  %v12391_v9 = vld [vmem:[%s12833_s19] sm:$0xff]  }
  0x16   : > { %12114 = vmatpush3.bf16.msra.mxu1 %v12823_v6  ;;  %11334 = vmatpush3.bf16.msra.mxu0 %v12823_v6  ;;  %v12392_v10 = vld [vmem:[%s12833_s19 + $0x8] sm:$0xff]   ;;  %v12393_v11 = vld [vmem:[%s12833_s19 + $0x1c] sm:$0xff]   ;;  %v12398_v17 = vld [vmem:[%s12833_s19 + $0x34] ss:$0 sps:$4 sm:$0x11]  }
  0x17   : > { %11343 = vmatprep.subr.bf16.mxu1 %v12812_v1  ;;  %11355 = vmatprep.subr.bf16.mxu0 %v12812_v1  ;;  %v12395_v12 = vld [vmem:[%s12833_s19 + $0x38] sm:$0xff]   ;;  %v12394_v13 = vld [vmem:[%s12833_s19 + $0x24] sm:$0xff]   ;;  %v12397_v14 = vld [vmem:[%s12833_s19 + $0x2c] sm:$0xff]  }
  0x18   : > { %11339 = vmatprep.mubr.msk.bf16.mxu1 %vm373_vm2, %v12389_v7  ;;  %11335 = vmatprep.mubr.msk.bf16.mxu0 %vm373_vm2, %v12391_v9  ;;  %v12396_v15 = vld [vmem:[%s12833_s19 + $0x40] sm:$0xff]   ;;  %v12399_v16 = vld [vmem:[%s12833_s19 + $0x48] sm:$0xff]   ;;  %v12400_v18 = vld [vmem:[%s12833_s19 + $0x50] ss:$0 sps:$4 sm:$0x11]  }
  0x19   : > { %11340 = vmatmul.mubr.msk.bf16.vlgmr.msra.gmra.mrb[0].mxu1 %vm373_vm2, %v12390_v8  ;;  %11336 = vmatmul.mubr.msk.bf16.vlgmr.msra.gmra.mrb[0].mxu0 %vm373_vm2, %v12392_v10  ;;  %v12401_v19 = vld [vmem:[%s12833_s19 + $0x54] sm:$0xff]   ;;  %v12402_v21 = vld [vmem:[%s12833_s19 + $0x5c] sm:$0xff]   ;;  %v12405_v22 = vld [vmem:[%s12833_s19 + $0x64] sm:$0xff]   ;;  %v12742_v8 = vmov 0.0  }
  0x1a   : > { %11344 = vmatpush3.bf16.msra.mxu1 %v12812_v1  ;;  %11356 = vmatpush3.bf16.msra.mxu0 %v12812_v1  ;;  %v12403_v20 = vld [vmem:[%s12833_s19 + $0x70] sm:$0xff]   ;;  %v12404_v23 = vld [vmem:[%s12833_s19 + $0x78] sm:$0xff]   ;;  %v12407_v24 = vld [vmem:[%s12833_s19 + $0x80] sm:$0xff]   ;;  %2211 = vst.msk [vmem:[#allocation3 + $0x168] sm:$0xff] %vm804_vm3, %v12742_v8 }
  0x1b   : > { %11345 = vmatprep.subr.bf16.mxu1 %v12823_v6  ;;  %11347 = vmatprep.mubr.msk.bf16.mxu1 %vm373_vm2, %v12393_v11  ;;  %v12406_v25 = vld [vmem:[%s12833_s19 + $0x6c] ss:$0 sps:$4 sm:$0x11]   ;;  %v12408_v27 = vld [vmem:[%s12833_s19 + $0x88] ss:$0 sps:$4 sm:$0x11]  }
  0x1c   : > { %11357 = vmatprep.subr.bf16.mxu0 %v12823_v6  ;;  %11359 = vmatprep.mubr.msk.bf16.mxu0 %vm373_vm2, %v12395_v12  ;;  %v12409_v26 = vld [vmem:[%s12833_s19 + $0x8c] sm:$0xff]   ;;  %v12410_v29 = vld [vmem:[%s12833_s19 + $0x94] sm:$0xff]   ;;  %v12413_v31 = vld [vmem:[%s12833_s19 + $0x9c] sm:$0xff]   ;;  %2213 = vst.msk [vmem:[#allocation3 + $0x178] sm:$0xff] %vm804_vm3, %v12742_v8 }
  0x1d   : > { %v12411_v28 = vld [vmem:[%s12833_s19 + $0xa8] sm:$0xff]   ;;  %v12412_v30 = vld [vmem:[%s12833_s19 + $0xb0] sm:$0xff]   ;;  %v12415_v32 = vld [vmem:[%s12833_s19 + $0xb8] sm:$0xff]   ;;  %2166 = vst [vmem:[#allocation3] sm:$0xff] %v12742_v8 }
  0x1e   : > { %11346 = vmatpush3.bf16.msra.mxu1 %v12823_v6  ;;  %11358 = vmatpush3.bf16.msra.mxu0 %v12823_v6  ;;  %v12414_v33 = vld [vmem:[%s12833_s19 + $0xa4] ss:$0 sps:$4 sm:$0x11]   ;;  %v12416_v34 = vld [vmem:[%s12833_s19 + $0xc0] ss:$0 sps:$4 sm:$0x11]  }
  0x1f   : > { %11367 = vmatprep.subr.bf16.mxu1 %v12812_v1  ;;  %11379 = vmatprep.subr.bf16.mxu0 %v12812_v1  ;;  %v12417_v35 = vld [vmem:[%s12833_s19 + $0xc4] sm:$0xff]   ;;  %v12418_v37 = vld [vmem:[%s12833_s19 + $0xcc] sm:$0xff]   ;;  %v12421_v38 = vld [vmem:[%s12833_s19 + $0xd4] sm:$0xff]   ;;  %2167 = vst.msk [vmem:[#allocation3 + $0x8] sm:$0xff] %vm804_vm3, %v12742_v8 }
  0x20   : > { %v12419_v36 = vld [vmem:[%s12833_s19 + $0xe0] sm:$0xff]   ;;  %v12420_v39 = vld [vmem:[%s12833_s19 + $0xe8] sm:$0xff]   ;;  %v12423_v40 = vld [vmem:[%s12833_s19 + $0xf0] sm:$0xff]   ;;  %2168 = vst [vmem:[#allocation3 + $0x10] sm:$0xff] %v12742_v8 }
  0x21   : > { %11348 = vmatmul.mubr.msk.bf16.vlgmr.msra.gmra.mrb[4].mxu1 %vm373_vm2, %v12394_v13  ;;  %11360 = vmatmul.mubr.msk.bf16.vlgmr.msra.gmra.mrb[4].mxu0 %vm373_vm2, %v12396_v15  ;;  %v12422_v41 = vld [vmem:[%s12833_s19 + $0xdc] ss:$0 sps:$4 sm:$0x11]   ;;  %v12424_v43 = vld [vmem:[%s12833_s19 + $0xf8] ss:$0 sps:$4 sm:$0x11]  }
  0x22   : > { %11368 = vmatpush3.bf16.msra.mxu1 %v12812_v1  ;;  %11351 = vmatprep.mubr.msk.bf16.mxu1 %vm373_vm2, %v12397_v14  ;;  %v12425_v42 = vld [vmem:[%s12833_s19 + $0xfc] sm:$0xff]   ;;  %v12426_v45 = vld [vmem:[%s12833_s19 + $0x104] sm:$0xff]   ;;  %v12429_v46 = vld [vmem:[%s12833_s19 + $0x10c] sm:$0xff]   ;;  %2169 = vst.msk [vmem:[#allocation3 + $0x18] sm:$0xff] %vm804_vm3, %v12742_v8 }
  0x23   : > { %11369 = vmatprep.subr.bf16.mxu1 %v12823_v6  ;;  %11363 = vmatprep.mubr.msk.bf16.mxu0 %vm373_vm2, %v12399_v16  ;;  %v12427_v44 = vld [vmem:[%s12833_s19 + $0x118] sm:$0xff]   ;;  %v12428_v47 = vld [vmem:[%s12833_s19 + $0x120] sm:$0xff]   ;;  %v12431_v48 = vld [vmem:[%s12833_s19 + $0x128] sm:$0xff]   ;;  %2170 = vst [vmem:[#allocation3 + $0x20] sm:$0xff] %v12742_v8 }
  0x24   : > { %11380 = vmatpush3.bf16.msra.mxu0 %v12812_v1  ;;  %v12430_v49 = vld [vmem:[%s12833_s19 + $0x114] ss:$0 sps:$4 sm:$0x11]   ;;  %v12432_v51 = vld [vmem:[%s12833_s19 + $0x130] ss:$0 sps:$4 sm:$0x11]  }
  0x25   : > { %11381 = vmatprep.subr.bf16.mxu0 %v12823_v6  ;;  %v12433_v50 = vld [vmem:[%s12833_s19 + $0x134] sm:$0xff]   ;;  %v12434_v53 = vld [vmem:[%s12833_s19 + $0x13c] sm:$0xff]   ;;  %v12437_v54 = vld [vmem:[%s12833_s19 + $0x144] sm:$0xff]   ;;  %2171 = vst.msk [vmem:[#allocation3 + $0x28] sm:$0xff] %vm804_vm3, %v12742_v8 }
  0x26   : > { %11370 = vmatpush3.bf16.msra.mxu1 %v12823_v6  ;;  %v12435_v52 = vld [vmem:[%s12833_s19 + $0x150] sm:$0xff]   ;;  %v12436_v55 = vld [vmem:[%s12833_s19 + $0x158] sm:$0xff]   ;;  %v12439_v56 = vld [vmem:[%s12833_s19 + $0x160] sm:$0xff]   ;;  %2172 = vst [vmem:[#allocation3 + $0x30] sm:$0xff] %v12742_v8 }
  0x27   : > { %11391 = vmatprep.subr.bf16.mxu1 %v12812_v1  ;;  %v12438_v57 = vld [vmem:[%s12833_s19 + $0x14c] ss:$0 sps:$4 sm:$0x11]   ;;  %v12440_v59 = vld [vmem:[%s12833_s19 + $0x168] ss:$0 sps:$4 sm:$0x11]  }
  0x28   : > { %11382 = vmatpush3.bf16.msra.mxu0 %v12823_v6  ;;  %v12441_v58 = vld [vmem:[%s12833_s19 + $0x16c] sm:$0xff]   ;;  %v12442_v61 = vld [vmem:[%s12833_s19 + $0x174] sm:$0xff]   ;;  %v12445_v62 = vld [vmem:[%s12833_s19 + $0x17c] sm:$0xff]   ;;  %2173 = vst.msk [vmem:[#allocation3 + $0x38] sm:$0xff] %vm804_vm3, %v12742_v8 }
  0x29   : > { %11352 = vmatmul.mubr.msk.bf16.gmra.mrb[8].mxu1 %vm373_vm2, %v12398_v17  ;;  %11403 = vmatprep.subr.bf16.mxu0 %v12812_v1  ;;  %v12443_v60 = vld [vmem:[%s12833_s19 + $0x188] sm:$0xff]   ;;  %v12444_v63 = vld [vmem:[%s12833_s19 + $0x190] sm:$0xff]   ;;  %v12447_v0 = vld [vmem:[%s12833_s19 + $0x198] sm:$0xff]   ;;  %2174 = vst [vmem:[#allocation3 + $0x40] sm:$0xff] %v12742_v8 }
  0x2a   : > { %11371 = vmatprep.mubr.msk.bf16.mxu1 %vm373_vm2, %v12401_v19  ;;  %11364 = vmatmul.mubr.msk.bf16.gmra.mrb[8].mxu0 %vm373_vm2, %v12400_v18  ;;  %v12446_v2 = vld [vmem:[%s12833_s19 + $0x184] ss:$0 sps:$4 sm:$0x11]   ;;  %v12448_v4 = vld [vmem:[%s12833_s19 + $0x1a0] ss:$0 sps:$4 sm:$0x11]  }
  0x2b   : > { %11383 = vmatprep.mubr.msk.bf16.mxu0 %vm373_vm2, %v12403_v20  ;;  %v12449_v3 = vld [vmem:[%s12833_s19 + $0x1a4] sm:$0xff]   ;;  %v12451_v5 = vld [vmem:[%s12833_s19 + $0x1b4] sm:$0xff]   ;;  %v12452_v7 = vld [vmem:[%s12833_s19 + $0x1bc] ss:$0 sps:$4 sm:$0x11]   ;;  %2175 = vst.msk [vmem:[#allocation3 + $0x48] sm:$0xff] %vm804_vm3, %v12742_v8 }
  0x2c   : > { %2176 = vst [vmem:[#allocation3 + $0x50] sm:$0xff] %v12742_v8  ;;  %2177 = vst.msk [vmem:[#allocation3 + $0x58] sm:$0xff] %vm804_vm3, %v12742_v8 }
  0x2d   : > { %2178 = vst [vmem:[#allocation3 + $0x60] sm:$0xff] %v12742_v8  ;;  %2179 = vst.msk [vmem:[#allocation3 + $0x68] sm:$0xff] %vm804_vm3, %v12742_v8 }
  0x2e   : > { %2180 = vst [vmem:[#allocation3 + $0x70] sm:$0xff] %v12742_v8  ;;  %2181 = vst.msk [vmem:[#allocation3 + $0x78] sm:$0xff] %vm804_vm3, %v12742_v8 }
  0x2f   : > { %2182 = vst [vmem:[#allocation3 + $0x80] sm:$0xff] %v12742_v8  ;;  %2183 = vst.msk [vmem:[#allocation3 + $0x88] sm:$0xff] %vm804_vm3, %v12742_v8 }
  0x30   : > { %2185 = vst.msk [vmem:[#allocation3 + $0x98] sm:$0xff] %vm804_vm3, %v12742_v8  ;;  %2186 = vst [vmem:[#allocation3 + $0xa0] sm:$0x1] %v12742_v8 }
  0x31   : > { %11372 = vmatmul.mubr.msk.bf16.vlgmr.msra.gmra.mrb[12].mxu1 %vm373_vm2, %v12402_v21  ;;  %2187 = vst.msk [vmem:[#allocation3 + $0xa8] sm:$0x1] %vm811_vm4, %v12742_v8  ;;  %2190 = vst [vmem:[#allocation3 + $0xc0] sm:$0xff] %v12742_v8 }
  0x32   : > { %11392 = vmatpush3.bf16.msra.mxu1 %v12812_v1  ;;  %11375 = vmatprep.mubr.msk.bf16.mxu1 %vm373_vm2, %v12405_v22  ;;  %2189 = vst.msk [vmem:[#allocation3 + $0xb8] sm:$0xff] %vm804_vm3, %v12742_v8  ;;  %2191 = vst.msk [vmem:[#allocation3 + $0xc8] sm:$0xff] %vm804_vm3, %v12742_v8 }
  0x33   : > { %11384 = vmatmul.mubr.msk.bf16.vlgmr.msra.gmra.mrb[12].mxu0 %vm373_vm2, %v12404_v23  ;;  %11393 = vmatprep.subr.bf16.mxu1 %v12823_v6  ;;  %2192 = vst [vmem:[#allocation3 + $0xd0] sm:$0xff] %v12742_v8  ;;  %2193 = vst.msk [vmem:[#allocation3 + $0xd8] sm:$0xff] %vm804_vm3, %v12742_v8 }
  0x34   : > { %11387 = vmatprep.mubr.msk.bf16.mxu0 %vm373_vm2, %v12407_v24  ;;  %11404 = vmatpush3.bf16.msra.mxu0 %v12812_v1  ;;  %2194 = vst [vmem:[#allocation3 + $0xe0] sm:$0xff] %v12742_v8  ;;  %2195 = vst.msk [vmem:[#allocation3 + $0xe8] sm:$0xff] %vm804_vm3, %v12742_v8 }
  0x35   : > { %11405 = vmatprep.subr.bf16.mxu0 %v12823_v6  ;;  %2196 = vst [vmem:[#allocation3 + $0xf0] sm:$0xff] %v12742_v8  ;;  %2197 = vst.msk [vmem:[#allocation3 + $0xf8] sm:$0xff] %vm804_vm3, %v12742_v8 }
  0x36   : > { %11394 = vmatpush3.bf16.msra.mxu1 %v12823_v6  ;;  %2198 = vst [vmem:[#allocation3 + $0x100] sm:$0xff] %v12742_v8  ;;  %2199 = vst.msk [vmem:[#allocation3 + $0x108] sm:$0xff] %vm804_vm3, %v12742_v8 }
  0x37   : > { %11415 = vmatprep.subr.bf16.mxu1 %v12812_v1  ;;  %2200 = vst [vmem:[#allocation3 + $0x110] sm:$0xff] %v12742_v8  ;;  %2201 = vst.msk [vmem:[#allocation3 + $0x118] sm:$0xff] %vm804_vm3, %v12742_v8 }
  0x38   : > { %11406 = vmatpush3.bf16.msra.mxu0 %v12823_v6  ;;  %2202 = vst [vmem:[#allocation3 + $0x120] sm:$0xff] %v12742_v8  ;;  %2203 = vst.msk [vmem:[#allocation3 + $0x128] sm:$0xff] %vm804_vm3, %v12742_v8 }
  0x39   : > { %11376 = vmatmul.mubr.msk.bf16.gmra.mrb[16].mxu1 %vm373_vm2, %v12406_v25  ;;  %11427 = vmatprep.subr.bf16.mxu0 %v12812_v1  ;;  %2204 = vst [vmem:[#allocation3 + $0x130] sm:$0xff] %v12742_v8  ;;  %2205 = vst.msk [vmem:[#allocation3 + $0x138] sm:$0xff] %vm804_vm3, %v12742_v8 }
  0x3a   : > { %11395 = vmatprep.mubr.msk.bf16.mxu1 %vm373_vm2, %v12409_v26  ;;  %2207 = vst.msk [vmem:[#allocation3 + $0x148] sm:$0xff] %vm804_vm3, %v12742_v8  ;;  %2208 = vst [vmem:[#allocation3 + $0x150] sm:$0x1] %v12742_v8 }
  0x3b   : > { %11388 = vmatmul.mubr.msk.bf16.gmra.mrb[16].mxu0 %vm373_vm2, %v12408_v27  ;;  %2209 = vst.msk [vmem:[#allocation3 + $0x158] sm:$0x1] %vm811_vm4, %v12742_v8  ;;  %2212 = vst [vmem:[#allocation3 + $0x170] sm:$0xff] %v12742_v8 }
  0x3c   : > { %11407 = vmatprep.mubr.msk.bf16.mxu0 %vm373_vm2, %v12411_v28  ;;  %2214 = vst [vmem:[#allocation3 + $0x180] sm:$0xff] %v12742_v8  ;;  %2215 = vst.msk [vmem:[#allocation3 + $0x188] sm:$0xff] %vm804_vm3, %v12742_v8 }
  0x3d   : > { %2216 = vst [vmem:[#allocation3 + $0x190] sm:$0xff] %v12742_v8  ;;  %2217 = vst.msk [vmem:[#allocation3 + $0x198] sm:$0xff] %vm804_vm3, %v12742_v8 }
  0x3e   : > { %2218 = vst [vmem:[#allocation3 + $0x1a0] sm:$0xff] %v12742_v8  ;;  %2219 = vst.msk [vmem:[#allocation3 + $0x1a8] sm:$0xff] %vm804_vm3, %v12742_v8 }
  0x3f   : > { %2220 = vst [vmem:[#allocation3 + $0x1b0] sm:$0xff] %v12742_v8  ;;  %2221 = vst.msk [vmem:[#allocation3 + $0x1b8] sm:$0xff] %vm804_vm3, %v12742_v8 }
  0x40   : > { %2222 = vst [vmem:[#allocation3 + $0x1c0] sm:$0xff] %v12742_v8  ;;  %2223 = vst.msk [vmem:[#allocation3 + $0x1c8] sm:$0xff] %vm804_vm3, %v12742_v8 }
  0x41   : > { %11396 = vmatmul.mubr.msk.bf16.vlgmr.msra.gmra.mrb[20].mxu1 %vm373_vm2, %v12410_v29  ;;  %2224 = vst [vmem:[#allocation3 + $0x1d0] sm:$0xff] %v12742_v8  ;;  %2225 = vst.msk [vmem:[#allocation3 + $0x1d8] sm:$0xff] %vm804_vm3, %v12742_v8 }
  0x42   : > { %11416 = vmatpush3.bf16.msra.mxu1 %v12812_v1  ;;  %11399 = vmatprep.mubr.msk.bf16.mxu1 %vm373_vm2, %v12413_v31  ;;  %2226 = vst [vmem:[#allocation3 + $0x1e0] sm:$0xff] %v12742_v8  ;;  %2227 = vst.msk [vmem:[#allocation3 + $0x1e8] sm:$0xff] %vm804_vm3, %v12742_v8 }
  0x43   : > { %11408 = vmatmul.mubr.msk.bf16.vlgmr.msra.gmra.mrb[20].mxu0 %vm373_vm2, %v12412_v30  ;;  %11417 = vmatprep.subr.bf16.mxu1 %v12823_v6  ;;  %2229 = vst.msk [vmem:[#allocation3 + $0x1f8] sm:$0xff] %vm804_vm3, %v12742_v8  ;;  %2230 = vst [vmem:[#allocation3 + $0x200] sm:$0x1] %v12742_v8 }
  0x44   : > { %11411 = vmatprep.mubr.msk.bf16.mxu0 %vm373_vm2, %v12415_v32  ;;  %11428 = vmatpush3.bf16.msra.mxu0 %v12812_v1  ;;  %2231 = vst.msk [vmem:[#allocation3 + $0x208] sm:$0x1] %vm811_vm4, %v12742_v8  ;;  %2234 = vst [vmem:[#allocation3 + $0x220] sm:$0xff] %v12742_v8 }
  0x45   : > { %11429 = vmatprep.subr.bf16.mxu0 %v12823_v6  ;;  %2233 = vst.msk [vmem:[#allocation3 + $0x218] sm:$0xff] %vm804_vm3, %v12742_v8  ;;  %2235 = vst.msk [vmem:[#allocation3 + $0x228] sm:$0xff] %vm804_vm3, %v12742_v8 }
  0x46   : > { %11418 = vmatpush3.bf16.msra.mxu1 %v12823_v6  ;;  %2236 = vst [vmem:[#allocation3 + $0x230] sm:$0xff] %v12742_v8  ;;  %2237 = vst.msk [vmem:[#allocation3 + $0x238] sm:$0xff] %vm804_vm3, %v12742_v8 }
  0x47   : > { %11439 = vmatprep.subr.bf16.mxu1 %v12812_v1  ;;  %2238 = vst [vmem:[#allocation3 + $0x240] sm:$0xff] %v12742_v8  ;;  %2239 = vst.msk [vmem:[#allocation3 + $0x248] sm:$0xff] %vm804_vm3, %v12742_v8 }
  0x48   : > { %11430 = vmatpush3.bf16.msra.mxu0 %v12823_v6  ;;  %2240 = vst [vmem:[#allocation3 + $0x250] sm:$0xff] %v12742_v8  ;;  %2241 = vst.msk [vmem:[#allocation3 + $0x258] sm:$0xff] %vm804_vm3, %v12742_v8 }
  0x49   : > { %11400 = vmatmul.mubr.msk.bf16.gmra.mrb[24].mxu1 %vm373_vm2, %v12414_v33  ;;  %11451 = vmatprep.subr.bf16.mxu0 %v12812_v1  ;;  %2242 = vst [vmem:[#allocation3 + $0x260] sm:$0xff] %v12742_v8  ;;  %2243 = vst.msk [vmem:[#allocation3 + $0x268] sm:$0xff] %vm804_vm3, %v12742_v8 }
  0x4a   : > { %11419 = vmatprep.mubr.msk.bf16.mxu1 %vm373_vm2, %v12417_v35  ;;  %2244 = vst [vmem:[#allocation3 + $0x270] sm:$0xff] %v12742_v8  ;;  %2245 = vst.msk [vmem:[#allocation3 + $0x278] sm:$0xff] %vm804_vm3, %v12742_v8 }
  0x4b   : > { %11412 = vmatmul.mubr.msk.bf16.gmra.mrb[24].mxu0 %vm373_vm2, %v12416_v34  ;;  %2246 = vst [vmem:[#allocation3 + $0x280] sm:$0xff] %v12742_v8  ;;  %2247 = vst.msk [vmem:[#allocation3 + $0x288] sm:$0xff] %vm804_vm3, %v12742_v8 }
  0x4c   : > { %11431 = vmatprep.mubr.msk.bf16.mxu0 %vm373_vm2, %v12419_v36  ;;  %2248 = vst [vmem:[#allocation3 + $0x290] sm:$0xff] %v12742_v8  ;;  %2249 = vst.msk [vmem:[#allocation3 + $0x298] sm:$0xff] %vm804_vm3, %v12742_v8 }
  0x4d   : > { %2251 = vst.msk [vmem:[#allocation3 + $0x2a8] sm:$0xff] %vm804_vm3, %v12742_v8  ;;  %2252 = vst [vmem:[#allocation3 + $0x2b0] sm:$0x1] %v12742_v8 }
  0x4e   : > { %2253 = vst.msk [vmem:[#allocation3 + $0x2b8] sm:$0x1] %vm811_vm4, %v12742_v8 }
  0x51   : > { %11420 = vmatmul.mubr.msk.bf16.vlgmr.msra.gmra.mrb[28].mxu1 %vm373_vm2, %v12418_v37 }
  0x52   : > { %11440 = vmatpush3.bf16.msra.mxu1 %v12812_v1  ;;  %11423 = vmatprep.mubr.msk.bf16.mxu1 %vm373_vm2, %v12421_v38 }
  0x53   : > { %11432 = vmatmul.mubr.msk.bf16.vlgmr.msra.gmra.mrb[28].mxu0 %vm373_vm2, %v12420_v39  ;;  %11441 = vmatprep.subr.bf16.mxu1 %v12823_v6 }
  0x54   : > { %11435 = vmatprep.mubr.msk.bf16.mxu0 %vm373_vm2, %v12423_v40  ;;  %11452 = vmatpush3.bf16.msra.mxu0 %v12812_v1 }
  0x55   : > { %11453 = vmatprep.subr.bf16.mxu0 %v12823_v6 }
  0x56   : > { %11442 = vmatpush3.bf16.msra.mxu1 %v12823_v6 }
  0x57   : > { %11463 = vmatprep.subr.bf16.mxu1 %v12812_v1 }
  0x58   : > { %11454 = vmatpush3.bf16.msra.mxu0 %v12823_v6 }
  0x59   : > { %11424 = vmatmul.mubr.msk.bf16.gmra.mrb[32].mxu1 %vm373_vm2, %v12422_v41  ;;  %11475 = vmatprep.subr.bf16.mxu0 %v12812_v1 }
  0x5a   : > { %11443 = vmatprep.mubr.msk.bf16.mxu1 %vm373_vm2, %v12425_v42 }
  0x5b   : > { %11436 = vmatmul.mubr.msk.bf16.gmra.mrb[32].mxu0 %vm373_vm2, %v12424_v43 }
  0x5c   : > { %11455 = vmatprep.mubr.msk.bf16.mxu0 %vm373_vm2, %v12427_v44 }
  0x61   : > { %11444 = vmatmul.mubr.msk.bf16.vlgmr.msra.gmra.mrb[36].mxu1 %vm373_vm2, %v12426_v45 }
  0x62   : > { %11464 = vmatpush3.bf16.msra.mxu1 %v12812_v1  ;;  %11447 = vmatprep.mubr.msk.bf16.mxu1 %vm373_vm2, %v12429_v46  ;;  %v13151_v46 = vld [vmem:[%s16021_s2] ss:$0 sm:$0xff] }
  0x63   : > { %11456 = vmatmul.mubr.msk.bf16.vlgmr.msra.gmra.mrb[36].mxu0 %vm373_vm2, %v12428_v47  ;;  %11465 = vmatprep.subr.bf16.mxu1 %v12823_v6 }
  0x64   : > { %11459 = vmatprep.mubr.msk.bf16.mxu0 %vm373_vm2, %v12431_v48  ;;  %11476 = vmatpush3.bf16.msra.mxu0 %v12812_v1 }
  0x65   : > { %11477 = vmatprep.subr.bf16.mxu0 %v12823_v6 }
  0x66   : > { %11466 = vmatpush3.bf16.msra.mxu1 %v12823_v6 }
  0x67   : > { %11487 = vmatprep.subr.bf16.mxu1 %v12812_v1 }
  0x68   : > { %11478 = vmatpush3.bf16.msra.mxu0 %v12823_v6 }
  0x69   : > { %11448 = vmatmul.mubr.msk.bf16.gmra.mrb[40].mxu1 %vm373_vm2, %v12430_v49  ;;  %11499 = vmatprep.subr.bf16.mxu0 %v12812_v1 }
  0x6a   : > { %11467 = vmatprep.mubr.msk.bf16.mxu1 %vm373_vm2, %v12433_v50 }
  0x6b   : > { %11460 = vmatmul.mubr.msk.bf16.gmra.mrb[40].mxu0 %vm373_vm2, %v12432_v51 }
  0x6c   : > { %11479 = vmatprep.mubr.msk.bf16.mxu0 %vm373_vm2, %v12435_v52 }
  0x71   : > { %11468 = vmatmul.mubr.msk.bf16.vlgmr.msra.gmra.mrb[44].mxu1 %vm373_vm2, %v12434_v53 }
  0x72   : > { %11488 = vmatpush3.bf16.msra.mxu1 %v12812_v1  ;;  %11471 = vmatprep.mubr.msk.bf16.mxu1 %vm373_vm2, %v12437_v54 }
  0x73   : > { %11480 = vmatmul.mubr.msk.bf16.vlgmr.msra.gmra.mrb[44].mxu0 %vm373_vm2, %v12436_v55  ;;  %11489 = vmatprep.subr.bf16.mxu1 %v12823_v6 }
  0x74   : > { %11483 = vmatprep.mubr.msk.bf16.mxu0 %vm373_vm2, %v12439_v56  ;;  %11500 = vmatpush3.bf16.msra.mxu0 %v12812_v1 }
  0x75   : > { %11501 = vmatprep.subr.bf16.mxu0 %v12823_v6 }
  0x76   : > { %11490 = vmatpush3.bf16.msra.mxu1 %v12823_v6 }
  0x77   : > { %11511 = vmatprep.subr.bf16.mxu1 %v12812_v1 }
  0x78   : > { %11502 = vmatpush3.bf16.msra.mxu0 %v12823_v6 }
  0x79   : > { %11472 = vmatmul.mubr.msk.bf16.gmra.mrb[48].mxu1 %vm373_vm2, %v12438_v57 }
  0x7a   : > { %11491 = vmatprep.mubr.msk.bf16.mxu1 %vm373_vm2, %v12441_v58 }
  0x7b   : > { %11484 = vmatmul.mubr.msk.bf16.gmra.mrb[48].mxu0 %vm373_vm2, %v12440_v59 }
  0x7c   : > { %11503 = vmatprep.mubr.msk.bf16.mxu0 %vm373_vm2, %v12443_v60 }
  0x81   : > { %11492 = vmatmul.mubr.msk.bf16.vlgmr.msra.gmra.mrb[52].mxu1 %vm373_vm2, %v12442_v61 }
  0x82   : > { %11512 = vmatpush3.bf16.msra.mxu1 %v12812_v1  ;;  %11495 = vmatprep.mubr.msk.bf16.mxu1 %vm373_vm2, %v12445_v62  ;;  %v12450_v1 = vld [vmem:[%s12833_s19 + $0x1ac] sm:$0xff]  }
  0x83   : > { %11504 = vmatmul.mubr.msk.bf16.vlgmr.msra.gmra.mrb[52].mxu0 %vm373_vm2, %v12444_v63  ;;  %11513 = vmatprep.subr.bf16.mxu1 %v12823_v6 }
  0x84   : > { %11507 = vmatprep.mubr.msk.bf16.mxu0 %vm373_vm2, %v12447_v0 }
  0x86   : > { %11514 = vmatpush3.bf16.msra.mxu1 %v12823_v6 }
  0x89   : > { %11496 = vmatmul.mubr.msk.bf16.gmra.mrb[56].mxu1 %vm373_vm2, %v12446_v2 }
  0x8a   : > { %11515 = vmatprep.mubr.msk.bf16.mxu1 %vm373_vm2, %v12449_v3 }
  0x8b   : > { %11508 = vmatmul.mubr.msk.bf16.gmra.mrb[56].mxu0 %vm373_vm2, %v12448_v4 }
  0x91   : > { %11516 = vmatmul.mubr.msk.bf16.vlgmr.msra.gmra.mrb[60].mxu1 %vm373_vm2, %v12450_v1 }
  0x92   : > { %11519 = vmatprep.mubr.msk.bf16.mxu1 %vm373_vm2, %v12451_v5 }
  0x99   : > { %11520 = vmatmul.mubr.msk.bf16.gmra.mrb[64].mxu1 %vm373_vm2, %v12452_v7  ;;  %vm2593_vm2 = vcmask 523521  }
  0xec   : > { %v11341_v6 = vpop.f32.mrb[0].mxu1  ;;  %v11337_v11 = vpop.f32.mrb[0].mxu0 }
  0xed   : > { %v443_v9 = vpop.f32.mrb[1].mxu1  ;;  %v427_v13 = vpop.f32.mrb[1].mxu0 }
  0xee   : > { %v11342_v10 = vpop.f32.mrb[2].mxu1  ;;  %v11338_v14 = vpop.f32.mrb[2].mxu0 }
  0xef   : > { %v446_v12 = vpop.f32.mrb[3].mxu1  ;;  %v430_v15 = vpop.f32.mrb[3].mxu0 }
  0xf4   : > { %v11349_v16 = vpop.f32.mrb[4].mxu1  ;;  %v11361_v21 = vpop.f32.mrb[4].mxu0 }
  0xf5   : > { %v561_v17 = vmax.f32 %v11337_v11, %v11349_v16  ;;  %v529_v18 = vpop.f32.mrb[5].mxu1  ;;  %v638_v25 = vpop.f32.mrb[5].mxu0 }
  0xf6   : > { %v559_v19 = vmax.f32 %v427_v13, %v529_v18  ;;  %v11350_v20 = vpop.f32.mrb[6].mxu1  ;;  %v11362_v28 = vpop.f32.mrb[6].mxu0 }
  0xf7   : > { %v562_v22 = vmax.f32 %v11338_v14, %v11350_v20  ;;  %v670_v23 = vmax.f32 %v561_v17, %v11361_v21  ;;  %v532_v24 = vpop.f32.mrb[7].mxu1  ;;  %v641_v30 = vpop.f32.mrb[7].mxu0 }
  0xf8   : > { %v560_v26 = vmax.f32 %v430_v15, %v532_v24  ;;  %v668_v27 = vmax.f32 %v559_v19, %v638_v25 }
  0xf9   : > { %v671_v29 = vmax.f32 %v562_v22, %v11362_v28 }
  0xfa   : > { %v669_v31 = vmax.f32 %v560_v26, %v641_v30 }
  0xfc   : > { %v11353_v32 = vpop.f32.mrb[8].mxu1 }
  0xfd   : > { %v565_v33 = vmax.f32 %v11341_v6, %v11353_v32  ;;  %v545_v34 = vpop.f32.mrb[9].mxu1  ;;  %v11365_v37 = vpop.f32.mrb[8].mxu0 }
  0xfe   : > { %v563_v35 = vmax.f32 %v443_v9, %v545_v34  ;;  %v11354_v36 = vpop.f32.mrb[10].mxu1  ;;  %v654_v40 = vpop.f32.mrb[9].mxu0 }
  0xff   : > { %v674_v38 = vmax.f32 %v565_v33, %v11365_v37  ;;  %v548_v39 = vpop.f32.mrb[11].mxu1  ;;  %v11366_v43 = vpop.f32.mrb[10].mxu0 }
 0x100   : > { %v564_v41 = vmax.f32 %v446_v12, %v548_v39  ;;  %v672_v42 = vmax.f32 %v563_v35, %v654_v40  ;;  %v657_v44 = vpop.f32.mrb[11].mxu0 }
 0x102   : > { %v673_v45 = vmax.f32 %v564_v41, %v657_v44 }
 0x104   : > { %v11373_v47 = vpop.f32.mrb[12].mxu1 }
 0x105   : > { %v779_v48 = vmax.f32 %v670_v23, %v11373_v47  ;;  %v747_v49 = vpop.f32.mrb[13].mxu1 }
 0x106   : > { %v777_v50 = vmax.f32 %v668_v27, %v747_v49  ;;  %v11374_v51 = vpop.f32.mrb[14].mxu1  ;;  %v13153_v52 = vpop.f32.mrb[12].mxu0 }
 0x107   : > { %v792_v53 = vadd.f32 %v13151_v46, %v779_v48  ;;  %v780_v54 = vmax.f32 %v671_v29, %v11374_v51  ;;  %v750_v55 = vpop.f32.mrb[15].mxu1  ;;  %v13156_v56 = vpop.f32.mrb[13].mxu0 }
 0x108   : > { %v790_v57 = vadd.f32 %v13151_v46, %v777_v50  ;;  %v778_v58 = vmax.f32 %v669_v31, %v750_v55  ;;  %v13159_v59 = vpop.f32.mrb[14].mxu0 }
 0x109   : > { %v799_v60 = vmax.f32 %v792_v53, 0.0  ;;  %v793_v61 = vadd.f32 %v13151_v46, %v780_v54  ;;  %v13162_v62 = vpop.f32.mrb[15].mxu0 }
 0x10a   : > { %v797_v63 = vmax.f32 %v790_v57, 0.0  ;;  %v791_v0 = vadd.f32 %v13151_v46, %v778_v58 }
 0x10b   : > { %807 = vst.msk [vmem:[#allocation2 + $0x10] sm:$0xff] %vm804_vm3, %v799_v60  ;;  %v800_v2 = vmax.f32 %v793_v61, 0.0 }
 0x10c   : > { %805 = vst.msk [vmem:[#allocation2] sm:$0xff] %vm804_vm3, %v797_v63  ;;  %v798_v3 = vmax.f32 %v791_v0, 0.0  ;;  %v11377_v4 = vpop.f32.mrb[16].mxu1 }
 0x10d   : > { %808 = vst.msk [vmem:[#allocation2 + $0x18] sm:$0xff] %vm804_vm3, %v800_v2  ;;  %v783_v1 = vmax.f32 %v674_v38, %v11377_v4  ;;  %v763_v5 = vpop.f32.mrb[17].mxu1 }
 0x10e   : > { %806 = vst.msk [vmem:[#allocation2 + $0x8] sm:$0xff] %vm804_vm3, %v798_v3  ;;  %v781_v7 = vmax.f32 %v672_v42, %v763_v5  ;;  %v11378_v8 = vpop.f32.mrb[18].mxu1  ;;  %v13169_v6 = vpop.f32.mrb[16].mxu0 }
 0x10f   : > { %v796_v9 = vadd.f32 %v13151_v46, %v783_v1  ;;  %v766_v10 = vpop.f32.mrb[19].mxu1  ;;  %v13172_v11 = vpop.f32.mrb[17].mxu0 }
 0x110   : > { %v794_v12 = vadd.f32 %v13151_v46, %v781_v7  ;;  %v782_v13 = vmax.f32 %v673_v45, %v766_v10  ;;  %v11390_v14 = vpop.f32.mrb[18].mxu0 }
 0x111   : > { %v803_v15 = vmax.f32 %v796_v9, 0.0  ;;  %v13175_v16 = vpop.f32.mrb[19].mxu0 }
 0x112   : > { %v801_v17 = vmax.f32 %v794_v12, 0.0  ;;  %v795_v18 = vadd.f32 %v13151_v46, %v782_v13 }
 0x113   : > { %v2507_v19 = vld [vmem:[#allocation2 + $0x1] sm:$0x3f]  ;;  %812 = vst.msk [vmem:[#allocation2 + $0x30] sm:$0x1] %vm811_vm4, %v803_v15 }
 0x114   : > { %v2587_v20 = vld [vmem:[#allocation2] sm:$0x7f]  ;;  %v2509_v22 = vrot.slane %v2507_v19, 7  ;;  %v2524_v23 = vld [vmem:[#allocation2 + $0x16] sm:$0x3f]  ;;  %809 = vst.msk [vmem:[#allocation2 + $0x20] sm:$0xff] %vm804_vm3, %v801_v17 }
 0x115   : > { %v2371_v21 = vld [vmem:[#allocation2] sm:$0x7f]  ;;  %v802_v24 = vmax.f32 %v795_v18, 0.0  ;;  %v11397_v25 = vpop.f32.mrb[20].mxu1  ;;  %v2589_v26 = vrot.slane %v2587_v20, 7  ;;  %v2526_v27 = vrot.slane %v2524_v23, 4 }
 0x116   : > { %v2513_v28 = vld [vmem:[#allocation2 + $0x8] sm:$0x3f]  ;;  %v2518_v29 = vld [vmem:[#allocation2 + $0xf] sm:$0x3f]  ;;  %v1019_v30 = vmax.f32 %v13153_v52, %v11397_v25  ;;  %v987_v31 = vpop.f32.mrb[21].mxu1  ;;  %v2373_v36 = vrot.slane %v2371_v21, 7 }
 0x117   : > { %v2515_v32 = vrot.slane %v2513_v28, 6  ;;  %v2520_v33 = vrot.slane %v2518_v29, 5  ;;  %810 = vst.msk [vmem:[#allocation2 + $0x28] sm:$0xff] %vm804_vm3, %v802_v24  ;;  %v1017_v34 = vmax.f32 %v13156_v56, %v987_v31  ;;  %v11398_v35 = vpop.f32.mrb[22].mxu1  ;;  %2590 = vrot.lane.b32.xlu1 %v2589_v26, %s12743_s22  ;;  %v11409_v37 = vpop.f32.mrb[20].mxu0 }
 0x118   : > { %2512 = vst.msk [vmem:[#allocation3 + $0x18] sm:$0x7e] %vm2511_vm5, %v2509_v22  ;;  %v1020_v38 = vmax.f32 %v13159_v59, %v11398_v35  ;;  %v13186_v39 = vmax.f32 %v1019_v30, %v11409_v37  ;;  %v990_v40 = vpop.f32.mrb[23].mxu1  ;;  %v1096_v41 = vpop.f32.mrb[21].mxu0  ;;  %v2698_v42 = vld [vmem:[#allocation2 + $0x1] sm:$0x3f]  ;;  %2374 = vrot.lane.b32.xlu0 %v2373_v36, %s12744_s23 }
 0x119   : > { %v2595_v43 = vld [vmem:[#allocation2 + $0x7] sm:$0x7f]  ;;  %2529 = vst.msk [vmem:[#allocation3 + $0x58] sm:$0x3] %vm2267_vm7, %v2526_v27  ;;  %v1018_v44 = vmax.f32 %v13162_v62, %v990_v40  ;;  %v13192_v45 = vmax.f32 %v1017_v34, %v1096_v41  ;;  %v11410_v47 = vpop.f32.mrb[22].mxu0  ;;  %v2700_v48 = vrot.slane %v2698_v42, 7 }
 0x11a   : > { %2528 = vst.msk [vmem:[#allocation3 + $0x48] sm:$0xf0] %vm2273_vm9, %v2526_v27  ;;  %v13197_v49 = vmax.f32 %v1020_v38, %v11410_v47  ;;  %v1099_v50 = vpop.f32.mrb[23].mxu0  ;;  %v2603_v51 = vld [vmem:[#allocation2 + $0xe] sm:$0x7f]  ;;  %v2597_v53 = vrot.slane %v2595_v43, 6 }
 0x11b   : > { %2523 = vst.msk [vmem:[#allocation3 + $0x48] sm:$0x1] %vm811_vm4, %v2520_v33  ;;  %v13199_v52 = vmax.f32 %v1018_v44, %v1099_v50  ;;  %2701 = vrot.lane.b32.xlu1 %v2700_v48, %s12745_s24  ;;  %v2379_v54 = vld [vmem:[#allocation2 + $0x7] sm:$0x7f]  ;;  %v2530_v55 = vld [vmem:[#allocation2 + $0x1d] sm:$0x3f] }
 0x11c   : > { %2517 = vst.msk [vmem:[#allocation3 + $0x28] sm:$0xfc] %vm2258_vm6, %v2515_v32  ;;  %v2389_v56 = vld [vmem:[#allocation2 + $0xe] sm:$0x7f]  ;;  %v2254_v57 = vld [vmem:[#allocation2] sm:$0x7f]  ;;  %2598 = vrot.lane.b32.xlu0 %v2597_v53, %s12743_s22 }
 0x11d   : > { %2522 = vst.msk [vmem:[#allocation3 + $0x38] sm:$0xf8] %vm2265_vm8, %v2520_v33  ;;  %v2532_v58 = vrot.slane %v2530_v55, 3  ;;  %v11401_v59 = vpop.f32.mrb[24].mxu1  ;;  %v2605_v60 = vrot.slane %v2603_v51, 5  ;;  %v2256_v61 = vrot.slane %v2254_v57, 6 }
 0x11e   : > { %v2269_v62 = vld [vmem:[#allocation2 + $0xe] sm:$0x7f]  ;;  %v2536_v63 = vld [vmem:[#allocation2 + $0x24] sm:$0x3f]  ;;  %v1023_v2 = vmax.f32 %v13169_v6, %v11401_v59  ;;  %v1003_v3 = vpop.f32.mrb[25].mxu1  ;;  %v11413_v9 = vpop.f32.mrb[24].mxu0 }
 0x11f   : > { %v2542_v0 = vld [vmem:[#allocation2 + $0x2b] sm:$0x3f]  ;;  %v2271_v4 = vrot.slane %v2269_v62, 4  ;;  %v2538_v1 = vrot.slane %v2536_v63, 2  ;;  %v1021_v7 = vmax.f32 %v13172_v11, %v1003_v3  ;;  %v11402_v8 = vpop.f32.mrb[26].mxu1  ;;  %2606 = vrot.lane.b32.xlu1 %v2605_v60, %s12743_s22  ;;  %v2381_v10 = vrot.slane %v2379_v54, 6 }
 0x120   : > { %v2544_v5 = vrot.slane %v2542_v0, 1  ;;  %2535 = vst.msk [vmem:[#allocation3 + $0x68] sm:$0x7] %vm2275_vm10, %v2532_v58  ;;  %v13210_v6 = vmax.f32 %v1023_v2, %v11413_v9  ;;  %v1006_v12 = vpop.f32.mrb[27].mxu1  ;;  %v1112_v13 = vpop.f32.mrb[25].mxu0  ;;  %v2391_v17 = vrot.slane %v2389_v56, 5 }
 0x121   : > { %2259 = vst.msk [vmem:[#allocation3 + $0x10] sm:$0xfc] %vm2258_vm6, %v2256_v61  ;;  %2382 = vrot.lane.b32.xlu0 %v2381_v10, %s12744_s23  ;;  %v1022_v11 = vmax.f32 %v13175_v16, %v1006_v12  ;;  %v13216_v14 = vmax.f32 %v1021_v7, %v1112_v13  ;;  %v11414_v15 = vpop.f32.mrb[26].mxu0  ;;  %v2261_v18 = vld [vmem:[#allocation2 + $0x7] sm:$0x7f] }
 0x122   : > { %2260 = vst.msk [vmem:[#allocation3 + $0x20] sm:$0x1] %vm811_vm4, %v2256_v61  ;;  %v1115_v19 = vpop.f32.mrb[27].mxu0  ;;  %v2263_v20 = vrot.slane %v2261_v18, 5  ;;  %v2285_v31 = vld [vmem:[#allocation2 + $0x1c] sm:$0x7f] }
 0x123   : > { %2534 = vst.msk [vmem:[#allocation3 + $0x58] sm:$0xe0] %vm2281_vm11, %v2532_v58  ;;  %v1131_v21 = vmax.f32 %v1022_v11, %v1115_v19  ;;  %2392 = vrot.lane.b32.xlu1 %v2391_v17, %s12744_s23  ;;  %v2277_v35 = vld [vmem:[#allocation2 + $0x15] sm:$0x7f]  ;;  %v2293_v41 = vld [vmem:[#allocation2 + $0x23] sm:$0x7f] }
 0x124   : > { %2274 = vst.msk [vmem:[#allocation3 + $0x30] sm:$0xf0] %vm2273_vm9, %v2271_v4  ;;  %v11421_v16 = vpop.f32.mrb[28].mxu1  ;;  %v2279_v40 = vrot.slane %v2277_v35, 3  ;;  %v2295_v44 = vrot.slane %v2293_v41, 1 }
 0x125   : > { %2276 = vst.msk [vmem:[#allocation3 + $0x40] sm:$0x7] %vm2275_vm10, %v2271_v4  ;;  %v1237_v22 = vmax.f32 %v13186_v39, %v11421_v16  ;;  %v1205_v23 = vpop.f32.mrb[29].mxu1  ;;  %v2287_v39 = vrot.slane %v2285_v31, 2 }
 0x126   : > { %2541 = vst.msk [vmem:[#allocation3 + $0x78] sm:$0xf] %vm2283_vm13, %v2538_v1  ;;  %v1235_v24 = vmax.f32 %v13192_v45, %v1205_v23  ;;  %v11422_v25 = vpop.f32.mrb[30].mxu1  ;;  %v13227_v26 = vpop.f32.mrb[28].mxu0  ;;  %v2301_v45 = vld [vmem:[#allocation2 + $0x2a] sm:$0x7f] }
 0x127   : > { %2540 = vst.msk [vmem:[#allocation3 + $0x68] sm:$0xc0] %vm2289_vm14, %v2538_v1  ;;  %v1244_v27 = vadd.f32 %v13151_v46, %v1237_v22  ;;  %v1238_v28 = vmax.f32 %v13197_v49, %v11422_v25  ;;  %v1208_v29 = vpop.f32.mrb[31].mxu1  ;;  %v13231_v30 = vpop.f32.mrb[29].mxu0  ;;  %2290 = vst.msk [vmem:[#allocation3 + $0x50] sm:$0xc0] %vm2289_vm14, %v2287_v39 }
 0x128   : > { %2547 = vst.msk [vmem:[#allocation3 + $0x88] sm:$0x1f] %vm2291_vm15, %v2544_v5  ;;  %v1242_v32 = vadd.f32 %v13151_v46, %v1235_v24  ;;  %v1236_v33 = vmax.f32 %v13199_v52, %v1208_v29  ;;  %v13235_v34 = vpop.f32.mrb[30].mxu0  ;;  %2292 = vst.msk [vmem:[#allocation3 + $0x60] sm:$0x1f] %vm2291_vm15, %v2287_v39 }
 0x129   : > { %2546 = vst.msk [vmem:[#allocation3 + $0x78] sm:$0x80] %vm2297_vm12, %v2544_v5  ;;  %v1251_v36 = vmax.f32 %v1244_v27, 0.0  ;;  %v1245_v37 = vadd.f32 %v13151_v46, %v1238_v28  ;;  %v13238_v38 = vpop.f32.mrb[31].mxu0  ;;  %2298 = vst.msk [vmem:[#allocation3 + $0x60] sm:$0x80] %vm2297_vm12, %v2295_v44 }
 0x12a   : > { %2266 = vst.msk [vmem:[#allocation3 + $0x20] sm:$0xf8] %vm2265_vm8, %v2263_v20  ;;  %v1249_v42 = vmax.f32 %v1242_v32, 0.0  ;;  %v1243_v43 = vadd.f32 %v13151_v46, %v1236_v33 }
 0x12b   : > { %2268 = vst.msk [vmem:[#allocation3 + $0x30] sm:$0x3] %vm2267_vm7, %v2263_v20  ;;  %v1252_v47 = vmax.f32 %v1245_v37, 0.0 }
 0x12c   : > { %1259 = vst.msk [vmem:[#allocation2 + $0x48] sm:$0xff] %vm804_vm3, %v1251_v36  ;;  %1257 = vst.msk [vmem:[#allocation2 + $0x38] sm:$0xff] %vm804_vm3, %v1249_v42  ;;  %v1250_v48 = vmax.f32 %v1243_v43, 0.0  ;;  %v11425_v49 = vpop.f32.mrb[32].mxu1 }
 0x12d   : > { %2282 = vst.msk [vmem:[#allocation3 + $0x40] sm:$0xe0] %vm2281_vm11, %v2279_v40  ;;  %v1241_v50 = vmax.f32 %v13210_v6, %v11425_v49  ;;  %v1221_v51 = vpop.f32.mrb[33].mxu1 }
 0x12e   : > { %2284 = vst.msk [vmem:[#allocation3 + $0x50] sm:$0xf] %vm2283_vm13, %v2279_v40  ;;  %v1239_v52 = vmax.f32 %v13216_v14, %v1221_v51  ;;  %v11426_v53 = vpop.f32.mrb[34].mxu1  ;;  %v13254_v54 = vpop.f32.mrb[32].mxu0 }
 0x12f   : > { %2303 = vst.msk [vmem:[#allocation3 + $0x80] sm:$0x7f] %vm2302_vm1, %v2301_v45  ;;  %v1248_v55 = vadd.f32 %v13151_v46, %v1241_v50  ;;  %v1224_v56 = vpop.f32.mrb[35].mxu1  ;;  %v13257_v57 = vpop.f32.mrb[33].mxu0 }
 0x130   : > { %2300 = vst.msk [vmem:[#allocation3 + $0x70] sm:$0x3f] %vm2299_vm0, %v2295_v44  ;;  %v1246_v58 = vadd.f32 %v13151_v46, %v1239_v52  ;;  %v1240_v59 = vmax.f32 %v1131_v21, %v1224_v56  ;;  %v11438_v60 = vpop.f32.mrb[34].mxu0 }
 0x131   : > { %1260 = vst.msk [vmem:[#allocation2 + $0x50] sm:$0xff] %vm804_vm3, %v1252_v47  ;;  %1258 = vst.msk [vmem:[#allocation2 + $0x40] sm:$0xff] %vm804_vm3, %v1250_v48  ;;  %v1255_v61 = vmax.f32 %v1248_v55, 0.0  ;;  %v13260_v62 = vpop.f32.mrb[35].mxu0 }
 0x132   : > { %v1253_v63 = vmax.f32 %v1246_v58, 0.0  ;;  %v1247_v0 = vadd.f32 %v13151_v46, %v1240_v59 }
 0x133   : > { %v2753_v2 = vld [vmem:[#allocation2 + $0x39] sm:$0x3f]  ;;  %1263 = vst.msk [vmem:[#allocation2 + $0x68] sm:$0x1] %vm811_vm4, %v1255_v61 }
 0x134   : > { %v2643_v3 = vld [vmem:[#allocation2 + $0x38] sm:$0x7f]  ;;  %v2755_v1 = vrot.slane %v2753_v2, 7  ;;  %1261 = vst.msk [vmem:[#allocation2 + $0x58] sm:$0xff] %vm804_vm3, %v1253_v63  ;;  %v1254_v7 = vmax.f32 %v1247_v0, 0.0  ;;  %v11445_v8 = vpop.f32.mrb[36].mxu1 }
 0x135   : > { %v2304_v4 = vld [vmem:[#allocation2 + $0x38] sm:$0x7f]  ;;  %v2645_v9 = vrot.slane %v2643_v3, 7  ;;  %v1470_v13 = vmax.f32 %v13227_v26, %v11445_v8  ;;  %v1438_v11 = vpop.f32.mrb[37].mxu1 }
 0x136   : > { %1262 = vst.msk [vmem:[#allocation2 + $0x60] sm:$0xff] %vm804_vm3, %v1254_v7  ;;  %v1468_v17 = vmax.f32 %v13231_v30, %v1438_v11  ;;  %v11446_v18 = vpop.f32.mrb[38].mxu1  ;;  %v11457_v19 = vpop.f32.mrb[36].mxu0  ;;  %v2306_v20 = vrot.slane %v2304_v4, 6  ;;  %v2439_v25 = vld [vmem:[#allocation2 + $0x38] sm:$0x7f] }
 0x137   : > { %2646 = vrot.lane.b32.xlu1 %v2645_v9, %s12744_s23  ;;  %2757 = vst.msk [vmem:[#allocation3 + $0xc8] sm:$0x7e] %vm2511_vm5, %v2755_v1  ;;  %v1471_v21 = vmax.f32 %v13235_v34, %v11446_v18  ;;  %v13271_v16 = vmax.f32 %v1470_v13, %v11457_v19  ;;  %v1441_v22 = vpop.f32.mrb[39].mxu1  ;;  %v1547_v23 = vpop.f32.mrb[37].mxu0  ;;  %v2548_v32 = vld [vmem:[#allocation2 + $0x38] sm:$0x7f] }
 0x138   : > { %v2769_v5 = vld [vmem:[#allocation2 + $0x4e] sm:$0x3f]  ;;  %v2758_v6 = vld [vmem:[#allocation2 + $0x40] sm:$0x3f]  ;;  %v2763_v12 = vld [vmem:[#allocation2 + $0x47] sm:$0x3f]  ;;  %2307 = vrot.lane.b32.xlu0 %v2306_v20, %s12743_s22  ;;  %v1469_v26 = vmax.f32 %v13238_v38, %v1441_v22  ;;  %v13277_v27 = vmax.f32 %v1468_v17, %v1547_v23 }
 0x139   : > { %v2771_v10 = vrot.slane %v2769_v5, 4  ;;  %v2760_v14 = vrot.slane %v2758_v6, 6  ;;  %v2765_v15 = vrot.slane %v2763_v12, 5  ;;  %v2324_v24 = vld [vmem:[#allocation2 + $0x46] sm:$0x7f]  ;;  %v11458_v28 = vpop.f32.mrb[38].mxu0 }
 0x13a   : > { %v2326_v29 = vrot.slane %v2324_v24, 4  ;;  %v13282_v30 = vmax.f32 %v1471_v21, %v11458_v28  ;;  %v1550_v31 = vpop.f32.mrb[39].mxu0  ;;  %v2441_v34 = vrot.slane %v2439_v25, 7  ;;  %v2550_v35 = vrot.slane %v2548_v32, 6  ;;  %v2555_v36 = vld [vmem:[#allocation2 + $0x3f] sm:$0x7f] }
 0x13b   : > { %2774 = vst.msk [vmem:[#allocation3 + $0x108] sm:$0x3] %vm2267_vm7, %v2771_v10  ;;  %v13284_v33 = vmax.f32 %v1469_v26, %v1550_v31  ;;  %v2561_v37 = vld [vmem:[#allocation2 + $0x46] sm:$0x7f]  ;;  %v2775_v38 = vld [vmem:[#allocation2 + $0x55] sm:$0x3f] }
 0x13c   : > { %2773 = vst.msk [vmem:[#allocation3 + $0xf8] sm:$0xf0] %vm2273_vm9, %v2771_v10  ;;  %2327 = vrot.lane.b32.xlu1 %v2326_v29, %s12743_s22  ;;  %v2314_v39 = vld [vmem:[#allocation2 + $0x3f] sm:$0x7f]  ;;  %v2557_v40 = vrot.slane %v2555_v36, 5  ;;  %v2563_v41 = vrot.slane %v2561_v37, 4  ;;  %2442 = vrot.lane.b32.xlu0 %v2441_v34, %s12745_s24 }
 0x13d   : > { %2768 = vst.msk [vmem:[#allocation3 + $0xf8] sm:$0x1] %vm811_vm4, %v2765_v15  ;;  %v2777_v42 = vrot.slane %v2775_v38, 3  ;;  %v11449_v43 = vpop.f32.mrb[40].mxu1  ;;  %2554 = vst.msk [vmem:[#allocation3 + $0xd0] sm:$0x1] %vm811_vm4, %v2550_v35 }
 0x13e   : > { %2762 = vst.msk [vmem:[#allocation3 + $0xd8] sm:$0xfc] %vm2258_vm6, %v2760_v14  ;;  %2553 = vst.msk [vmem:[#allocation3 + $0xc0] sm:$0xfc] %vm2258_vm6, %v2550_v35  ;;  %v2781_v44 = vld [vmem:[#allocation2 + $0x5c] sm:$0x3f]  ;;  %v1474_v47 = vmax.f32 %v13254_v54, %v11449_v43 }
 0x13f   : > { %2767 = vst.msk [vmem:[#allocation3 + $0xe8] sm:$0xf8] %vm2265_vm8, %v2765_v15  ;;  %v2787_v45 = vld [vmem:[#allocation2 + $0x63] sm:$0x3f]  ;;  %v1454_v48 = vpop.f32.mrb[41].mxu1  ;;  %v2783_v49 = vrot.slane %v2781_v44, 2 }
 0x140   : > { %2559 = vst.msk [vmem:[#allocation3 + $0xd0] sm:$0xf8] %vm2265_vm8, %v2557_v40  ;;  %v2789_v50 = vrot.slane %v2787_v45, 1  ;;  %v1472_v51 = vmax.f32 %v13257_v57, %v1454_v48  ;;  %v11450_v52 = vpop.f32.mrb[42].mxu1  ;;  %v11461_v53 = vpop.f32.mrb[40].mxu0  ;;  %v2316_v55 = vrot.slane %v2314_v39, 5 }
 0x141   : > { %2560 = vst.msk [vmem:[#allocation3 + $0xe0] sm:$0x3] %vm2267_vm7, %v2557_v40  ;;  %v1583_v54 = vmax.f32 %v1474_v47, %v11461_v53  ;;  %v1457_v56 = vpop.f32.mrb[43].mxu1  ;;  %v1563_v58 = vpop.f32.mrb[41].mxu0  ;;  %v2573_v10 = vld [vmem:[#allocation2 + $0x54] sm:$0x7f] }
 0x142   : > { %2565 = vst.msk [vmem:[#allocation3 + $0xe0] sm:$0xf0] %vm2273_vm9, %v2563_v41  ;;  %2317 = vrot.lane.b32.xlu0 %v2316_v55, %s12743_s22  ;;  %v1473_v59 = vmax.f32 %v13260_v62, %v1457_v56  ;;  %v1581_v60 = vmax.f32 %v1472_v51, %v1563_v58  ;;  %v11462_v61 = vpop.f32.mrb[42].mxu0  ;;  %v2575_v11 = vrot.slane %v2573_v10, 2  ;;  %v2567_v14 = vld [vmem:[#allocation2 + $0x4d] sm:$0x7f] }
 0x143   : > { %2566 = vst.msk [vmem:[#allocation3 + $0xf0] sm:$0x7] %vm2275_vm10, %v2563_v41  ;;  %2780 = vst.msk [vmem:[#allocation3 + $0x118] sm:$0x7] %vm2275_vm10, %v2777_v42  ;;  %v1566_v57 = vpop.f32.mrb[43].mxu0  ;;  %v2569_v19 = vrot.slane %v2567_v14, 3 }
 0x144   : > { %2779 = vst.msk [vmem:[#allocation3 + $0x108] sm:$0xe0] %vm2281_vm11, %v2777_v42  ;;  %v1582_v63 = vmax.f32 %v1473_v59, %v1566_v57  ;;  %v11469_v0 = vpop.f32.mrb[44].mxu1  ;;  %v2579_v20 = vld [vmem:[#allocation2 + $0x5b] sm:$0x7f]  ;;  %v12453_v38 = vld [vmem:[%s16022_s3 + $0x50] sm:$0xff]  }
 0x145   : > { %2786 = vst.msk [vmem:[#allocation3 + $0x128] sm:$0xf] %vm2283_vm13, %v2783_v49  ;;  %v1688_v2 = vmax.f32 %v13271_v16, %v11469_v0  ;;  %v1656_v3 = vpop.f32.mrb[45].mxu1  ;;  %v2581_v22 = vrot.slane %v2579_v20, 1  ;;  %2572 = vst.msk [vmem:[#allocation3 + $0x100] sm:$0xf] %vm2283_vm13, %v2569_v19 }
 0x146   : > { %2785 = vst.msk [vmem:[#allocation3 + $0x118] sm:$0xc0] %vm2289_vm14, %v2783_v49  ;;  %v1686_v4 = vmax.f32 %v13277_v27, %v1656_v3  ;;  %v11470_v1 = vpop.f32.mrb[46].mxu1  ;;  %v13306_v62 = vpop.f32.mrb[44].mxu0  ;;  %2577 = vst.msk [vmem:[#allocation3 + $0x100] sm:$0xc0] %vm2289_vm14, %v2575_v11 }
 0x147   : > { %2792 = vst.msk [vmem:[#allocation3 + $0x138] sm:$0x1f] %vm2291_vm15, %v2789_v50  ;;  %v1695_v5 = vadd.f32 %v13151_v46, %v1688_v2  ;;  %v1689_v7 = vmax.f32 %v13282_v30, %v11470_v1  ;;  %v1659_v8 = vpop.f32.mrb[47].mxu1  ;;  %v13310_v9 = vpop.f32.mrb[45].mxu0  ;;  %2578 = vst.msk [vmem:[#allocation3 + $0x110] sm:$0x1f] %vm2291_vm15, %v2575_v11 }
 0x148   : > { %2791 = vst.msk [vmem:[#allocation3 + $0x128] sm:$0x80] %vm2297_vm12, %v2789_v50  ;;  %v1693_v6 = vadd.f32 %v13151_v46, %v1686_v4  ;;  %v1687_v12 = vmax.f32 %v13284_v33, %v1659_v8  ;;  %v13314_v13 = vpop.f32.mrb[46].mxu0  ;;  %v2585_v24 = vld [vmem:[#allocation2 + $0x62] sm:$0x7f]  ;;  %v12746_v41 = vmov 0  }
 0x149   : > { %v1702_v15 = vmax.f32 %v1695_v5, 0.0  ;;  %v1696_v17 = vadd.f32 %v13151_v46, %v1689_v7  ;;  %v13317_v18 = vpop.f32.mrb[47].mxu0  ;;  %2571 = vst.msk [vmem:[#allocation3 + $0xf0] sm:$0xe0] %vm2281_vm11, %v2569_v19  ;;  %3488 = vmatprep.subr.bf16.mxu0 %v12746_v41  ;;  %3702 = vmatprep.subr.bf16.mxu1 %v12746_v41  ;;  %v12454_v2 = vld [vmem:[%s16022_s3 + $0x58] sm:$0xff]  }
 0x14a   : > { %v1700_v21 = vmax.f32 %v1693_v6, 0.0  ;;  %v1694_v16 = vadd.f32 %v13151_v46, %v1687_v12  ;;  %2583 = vst.msk [vmem:[#allocation3 + $0x110] sm:$0x80] %vm2297_vm12, %v2581_v22  ;;  %3489 = vmatpush1.bf16.msra.mxu0 %v12453_v38  ;;  %3703 = vmatpush1.bf16.msra.mxu1 %v12453_v38 }
 0x14b   : > { %1710 = vst.msk [vmem:[#allocation2 + $0x80] sm:$0xff] %vm804_vm3, %v1702_v15  ;;  %v1703_v23 = vmax.f32 %v1696_v17, 0.0  ;;  %3490 = vmatprep.subr.bf16.mxu0 %v12746_v41  ;;  %3704 = vmatprep.subr.bf16.mxu1 %v12746_v41 }
 0x14c   : > { %1708 = vst.msk [vmem:[#allocation2 + $0x70] sm:$0xff] %vm804_vm3, %v1700_v21  ;;  %v1701_v25 = vmax.f32 %v1694_v16, 0.0  ;;  %v11473_v26 = vpop.f32.mrb[48].mxu1  ;;  %v3348_v21 = vld [vmem:[#allocation3 + $0x168] sm:$0xff] }
 0x14d   : > { %2584 = vst.msk [vmem:[#allocation3 + $0x120] sm:$0x3f] %vm2299_vm0, %v2581_v22  ;;  %v1692_v27 = vmax.f32 %v1583_v54, %v11473_v26  ;;  %v1672_v28 = vpop.f32.mrb[49].mxu1 }
 0x14e   : > { %2586 = vst.msk [vmem:[#allocation3 + $0x130] sm:$0x7f] %vm2302_vm1, %v2585_v24  ;;  %v1690_v29 = vmax.f32 %v1581_v60, %v1672_v28  ;;  %v11474_v30 = vpop.f32.mrb[50].mxu1  ;;  %v13331_v31 = vpop.f32.mrb[48].mxu0  ;;  %3491 = vmatpush1.bf16.msra.mxu0 %v12454_v2  ;;  %3705 = vmatpush1.bf16.msra.mxu1 %v12454_v2 }
 0x14f   : > { %1711 = vst.msk [vmem:[#allocation2 + $0x88] sm:$0xff] %vm804_vm3, %v1703_v23  ;;  %1709 = vst.msk [vmem:[#allocation2 + $0x78] sm:$0xff] %vm804_vm3, %v1701_v25  ;;  %v1699_v32 = vadd.f32 %v13151_v46, %v1692_v27  ;;  %v1675_v33 = vpop.f32.mrb[51].mxu1  ;;  %v13334_v34 = vpop.f32.mrb[49].mxu0  ;;  %3492 = vmatprep.subr.bf16.mxu0 %v12746_v41  ;;  %3706 = vmatprep.subr.bf16.mxu1 %v12746_v41  ;;  %v12456_v25 = vld [vmem:[%s16022_s3 + $0x68] sm:$0xff]  }
 0x150   : > { %v1697_v35 = vadd.f32 %v13151_v46, %v1690_v29  ;;  %v1691_v36 = vmax.f32 %v1582_v63, %v1675_v33  ;;  %v11486_v37 = vpop.f32.mrb[50].mxu0 }
 0x151   : > { %v1706_v39 = vmax.f32 %v1699_v32, 0.0  ;;  %v13340_v40 = vpop.f32.mrb[51].mxu0 }
 0x152   : > { %v1704_v42 = vmax.f32 %v1697_v35, 0.0  ;;  %v1698_v43 = vadd.f32 %v13151_v46, %v1691_v36 }
 0x153   : > { %v2996_v44 = vld [vmem:[#allocation2 + $0x71] sm:$0x3f]  ;;  %1714 = vst.msk [vmem:[#allocation2 + $0xa0] sm:$0x1] %vm811_vm4, %v1706_v39 }
 0x154   : > { %v2886_v45 = vld [vmem:[#allocation2 + $0x70] sm:$0x7f]  ;;  %v2998_v48 = vrot.slane %v2996_v44, 7  ;;  %1712 = vst.msk [vmem:[#allocation2 + $0x90] sm:$0xff] %vm804_vm3, %v1704_v42  ;;  %v1705_v50 = vmax.f32 %v1698_v43, 0.0  ;;  %v11493_v51 = vpop.f32.mrb[52].mxu1 }
 0x155   : > { %v3075_v47 = vld [vmem:[#allocation2 + $0x70] sm:$0x7f]  ;;  %v2888_v52 = vrot.slane %v2886_v45, 7  ;;  %v1921_v56 = vmax.f32 %v13306_v62, %v11493_v51  ;;  %v1889_v58 = vpop.f32.mrb[53].mxu1 }
 0x156   : > { %v3012_v49 = vld [vmem:[#allocation2 + $0x86] sm:$0x3f]  ;;  %v3001_v55 = vld [vmem:[#allocation2 + $0x78] sm:$0x3f]  ;;  %v3006_v54 = vld [vmem:[#allocation2 + $0x7f] sm:$0x3f]  ;;  %v1919_v61 = vmax.f32 %v13310_v9, %v1889_v58 }
 0x157   : > { %v3014_v53 = vrot.slane %v3012_v49, 4  ;;  %v3003_v59 = vrot.slane %v3001_v55, 6  ;;  %v3008_v60 = vrot.slane %v3006_v54, 5  ;;  %1713 = vst.msk [vmem:[#allocation2 + $0x98] sm:$0xff] %vm804_vm3, %v1705_v50  ;;  %v11494_v57 = vpop.f32.mrb[54].mxu1  ;;  %v11505_v63 = vpop.f32.mrb[52].mxu0  ;;  %2889 = vrot.lane.b32.xlu1 %v2888_v52, %s12744_s23 }
 0x158   : > { %v3077_v0 = vrot.slane %v3075_v47, 7  ;;  %3000 = vst.msk [vmem:[#allocation3 + $0x178] sm:$0x7e] %vm2511_vm5, %v2998_v48  ;;  %v1922_v3 = vmax.f32 %v13314_v13, %v11494_v57  ;;  %v13358_v4 = vmax.f32 %v1921_v56, %v11505_v63  ;;  %v1892_v1 = vpop.f32.mrb[55].mxu1  ;;  %v1998_v62 = vpop.f32.mrb[53].mxu0  ;;  %v12455_v13 = vld [vmem:[%s16022_s3 + $0x60] sm:$0xff]  }
 0x159   : > { %v3185_v5 = vld [vmem:[#allocation2 + $0x71] sm:$0x3f]  ;;  %v3098_v7 = vld [vmem:[#allocation2 + $0x85] sm:$0x7f]  ;;  %3017 = vst.msk [vmem:[#allocation3 + $0x1b8] sm:$0x3] %vm2267_vm7, %v3014_v53  ;;  %v1920_v8 = vmax.f32 %v13317_v18, %v1892_v1  ;;  %v13364_v9 = vmax.f32 %v1919_v61, %v1998_v62  ;;  %3493 = vmatpush1.bf16.msra.mxu0 %v12455_v13  ;;  %3707 = vmatpush1.bf16.msra.mxu1 %v12455_v13 }
 0x15a   : > { %3016 = vst.msk [vmem:[#allocation3 + $0x1a8] sm:$0xf0] %vm2273_vm9, %v3014_v53  ;;  %3078 = vrot.lane.b32.xlu0 %v3077_v0, %s12743_s22  ;;  %v11506_v10 = vpop.f32.mrb[54].mxu0  ;;  %v3187_v6 = vrot.slane %v3185_v5, 7  ;;  %v3090_v12 = vld [vmem:[#allocation2 + $0x7e] sm:$0x7f]  ;;  %3494 = vmatprep.subr.bf16.mxu0 %v12746_v41 }
 0x15b   : > { %3011 = vst.msk [vmem:[#allocation3 + $0x1a8] sm:$0x1] %vm811_vm4, %v3008_v60  ;;  %v13372_v11 = vmax.f32 %v1922_v3, %v11506_v10  ;;  %v2001_v14 = vpop.f32.mrb[55].mxu0  ;;  %v2909_v15 = vld [vmem:[#allocation2 + $0x85] sm:$0x7f]  ;;  %v3100_v18 = vrot.slane %v3098_v7, 4  ;;  %3708 = vmatprep.subr.bf16.mxu1 %v12746_v41 }
 0x15c   : > { %3005 = vst.msk [vmem:[#allocation3 + $0x188] sm:$0xfc] %vm2258_vm6, %v3003_v59  ;;  %v13375_v17 = vmax.f32 %v1920_v8, %v2001_v14  ;;  %3188 = vrot.lane.b32.xlu1 %v3187_v6, %s12745_s24  ;;  %v3018_v19 = vld [vmem:[#allocation2 + $0x8d] sm:$0x3f]  ;;  %v3092_v20 = vrot.slane %v3090_v12, 5  ;;  %v11497_v22 = vpop.f32.mrb[56].mxu1 }
 0x15d   : > { %3010 = vst.msk [vmem:[#allocation3 + $0x198] sm:$0xf8] %vm2265_vm8, %v3008_v60  ;;  %v3020_v16 = vrot.slane %v3018_v19, 3  ;;  %v2911_v23 = vrot.slane %v2909_v15, 4  ;;  %v2901_v24 = vld [vmem:[#allocation2 + $0x7e] sm:$0x7f]  ;;  %v1925_v28 = vmax.f32 %v13331_v31, %v11497_v22  ;;  %3495 = vmatpush1.bf16.msra.mxu0 %v12456_v25  ;;  %3709 = vmatpush1.bf16.msra.mxu1 %v12456_v25 }
 0x15e   : > { %3101 = vrot.lane.b32.xlu0 %v3100_v18, %s12743_s22  ;;  %v3024_v26 = vld [vmem:[#allocation2 + $0x94] sm:$0x3f]  ;;  %v3030_v27 = vld [vmem:[#allocation2 + $0x9b] sm:$0x3f]  ;;  %v1905_v29 = vpop.f32.mrb[57].mxu1  ;;  %v11509_v37 = vpop.f32.mrb[56].mxu0  ;;  %3496 = vmatprep.subr.bf16.mxu0 %v12746_v41 }
 0x15f   : > { %v3350_v30 = vld [vmem:[#allocation3 + $0x178] sm:$0xff]  ;;  %v3026_v32 = vrot.slane %v3024_v26, 2  ;;  %v3032_v33 = vrot.slane %v3030_v27, 1  ;;  %v1923_v35 = vmax.f32 %v13334_v34, %v1905_v29  ;;  %v11498_v36 = vpop.f32.mrb[58].mxu1  ;;  %3023 = vst.msk [vmem:[#allocation3 + $0x1c8] sm:$0x7] %vm2275_vm10, %v3020_v16  ;;  %v13392_v31 = vmax.f32 %v1925_v28, %v11509_v37  ;;  %3710 = vmatprep.subr.bf16.mxu1 %v12746_v41 }
 0x160   : > { %3093 = vrot.lane.b32.xlu1 %v3092_v20, %s12743_s22  ;;  %v13387_v38 = vpack.c.bf16 %v3350_v30, %v3348_v21  ;;  %3022 = vst.msk [vmem:[#allocation3 + $0x1b8] sm:$0xe0] %vm2281_vm11, %v3020_v16  ;;  %v1908_v39 = vpop.f32.mrb[59].mxu1  ;;  %v2014_v42 = vpop.f32.mrb[57].mxu0  ;;  %v3207_v43 = vld [vmem:[#allocation2 + $0x86] sm:$0x3f] }
 0x161   : > { %v1924_v34 = vmax.f32 %v13340_v40, %v1908_v39  ;;  %v13396_v44 = vmax.f32 %v1923_v35, %v2014_v42  ;;  %v11510_v45 = vpop.f32.mrb[58].mxu0  ;;  %v2903_v47 = vrot.slane %v2901_v24, 5  ;;  %3029 = vst.msk [vmem:[#allocation3 + $0x1d8] sm:$0xf] %vm2283_vm13, %v3026_v32  ;;  %v3199_v49 = vld [vmem:[#allocation2 + $0x7f] sm:$0x3f] }
 0x162   : > { %2912 = vrot.lane.b32.xlu0 %v2911_v23, %s12744_s23  ;;  %10178 = vmatprep.mubr.msk.bf16.mxu0 %vm804_vm3, %v13387_v38  ;;  %3028 = vst.msk [vmem:[#allocation3 + $0x1c8] sm:$0xc0] %vm2289_vm14, %v3026_v32  ;;  %v2017_v48 = vpop.f32.mrb[59].mxu0  ;;  %v3209_v50 = vrot.slane %v3207_v43, 4  ;;  %v3082_v51 = vld [vmem:[#allocation2 + $0x77] sm:$0x7f] }
 0x163   : > { %3035 = vst.msk [vmem:[#allocation3 + $0x1e8] sm:$0x1f] %vm2291_vm15, %v3032_v33  ;;  %v13404_v40 = vmax.f32 %v1924_v34, %v2017_v48  ;;  %v3201_v53 = vrot.slane %v3199_v49, 5  ;;  %v3106_v55 = vld [vmem:[#allocation2 + $0x8c] sm:$0x7f]  ;;  %v3084_v57 = vrot.slane %v3082_v51, 6 }
 0x164   : > { %3034 = vst.msk [vmem:[#allocation3 + $0x1d8] sm:$0x80] %vm2297_vm12, %v3032_v33  ;;  %2904 = vrot.lane.b32.xlu1 %v2903_v47, %s12744_s23  ;;  %v11517_v52 = vpop.f32.mrb[60].mxu1  ;;  %v12457_v54 = vld [vmem:[%s16022_s3 + $0x70] sm:$0xff]   ;;  %v12458_v0 = vld [vmem:[%s16022_s3 + $0x78] sm:$0xff]   ;;  %v3108_v62 = vrot.slane %v3106_v55, 3 }
 0x165   : > { %v2139_v56 = vmax.f32 %v13358_v4, %v11517_v52  ;;  %v2107_v58 = vpop.f32.mrb[61].mxu1  ;;  %v2793_v59 = vld [vmem:[#allocation2 + $0x70] sm:$0x7f]  ;;  %v2893_v63 = vld [vmem:[#allocation2 + $0x77] sm:$0x7f]  ;;  %3497 = vmatpush1.bf16.msra.mxu0 %v12457_v54  ;;  %3711 = vmatpush1.bf16.msra.mxu1 %v12457_v54  ;;  %v12459_v22 = vld [vmem:[%s16022_s3 + $0x80] sm:$0xff]  }
 0x166   : > { %3210 = vrot.lane.b32.xlu0 %v3209_v50, %s12745_s24  ;;  %v2137_v60 = vmax.f32 %v13364_v9, %v2107_v58  ;;  %v11518_v61 = vpop.f32.mrb[62].mxu1  ;;  %v2795_v2 = vrot.slane %v2793_v59, 6  ;;  %v2917_v5 = vld [vmem:[#allocation2 + $0x8c] sm:$0x7f]  ;;  %3498 = vmatprep.subr.bf16.mxu0 %v12746_v41  ;;  %v2812_v7 = vld [vmem:[#allocation2 + $0x85] sm:$0x7f] }
 0x167   : > { %v2146_v3 = vadd.f32 %v13151_v46, %v2139_v56  ;;  %v2140_v1 = vmax.f32 %v13372_v11, %v11518_v61  ;;  %v2110_v4 = vpop.f32.mrb[63].mxu1  ;;  %v2806_v8 = vld [vmem:[#allocation2 + $0x7e] sm:$0x7f]  ;;  %3712 = vmatprep.subr.bf16.mxu1 %v12746_v41  ;;  %v2814_v6 = vrot.slane %v2812_v7, 3  ;;  %v2800_v13 = vld [vmem:[#allocation2 + $0x77] sm:$0x7f] }
 0x168   : > { %3202 = vrot.lane.b32.xlu1 %v3201_v53, %s12745_s24  ;;  %v2144_v9 = vadd.f32 %v13151_v46, %v2137_v60  ;;  %v2138_v10 = vmax.f32 %v13375_v17, %v2110_v4  ;;  %2798 = vst.msk [vmem:[#allocation3 + $0x170] sm:$0xfc] %vm2258_vm6, %v2795_v2  ;;  %v2808_v12 = vrot.slane %v2806_v8, 4  ;;  %v2818_v11 = vld [vmem:[#allocation2 + $0x8c] sm:$0x7f]  ;;  %v2802_v18 = vrot.slane %v2800_v13, 5 }
 0x169   : > { %2799 = vst.msk [vmem:[#allocation3 + $0x180] sm:$0x1] %vm811_vm4, %v2795_v2  ;;  %v2153_v14 = vmax.f32 %v2146_v3, 0.0  ;;  %v2147_v15 = vadd.f32 %v13151_v46, %v2140_v1  ;;  %v2820_v19 = vrot.slane %v2818_v11, 2  ;;  %v2824_v20 = vld [vmem:[#allocation2 + $0x93] sm:$0x7f]  ;;  %3499 = vmatpush1.bf16.msra.mxu0 %v12458_v0  ;;  %3713 = vmatpush1.bf16.msra.mxu1 %v12458_v0 }
 0x16a   : > { %3085 = vrot.lane.b32.xlu0 %v3084_v57, %s12743_s22  ;;  %v2151_v21 = vmax.f32 %v2144_v9, 0.0  ;;  %v2145_v16 = vadd.f32 %v13151_v46, %v2138_v10  ;;  %v2895_v17 = vrot.slane %v2893_v63, 6  ;;  %2816 = vst.msk [vmem:[#allocation3 + $0x1a0] sm:$0xe0] %vm2281_vm11, %v2814_v6  ;;  %v2826_v23 = vrot.slane %v2824_v20, 1  ;;  %3500 = vmatprep.subr.bf16.mxu0 %v12746_v41  ;;  %v12460_v37 = vld [vmem:[%s16022_s3 + $0x88] sm:$0xff]  }
 0x16b   : > { %2817 = vst.msk [vmem:[#allocation3 + $0x1b0] sm:$0xf] %vm2283_vm13, %v2814_v6  ;;  %v2154_v46 = vmax.f32 %v2147_v15, 0.0  ;;  %v3192_v24 = vld [vmem:[#allocation2 + $0x78] sm:$0x3f]  ;;  %v2919_v28 = vrot.slane %v2917_v5, 3  ;;  %3714 = vmatprep.subr.bf16.mxu1 %v12746_v41 }
 0x16c   : > { %3109 = vrot.lane.b32.xlu1 %v3108_v62, %s12743_s22  ;;  %2810 = vst.msk [vmem:[#allocation3 + $0x190] sm:$0xf0] %vm2273_vm9, %v2808_v12  ;;  %v2830_v25 = vld [vmem:[#allocation2 + $0x9a] sm:$0x7f]  ;;  %v2152_v26 = vmax.f32 %v2145_v16, 0.0  ;;  %v11521_v27 = vpop.f32.mrb[64].mxu1 }
 0x16d   : > { %2811 = vst.msk [vmem:[#allocation3 + $0x1a0] sm:$0x7] %vm2275_vm10, %v2808_v12  ;;  %v2143_v29 = vmax.f32 %v13392_v31, %v11521_v27  ;;  %v2123_v30 = vpop.f32.mrb[65].mxu1  ;;  %v3215_v32 = vld [vmem:[#allocation2 + $0x8d] sm:$0x3f]  ;;  %v3194_v36 = vrot.slane %v3192_v24, 6  ;;  %3501 = vmatpush1.bf16.msra.mxu0 %v12459_v22  ;;  %3715 = vmatpush1.bf16.msra.mxu1 %v12459_v22 }
 0x16e   : > { %2161 = vst.msk [vmem:[#allocation2 + $0xb8] sm:$0xff] %vm804_vm3, %v2153_v14  ;;  %2159 = vst.msk [vmem:[#allocation2 + $0xa8] sm:$0xff] %vm804_vm3, %v2151_v21  ;;  %2896 = vrot.lane.b32.xlu0 %v2895_v17, %s12744_s23  ;;  %v2141_v33 = vmax.f32 %v13396_v44, %v2123_v30  ;;  %v11522_v35 = vpop.f32.mrb[66].mxu1  ;;  %v12699_v39 = vld [vmem:[%s16021_s2] ss:$0 sm:$0xff]  ;;  %3502 = vmatprep.subr.bf16.mxu0 %v12746_v41  ;;  %v3217_v45 = vrot.slane %v3215_v32, 3 }
 0x16f   : > { %2804 = vst.msk [vmem:[#allocation3 + $0x180] sm:$0xf8] %vm2265_vm8, %v2802_v18  ;;  %v2150_v31 = vadd.f32 %v12699_v39, %v2143_v29  ;;  %v2126_v42 = vpop.f32.mrb[67].mxu1  ;;  %v2925_v43 = vld [vmem:[#allocation2 + $0x93] sm:$0x7f]  ;;  %3716 = vmatprep.subr.bf16.mxu1 %v12746_v41  ;;  %v13473_v58 = vld [vmem:[#allocation3 + $0x1c8] sm:$0xff] }
 0x170   : > { %2805 = vst.msk [vmem:[#allocation3 + $0x190] sm:$0x3] %vm2267_vm7, %v2802_v18  ;;  %2920 = vrot.lane.b32.xlu1 %v2919_v28, %s12744_s23  ;;  %v2148_v34 = vadd.f32 %v12699_v39, %v2141_v33  ;;  %v2142_v44 = vmax.f32 %v13404_v40, %v2126_v42  ;;  %v3114_v47 = vld [vmem:[#allocation2 + $0x93] sm:$0x7f]  ;;  %v2927_v51 = vrot.slane %v2925_v43, 2  ;;  %v13480_v1 = vld [vmem:[#allocation3 + $0x1a8] sm:$0xff] }
 0x171   : > { %2822 = vst.msk [vmem:[#allocation3 + $0x1b0] sm:$0xc0] %vm2289_vm14, %v2820_v19  ;;  %v2157_v48 = vmax.f32 %v2150_v31, 0.0  ;;  %3503 = vmatpush1.bf16.msra.mxu0 %v12460_v37  ;;  %v12461_v52 = vld [vmem:[%s16022_s3 + $0x90] sm:$0xff]   ;;  %v13469_v53 = vld [vmem:[#allocation3 + $0x1b8] sm:$0xff]  ;;  %v3116_v40 = vrot.slane %v3114_v47, 2  ;;  %3717 = vmatpush1.bf16.msra.mxu1 %v12460_v37 }
 0x172   : > { %2823 = vst.msk [vmem:[#allocation3 + $0x1c0] sm:$0x1f] %vm2291_vm15, %v2820_v19  ;;  %3195 = vrot.lane.b32.xlu0 %v3194_v36, %s12745_s24  ;;  %v2155_v49 = vmax.f32 %v2148_v34, 0.0  ;;  %v2149_v50 = vadd.f32 %v12699_v39, %v2142_v44  ;;  %v3223_v56 = vld [vmem:[#allocation2 + $0x94] sm:$0x3f]  ;;  %3504 = vmatprep.subr.bf16.mxu0 %v12746_v41  ;;  %v5652_v7 = vpack.c.bf16 %v13469_v53, %v13480_v1 }
 0x173   : > { %2828 = vst.msk [vmem:[#allocation3 + $0x1c0] sm:$0x80] %vm2297_vm12, %v2826_v23  ;;  %3718 = vmatprep.subr.bf16.mxu1 %v12746_v41  ;;  %v13478_v63 = vld [vmem:[#allocation3 + $0x1d8] sm:$0xff]  ;;  %v3225_v10 = vrot.slane %v3223_v56, 2  ;;  %v2658_v44 = vld [vmem:[#allocation2 + $0x46] sm:$0x7f] }
 0x174   : > { %2829 = vst.msk [vmem:[#allocation3 + $0x1d0] sm:$0x3f] %vm2299_vm0, %v2826_v23  ;;  %3218 = vrot.lane.b32.xlu1 %v3217_v45, %s12745_s24  ;;  %v2156_v61 = vmax.f32 %v2149_v50, 0.0  ;;  %v12462_v5 = vld [vmem:[%s16022_s3 + $0x98] sm:$0xff]   ;;  %v5654_v9 = vpack.c.bf16 %v13478_v63, %v13473_v58  ;;  %v2660_v50 = vrot.slane %v2658_v44, 5 }
 0x175   : > { %2831 = vst.msk [vmem:[#allocation3 + $0x1e0] sm:$0x7f] %vm2302_vm1, %v2830_v25  ;;  %v3239_v55 = vld [vmem:[#allocation2 + $0xa9] sm:$0x3f]  ;;  %3505 = vmatpush1.bf16.msra.mxu0 %v12461_v52  ;;  %3719 = vmatpush1.bf16.msra.mxu1 %v12461_v52  ;;  %v3372_v14 = vld [vmem:[#allocation3 + $0x218] sm:$0xff] }
 0x176   : > { %2162 = vst.msk [vmem:[#allocation2 + $0xc0] sm:$0xff] %vm804_vm3, %v2154_v46  ;;  %2160 = vst.msk [vmem:[#allocation2 + $0xb0] sm:$0xff] %vm804_vm3, %v2152_v26  ;;  %v2832_v54 = vld [vmem:[#allocation2 + $0xa8] sm:$0x7f]  ;;  %v3241_v59 = vrot.slane %v3239_v55, 7  ;;  %2928 = vrot.lane.b32.xlu0 %v2927_v51, %s12744_s23  ;;  %3506 = vmatprep.subr.bf16.mxu0 %v12746_v41 }
 0x177   : > { %2165 = vst.msk [vmem:[#allocation2 + $0xd8] sm:$0x1] %vm811_vm4, %v2157_v48  ;;  %v2834_v57 = vrot.slane %v2832_v54, 6  ;;  %v2941_v8 = vld [vmem:[#allocation2 + $0xa8] sm:$0x7f]  ;;  %3720 = vmatprep.subr.bf16.mxu1 %v12746_v41  ;;  %v4541_v54 = vld [vmem:[#allocation3 + $0x198] sm:$0xff] }
 0x178   : > { %2163 = vst.msk [vmem:[#allocation2 + $0xc8] sm:$0xff] %vm804_vm3, %v2155_v49  ;;  %2164 = vst.msk [vmem:[#allocation2 + $0xd0] sm:$0xff] %vm804_vm3, %v2156_v61  ;;  %3117 = vrot.lane.b32.xlu1 %v3116_v40, %s12743_s22  ;;  %v3130_v6 = vld [vmem:[#allocation2 + $0xa8] sm:$0x7f]  ;;  %v2943_v12 = vrot.slane %v2941_v8, 7 }
 0x179   : > { %3243 = vst.msk [vmem:[#allocation3 + $0x228] sm:$0x7e] %vm2511_vm5, %v3241_v59  ;;  %3507 = vmatpush1.bf16.msra.mxu0 %v12462_v5  ;;  %3721 = vmatpush1.bf16.msra.mxu1 %v12462_v5  ;;  %v3132_v18 = vrot.slane %v3130_v6, 7  ;;  %v3036_v27 = vld [vmem:[#allocation2 + $0xa8] sm:$0x7f]  ;;  %vm2312_vm5 = vcmask 516352  }
 0x17a   : > { %2835 = vrot.lane.b32.xlu0 %v2834_v57, %s12743_s22  ;;  %3625 = vmatprep.subr.bf16.mxu0 %v12746_v41  ;;  %v3038_v29 = vrot.slane %v3036_v27, 6  ;;  %v5632_v56 = vld [vmem:[#allocation3 + $0x188] sm:$0xfc]  ;;  %v2447_v58 = vld [vmem:[#allocation2 + $0x3f] sm:$0x7f] }
 0x17b   : > { %3779 = vmatprep.subr.bf16.mxu1 %v12746_v41 }
 0x17c   : > { %3226 = vrot.lane.b32.xlu1 %v3225_v10, %s12745_s24  ;;  %3041 = vst.msk [vmem:[#allocation3 + $0x220] sm:$0xfc] %vm2258_vm6, %v3038_v29  ;;  %v5791_v10 = vld [vmem:[#allocation3 + $0x2a8] sm:$0xff] }
 0x17d   : > { %v3255_v60 = vld [vmem:[#allocation2 + $0xbe] sm:$0x3f]  ;;  %v3244_v2 = vld [vmem:[#allocation2 + $0xb0] sm:$0x3f]  ;;  %v3249_v3 = vld [vmem:[#allocation2 + $0xb7] sm:$0x3f] }
 0x17e   : > { %v3257_v0 = vrot.slane %v3255_v60, 4  ;;  %v3246_v4 = vrot.slane %v3244_v2, 6  ;;  %v3251_v62 = vrot.slane %v3249_v3, 5  ;;  %v2856_v11 = vld [vmem:[#allocation2 + $0xbd] sm:$0x7f]  ;;  %2944 = vrot.lane.b32.xlu0 %v2943_v12, %s12745_s24  ;;  %v5650_v2 = vpack.c.bf16 %v4541_v54, %v5632_v56 }
 0x17f   : > { %v3261_v13 = vld [vmem:[#allocation2 + $0xc5] sm:$0x3f]  ;;  %v2848_v19 = vld [vmem:[#allocation2 + $0xb6] sm:$0x7f]  ;;  %v3267_v20 = vld [vmem:[#allocation2 + $0xcc] sm:$0x3f] }
 0x180   : > { %3260 = vst.msk [vmem:[#allocation3 + $0x268] sm:$0x3] %vm2267_vm7, %v3257_v0  ;;  %v3263_v15 = vrot.slane %v3261_v13, 3  ;;  %v3273_v21 = vld [vmem:[#allocation2 + $0xd3] sm:$0x3f]  ;;  %v3374_v16 = vld [vmem:[#allocation3 + $0x228] sm:$0xff]  ;;  %3133 = vrot.lane.b32.xlu1 %v3132_v18, %s12744_s23 }
 0x181   : > { %3259 = vst.msk [vmem:[#allocation3 + $0x258] sm:$0xf0] %vm2273_vm9, %v3257_v0  ;;  %v3269_v17 = vrot.slane %v3267_v20, 2  ;;  %v3275_v22 = vrot.slane %v3273_v21, 1  ;;  %v2858_v23 = vrot.slane %v2856_v11, 3  ;;  %v13505_v46 = vpack.c.bf16 %v3374_v16, %v3372_v14  ;;  %v4551_v0 = vld [vmem:[#allocation3 + $0x1e8] sm:$0xff] }
 0x182   : > { %3254 = vst.msk [vmem:[#allocation3 + $0x258] sm:$0x1] %vm811_vm4, %v3251_v62  ;;  %v2850_v24 = vrot.slane %v2848_v19, 4  ;;  %v3153_v25 = vld [vmem:[#allocation2 + $0xbd] sm:$0x7f]  ;;  %v5673_v14 = vrot.slane %v5652_v7, 1 }
 0x183   : > { %3248 = vst.msk [vmem:[#allocation3 + $0x238] sm:$0xfc] %vm2258_vm6, %v3246_v4  ;;  %2859 = vrot.lane.b32.xlu0 %v2858_v23, %s12743_s22  ;;  %10196 = vmatprep.mubr.msk.bf16.mxu1 %vm804_vm3, %v13505_v46  ;;  %v3145_v26 = vld [vmem:[#allocation2 + $0xb6] sm:$0x7f]  ;;  %v3055_v28 = vld [vmem:[#allocation2 + $0xbd] sm:$0x7f] }
 0x184   : > { %3253 = vst.msk [vmem:[#allocation3 + $0x248] sm:$0xf8] %vm2265_vm8, %v3251_v62  ;;  %v3057_v30 = vrot.slane %v3055_v28, 3  ;;  %v3049_v32 = vld [vmem:[#allocation2 + $0xb6] sm:$0x7f]  ;;  %2851 = vrot.lane.b32.xlu1 %v2850_v24, %s12743_s22  ;;  %v3155_v35 = vrot.slane %v3153_v25, 4 }
 0x185   : > { %3266 = vst.msk [vmem:[#allocation3 + $0x278] sm:$0x7] %vm2275_vm10, %v3263_v15  ;;  %v3043_v33 = vld [vmem:[#allocation2 + $0xaf] sm:$0x7f]  ;;  %v3051_v36 = vrot.slane %v3049_v32, 4  ;;  %v3147_v43 = vrot.slane %v3145_v26, 5 }
 0x186   : > { %3265 = vst.msk [vmem:[#allocation3 + $0x268] sm:$0xe0] %vm2281_vm11, %v3263_v15  ;;  %v3045_v37 = vrot.slane %v3043_v33, 5  ;;  %v3061_v39 = vld [vmem:[#allocation2 + $0xc4] sm:$0x7f]  ;;  %v5646_v3 = vld [vmem:[#allocation3 + $0x1f8] sm:$0xff] }
 0x187   : > { %3272 = vst.msk [vmem:[#allocation3 + $0x288] sm:$0xf] %vm2283_vm13, %v3269_v17  ;;  %v2964_v31 = vld [vmem:[#allocation2 + $0xbd] sm:$0x7f]  ;;  %3060 = vst.msk [vmem:[#allocation3 + $0x260] sm:$0xf] %vm2283_vm13, %v3057_v30  ;;  %3156 = vrot.lane.b32.xlu0 %v3155_v35, %s12744_s23  ;;  %v5656_v18 = vpack.c.bf16 %v5646_v3, %v4551_v0 }
 0x188   : > { %3271 = vst.msk [vmem:[#allocation3 + $0x278] sm:$0xc0] %vm2289_vm14, %v3269_v17  ;;  %v3063_v42 = vrot.slane %v3061_v39, 2  ;;  %v3067_v34 = vld [vmem:[#allocation2 + $0xcb] sm:$0x7f]  ;;  %3148 = vrot.lane.b32.xlu1 %v3147_v43, %s12744_s23  ;;  %v2966_v47 = vrot.slane %v2964_v31, 4 }
 0x189   : > { %3278 = vst.msk [vmem:[#allocation3 + $0x298] sm:$0x1f] %vm2291_vm15, %v3275_v22  ;;  %v3069_v45 = vrot.slane %v3067_v34, 1  ;;  %v2840_v48 = vld [vmem:[#allocation2 + $0xaf] sm:$0x7f]  ;;  %v2591_v49 = vpop.permute.xlu1 %2590  ;;  %vm2320_vm6 = vcmask 523523  }
 0x18a   : > { %3277 = vst.msk [vmem:[#allocation3 + $0x288] sm:$0x80] %vm2297_vm12, %v3275_v22  ;;  %v3073_v51 = vld [vmem:[#allocation2 + $0xd2] sm:$0x7f]  ;;  %v13534_v55 = vpop.permute.xlu0 %2374  ;;  %v2842_v40 = vrot.slane %v2840_v48, 5  ;;  %v5672_v16 = vrot.slane %v5650_v2, 1 }
 0x18b   : > { %3042 = vst.msk [vmem:[#allocation3 + $0x230] sm:$0x1] %vm811_vm4, %v3038_v29  ;;  %2967 = vrot.lane.b32.xlu0 %v2966_v47, %s12745_s24  ;;  %v2956_v52 = vld [vmem:[#allocation2 + $0xb6] sm:$0x7f]  ;;  %v3137_v59 = vld [vmem:[#allocation2 + $0xaf] sm:$0x7f] }
 0x18c   : > { %3059 = vst.msk [vmem:[#allocation3 + $0x250] sm:$0xe0] %vm2281_vm11, %v3057_v30  ;;  %2661 = vrot.lane.b32.xlu1 %v2660_v50, %s12744_s23  ;;  %vm2310_vm4 = vcmask 523522   ;;  %v2958_v61 = vrot.slane %v2956_v52, 5  ;;  %v2864_v57 = vld [vmem:[#allocation2 + $0xc4] sm:$0x7f] }
 0x18d   : > { %3053 = vst.msk [vmem:[#allocation3 + $0x240] sm:$0xf0] %vm2273_vm9, %v3051_v36  ;;  %v13538_v60 = vpop.permute.xlu1 %2701  ;;  %v3139_v62 = vrot.slane %v3137_v59, 6  ;;  %v2948_v5 = vld [vmem:[#allocation2 + $0xaf] sm:$0x7f]  ;;  %v2866_v12 = vrot.slane %v2864_v57, 2 }
 0x18e   : > { %3054 = vst.msk [vmem:[#allocation3 + $0x250] sm:$0x7] %vm2275_vm10, %v3051_v36  ;;  %v2599_v4 = vpop.permute.xlu0 %2598  ;;  %v3161_v8 = vld [vmem:[#allocation2 + $0xc4] sm:$0x7f]  ;;  %v5777_v15 = vld [vmem:[#allocation3 + $0x238] sm:$0xfc] }
 0x18f   : > { %3047 = vst.msk [vmem:[#allocation3 + $0x230] sm:$0xf8] %vm2265_vm8, %v3045_v37  ;;  %2843 = vrot.lane.b32.xlu0 %v2842_v40, %s12743_s22  ;;  %v4716_v13 = vld [vmem:[#allocation3 + $0x248] sm:$0xff]  ;;  %v4722_v19 = vld [vmem:[#allocation3 + $0x278] sm:$0xff]  ;;  %v2950_v17 = vrot.slane %v2948_v5, 6  ;;  %vm16029_vm8 = vcmask 1046528  }
 0x190   : > { %3048 = vst.msk [vmem:[#allocation3 + $0x240] sm:$0x3] %vm2267_vm7, %v3045_v37  ;;  %2959 = vrot.lane.b32.xlu1 %v2958_v61, %s12745_s24  ;;  %vm16032_vm7 = vcmask 517376   ;;  %v4720_v11 = vld [vmem:[#allocation3 + $0x268] sm:$0xff]  ;;  %v4726_v21 = vld [vmem:[#allocation3 + $0x298] sm:$0xff]  ;;  %v3163_v23 = vrot.slane %v3161_v8, 3  ;;  %v13551_v53 = vsel %vm16029_vm8, %v5672_v16, %v5673_v14  ;;  %v5795_v1 = vpack.c.bf16 %v4716_v13, %v5777_v15 }
 0x191   : > { %3065 = vst.msk [vmem:[#allocation3 + $0x260] sm:$0xc0] %vm2289_vm14, %v3063_v42  ;;  %v2607_v6 = vpop.permute.xlu1 %2606  ;;  %v4724_v20 = vld [vmem:[#allocation3 + $0x288] sm:$0xff]  ;;  %v4718_v22 = vld [vmem:[#allocation3 + $0x258] sm:$0xff]  ;;  %16045 = vst [vmem:[#allocation6_spill] sm:$0xff] %v13551_v53  ;;  %v5677_v25 = vrot.slane %v5654_v9, 1  ;;  %v5801_v28 = vpack.c.bf16 %v5791_v10, %v4726_v21 }
 0x192   : > { %3066 = vst.msk [vmem:[#allocation3 + $0x270] sm:$0x1f] %vm2291_vm15, %v3063_v42  ;;  %v2650_v24 = vld [vmem:[#allocation2 + $0x3f] sm:$0x7f]  ;;  %v5797_v7 = vpack.c.bf16 %v4720_v11, %v4718_v22  ;;  %v5799_v26 = vpack.c.bf16 %v4724_v20, %v4722_v19  ;;  %v13557_v27 = vrot.slane %v5656_v18, 1  ;;  %v5817_v30 = vrot.slane %v5795_v1, 1 }
 0x193   : > { %3071 = vst.msk [vmem:[#allocation3 + $0x270] sm:$0x80] %vm2297_vm12, %v3069_v45  ;;  %3140 = vrot.lane.b32.xlu0 %v3139_v62, %s12744_s23  ;;  %v2972_v29 = vld [vmem:[#allocation2 + $0xc4] sm:$0x7f]  ;;  %v2652_v33 = vrot.slane %v2650_v24, 6  ;;  %v13561_v35 = vsel %vm16029_vm8, %v5673_v14, %v5677_v25  ;;  %v13570_v9 = vrot.slane %v5801_v28, 1  ;;  %v2383_v61 = vpop.permute.xlu0 %2382 }
 0x194   : > { %3072 = vst.msk [vmem:[#allocation3 + $0x280] sm:$0x3f] %vm2299_vm0, %v3069_v45  ;;  %2867 = vrot.lane.b32.xlu1 %v2866_v12, %s12743_s22  ;;  %16046 = vst [vmem:[#allocation7_spill] sm:$0xff] %v13557_v27  ;;  %v5818_v32 = vrot.slane %v5797_v7, 1  ;;  %v5822_v36 = vrot.slane %v5799_v26, 1  ;;  %v13565_v37 = vsel %vm16029_vm8, %v5677_v25, %v13557_v27  ;;  %v2974_v39 = vrot.slane %v2972_v29, 3 }
 0x195   : > { %2594 = vst.msk [vmem:[#allocation3 + $0xc0] sm:$0xfe] %vm2593_vm2, %v2591_v49  ;;  %16047 = vst [vmem:[#allocation8_spill] sm:$0xff] %v13561_v35  ;;  %v3169_v42 = vld [vmem:[#allocation2 + $0xcb] sm:$0x7f]  ;;  %v2449_v34 = vrot.slane %v2447_v58, 6  ;;  %v2393_v54 = vpop.permute.xlu1 %2392 }
 0x196   : > { %3074 = vst.msk [vmem:[#allocation3 + $0x290] sm:$0x7f] %vm2302_vm1, %v3073_v51  ;;  %16048 = vst [vmem:[#allocation9_spill] sm:$0xff] %v13565_v37  ;;  %v13568_v63 = vsel %vm16029_vm8, %v5817_v30, %v5818_v32  ;;  %v13574_v31 = vsel %vm16029_vm8, %v5818_v32, %v5822_v36  ;;  %v13578_v43 = vsel %vm16029_vm8, %v5822_v36, %v13570_v9  ;;  %v2872_v44 = vld [vmem:[#allocation2 + $0xcb] sm:$0x7f]  ;;  %v3171_v45 = vrot.slane %v3169_v42, 2 }
 0x197   : > { %2601 = vst.msk [vmem:[#allocation3 + $0xd0] sm:$0xfc] %vm2310_vm4, %v2599_v4  ;;  %2951 = vrot.lane.b32.xlu0 %v2950_v17, %s12745_s24  ;;  %16049 = vst [vmem:[#allocation10_spill] sm:$0xff] %v13568_v63  ;;  %v2457_v47 = vld [vmem:[#allocation2 + $0x46] sm:$0x7f]  ;;  %v2874_v48 = vrot.slane %v2872_v44, 1 }
 0x198   : > { %2602 = vst.msk [vmem:[#allocation3 + $0xe0] sm:$0x1] %vm2312_vm5, %v2599_v4  ;;  %3164 = vrot.lane.b32.xlu1 %v3163_v23, %s12744_s23  ;;  %16050 = vst [vmem:[#allocation11_spill] sm:$0xff] %v13570_v9  ;;  %v2980_v49 = vld [vmem:[#allocation2 + $0xcb] sm:$0x7f]  ;;  %v2459_v50 = vrot.slane %v2457_v47, 5 }
 0x199   : > { %2609 = vst.msk [vmem:[#allocation3 + $0xe0] sm:$0xf8] %vm2320_vm6, %v2607_v6  ;;  %16051 = vst [vmem:[#allocation12_spill] sm:$0xff] %v13574_v31  ;;  %v2713_v51 = vld [vmem:[#allocation2 + $0xf] sm:$0x3f]  ;;  %v2982_v52 = vrot.slane %v2980_v49, 2 }
 0x19a   : > { %2610 = vst.msk [vmem:[#allocation3 + $0xf0] sm:$0x3] %vm16032_vm7, %v2607_v6  ;;  %16052 = vst [vmem:[#allocation13_spill] sm:$0xff] %v13578_v43  ;;  %v2706_v40 = vld [vmem:[#allocation2 + $0x8] sm:$0x3f]  ;;  %v2715_v56 = vrot.slane %v2713_v51, 5 }
 0x19b   : > { %2653 = vrot.lane.b32.xlu0 %v2652_v33, %s12744_s23  ;;  %v2344_v59 = vld [vmem:[#allocation2 + $0x54] sm:$0x7f]  ;;  %v2708_v57 = vrot.slane %v2706_v40, 6  ;;  %vm2377_vm9 = vcmask 785921   ;;  %vm2704_vm10 = vcmask 1047297   ;;  %vm2330_vm11 = vcmask 523524  }
 0x19c   : > { %2975 = vrot.lane.b32.xlu1 %v2974_v39, %s12745_s24  ;;  %v2334_v0 = vld [vmem:[#allocation2 + $0x4d] sm:$0x7f]  ;;  %v2346_v3 = vrot.slane %v2344_v59, 2  ;;  %v2619_v4 = vld [vmem:[#allocation2 + $0x1c] sm:$0x7f]  ;;  %vm2332_vm12 = vcmask 518400  }
 0x19d   : > { %v2336_v5 = vrot.slane %v2334_v0, 3  ;;  %v2611_v8 = vld [vmem:[#allocation2 + $0x15] sm:$0x7f]  ;;  %vm2395_vm13 = vcmask 785923   ;;  %vm2397_vm14 = vcmask 779776   ;;  %vm2445_vm15 = vcmask 1048321  }
 0x19e   : > { %v2409_v6 = vld [vmem:[#allocation2 + $0x1c] sm:$0x7f]  ;;  %v2613_v13 = vrot.slane %v2611_v8, 4  ;;  %v2674_v14 = vld [vmem:[#allocation2 + $0x54] sm:$0x7f]  ;;  %vm16031_vm0 = vcmask 785922  }
 0x19f   : > { %2450 = vrot.lane.b32.xlu0 %v2449_v34, %s12745_s24  ;;  %v2411_v11 = vrot.slane %v2409_v6, 3  ;;  %vm16030_vm1 = vcmask 778752   ;;  %v2666_v19 = vld [vmem:[#allocation2 + $0x4d] sm:$0x7f]  ;;  %v2676_v20 = vrot.slane %v2674_v14, 3  ;;  %vm2342_vm8 = vcmask 519424  }
 0x1a0   : > { %3172 = vrot.lane.b32.xlu1 %v3171_v45, %s12744_s23  ;;  %v2477_v21 = vld [vmem:[#allocation2 + $0x54] sm:$0x7f]  ;;  %v2668_v16 = vrot.slane %v2666_v19, 4  ;;  %v2467_v17 = vld [vmem:[#allocation2 + $0x4d] sm:$0x7f] }
 0x1a1   : > { %v2479_v22 = vrot.slane %v2477_v21, 3  ;;  %v2729_v23 = vld [vmem:[#allocation2 + $0x1d] sm:$0x3f]  ;;  %v2469_v24 = vrot.slane %v2467_v17, 4  ;;  %v2721_v1 = vld [vmem:[#allocation2 + $0x16] sm:$0x3f] }
 0x1a2   : > { %v2731_v7 = vrot.slane %v2729_v23, 3  ;;  %v2627_v25 = vld [vmem:[#allocation2 + $0x23] sm:$0x7f]  ;;  %v2723_v26 = vrot.slane %v2721_v1, 4  ;;  %v2354_v28 = vld [vmem:[#allocation2 + $0x5b] sm:$0x7f] }
 0x1a3   : > { %2875 = vrot.lane.b32.xlu0 %v2874_v48, %s12743_s22  ;;  %v2629_v29 = vrot.slane %v2627_v25, 2  ;;  %v2682_v30 = vld [vmem:[#allocation2 + $0x5b] sm:$0x7f]  ;;  %v2356_v32 = vrot.slane %v2354_v28, 1  ;;  %v2419_v33 = vld [vmem:[#allocation2 + $0x23] sm:$0x7f] }
 0x1a4   : > { %2460 = vrot.lane.b32.xlu1 %v2459_v50, %s12745_s24  ;;  %v2684_v36 = vrot.slane %v2682_v30, 2  ;;  %v2737_v58 = vld [vmem:[#allocation2 + $0x24] sm:$0x3f]  ;;  %v2421_v39 = vrot.slane %v2419_v33, 2  ;;  %v2487_v42 = vld [vmem:[#allocation2 + $0x5b] sm:$0x7f] }
 0x1a5   : > { %v2739_v44 = vrot.slane %v2737_v58, 2  ;;  %v2635_v45 = vld [vmem:[#allocation2 + $0x2a] sm:$0x7f]  ;;  %v2489_v48 = vrot.slane %v2487_v42, 2  ;;  %v2690_v51 = vld [vmem:[#allocation2 + $0x62] sm:$0x7f] }
 0x1a6   : > { %v2637_v50 = vrot.slane %v2635_v45, 1  ;;  %v2364_v40 = vld [vmem:[#allocation2 + $0x62] sm:$0x7f]  ;;  %v2692_v59 = vrot.slane %v2690_v51, 1  ;;  %v3177_v6 = vld [vmem:[#allocation2 + $0xd2] sm:$0x7f] }
 0x1a7   : > { %2983 = vrot.lane.b32.xlu0 %v2982_v52, %s12745_s24  ;;  %v3179_v14 = vrot.slane %v3177_v6, 1  ;;  %v3354_v33 = vld [vmem:[#allocation3 + $0x198] sm:$0xff] }
 0x1a8   : > { %2716 = vrot.lane.b32.xlu1 %v2715_v56, %s12745_s24  ;;  %v3376_v45 = vld [vmem:[#allocation3 + $0x238] sm:$0xff] }
 0x1a9   : > { %v2647_v2 = vpop.permute.xlu1 %2646 }
 0x1aa   : > { %2649 = vst.msk [vmem:[#allocation3 + $0xc0] sm:$0xfe] %vm2377_vm9, %v2647_v2  ;;  %v2308_v62 = vpop.permute.xlu0 %2307  ;;  %v2497_v2 = vld [vmem:[#allocation2 + $0x62] sm:$0x7f] }
 0x1ab   : > { %2709 = vrot.lane.b32.xlu0 %v2708_v57, %s12745_s24  ;;  %2705 = vst.msk [vmem:[#allocation3 + $0xc0] sm:$0x7e] %vm2704_vm10, %v13538_v60  ;;  %v2621_v60 = vrot.slane %v2619_v4, 3  ;;  %v2499_v8 = vrot.slane %v2497_v2, 1  ;;  %v13763_v2 = vld [vmem:[%s16022_s3 + $0x18] sm:$0xff]  }
 0x1ac   : > { %2347 = vrot.lane.b32.xlu1 %v2346_v3, %s12743_s22  ;;  %2311 = vst.msk [vmem:[#allocation3 + $0x10] sm:$0xfc] %vm2310_vm4, %v2308_v62 }
 0x1ad   : > { %2313 = vst.msk [vmem:[#allocation3 + $0x20] sm:$0x1] %vm2312_vm5, %v2308_v62  ;;  %v3122_v62 = vld [vmem:[#allocation2 + $0x9a] sm:$0x7f] }
 0x1ae   : > { %2378 = vst.msk [vmem:[#allocation3 + $0x10] sm:$0xfe] %vm2377_vm9, %v13534_v55  ;;  %v2328_v10 = vpop.permute.xlu1 %2327  ;;  %v2443_v12 = vpop.permute.xlu0 %2442  ;;  %v2399_v55 = vld [vmem:[#allocation2 + $0x15] sm:$0x7f] }
 0x1af   : > { %2337 = vrot.lane.b32.xlu0 %v2336_v5, %s12743_s22  ;;  %2331 = vst.msk [vmem:[#allocation3 + $0x30] sm:$0xf0] %vm2330_vm11, %v2328_v10  ;;  %v2401_v18 = vrot.slane %v2399_v55, 4  ;;  %v2933_v55 = vld [vmem:[#allocation2 + $0x9a] sm:$0x7f] }
 0x1b0   : > { %2333 = vst.msk [vmem:[#allocation3 + $0x40] sm:$0x7] %vm2332_vm12, %v2328_v10  ;;  %2622 = vrot.lane.b32.xlu1 %v2621_v60, %s12743_s22  ;;  %v3124_v60 = vrot.slane %v3122_v62, 1  ;;  %v2935_v19 = vrot.slane %v2933_v55, 1  ;;  %v13780_v62 = vld [vmem:[%s16022_s3 + $0x20] sm:$0xff]  }
 0x1b1   : > { %2396 = vst.msk [vmem:[#allocation3 + $0x30] sm:$0xf8] %vm2395_vm13, %v2393_v54 }
 0x1b2   : > { %2398 = vst.msk [vmem:[#allocation3 + $0x40] sm:$0x3] %vm2397_vm14, %v2393_v54  ;;  %v2429_v54 = vld [vmem:[#allocation2 + $0x2a] sm:$0x7f] }
 0x1b3   : > { %2446 = vst.msk [vmem:[#allocation3 + $0x10] sm:$0xfe] %vm2445_vm15, %v2443_v12  ;;  %2614 = vrot.lane.b32.xlu0 %v2613_v13, %s12743_s22  ;;  %v2431_v0 = vrot.slane %v2429_v54, 1  ;;  %v2880_v13 = vld [vmem:[#allocation2 + $0xd2] sm:$0x7f]  ;;  %v13729_v54 = vld [vmem:[%s16022_s3 + $0x8] sm:$0xff]  }
 0x1b4   : > { %v2318_v15 = vpop.permute.xlu0 %2317  ;;  %2412 = vrot.lane.b32.xlu1 %v2411_v11, %s12744_s23 }
 0x1b5   : > { %2321 = vst.msk [vmem:[#allocation3 + $0x20] sm:$0xf8] %vm2320_vm6, %v2318_v15 }
 0x1b6   : > { %2323 = vst.msk [vmem:[#allocation3 + $0x30] sm:$0x3] %vm16032_vm7, %v2318_v15  ;;  %v3231_v15 = vld [vmem:[#allocation2 + $0x9b] sm:$0x3f] }
 0x1b7   : > { %2402 = vrot.lane.b32.xlu0 %v2401_v18, %s12744_s23  ;;  %2386 = vst.msk [vmem:[#allocation3 + $0x20] sm:$0xfc] %vm16031_vm0, %v2383_v61  ;;  %vm2352_vm0 = vcmask 520448  }
 0x1b8   : > { %2388 = vst.msk [vmem:[#allocation3 + $0x30] sm:$0x1] %vm16030_vm1, %v2383_v61  ;;  %2677 = vrot.lane.b32.xlu1 %v2676_v20, %s12744_s23  ;;  %v2745_v61 = vld [vmem:[#allocation2 + $0x2b] sm:$0x3f]  ;;  %v2988_v20 = vld [vmem:[#allocation2 + $0xd2] sm:$0x7f] }
 0x1b9   : > { %v2747_v4 = vrot.slane %v2745_v61, 1  ;;  %vm16033_vm1 = vcmask 523526   ;;  %v13748_v61 = vld [vmem:[%s16022_s3 + $0x10] sm:$0xff]  }
 0x1bb   : > { %2669 = vrot.lane.b32.xlu0 %v2668_v16, %s12744_s23  ;;  %v3233_v16 = vrot.slane %v3231_v15, 1 }
 0x1bc   : > { %2480 = vrot.lane.b32.xlu1 %v2479_v22, %s12745_s24  ;;  %v2990_v22 = vrot.slane %v2988_v20, 1 }
 0x1bf   : > { %2470 = vrot.lane.b32.xlu0 %v2469_v24, %s12745_s24 }
 0x1c0   : > { %2732 = vrot.lane.b32.xlu1 %v2731_v7, %s12745_s24 }
 0x1c3   : > { %2724 = vrot.lane.b32.xlu0 %v2723_v26, %s12745_s24 }
 0x1c4   : > { %2630 = vrot.lane.b32.xlu1 %v2629_v29, %s12743_s22 }
 0x1c7   : > { %2357 = vrot.lane.b32.xlu0 %v2356_v32, %s12743_s22  ;;  %v3352_v32 = vld [vmem:[#allocation3 + $0x188] sm:$0xff] }
 0x1c8   : > { %2685 = vrot.lane.b32.xlu1 %v2684_v36, %s12744_s23 }
 0x1c9   : > { %v13620_v34 = vpop.permute.xlu1 %2889 }
 0x1cb   : > { %2422 = vrot.lane.b32.xlu0 %v2421_v39, %s12744_s23  ;;  %v13691_v39 = vld [vmem:[#allocation3] sm:$0xff] }
 0x1cc   : > { %v3079_v47 = vpop.permute.xlu0 %3078  ;;  %2740 = vrot.lane.b32.xlu1 %v2739_v44, %s12745_s24  ;;  %v13700_v44 = vpack.c.bf16 %v3354_v33, %v3352_v32 }
 0x1cd   : > { %3081 = vst.msk [vmem:[#allocation3 + $0x220] sm:$0xfe] %vm2593_vm2, %v3079_v47  ;;  %vm2340_vm2 = vcmask 523525   ;;  %v3378_v47 = vld [vmem:[#allocation3 + $0x248] sm:$0xff] }
 0x1ce   : > { %v13625_v49 = vpop.permute.xlu1 %3188 }
 0x1cf   : > { %2490 = vrot.lane.b32.xlu0 %v2489_v48, %s12745_s24  ;;  %v13705_v48 = vld [vmem:[%s16022_s3] sm:$0xff]  }
 0x1d0   : > { %v3102_v52 = vpop.permute.xlu0 %3101  ;;  %2638 = vrot.lane.b32.xlu1 %v2637_v50, %s12743_s22 }
 0x1d1   : > { %3104 = vst.msk [vmem:[#allocation3 + $0x250] sm:$0xf0] %vm2330_vm11, %v3102_v52 }
 0x1d2   : > { %3105 = vst.msk [vmem:[#allocation3 + $0x260] sm:$0x7] %vm2332_vm12, %v3102_v52  ;;  %v3094_v56 = vpop.permute.xlu1 %3093  ;;  %v13722_v52 = vpack.c.bf16 %v3378_v47, %v3376_v45 }
 0x1d3   : > { %2366 = vrot.lane.b32.xlu0 %v2364_v40, %s12743_s22  ;;  %3096 = vst.msk [vmem:[#allocation3 + $0x240] sm:$0xf8] %vm2320_vm6, %v3094_v56 }
 0x1d4   : > { %3097 = vst.msk [vmem:[#allocation3 + $0x250] sm:$0x3] %vm16032_vm7, %v3094_v56  ;;  %v13633_v57 = vpop.permute.xlu0 %2912  ;;  %2693 = vrot.lane.b32.xlu1 %v2692_v59, %s12744_s23  ;;  %vm16036_vm7 = vcmask 785924  }
 0x1d6   : > { %v13637_v3 = vpop.permute.xlu1 %2904 }
 0x1d7   : > { %2432 = vrot.lane.b32.xlu0 %v2431_v0, %s12744_s23 }
 0x1d8   : > { %v13639_v5 = vpop.permute.xlu0 %3210  ;;  %2748 = vrot.lane.b32.xlu1 %v2747_v4, %s12745_s24 }
 0x1da   : > { %v13643_v10 = vpop.permute.xlu1 %3202 }
 0x1db   : > { %2500 = vrot.lane.b32.xlu0 %v2499_v8, %s12745_s24 }
 0x1dc   : > { %v3086_v12 = vpop.permute.xlu0 %3085  ;;  %3125 = vrot.lane.b32.xlu1 %v3124_v60, %s12743_s22 }
 0x1dd   : > { %3088 = vst.msk [vmem:[#allocation3 + $0x230] sm:$0xfc] %vm2310_vm4, %v3086_v12 }
 0x1de   : > { %3089 = vst.msk [vmem:[#allocation3 + $0x240] sm:$0x1] %vm2312_vm5, %v3086_v12  ;;  %v3110_v11 = vpop.permute.xlu1 %3109 }
 0x1df   : > { %2882 = vrot.lane.b32.xlu0 %v2880_v13, %s12743_s22  ;;  %3112 = vst.msk [vmem:[#allocation3 + $0x260] sm:$0xe0] %vm2340_vm2, %v3110_v11  ;;  %v3380_v13 = vld [vmem:[#allocation3 + $0x258] sm:$0xff]  ;;  %s330_s22 = scalar_lea.vmem %s16028_s9, %s16118_s12 }
 0x1e0   : > { %3113 = vst.msk [vmem:[#allocation3 + $0x270] sm:$0xf] %vm2342_vm8, %v3110_v11  ;;  %v13651_v18 = vpop.permute.xlu0 %2896  ;;  %3180 = vrot.lane.b32.xlu1 %v3179_v14, %s12744_s23  ;;  %v3358_v11 = vld [vmem:[#allocation3 + $0x1b8] sm:$0xff]  ;;  %v13804_v14 = vld [vmem:[%s16022_s3 + $0x28] sm:$0xff]  }
 0x1e2   : > { %v13655_v21 = vpop.permute.xlu1 %2920 }
 0x1e3   : > { %2936 = vrot.lane.b32.xlu0 %v2935_v19, %s12744_s23 }
 0x1e4   : > { %v13657_v17 = vpop.permute.xlu0 %3195  ;;  %3234 = vrot.lane.b32.xlu1 %v3233_v16, %s12745_s24 }
 0x1e6   : > { %v13661_v23 = vpop.permute.xlu1 %3218 }
 0x1e7   : > { %2991 = vrot.lane.b32.xlu0 %v2990_v22, %s12745_s24  ;;  %v3384_v22 = vld [vmem:[#allocation3 + $0x278] sm:$0xff] }
 0x1e8   : > { %v13663_v24 = vpop.permute.xlu0 %2928 }
 0x1ea   : > { %v3118_v1 = vpop.permute.xlu1 %3117 }
 0x1eb   : > { %3120 = vst.msk [vmem:[#allocation3 + $0x270] sm:$0xc0] %vm16033_vm1, %v3118_v1  ;;  %vm16035_vm1 = vcmask 780800  }
 0x1ec   : > { %3121 = vst.msk [vmem:[#allocation3 + $0x280] sm:$0x1f] %vm2352_vm0, %v3118_v1  ;;  %v2836_v7 = vpop.permute.xlu0 %2835 }
 0x1ed   : > { %2838 = vst.msk [vmem:[#allocation3 + $0x170] sm:$0xfc] %vm2310_vm4, %v2836_v7  ;;  %vm2465_vm4 = vcmask 1042176  }
 0x1ee   : > { %2839 = vst.msk [vmem:[#allocation3 + $0x180] sm:$0x1] %vm2312_vm5, %v2836_v7  ;;  %v13671_v25 = vpop.permute.xlu1 %3226  ;;  %vm16034_vm5 = vcmask 1048324  }
 0x1ef   : > { %2892 = vst.msk [vmem:[#allocation3 + $0x170] sm:$0xfe] %vm2377_vm9, %v13620_v34 }
 0x1f0   : > { %v2945_v26 = vpop.permute.xlu0 %2944 }
 0x1f1   : > { %2947 = vst.msk [vmem:[#allocation3 + $0x170] sm:$0xfe] %vm2445_vm15, %v2945_v26  ;;  %vm16038_vm15 = vcmask 1043200   ;;  %v13822_v26 = vld [vmem:[%s16022_s3 + $0x30] sm:$0xff]  }
 0x1f2   : > { %v3134_v28 = vpop.permute.xlu1 %3133 }
 0x1f3   : > { %3136 = vst.msk [vmem:[#allocation3 + $0x220] sm:$0xfe] %vm2377_vm9, %v3134_v28  ;;  %vm2455_vm9 = vcmask 1041152  }
 0x1f4   : > { %3191 = vst.msk [vmem:[#allocation3 + $0x220] sm:$0x7e] %vm2704_vm10, %v13625_v49  ;;  %vm2463_vm10 = vcmask 1048323  }
 0x1f5   : > { %v2860_v29 = vpop.permute.xlu0 %2859 }
 0x1f6   : > { %2862 = vst.msk [vmem:[#allocation3 + $0x1a0] sm:$0xe0] %vm2340_vm2, %v2860_v29  ;;  %v2852_v30 = vpop.permute.xlu1 %2851 }
 0x1f7   : > { %2863 = vst.msk [vmem:[#allocation3 + $0x1b0] sm:$0xf] %vm2342_vm8, %v2860_v29 }
 0x1f8   : > { %2915 = vst.msk [vmem:[#allocation3 + $0x1a0] sm:$0xf0] %vm16036_vm7, %v13633_v57  ;;  %v3349_v58 = vld [vmem:[#allocation3 + $0x170] sm:$0xff] }
 0x1f9   : > { %2916 = vst.msk [vmem:[#allocation3 + $0x1b0] sm:$0x7] %vm16035_vm1, %v13633_v57  ;;  %v3157_v36 = vpop.permute.xlu0 %3156  ;;  %v13694_v42 = vpack.c.bf16 %v3349_v58, %v13691_v39 }
 0x1fa   : > { %2854 = vst.msk [vmem:[#allocation3 + $0x190] sm:$0xf0] %vm2330_vm11, %v2852_v30  ;;  %v3149_v34 = vpop.permute.xlu1 %3148 }
 0x1fb   : > { %2855 = vst.msk [vmem:[#allocation3 + $0x1a0] sm:$0x7] %vm2332_vm12, %v2852_v30  ;;  %3521 = vmatmul.mubr.bf16.vlgmr.msra.gmra.mrb[60].mxu0 %v13694_v42  ;;  %v3373_v49 = vld [vmem:[#allocation3 + $0x220] sm:$0xff] }
 0x1fc   : > { %2907 = vst.msk [vmem:[#allocation3 + $0x190] sm:$0xf8] %vm2395_vm13, %v13637_v3  ;;  %3151 = vst.msk [vmem:[#allocation3 + $0x240] sm:$0xf8] %vm2395_vm13, %v3149_v34  ;;  %10179 = vmatprep.mubr.msk.bf16.mxu0 %vm804_vm3, %v13700_v44  ;;  %v13717_v51 = vpack.c.bf16 %v3373_v49, %v13691_v39  ;;  %3626 = vmatpush1.bf16.msra.mxu0 %v13705_v48 }
 0x1fd   : > { %2908 = vst.msk [vmem:[#allocation3 + $0x1a0] sm:$0x3] %vm2397_vm14, %v13637_v3  ;;  %3152 = vst.msk [vmem:[#allocation3 + $0x250] sm:$0x3] %vm2397_vm14, %v3149_v34  ;;  %v2968_v50 = vpop.permute.xlu0 %2967  ;;  %3627 = vmatprep.subr.bf16.mxu0 %v12746_v41 }
 0x1fe   : > { %3159 = vst.msk [vmem:[#allocation3 + $0x250] sm:$0xf0] %vm16036_vm7, %v3157_v36  ;;  %v2662_v40 = vpop.permute.xlu1 %2661  ;;  %3735 = vmatmul.mubr.bf16.vlgmr.msra.gmra.mrb[68].mxu1 %v13717_v51  ;;  %vm16058_vm7 = vcmask 523526  }
 0x1ff   : > { %3160 = vst.msk [vmem:[#allocation3 + $0x260] sm:$0x7] %vm16035_vm1, %v3157_v36  ;;  %10197 = vmatprep.mubr.msk.bf16.mxu1 %vm804_vm3, %v13722_v52  ;;  %3780 = vmatpush1.bf16.msra.mxu1 %v13705_v48  ;;  %vm16040_vm1 = vcmask 781824  }
 0x200   : > { %3213 = vst.msk [vmem:[#allocation3 + $0x250] sm:$0xf0] %vm16034_vm5, %v13639_v5  ;;  %2970 = vst.msk [vmem:[#allocation3 + $0x1a0] sm:$0xf0] %vm16034_vm5, %v2968_v50  ;;  %3781 = vmatprep.subr.bf16.mxu1 %v12746_v41  ;;  %3628 = vmatpush1.bf16.msra.mxu0 %v13729_v54  ;;  %vm16053_vm5 = vcmask 517376  }
 0x201   : > { %3214 = vst.msk [vmem:[#allocation3 + $0x260] sm:$0x3] %vm2465_vm4, %v13639_v5  ;;  %v2844_v56 = vpop.permute.xlu0 %2843  ;;  %3629 = vmatprep.subr.bf16.mxu0 %v12746_v41 }
 0x202   : > { %3205 = vst.msk [vmem:[#allocation3 + $0x240] sm:$0xf8] %vm2463_vm10, %v13643_v10  ;;  %v2960_v59 = vpop.permute.xlu1 %2959 }
 0x203   : > { %3206 = vst.msk [vmem:[#allocation3 + $0x250] sm:$0x1] %vm2455_vm9, %v13643_v10  ;;  %3782 = vmatpush1.bf16.msra.mxu1 %v13729_v54  ;;  %v3382_v10 = vld [vmem:[#allocation3 + $0x268] sm:$0xff] }
 0x204   : > { %2971 = vst.msk [vmem:[#allocation3 + $0x1b0] sm:$0x7] %vm16038_vm15, %v2968_v50  ;;  %3783 = vmatprep.subr.bf16.mxu1 %v12746_v41  ;;  %3630 = vmatpush1.bf16.msra.mxu0 %v13748_v61  ;;  %v13798_v55 = vpack.c.bf16 %v3382_v10, %v3380_v13 }
 0x205   : > { %2664 = vst.msk [vmem:[#allocation3 + $0xe0] sm:$0xf8] %vm2395_vm13, %v2662_v40  ;;  %vm16054_vm13 = vcmask 785922   ;;  %v3141_v57 = vpop.permute.xlu0 %3140  ;;  %3631 = vmatprep.subr.bf16.mxu0 %v12746_v41 }
 0x206   : > { %2665 = vst.msk [vmem:[#allocation3 + $0xf0] sm:$0x3] %vm2397_vm14, %v2662_v40  ;;  %vm16055_vm14 = vcmask 778752   ;;  %v2868_v0 = vpop.permute.xlu1 %2867 }
 0x207   : > { %2846 = vst.msk [vmem:[#allocation3 + $0x180] sm:$0xf8] %vm2320_vm6, %v2844_v56  ;;  %vm2453_vm6 = vcmask 1048322   ;;  %3784 = vmatpush1.bf16.msra.mxu1 %v13748_v61 }
 0x208   : > { %2847 = vst.msk [vmem:[#allocation3 + $0x190] sm:$0x3] %vm16053_vm5, %v2844_v56  ;;  %vm16056_vm5 = vmmov %vm16054_vm13  ;;  %3785 = vmatprep.subr.bf16.mxu1 %v12746_v41  ;;  %3632 = vmatpush1.bf16.msra.mxu0 %v13763_v2 }
 0x209   : > { %2899 = vst.msk [vmem:[#allocation3 + $0x180] sm:$0xfc] %vm16054_vm13, %v13651_v18  ;;  %vm16057_vm13 = vmmov %vm16055_vm14  ;;  %v2952_v3 = vpop.permute.xlu0 %2951  ;;  %3633 = vmatprep.subr.bf16.mxu0 %v12746_v41 }
 0x20a   : > { %2900 = vst.msk [vmem:[#allocation3 + $0x190] sm:$0x1] %vm16055_vm14, %v13651_v18  ;;  %vm16037_vm14 = vcmask 785925   ;;  %v3165_v4 = vpop.permute.xlu1 %3164  ;;  %v3379_v30 = vld [vmem:[#allocation3 + $0x250] sm:$0xff] }
 0x20b   : > { %2962 = vst.msk [vmem:[#allocation3 + $0x190] sm:$0xf8] %vm2463_vm10, %v2960_v59  ;;  %3786 = vmatpush1.bf16.msra.mxu1 %v13763_v2  ;;  %v4717_v45 = vld [vmem:[#allocation3 + $0x250] sm:$0xff] }
 0x20c   : > { %2963 = vst.msk [vmem:[#allocation3 + $0x1a0] sm:$0x3] %vm2465_vm4, %v2960_v59  ;;  %3787 = vmatprep.subr.bf16.mxu1 %v12746_v41  ;;  %3634 = vmatpush1.bf16.msra.mxu0 %v13780_v62 }
 0x20d   : > { %3143 = vst.msk [vmem:[#allocation3 + $0x230] sm:$0xfc] %vm16056_vm5, %v3141_v57  ;;  %v2654_v5 = vpop.permute.xlu0 %2653  ;;  %vm16041_vm5 = vcmask 1044224   ;;  %3635 = vmatprep.subr.bf16.mxu0 %v12746_v41 }
 0x20e   : > { %3144 = vst.msk [vmem:[#allocation3 + $0x240] sm:$0x1] %vm16057_vm13, %v3141_v57  ;;  %vm16059_vm13 = vcmask 785922   ;;  %v2976_v6 = vpop.permute.xlu1 %2975 }
 0x20f   : > { %3198 = vst.msk [vmem:[#allocation3 + $0x230] sm:$0xfc] %vm2453_vm6, %v13657_v17  ;;  %2954 = vst.msk [vmem:[#allocation3 + $0x180] sm:$0xfc] %vm2453_vm6, %v2952_v3  ;;  %3788 = vmatpush1.bf16.msra.mxu1 %v13780_v62  ;;  %v3356_v17 = vld [vmem:[#allocation3 + $0x1a8] sm:$0xff] }
 0x210   : > { %2870 = vst.msk [vmem:[#allocation3 + $0x1b0] sm:$0xc0] %vm16058_vm7, %v2868_v0  ;;  %vm16039_vm7 = vcmask 1048325   ;;  %3789 = vmatprep.subr.bf16.mxu1 %v12746_v41  ;;  %3636 = vmatpush1.bf16.msra.mxu0 %v13804_v14  ;;  %v13817_v7 = vpack.c.bf16 %v3358_v11, %v3356_v17 }
 0x211   : > { %2871 = vst.msk [vmem:[#allocation3 + $0x1c0] sm:$0x1f] %vm2352_vm0, %v2868_v0  ;;  %v2451_v18 = vpop.permute.xlu0 %2450  ;;  %3637 = vmatprep.subr.bf16.mxu0 %v12746_v41 }
 0x212   : > { %2923 = vst.msk [vmem:[#allocation3 + $0x1b0] sm:$0xe0] %vm16037_vm14, %v13655_v21  ;;  %3167 = vst.msk [vmem:[#allocation3 + $0x260] sm:$0xe0] %vm16037_vm14, %v3165_v4  ;;  %vm16060_vm14 = vcmask 778752   ;;  %v3173_v1 = vpop.permute.xlu1 %3172 }
 0x213   : > { %2924 = vst.msk [vmem:[#allocation3 + $0x1c0] sm:$0xf] %vm16040_vm1, %v13655_v21  ;;  %3168 = vst.msk [vmem:[#allocation3 + $0x270] sm:$0xf] %vm16040_vm1, %v3165_v4  ;;  %vm2362_vm1 = vcmask 521472   ;;  %3790 = vmatpush1.bf16.msra.mxu1 %v13804_v14  ;;  %v3355_v47 = vld [vmem:[#allocation3 + $0x1a0] sm:$0xff] }
 0x214   : > { %2955 = vst.msk [vmem:[#allocation3 + $0x190] sm:$0x1] %vm2455_vm9, %v2952_v3  ;;  %2456 = vst.msk [vmem:[#allocation3 + $0x30] sm:$0x1] %vm2455_vm9, %v2451_v18  ;;  %3791 = vmatprep.subr.bf16.mxu1 %v12746_v41  ;;  %3638 = vmatpush1.bf16.msra.mxu0 %v13822_v26  ;;  %v4542_v59 = vld [vmem:[#allocation3 + $0x1a0] sm:$0xff]  ;;  %v3360_v3 = vld [vmem:[#allocation3 + $0x1c8] sm:$0xff] }
 0x215   : > { %3221 = vst.msk [vmem:[#allocation3 + $0x260] sm:$0xe0] %vm16039_vm7, %v13661_v23  ;;  %v3377_v8 = vld [vmem:[#allocation3 + $0x240] sm:$0xff]  ;;  %2978 = vst.msk [vmem:[#allocation3 + $0x1b0] sm:$0xe0] %vm16039_vm7, %v2976_v6  ;;  %vm2360_vm7 = vcmask 523527   ;;  %v2876_v58 = vpop.permute.xlu0 %2875  ;;  %3639 = vmatprep.subr.bf16.mxu0 %v12746_v41 }
 0x216   : > { %3222 = vst.msk [vmem:[#allocation3 + $0x270] sm:$0x7] %vm16038_vm15, %v13661_v23  ;;  %v3375_v60 = vld [vmem:[#allocation3 + $0x230] sm:$0xff]  ;;  %v13806_v15 = vld [vmem:[#allocation3 + $0x240] sm:$0xff]  ;;  %vm2493_vm15 = vcmask 1048326  }
 0x217   : > { %2656 = vst.msk [vmem:[#allocation3 + $0xd0] sm:$0xfc] %vm16059_vm13, %v2654_v5  ;;  %v13794_v12 = vpack.c.bf16 %v3377_v8, %v3375_v60  ;;  %v3351_v19 = vld [vmem:[#allocation3 + $0x180] sm:$0xff]  ;;  %vm16042_vm13 = vcmask 782848   ;;  %v5776_v21 = vld [vmem:[#allocation3 + $0x230] sm:$0xfc]  ;;  %3792 = vmatpush1.bf16.msra.mxu1 %v13822_v26 }
 0x218   : > { %2657 = vst.msk [vmem:[#allocation3 + $0xe0] sm:$0x1] %vm16060_vm14, %v2654_v5  ;;  %vm2425_vm14 = vcmask 785926   ;;  %v3386_v23 = vld [vmem:[#allocation3 + $0x288] sm:$0x7f]  ;;  %v5794_v36 = vpack.c.bf16 %v13806_v15, %v5776_v21  ;;  %3793 = vmatprep.subr.bf16.mxu1 %v12746_v41  ;;  %v13884_v21 = vld [vmem:[%s16022_s3 + $0x40] sm:$0xff]  }
 0x219   : > { %2979 = vst.msk [vmem:[#allocation3 + $0x1c0] sm:$0xf] %vm16041_vm5, %v2976_v6  ;;  %3743 = vmatmul.mubr.bf16.gmra.mrb[72].mxu1 %v13794_v12  ;;  %v5631_v29 = vld [vmem:[#allocation3 + $0x180] sm:$0xfc]  ;;  %v13846_v40 = vpack.c.bf16 %v3386_v23, %v3384_v22  ;;  %v3362_v4 = vld [vmem:[#allocation3 + $0x1d8] sm:$0x7f]  ;;  %v2984_v60 = vpop.permute.xlu0 %2983 }
 0x21a   : > { %2454 = vst.msk [vmem:[#allocation3 + $0x20] sm:$0xfc] %vm2453_vm6, %v2451_v18  ;;  %10198 = vmatprep.mubr.msk.bf16.mxu1 %vm804_vm3, %v13798_v55  ;;  %v5814_v8 = vrot.slane %v5794_v36, 1  ;;  %v13874_v18 = vpack.c.bf16 %v3362_v4, %v3360_v3  ;;  %v13904_v36 = vld [vmem:[%s16022_s3 + $0x48] sm:$0xff]  }
 0x21b   : > { %v3353_v20 = vld [vmem:[#allocation3 + $0x190] sm:$0xff]  ;;  %3175 = vst.msk [vmem:[#allocation3 + $0x270] sm:$0xc0] %vm2425_vm14, %v3173_v1  ;;  %v13922_v3 = vld [vmem:[#allocation3 + $0xe8] sm:$0xff] }
 0x21c   : > { %v13814_v16 = vpack.c.bf16 %v3353_v20, %v3351_v19  ;;  %v4540_v28 = vld [vmem:[#allocation3 + $0x190] sm:$0xff]  ;;  %3176 = vst.msk [vmem:[#allocation3 + $0x280] sm:$0x1f] %vm16042_vm13, %v3173_v1  ;;  %v3381_v32 = vld [vmem:[#allocation3 + $0x260] sm:$0xff]  ;;  %v3324_v1 = vld [vmem:[#allocation3 + $0xb8] sm:$0xff] }
 0x21d   : > { %v4719_v33 = vld [vmem:[#allocation3 + $0x260] sm:$0xff]  ;;  %3229 = vst.msk [vmem:[#allocation3 + $0x270] sm:$0xc0] %vm2493_vm15, %v13671_v25  ;;  %v13836_v34 = vpack.c.bf16 %v3381_v32, %v3379_v30  ;;  %v5649_v49 = vpack.c.bf16 %v4540_v28, %v5631_v29  ;;  %v3357_v56 = vld [vmem:[#allocation3 + $0x1b0] sm:$0xff]  ;;  %v2710_v22 = vpop.permute.xlu0 %2709  ;;  %v3326_v28 = vld [vmem:[#allocation3 + $0xc8] sm:$0xff] }
 0x21e   : > { %3529 = vmatmul.mubr.bf16.gmra.mrb[64].mxu0 %v13814_v16  ;;  %3230 = vst.msk [vmem:[#allocation3 + $0x280] sm:$0xf] %vm16041_vm5, %v13671_v25  ;;  %v5796_v50 = vpack.c.bf16 %v4719_v33, %v4717_v45  ;;  %v2461_v25 = vpop.permute.xlu1 %2460  ;;  %vm2495_vm5 = vcmask 1045248   ;;  %v4544_v57 = vld [vmem:[#allocation3 + $0x1b0] sm:$0xff]  ;;  %v13852_v0 = vpack.c.bf16 %v3357_v56, %v3355_v47  ;;  %v3340_v30 = vpack.c.bf16 %v3326_v28, %v3324_v1  ;;  %v3300_v32 = vld [vmem:[#allocation3 + $0x8] sm:$0xff]  ;;  %v3302_v33 = vld [vmem:[#allocation3 + $0x18] sm:$0xff] }
 0x21f   : > { %10180 = vmatprep.mubr.msk.bf16.mxu0 %vm804_vm3, %v13817_v7  ;;  %2878 = vst.msk [vmem:[#allocation3 + $0x1c0] sm:$0x80] %vm2360_vm7, %v2876_v58  ;;  %v5651_v5 = vpack.c.bf16 %v4544_v57, %v4542_v59  ;;  %v5669_v6 = vrot.slane %v5649_v49, 1  ;;  %v3325_v56 = vld [vmem:[#allocation3 + $0xc0] sm:$0xff]  ;;  %v13920_v57 = vld [vmem:[#allocation3 + $0xd8] sm:$0xff] }
 0x220   : > { %2879 = vst.msk [vmem:[#allocation3 + $0x1d0] sm:$0x3f] %vm2362_vm1, %v2876_v58  ;;  %v13859_v10 = vrot.slane %v5796_v50, 1 }
 0x221   : > { %2931 = vst.msk [vmem:[#allocation3 + $0x1c0] sm:$0xc0] %vm2425_vm14, %v13663_v24  ;;  %3751 = vmatmul.mubr.bf16.gmra.mrb[76].mxu1 %v13836_v34  ;;  %v13868_v13 = vrot.slane %v5651_v5, 1  ;;  %v2338_v58 = vpop.permute.xlu0 %2337  ;;  %v3339_v5 = vpack.c.bf16 %v3325_v56, %v13691_v39  ;;  %v13972_v56 = vld [vmem:[#allocation3 + $0x58] sm:$0xff] }
 0x222   : > { %2932 = vst.msk [vmem:[#allocation3 + $0x1d0] sm:$0x1f] %vm16042_vm13, %v13663_v24  ;;  %v13857_v24 = vld [vmem:[%s16022_s3 + $0x38] sm:$0xff]   ;;  %10199 = vmatprep.mubr.msk.bf16.mxu1 %vm804_vm3, %v13846_v40  ;;  %vm16061_vm13 = vcmask 1046528   ;;  %v2717_v15 = vpop.permute.xlu1 %2716 }
 0x223   : > { %2464 = vst.msk [vmem:[#allocation3 + $0x30] sm:$0xf8] %vm2463_vm10, %v2461_v25  ;;  %3640 = vmatpush1.bf16.msra.mxu0 %v13857_v24  ;;  %v13872_v11 = vsel %vm16061_vm13, %v5814_v8, %v13859_v10  ;;  %2719 = vst.msk [vmem:[#allocation3 + $0xe0] sm:$0xf8] %vm2463_vm10, %v2717_v15  ;;  %3794 = vmatpush1.bf16.msra.mxu1 %v13857_v24  ;;  %v13888_v17 = vsel %vm16061_vm13, %v5669_v6, %v13868_v13  ;;  %v3301_v8 = vld [vmem:[#allocation3 + $0x10] sm:$0xff]  ;;  %v13932_v6 = vld [vmem:[#allocation3 + $0x28] sm:$0xff] }
 0x224   : > { %2466 = vst.msk [vmem:[#allocation3 + $0x40] sm:$0x3] %vm2465_vm4, %v2461_v25  ;;  %16062 = vst [vmem:[#allocation14_spill] sm:$0xff] %v13872_v11  ;;  %3641 = vmatprep.subr.bf16.mxu0 %v12746_v41  ;;  %v3383_v19 = vld [vmem:[#allocation3 + $0x270] sm:$0xff]  ;;  %3795 = vmatprep.subr.bf16.mxu1 %v12746_v41  ;;  %v3316_v25 = vpack.c.bf16 %v3302_v33, %v3300_v32  ;;  %v13953_v32 = vld [vmem:[#allocation3 + $0x108] sm:$0xff] }
 0x225   : > { %2986 = vst.msk [vmem:[#allocation3 + $0x1c0] sm:$0xc0] %vm2493_vm15, %v2984_v60  ;;  %v3385_v20 = vld [vmem:[#allocation3 + $0x280] sm:$0x7f]  ;;  %16063 = vst [vmem:[#allocation15_spill] sm:$0xff] %v13888_v17  ;;  %v2615_v59 = vpop.permute.xlu0 %2614  ;;  %v12702_v33 = vld [vmem:[%s16022_s3 + $0x58] sm:$0xff]  }
 0x226   : > { %2987 = vst.msk [vmem:[#allocation3 + $0x1d0] sm:$0x1f] %vm2495_vm5, %v2984_v60  ;;  %3537 = vmatmul.mubr.bf16.gmra.mrb[68].mxu0 %v13852_v0  ;;  %v13892_v23 = vpack.c.bf16 %v3385_v20, %v3383_v19  ;;  %v2348_v29 = vpop.permute.xlu1 %2347  ;;  %v3342_v60 = vpack.c.bf16 %v13922_v3, %v13920_v57  ;;  %v3315_v20 = vpack.c.bf16 %v3301_v8, %v13691_v39  ;;  %v13982_v8 = vld [vmem:[#allocation3 + $0x48] sm:$0xff] }
 0x227   : > { %2720 = vst.msk [vmem:[#allocation3 + $0xf0] sm:$0x1] %vm2455_vm9, %v2717_v15  ;;  %10181 = vmatprep.mubr.msk.bf16.mxu0 %vm804_vm3, %v13874_v18  ;;  %3642 = vmatpush1.bf16.msra.mxu0 %v13884_v21  ;;  %vm16064_vm9 = vcmask 523526   ;;  %v13934_v15 = vld [vmem:[#allocation3 + $0x38] sm:$0xff]  ;;  %v3859_v11 = vld [vmem:[#allocation3 + $0x88] sm:$0xff] }
 0x228   : > { %2712 = vst.msk [vmem:[#allocation3 + $0xd0] sm:$0xfc] %vm2453_vm6, %v2710_v22  ;;  %3643 = vmatprep.subr.bf16.mxu0 %v12746_v41  ;;  %3796 = vmatpush1.bf16.msra.mxu1 %v13884_v21  ;;  %v12701_v22 = vld [vmem:[%s16022_s3 + $0x50] sm:$0xff]   ;;  %v3318_v28 = vpack.c.bf16 %v13934_v15, %v13932_v6 }
 0x229   : > { %2351 = vst.msk [vmem:[#allocation3 + $0x50] sm:$0xc0] %vm16064_vm9, %v2348_v29  ;;  %3759 = vmatmul.mubr.bf16.gmra.mrb[80].mxu1 %v13892_v23  ;;  %3797 = vmatprep.subr.bf16.mxu1 %v12746_v41  ;;  %v2403_v19 = vpop.permute.xlu0 %2402 }
 0x22a   : > { %2353 = vst.msk [vmem:[#allocation3 + $0x60] sm:$0x1f] %vm2352_vm0, %v2348_v29  ;;  %10200 = vmatprep.mubr.msk.bf16.mxu1 %vm804_vm3, %v3340_v30  ;;  %v2623_v50 = vpop.permute.xlu1 %2622  ;;  %v13950_v30 = vld [vmem:[#allocation3 + $0xe0] sm:$0xff] }
 0x22b   : > { %2341 = vst.msk [vmem:[#allocation3 + $0x40] sm:$0xe0] %vm2340_vm2, %v2338_v58  ;;  %3644 = vmatpush1.bf16.msra.mxu0 %v13904_v36  ;;  %2625 = vst.msk [vmem:[#allocation3 + $0x100] sm:$0xe0] %vm2340_vm2, %v2623_v50  ;;  %vm16066_vm2 = vcmask 781824  }
 0x22c   : > { %v3359_v45 = vld [vmem:[#allocation3 + $0x1c0] sm:$0xff]  ;;  %2343 = vst.msk [vmem:[#allocation3 + $0x50] sm:$0xf] %vm2342_vm8, %v2338_v58  ;;  %3947 = vmatprep.subr.bf16.mxu0 %v12746_v41  ;;  %2626 = vst.msk [vmem:[#allocation3 + $0x110] sm:$0xf] %vm2342_vm8, %v2623_v50  ;;  %3798 = vmatpush1.bf16.msra.mxu1 %v13904_v36  ;;  %vm16065_vm8 = vcmask 785925  }
 0x22d   : > { %v3361_v47 = vld [vmem:[#allocation3 + $0x1d0] sm:$0x7f]  ;;  %4179 = vmatprep.subr.bf16.mxu1 %v12746_v41  ;;  %2617 = vst.msk [vmem:[#allocation3 + $0xf0] sm:$0xf0] %vm2330_vm11, %v2615_v59  ;;  %vm16067_vm11 = vcmask 785924   ;;  %vm16069_vm10 = vmmov %vm16065_vm8  ;;  %v2670_v39 = vpop.permute.xlu0 %2669 }
 0x22e   : > { %v13911_v49 = vpack.c.bf16 %v3361_v47, %v3359_v45  ;;  %2618 = vst.msk [vmem:[#allocation3 + $0x100] sm:$0x7] %vm2332_vm12, %v2615_v59  ;;  %v2413_v4 = vpop.permute.xlu1 %2412  ;;  %vm16068_vm12 = vcmask 780800   ;;  %vm16070_vm6 = vmmov %vm16066_vm2  ;;  %v13963_v47 = vld [vmem:[#allocation3 + $0xf8] sm:$0xff]  ;;  %v13966_v50 = vld [vmem:[#allocation3 + $0x30] sm:$0xff] }
 0x22f   : > { %2416 = vst.msk [vmem:[#allocation3 + $0x50] sm:$0xe0] %vm16065_vm8, %v2413_v4  ;;  %v13948_v29 = vld [vmem:[#allocation3 + $0xd0] sm:$0xff]  ;;  %vm16071_vm13 = vmmov %vm16067_vm11  ;;  %vm16073_vm8 = vcmask 1048325  }
 0x230   : > { %3545 = vmatmul.mubr.bf16.gmra.mrb[72].mxu0 %v13911_v49  ;;  %2418 = vst.msk [vmem:[#allocation3 + $0x60] sm:$0xf] %vm16066_vm2, %v2413_v4  ;;  %vm16072_vm9 = vmmov %vm16068_vm12  ;;  %v3341_v45 = vpack.c.bf16 %v13950_v30, %v13948_v29  ;;  %vm16074_vm2 = vcmask 1044224   ;;  %v13974_v4 = vld [vmem:[#allocation3 + $0x20] sm:$0xff] }
 0x231   : > { %10192 = vmatprep.mubr.msk.bf16.mxu0 %vm804_vm3, %v3316_v25  ;;  %3812 = vmatmul.mubr.bf16.vlgmr.msra.gmra.mrb[68].mxu1 %v3339_v5  ;;  %2406 = vst.msk [vmem:[#allocation3 + $0x40] sm:$0xf0] %vm16067_vm11, %v2403_v19  ;;  %v3344_v25 = vpack.c.bf16 %v13953_v32, %v13963_v47  ;;  %v2471_v59 = vpop.permute.xlu0 %2470  ;;  %vm16075_vm11 = vcmask 1048324   ;;  %v3317_v5 = vpack.c.bf16 %v13966_v50, %v13974_v4 }
 0x232   : > { %2408 = vst.msk [vmem:[#allocation3 + $0x50] sm:$0x7] %vm16068_vm12, %v2403_v19  ;;  %10201 = vmatprep.mubr.msk.bf16.mxu1 %vm804_vm3, %v3342_v60  ;;  %4180 = vmatpush1.bf16.msra.mxu1 %v12701_v22  ;;  %v2678_v1 = vpop.permute.xlu1 %2677  ;;  %vm16076_vm12 = vcmask 1043200   ;;  %v12703_v60 = vld [vmem:[%s16022_s3 + $0x60] sm:$0xff]  }
 0x233   : > { %4181 = vmatprep.subr.bf16.mxu1 %v12746_v41  ;;  %2680 = vst.msk [vmem:[#allocation3 + $0x100] sm:$0xe0] %vm16069_vm10, %v2678_v1  ;;  %vm16077_vm10 = vmmov %vm16073_vm8 }
 0x234   : > { %2681 = vst.msk [vmem:[#allocation3 + $0x110] sm:$0xf] %vm16070_vm6, %v2678_v1  ;;  %vm16078_vm6 = vmmov %vm16076_vm12  ;;  %v12704_v1 = vld [vmem:[%s16022_s3 + $0x68] sm:$0xff]  }
 0x235   : > { %2672 = vst.msk [vmem:[#allocation3 + $0xf0] sm:$0xf0] %vm16071_vm13, %v2670_v39  ;;  %vm16079_vm13 = vmmov %vm16075_vm11 }
 0x236   : > { %2673 = vst.msk [vmem:[#allocation3 + $0x100] sm:$0x7] %vm16072_vm9, %v2670_v39  ;;  %4182 = vmatpush1.bf16.msra.mxu1 %v12702_v33  ;;  %v2481_v58 = vpop.permute.xlu1 %2480  ;;  %vm16080_vm9 = vcmask 523526   ;;  %v14002_v39 = vld [vmem:[#allocation3 + $0x68] sm:$0xff] }
 0x237   : > { %4183 = vmatprep.subr.bf16.mxu1 %v12746_v41  ;;  %2484 = vst.msk [vmem:[#allocation3 + $0x50] sm:$0xe0] %vm16073_vm8, %v2481_v58  ;;  %vm16083_vm8 = vmmov %vm16074_vm2 }
 0x238   : > { %3658 = vmatmul.mubr.bf16.vlgmr.msra.gmra.mrb[60].mxu0 %v3315_v20  ;;  %2486 = vst.msk [vmem:[#allocation3 + $0x60] sm:$0xf] %vm16074_vm2, %v2481_v58  ;;  %v3320_v20 = vpack.c.bf16 %v13972_v56, %v13982_v8  ;;  %vm2437_vm2 = vcmask 783872  }
 0x239   : > { %3948 = vmatpush1.bf16.msra.mxu0 %v12701_v22  ;;  %10193 = vmatprep.mubr.msk.bf16.mxu0 %vm804_vm3, %v3318_v28  ;;  %2474 = vst.msk [vmem:[#allocation3 + $0x40] sm:$0xf0] %vm16075_vm11, %v2471_v59  ;;  %v2725_v22 = vpop.permute.xlu0 %2724  ;;  %vm3868_vm11 = vsmask.f32 7424 }
 0x23a   : > { %3949 = vmatprep.subr.bf16.mxu0 %v12746_v41  ;;  %3820 = vmatmul.mubr.bf16.gmra.mrb[72].mxu1 %v3341_v45  ;;  %2476 = vst.msk [vmem:[#allocation3 + $0x50] sm:$0x7] %vm16076_vm12, %v2471_v59  ;;  %v2733_v19 = vpop.permute.xlu1 %2732  ;;  %v4078_v59 = vld [vmem:[#allocation3 + $0xc8] sm:$0xfe]  ;;  %vm2503_vm12 = vcmask 1048327  }
 0x23b   : > { %10202 = vmatprep.mubr.msk.bf16.mxu1 %vm804_vm3, %v3344_v25  ;;  %4184 = vmatpush1.bf16.msra.mxu1 %v12703_v60  ;;  %2735 = vst.msk [vmem:[#allocation3 + $0x100] sm:$0xe0] %vm16077_vm10, %v2733_v19  ;;  %vm2505_vm10 = vcmask 1046272  }
 0x23c   : > { %2736 = vst.msk [vmem:[#allocation3 + $0x110] sm:$0x7] %vm16078_vm6, %v2733_v19  ;;  %4185 = vmatprep.subr.bf16.mxu1 %v12746_v41  ;;  %v12705_v19 = vld [vmem:[%s16022_s3 + $0x70] sm:$0xff]  }
 0x23d   : > { %3950 = vmatpush1.bf16.msra.mxu0 %v12702_v33  ;;  %2727 = vst.msk [vmem:[#allocation3 + $0xf0] sm:$0xf0] %vm16079_vm13, %v2725_v22  ;;  %v3314_v33 = vld [vmem:[#allocation3 + $0x78] sm:$0x7f]  ;;  %v2358_v58 = vpop.permute.xlu0 %2357 }
 0x23e   : > { %3951 = vmatprep.subr.bf16.mxu0 %v12746_v41  ;;  %2728 = vst.msk [vmem:[#allocation3 + $0x100] sm:$0x3] %vm2465_vm4, %v2725_v22  ;;  %v2631_v28 = vpop.permute.xlu1 %2630  ;;  %v3322_v22 = vpack.c.bf16 %v3314_v33, %v14002_v39 }
 0x23f   : > { %4186 = vmatpush1.bf16.msra.mxu1 %v12704_v1  ;;  %2633 = vst.msk [vmem:[#allocation3 + $0x110] sm:$0xc0] %vm16080_vm9, %v2631_v28 }
 0x240   : > { %3666 = vmatmul.mubr.bf16.gmra.mrb[64].mxu0 %v3317_v5  ;;  %2634 = vst.msk [vmem:[#allocation3 + $0x120] sm:$0x1f] %vm2352_vm0, %v2631_v28  ;;  %4187 = vmatprep.subr.bf16.mxu1 %v12746_v41  ;;  %v14004_v45 = vld [vmem:[#allocation3 + $0x40] sm:$0xff]  ;;  %vm16081_vm0 = vcmask 782848   ;;  %v3336_v28 = vld [vmem:[#allocation3 + $0x118] sm:$0xff] }
 0x241   : > { %3952 = vmatpush1.bf16.msra.mxu0 %v12703_v60  ;;  %10194 = vmatprep.mubr.msk.bf16.mxu0 %vm804_vm3, %v3320_v20  ;;  %v14006_v25 = vld [vmem:[#allocation3 + $0x50] sm:$0xff]  ;;  %2361 = vst.msk [vmem:[#allocation3 + $0x60] sm:$0x80] %vm2360_vm7, %v2358_v58  ;;  %v14014_v60 = vpack.c.bf16 %v13920_v57, %v4078_v59  ;;  %v2423_v59 = vpop.permute.xlu0 %2422  ;;  %vm16082_vm4 = vmmov %vm16081_vm0 }
 0x242   : > { %3953 = vmatprep.subr.bf16.mxu0 %v12746_v41  ;;  %2363 = vst.msk [vmem:[#allocation3 + $0x70] sm:$0x3f] %vm2362_vm1, %v2358_v58  ;;  %v3319_v5 = vpack.c.bf16 %v14006_v25, %v14004_v45  ;;  %v2686_v20 = vpop.permute.xlu1 %2685  ;;  %v3338_v58 = vld [vmem:[#allocation3 + $0x128] sm:$0x7f] }
 0x243   : > { %4188 = vmatpush1.bf16.msra.mxu1 %v12705_v19  ;;  %2688 = vst.msk [vmem:[#allocation3 + $0x110] sm:$0xc0] %vm2425_vm14, %v2686_v20  ;;  %2426 = vst.msk [vmem:[#allocation3 + $0x60] sm:$0xc0] %vm2425_vm14, %v2423_v59  ;;  %vm2369_vm14 = vcmask 522496  }
 0x244   : > { %2689 = vst.msk [vmem:[#allocation3 + $0x120] sm:$0x1f] %vm16081_vm0, %v2686_v20  ;;  %4189 = vmatprep.subr.bf16.mxu1 %v12746_v41  ;;  %v3331_v27 = vld [vmem:[#allocation3 + $0xf0] sm:$0xff]  ;;  %v3346_v20 = vpack.c.bf16 %v3338_v58, %v3336_v28 }
 0x245   : > { %3954 = vmatpush1.bf16.msra.mxu0 %v12704_v1  ;;  %v3845_v1 = vld [vmem:[#allocation3 + $0x18] sm:$0xfe]  ;;  %v14027_v9 = vld [vmem:[#allocation3 + $0x100] sm:$0xff]  ;;  %2428 = vst.msk [vmem:[#allocation3 + $0x70] sm:$0x1f] %vm16082_vm4, %v2423_v59  ;;  %v2491_v59 = vpop.permute.xlu0 %2490 }
 0x246   : > { %3955 = vmatprep.subr.bf16.mxu0 %v12746_v41  ;;  %v14024_v57 = vpack.c.bf16 %v13932_v6, %v3845_v1  ;;  %v3343_v33 = vpack.c.bf16 %v14027_v9, %v3331_v27  ;;  %v12706_v6 = vld [vmem:[%s16022_s3 + $0x78] sm:$0xff]   ;;  %2494 = vst.msk [vmem:[#allocation3 + $0x60] sm:$0xc0] %vm2493_vm15, %v2491_v59 }
 0x247   : > { %4190 = vmatpush1.bf16.msra.mxu1 %v12706_v6  ;;  %2496 = vst.msk [vmem:[#allocation3 + $0x70] sm:$0x1f] %vm2495_vm5, %v2491_v59 }
 0x248   : > { %3674 = vmatmul.mubr.bf16.gmra.mrb[68].mxu0 %v3319_v5  ;;  %v4116_v5 = vshll.u32 %v14014_v60, 16  ;;  %3828 = vmatmul.mubr.bf16.gmra.mrb[76].mxu1 %v3343_v33  ;;  %v3884_v1 = vshll.u32 %v14024_v57, 16  ;;  %v14051_v33 = vpack.c.bf16 %v13982_v8, %v13934_v15  ;;  %v4114_v15 = vshrl.u32 %v14014_v60, 16 }
 0x249   : > { %3956 = vmatpush1.bf16.msra.mxu0 %v12705_v19  ;;  %10195 = vmatprep.mubr.msk.bf16.mxu0 %vm804_vm3, %v3322_v22  ;;  %v2741_v19 = vpop.permute.xlu1 %2740  ;;  %v14042_v22 = vpack.c.bf16 %v13963_v47, %v13922_v3  ;;  %v12707_v3 = vld [vmem:[%s16022_s3 + $0x80] sm:$0xff]   ;;  %v2367_v59 = vpop.permute.xlu0 %2366  ;;  %v3882_v60 = vshrl.u32 %v14024_v57, 16 }
 0x24a   : > { %3957 = vmatprep.subr.bf16.mxu0 %v12746_v41  ;;  %2743 = vst.msk [vmem:[#allocation3 + $0x110] sm:$0xc0] %vm2493_vm15, %v2741_v19  ;;  %4191 = vmatprep.subr.bf16.mxu1 %v12746_v41  ;;  %v4118_v58 = vrot.slane %v4116_v5, 1  ;;  %v3886_v5 = vrot.slane %v3884_v1, 1  ;;  %vm2435_vm15 = vcmask 785927   ;;  %v3889_v1 = vshll.u32 %v14051_v33, 16 }
 0x24b   : > { %2744 = vst.msk [vmem:[#allocation3 + $0x120] sm:$0xf] %vm16083_vm8, %v2741_v19  ;;  %10203 = vmatprep.mubr.msk.bf16.mxu1 %vm804_vm3, %v3346_v20  ;;  %v4077_v19 = vld [vmem:[#allocation3 + $0xc0] sm:$0xfe]  ;;  %4192 = vmatpush1.bf16.msra.mxu1 %v12707_v3  ;;  %v4121_v8 = vshll.u32 %v14042_v22, 16 }
 0x24c   : > { %4193 = vmatprep.subr.bf16.mxu1 %v12746_v41  ;;  %v3844_v20 = vld [vmem:[#allocation3 + $0x10] sm:$0xfe]  ;;  %2370 = vst.msk [vmem:[#allocation3 + $0x80] sm:$0x7f] %vm2369_vm14, %v2367_v59 }
 0x24d   : > { %3958 = vmatpush1.bf16.msra.mxu0 %v12706_v6  ;;  %v2639_v47 = vpop.permute.xlu1 %2638  ;;  %v14057_v6 = vpack.c.bf16 %v13948_v29, %v4077_v19  ;;  %v14065_v37 = vpack.c.bf16 %v13974_v4, %v3844_v20  ;;  %v14068_v29 = vpack.c.bf16 %v3331_v27, %v13950_v30  ;;  %v4119_v19 = vor.u32 %v4118_v58, %v4114_v15  ;;  %v12708_v4 = vld [vmem:[%s16022_s3 + $0x88] sm:$0xff]   ;;  %v2433_v59 = vpop.permute.xlu0 %2432  ;;  %v3311_v43 = vld [vmem:[#allocation3 + $0x60] sm:$0xff] }
 0x24e   : > { %3959 = vmatprep.subr.bf16.mxu0 %v12746_v41  ;;  %2641 = vst.msk [vmem:[#allocation3 + $0x120] sm:$0x80] %vm2360_vm7, %v2639_v47  ;;  %v14082_v20 = vpack.c.bf16 %v14004_v45, %v13966_v50  ;;  %v3887_v58 = vor.u32 %v3886_v5, %v3882_v60  ;;  %v14090_v15 = vpack.c.bf16 %v14002_v39, %v13972_v56  ;;  %v3313_v50 = vld [vmem:[#allocation3 + $0x70] sm:$0x7f]  ;;  %v3891_v39 = vrot.slane %v3889_v1, 1 }
 0x24f   : > { %2642 = vst.msk [vmem:[#allocation3 + $0x130] sm:$0x3f] %vm2362_vm1, %v2639_v47  ;;  %4194 = vmatpush1.bf16.msra.mxu1 %v12708_v4  ;;  %v4104_v57 = vshll.u32 %v14057_v6, 16  ;;  %v3872_v45 = vshll.u32 %v14065_v37, 16  ;;  %v4109_v35 = vshll.u32 %v14068_v29, 16  ;;  %v12709_v60 = vld [vmem:[%s16022_s3 + $0x90] sm:$0xff]   ;;  %v14133_v31 = vpack.c.bf16 %v3311_v43, %v14006_v25 }
 0x250   : > { %4195 = vmatprep.subr.bf16.mxu1 %v12746_v41  ;;  %2436 = vst.msk [vmem:[#allocation3 + $0x70] sm:$0x80] %vm2435_vm15, %v2433_v59  ;;  %v3905_v1 = vshll.u32 %v14090_v15, 16 }
 0x251   : > { %3960 = vmatpush1.bf16.msra.mxu0 %v12707_v3  ;;  %v14075_v3 = vpack.c.bf16 %v3336_v28, %v13953_v32  ;;  %v2694_v47 = vpop.permute.xlu1 %2693  ;;  %v3335_v27 = vld [vmem:[#allocation3 + $0x110] sm:$0xff]  ;;  %v4123_v28 = vrot.slane %v4121_v8, 1  ;;  %2438 = vst.msk [vmem:[#allocation3 + $0x80] sm:$0x3f] %vm2437_vm2, %v2433_v59  ;;  %v3321_v8 = vpack.c.bf16 %v3313_v50, %v3311_v43  ;;  %v3874_v59 = vrot.slane %v3872_v45, 1 }
 0x252   : > { %3961 = vmatprep.subr.bf16.mxu0 %v12746_v41  ;;  %v3337_v30 = vld [vmem:[#allocation3 + $0x120] sm:$0x7f]  ;;  %2696 = vst.msk [vmem:[#allocation3 + $0x120] sm:$0x80] %vm2435_vm15, %v2694_v47  ;;  %v14117_v50 = vrot.slane %v4109_v35, 1  ;;  %v3907_v53 = vrot.slane %v3905_v1, 1 }
 0x253   : > { %2697 = vst.msk [vmem:[#allocation3 + $0x130] sm:$0x3f] %vm2437_vm2, %v2694_v47  ;;  %v3345_v32 = vpack.c.bf16 %v3337_v30, %v3335_v27  ;;  %v14098_v56 = vsel %vm3868_vm11, %v4119_v19, %v4123_v28  ;;  %v4137_v5 = vshll.u32 %v14075_v3, 16  ;;  %4196 = vmatpush1.bf16.msra.mxu1 %v12709_v60  ;;  %v3877_v47 = vshll.u32 %v14082_v20, 16  ;;  %3682 = vmatmul.mubr.bf16.gmra.mrb[72].mxu0 %v3321_v8 }
 0x254   : > { %v4106_v30 = vrot.slane %v4104_v57, 1  ;;  %v14110_v19 = vsel %vm3868_vm11, %v3887_v58, %v3891_v39  ;;  %4197 = vmatprep.subr.bf16.mxu1 %v12746_v41  ;;  %v4102_v57 = vshrl.u32 %v14057_v6, 16  ;;  %v14120_v8 = vpack.c.bf16 %v3335_v27, %v14027_v9  ;;  %v4092_v58 = vld [vmem:[#allocation3 + $0x138] sm:$0xff] }
 0x255   : > { %3962 = vmatpush1.bf16.msra.mxu0 %v12708_v4  ;;  %3836 = vmatmul.mubr.bf16.gmra.mrb[80].mxu1 %v3345_v32  ;;  %v2749_v4 = vpop.permute.xlu1 %2748  ;;  %v2501_v32 = vpop.permute.xlu0 %2500  ;;  %v4139_v17 = vrot.slane %v4137_v5, 1  ;;  %v12710_v6 = vld [vmem:[%s16022_s3 + $0x98] sm:$0xff]   ;;  %v3870_v9 = vshrl.u32 %v14065_v37, 16  ;;  %v14130_v27 = vrot.slane %v3877_v47, 1  ;;  %v3901_v5 = vshrl.u32 %v14051_v33, 16 }
 0x256   : > { %3963 = vmatprep.subr.bf16.mxu0 %v12746_v41  ;;  %10212 = vmatprep.mubr.msk.bf16.mxu1 %vm804_vm3, %v14098_v56  ;;  %2751 = vst.msk [vmem:[#allocation3 + $0x120] sm:$0x80] %vm2503_vm12, %v2749_v4  ;;  %2504 = vst.msk [vmem:[#allocation3 + $0x70] sm:$0x80] %vm2503_vm12, %v2501_v32  ;;  %v4107_v45 = vor.u32 %v4106_v30, %v4102_v57  ;;  %v4129_v25 = vshll.u32 %v14120_v8, 16  ;;  %v3897_v57 = vshll.u32 %v14133_v31, 16 }
 0x257   : > { %2752 = vst.msk [vmem:[#allocation3 + $0x130] sm:$0x1f] %vm2495_vm5, %v2749_v4  ;;  %10204 = vmatprep.mubr.msk.bf16.mxu0 %vm804_vm3, %v14110_v19  ;;  %v4090_v4 = vld [vmem:[#allocation3 + $0x128] sm:$0xff]  ;;  %4198 = vmatpush1.bf16.msra.mxu1 %v12710_v6  ;;  %v3875_v47 = vor.u32 %v3874_v59, %v3870_v9 }
 0x258   : > { %2506 = vst.msk [vmem:[#allocation3 + $0x80] sm:$0x3f] %vm2505_vm10, %v2501_v32  ;;  %v3857_v32 = vld [vmem:[#allocation3 + $0x78] sm:$0xff]  ;;  %4244 = vmatprep.subr.bf16.mxu1 %v12746_v41  ;;  %v14139_v63 = vpack.c.bf16 %v4092_v58, %v4090_v4  ;;  %v14143_v43 = vsel %vm3868_vm11, %v4107_v45, %v14117_v50  ;;  %v4131_v9 = vrot.slane %v4129_v25, 1 }
 0x259   : > { %3964 = vmatpush1.bf16.msra.mxu0 %v12709_v60  ;;  %v4133_v60 = vshrl.u32 %v14042_v22, 16  ;;  %v3126_v35 = vpop.permute.xlu1 %3125  ;;  %v2883_v37 = vpop.permute.xlu0 %2882  ;;  %v14152_v30 = vpack.c.bf16 %v3859_v11, %v3857_v32  ;;  %v14156_v1 = vsel %vm3868_vm11, %v3875_v47, %v14130_v27  ;;  %v3899_v47 = vrot.slane %v3897_v57, 1 }
 0x25a   : > { %3965 = vmatprep.subr.bf16.mxu0 %v12746_v41  ;;  %3128 = vst.msk [vmem:[#allocation3 + $0x280] sm:$0x80] %vm2360_vm7, %v3126_v35 }
 0x25b   : > { %3129 = vst.msk [vmem:[#allocation3 + $0x290] sm:$0x3f] %vm2362_vm1, %v3126_v35  ;;  %v4135_v22 = vor.u32 %v4133_v60, %v4123_v28  ;;  %v3903_v28 = vor.u32 %v3901_v5, %v3891_v39  ;;  %v4149_v39 = vshrl.u32 %v14075_v3, 16  ;;  %v4153_v60 = vshll.u32 %v14139_v63, 16 }
 0x25c   : > { %2885 = vst.msk [vmem:[#allocation3 + $0x1e0] sm:$0x7f] %vm2369_vm14, %v2883_v37  ;;  %v4125_v35 = vshrl.u32 %v14068_v29, 16  ;;  %v3917_v3 = vshrl.u32 %v14090_v15, 16  ;;  %v3893_v29 = vshrl.u32 %v14082_v20, 16  ;;  %vm16084_vm1 = vcmask 1046528  }
 0x25d   : > { %3966 = vmatpush1.bf16.msra.mxu0 %v12710_v6  ;;  %4212 = vmatmul.mubr.bf16.vlgmr.msra.gmra.mrb[84].mxu1 %v14143_v43  ;;  %v14150_v33 = vsel %vm3868_vm11, %v4135_v22, %v4139_v17  ;;  %v3181_v59 = vpop.permute.xlu1 %3180  ;;  %v4089_v4 = vld [vmem:[#allocation3 + $0x120] sm:$0xff]  ;;  %v14166_v11 = vsel %vm3868_vm11, %v3903_v28, %v3907_v53  ;;  %v2937_v6 = vpop.permute.xlu0 %2936  ;;  %v3856_v45 = vld [vmem:[#allocation3 + $0x70] sm:$0xff]  ;;  %v4151_v5 = vor.u32 %v4149_v39, %v4139_v17  ;;  %v4141_v39 = vshrl.u32 %v14120_v8, 16  ;;  %vm16085_vm7 = vmmov %vm16084_vm1 }
 0x25e   : > { %4012 = vmatprep.subr.bf16.mxu0 %v12746_v41  ;;  %4245 = vmatpush1.bf16.msra.mxu1 %v13705_v48  ;;  %v4091_v58 = vld [vmem:[#allocation3 + $0x130] sm:$0xff]  ;;  %3183 = vst.msk [vmem:[#allocation3 + $0x280] sm:$0x80] %vm2435_vm15, %v3181_v59  ;;  %2939 = vst.msk [vmem:[#allocation3 + $0x1d0] sm:$0x80] %vm2435_vm15, %v2937_v6  ;;  %v4127_v25 = vor.u32 %v4125_v35, %v14117_v50  ;;  %v3919_v15 = vor.u32 %v3917_v3, %v3907_v53  ;;  %v3928_v8 = vshrl.u32 %v14152_v30, 16 }
 0x25f   : > { %10213 = vmatprep.mubr.msk.bf16.mxu1 %vm804_vm3, %v14150_v33  ;;  %3184 = vst.msk [vmem:[#allocation3 + $0x290] sm:$0x3f] %vm2437_vm2, %v3181_v59  ;;  %4246 = vmatprep.subr.bf16.mxu1 %v12746_v41  ;;  %v3858_v32 = vld [vmem:[#allocation3 + $0x80] sm:$0xff]  ;;  %v14175_v22 = vpack.c.bf16 %v4091_v58, %v4089_v4  ;;  %2940 = vst.msk [vmem:[#allocation3 + $0x1e0] sm:$0x3f] %vm2437_vm2, %v2937_v6  ;;  %v4155_v59 = vrot.slane %v4153_v60, 1  ;;  %v3895_v4 = vor.u32 %v3893_v29, %v14130_v27 }
 0x260   : > { %3980 = vmatmul.mubr.bf16.vlgmr.msra.gmra.mrb[76].mxu0 %v14156_v1  ;;  %v14185_v28 = vpack.c.bf16 %v3858_v32, %v3856_v45  ;;  %v14193_v20 = vsel %vm3868_vm11, %v4127_v25, %v4131_v9  ;;  %v3909_v6 = vshrl.u32 %v14133_v31, 16  ;;  %v4143_v45 = vor.u32 %v4141_v39, %v4131_v9  ;;  %v14223_v3 = vld [vmem:[#allocation3 + $0x270] sm:$0xff]  ;;  %v14243_v25 = vld [vmem:[#allocation3 + $0x1c0] sm:$0xff]  ;;  %vm16087_vm6 = vmmov %vm16084_vm1 }
 0x261   : > { %4013 = vmatpush1.bf16.msra.mxu0 %v13705_v48  ;;  %10205 = vmatprep.mubr.msk.bf16.mxu0 %vm804_vm3, %v14166_v11  ;;  %v3921_v48 = vshll.u32 %v14152_v30, 16  ;;  %v3235_v37 = vpop.permute.xlu1 %3234  ;;  %v2992_v17 = vpop.permute.xlu0 %2991  ;;  %v4145_v50 = vshll.u32 %v14175_v22, 16  ;;  %v14201_v57 = vsel %vm3868_vm11, %v4151_v5, %v4155_v59  ;;  %v4160_v32 = vshrl.u32 %v14139_v63, 16  ;;  %vm16088_vm13 = vmmov %vm16084_vm1 }
 0x262   : > { %4014 = vmatprep.subr.bf16.mxu0 %v12746_v41  ;;  %4247 = vmatpush1.bf16.msra.mxu1 %v13729_v54  ;;  %3237 = vst.msk [vmem:[#allocation3 + $0x280] sm:$0x80] %vm2503_vm12, %v3235_v37  ;;  %2994 = vst.msk [vmem:[#allocation3 + $0x1d0] sm:$0x80] %vm2503_vm12, %v2992_v17  ;;  %v3913_v27 = vshll.u32 %v14185_v28, 16  ;;  %v3911_v63 = vor.u32 %v3909_v6, %v3899_v47 }
 0x263   : > { %3238 = vst.msk [vmem:[#allocation3 + $0x290] sm:$0x1f] %vm2495_vm5, %v3235_v37  ;;  %4248 = vmatprep.subr.bf16.mxu1 %v12746_v41  ;;  %v3923_v53 = vrot.slane %v3921_v48, 1  ;;  %v4147_v60 = vrot.slane %v4145_v50, 1  ;;  %v14233_v37 = vld [vmem:[#allocation3] sm:$0xff]  ;;  %v14241_v29 = vor.u32 %v4160_v32, %v4155_v59  ;;  %vm16086_vm5 = vmmov %vm16084_vm1  ;;  %v3925_v32 = vshrl.u32 %v14185_v28, 16 }
 0x264   : > { %2995 = vst.msk [vmem:[#allocation3 + $0x1e0] sm:$0x3f] %vm2505_vm10, %v2992_v17  ;;  %v3915_v35 = vrot.slane %v3913_v27, 1  ;;  %vm16089_vm9 = vmmov %vm16084_vm1 }
 0x265   : > { %4015 = vmatpush1.bf16.msra.mxu0 %v13729_v54  ;;  %4220 = vmatmul.mubr.bf16.gmra.mrb[88].mxu1 %v14193_v20  ;;  %v14204_v54 = vsel %vm3868_vm11, %v3895_v4, %v3899_v47  ;;  %v14212_v58 = vsel %vm3868_vm11, %v3919_v15, %v3923_v53  ;;  %v14239_v9 = vsel %vm3868_vm11, %v4143_v45, %v4147_v60  ;;  %v4157_v45 = vshrl.u32 %v14175_v22, 16  ;;  %vm16090_vm0 = vmmov %vm16084_vm1 }
 0x266   : > { %4016 = vmatprep.subr.bf16.mxu0 %v12746_v41  ;;  %4249 = vmatpush1.bf16.msra.mxu1 %v13748_v61  ;;  %v14251_v17 = vor.u32 %v3928_v8, %v3923_v53  ;;  %v14256_v47 = vsel %vm3868_vm11, %v3911_v63, %v3915_v35  ;;  %v14297_v22 = vor.u32 %v3925_v32, %v3915_v35  ;;  %v4538_v35 = vld [vmem:[#allocation3 + $0x180] sm:$0xff]  ;;  %vm16091_vm4 = vmmov %vm16090_vm0 }
 0x267   : > { %10214 = vmatprep.mubr.msk.bf16.mxu1 %vm804_vm3, %v14201_v57  ;;  %4250 = vmatprep.subr.bf16.mxu1 %v12746_v41  ;;  %v14293_v8 = vor.u32 %v4157_v45, %v4147_v60  ;;  %v12718_v32 = vld [vmem:[#allocation3 + $0x240] sm:$0xff]  ;;  %vm16092_vm8 = vmmov %vm16090_vm0 }
 0x268   : > { %3988 = vmatmul.mubr.bf16.gmra.mrb[80].mxu0 %v14204_v54  ;;  %vm16093_vm14 = vmmov %vm16090_vm0 }
 0x269   : > { %4017 = vmatpush1.bf16.msra.mxu0 %v13748_v61  ;;  %10206 = vmatprep.mubr.msk.bf16.mxu0 %vm804_vm3, %v14212_v58  ;;  %v14225_v48 = vld [vmem:[#allocation3 + $0x280] sm:$0xff]  ;;  %v14245_v15 = vld [vmem:[#allocation3 + $0x1d0] sm:$0xff]  ;;  %vm16094_vm15 = vmmov %vm16090_vm0 }
 0x26a   : > { %4018 = vmatprep.subr.bf16.mxu0 %v12746_v41  ;;  %4251 = vmatpush1.bf16.msra.mxu1 %v13763_v2  ;;  %v14227_v61 = vld [vmem:[#allocation3 + $0x290] sm:$0xff]  ;;  %v5798_v5 = vpack.c.bf16 %v14225_v48, %v14223_v3  ;;  %vm16095_vm2 = vmmov %vm16090_vm0 }
 0x26b   : > { %4252 = vmatprep.subr.bf16.mxu1 %v12746_v41  ;;  %v5800_v31 = vpack.c.bf16 %v14233_v37, %v14227_v61  ;;  %v14247_v30 = vld [vmem:[#allocation3 + $0x1e0] sm:$0xff]  ;;  %vm16097_vm12 = vmmov %vm16090_vm0 }
 0x26c   : > { %v5820_v59 = vrot.slane %v5798_v5, 1  ;;  %v5655_v4 = vpack.c.bf16 %v14233_v37, %v14247_v30  ;;  %v4711_v5 = vld [vmem:[#allocation3 + $0x220] sm:$0xfe]  ;;  %vm16098_vm10 = vmmov %vm16090_vm0 }
 0x26d   : > { %4019 = vmatpush1.bf16.msra.mxu0 %v13763_v2  ;;  %4228 = vmatmul.mubr.bf16.gmra.mrb[92].mxu1 %v14239_v9  ;;  %v5653_v2 = vpack.c.bf16 %v14245_v15, %v14243_v25  ;;  %v14263_v50 = vrot.slane %v5800_v31, 1 }
 0x26e   : > { %4020 = vmatprep.subr.bf16.mxu0 %v12746_v41  ;;  %4253 = vmatpush1.bf16.msra.mxu1 %v13780_v62  ;;  %v14272_v27 = vsel %vm16084_vm1, %v13859_v10, %v5820_v59  ;;  %v14274_v39 = vrot.slane %v5655_v4, 1  ;;  %v12717_v4 = vld [vmem:[#allocation3 + $0x278] sm:$0xff]  ;;  %vm16099_vm1 = vmmov %vm16090_vm0 }
 0x26f   : > { %10215 = vmatprep.mubr.msk.bf16.mxu1 %vm804_vm3, %v14241_v29  ;;  %4254 = vmatprep.subr.bf16.mxu1 %v12746_v41  ;;  %v5675_v53 = vrot.slane %v5653_v2, 1  ;;  %v14278_v6 = vsel %vm16085_vm7, %v5820_v59, %v14263_v50  ;;  %v12716_v59 = vld [vmem:[#allocation3 + $0x268] sm:$0xff]  ;;  %vm16100_vm7 = vmmov %vm16090_vm0 }
 0x270   : > { %3996 = vmatmul.mubr.bf16.gmra.mrb[84].mxu0 %v14256_v47 }
 0x271   : > { %4021 = vmatpush1.bf16.msra.mxu0 %v13780_v62  ;;  %10207 = vmatprep.mubr.msk.bf16.mxu0 %vm804_vm3, %v14251_v17  ;;  %v14284_v62 = vsel %vm16086_vm5, %v13868_v13, %v5675_v53  ;;  %v14289_v10 = vsel %vm16087_vm6, %v5675_v53, %v14274_v39  ;;  %v14505_v53 = vpack.c.bf16 %v12717_v4, %v12716_v59  ;;  %vm16101_vm5 = vmmov %vm16090_vm0 }
 0x272   : > { %4022 = vmatprep.subr.bf16.mxu0 %v12746_v41  ;;  %4255 = vmatpush1.bf16.msra.mxu1 %v13804_v14  ;;  %vm16102_vm6 = vmmov %vm16090_vm0 }
 0x273   : > { %4256 = vmatprep.subr.bf16.mxu1 %v12746_v41 }
 0x275   : > { %4023 = vmatpush1.bf16.msra.mxu0 %v13804_v14  ;;  %4236 = vmatmul.mubr.bf16.gmra.mrb[96].mxu1 %v14293_v8  ;;  %v14417_v14 = vld [vmem:[%s16022_s3 + $0xe0] sm:$0xff]  }
 0x276   : > { %4024 = vmatprep.subr.bf16.mxu0 %v12746_v41  ;;  %4257 = vmatpush1.bf16.msra.mxu1 %v13822_v26 }
 0x277   : > { %10216 = vmatprep.mubr.msk.bf16.mxu1 %vm804_vm3, %v13505_v46  ;;  %4258 = vmatprep.subr.bf16.mxu1 %v12746_v41  ;;  %v14333_v46 = vld [vmem:[%s16022_s3 + $0xa8] sm:$0xff]  }
 0x278   : > { %4004 = vmatmul.mubr.bf16.gmra.mrb[88].mxu0 %v14297_v22 }
 0x279   : > { %4025 = vmatpush1.bf16.msra.mxu0 %v13822_v26  ;;  %10208 = vmatprep.mubr.msk.bf16.mxu0 %vm804_vm3, %v13387_v38  ;;  %v14321_v38 = vld [vmem:[%s16022_s3 + $0xa0] sm:$0xff]   ;;  %v4539_v26 = vld [vmem:[#allocation3 + $0x188] sm:$0xff] }
 0x27a   : > { %4026 = vmatprep.subr.bf16.mxu0 %v12746_v41  ;;  %4259 = vmatpush1.bf16.msra.mxu1 %v13857_v24 }
 0x27b   : > { %4260 = vmatprep.subr.bf16.mxu1 %v12746_v41 }
 0x27d   : > { %4027 = vmatpush1.bf16.msra.mxu0 %v13857_v24 }
 0x27e   : > { %4028 = vmatprep.subr.bf16.mxu0 %v12746_v41  ;;  %4261 = vmatpush1.bf16.msra.mxu1 %v13884_v21 }
 0x27f   : > { %4262 = vmatprep.subr.bf16.mxu1 %v12746_v41 }
 0x281   : > { %4029 = vmatpush1.bf16.msra.mxu0 %v13884_v21  ;;  %v12712_v21 = vld [vmem:[#allocation3 + $0x248] sm:$0xff] }
 0x282   : > { %4030 = vmatprep.subr.bf16.mxu0 %v12746_v41  ;;  %4263 = vmatpush1.bf16.msra.mxu1 %v13904_v36 }
 0x283   : > { %4463 = vmatprep.subr.bf16.mxu1 %v12746_v41 }
 0x285   : > { %4031 = vmatpush1.bf16.msra.mxu0 %v13904_v36  ;;  %4277 = vmatmul.mubr.bf16.vlgmr.msra.gmra.mrb[84].mxu1 %v13717_v51  ;;  %v14345_v51 = vld [vmem:[%s16022_s3 + $0xb0] sm:$0xff]  }
 0x286   : > { %4390 = vmatprep.subr.bf16.mxu0 %v12746_v41  ;;  %10217 = vmatprep.mubr.msk.bf16.mxu1 %vm804_vm3, %v13722_v52  ;;  %v14381_v52 = vld [vmem:[%s16022_s3 + $0xc8] sm:$0xff]  }
 0x287   : > { %4464 = vmatpush1.bf16.msra.mxu1 %v14321_v38 }
 0x288   : > { %4045 = vmatmul.mubr.bf16.vlgmr.msra.gmra.mrb[76].mxu0 %v13694_v42  ;;  %4465 = vmatprep.subr.bf16.mxu1 %v12746_v41  ;;  %v14357_v42 = vld [vmem:[%s16022_s3 + $0xb8] sm:$0xff]  }
 0x289   : > { %10209 = vmatprep.mubr.msk.bf16.mxu0 %vm804_vm3, %v13700_v44  ;;  %4391 = vmatpush1.bf16.msra.mxu0 %v14321_v38  ;;  %v14369_v44 = vld [vmem:[%s16022_s3 + $0xc0] sm:$0xff]  }
 0x28a   : > { %4392 = vmatprep.subr.bf16.mxu0 %v12746_v41 }
 0x28b   : > { %4466 = vmatpush1.bf16.msra.mxu1 %v14333_v46 }
 0x28c   : > { %4467 = vmatprep.subr.bf16.mxu1 %v12746_v41 }
 0x28d   : > { %4393 = vmatpush1.bf16.msra.mxu0 %v14333_v46  ;;  %4285 = vmatmul.mubr.bf16.gmra.mrb[88].mxu1 %v13794_v12  ;;  %v14393_v12 = vld [vmem:[%s16022_s3 + $0xd0] sm:$0xff]  }
 0x28e   : > { %4394 = vmatprep.subr.bf16.mxu0 %v12746_v41  ;;  %10218 = vmatprep.mubr.msk.bf16.mxu1 %vm804_vm3, %v13798_v55  ;;  %v14405_v55 = vld [vmem:[%s16022_s3 + $0xd8] sm:$0xff]  }
 0x28f   : > { %4468 = vmatpush1.bf16.msra.mxu1 %v14345_v51 }
 0x290   : > { %4053 = vmatmul.mubr.bf16.gmra.mrb[80].mxu0 %v13814_v16  ;;  %4469 = vmatprep.subr.bf16.mxu1 %v12746_v41  ;;  %v14426_v16 = vld [vmem:[%s16022_s3 + $0xe8] sm:$0xff]  }
 0x291   : > { %10210 = vmatprep.mubr.msk.bf16.mxu0 %vm804_vm3, %v13817_v7  ;;  %4395 = vmatpush1.bf16.msra.mxu0 %v14345_v51  ;;  %v4714_v7 = vld [vmem:[#allocation3 + $0x238] sm:$0xff] }
 0x292   : > { %4396 = vmatprep.subr.bf16.mxu0 %v12746_v41 }
 0x293   : > { %4470 = vmatpush1.bf16.msra.mxu1 %v14357_v42 }
 0x294   : > { %4471 = vmatprep.subr.bf16.mxu1 %v12746_v41 }
 0x295   : > { %4397 = vmatpush1.bf16.msra.mxu0 %v14357_v42  ;;  %4293 = vmatmul.mubr.bf16.gmra.mrb[92].mxu1 %v13836_v34  ;;  %v4712_v34 = vld [vmem:[#allocation3 + $0x228] sm:$0xfe] }
 0x296   : > { %4398 = vmatprep.subr.bf16.mxu0 %v12746_v41  ;;  %10219 = vmatprep.mubr.msk.bf16.mxu1 %vm804_vm3, %v13846_v40  ;;  %v4728_v40 = vpack.c.bf16 %v4714_v7, %v4712_v34  ;;  %v4771_v7 = vshll.u32 %v14505_v53, 16 }
 0x297   : > { %4472 = vmatpush1.bf16.msra.mxu1 %v14369_v44 }
 0x298   : > { %4061 = vmatmul.mubr.bf16.gmra.mrb[84].mxu0 %v13852_v0  ;;  %4473 = vmatprep.subr.bf16.mxu1 %v12746_v41  ;;  %v4537_v0 = vld [vmem:[#allocation3 + $0x178] sm:$0xfe]  ;;  %v4750_v13 = vshll.u32 %v4728_v40, 16 }
 0x299   : > { %10211 = vmatprep.mubr.msk.bf16.mxu0 %vm804_vm3, %v13874_v18  ;;  %4399 = vmatpush1.bf16.msra.mxu0 %v14369_v44  ;;  %v4553_v24 = vpack.c.bf16 %v4539_v26, %v4537_v0 }
 0x29a   : > { %4400 = vmatprep.subr.bf16.mxu0 %v12746_v41 }
 0x29b   : > { %4474 = vmatpush1.bf16.msra.mxu1 %v14381_v52  ;;  %v4575_v18 = vshll.u32 %v4553_v24, 16  ;;  %v4573_v28 = vshrl.u32 %v4553_v24, 16 }
 0x29c   : > { %4475 = vmatprep.subr.bf16.mxu1 %v12746_v41 }
 0x29d   : > { %4401 = vmatpush1.bf16.msra.mxu0 %v14381_v52  ;;  %4301 = vmatmul.mubr.bf16.gmra.mrb[96].mxu1 %v13892_v23  ;;  %v12713_v23 = vld [vmem:[#allocation3 + $0x258] sm:$0xff] }
 0x29e   : > { %4402 = vmatprep.subr.bf16.mxu0 %v12746_v41  ;;  %10254 = vmatprep.mubr.msk.bf16.mxu1 %vm804_vm3, %v14098_v56  ;;  %v14461_v36 = vpack.c.bf16 %v12713_v23, %v12712_v21  ;;  %v12715_v56 = vld [vmem:[#allocation3 + $0x198] sm:$0xff] }
 0x29f   : > { %4476 = vmatpush1.bf16.msra.mxu1 %v14393_v12 }
 0x2a0   : > { %4069 = vmatmul.mubr.bf16.gmra.mrb[88].mxu0 %v13911_v49  ;;  %4477 = vmatprep.subr.bf16.mxu1 %v12746_v41  ;;  %v12714_v49 = vld [vmem:[#allocation3 + $0x1a8] sm:$0xff]  ;;  %v4767_v23 = vshrl.u32 %v14461_v36, 16 }
 0x2a1   : > { %4403 = vmatpush1.bf16.msra.mxu0 %v14393_v12  ;;  %10250 = vmatprep.mubr.msk.bf16.mxu0 %vm804_vm3, %v14110_v19  ;;  %v14466_v19 = vpack.c.bf16 %v12714_v49, %v12715_v56  ;;  %v4773_v49 = vrot.slane %v4771_v7, 1 }
 0x2a2   : > { %4404 = vmatprep.subr.bf16.mxu0 %v12746_v41 }
 0x2a3   : > { %4478 = vmatpush1.bf16.msra.mxu1 %v14405_v55 }
 0x2a4   : > { %4479 = vmatprep.subr.bf16.mxu1 %v12746_v41 }
 0x2a5   : > { %4405 = vmatpush1.bf16.msra.mxu0 %v14405_v55 }
 0x2a6   : > { %4406 = vmatprep.subr.bf16.mxu0 %v12746_v41 }
 0x2a7   : > { %4480 = vmatpush1.bf16.msra.mxu1 %v14417_v14 }
 0x2a8   : > { %4481 = vmatprep.subr.bf16.mxu1 %v12746_v41 }
 0x2a9   : > { %4407 = vmatpush1.bf16.msra.mxu0 %v14417_v14 }
 0x2aa   : > { %4408 = vmatprep.subr.bf16.mxu0 %v12746_v41 }
 0x2ab   : > { %4482 = vmatpush1.bf16.msra.mxu1 %v14426_v16 }
 0x2ac   : > { %4813 = vmatprep.subr.bf16.mxu1 %v12746_v41 }
 0x2ad   : > { %4409 = vmatpush1.bf16.msra.mxu0 %v14426_v16 }
 0x2ae   : > { %4496 = vmatmul.mubr.bf16.vlgmr.msra.gmra.mrb[68].mxu1 %v14143_v43  ;;  %4638 = vmatprep.subr.bf16.mxu0 %v12746_v41  ;;  %v4752_v43 = vrot.slane %v4750_v13, 1 }
 0x2af   : > { %10255 = vmatprep.mubr.msk.bf16.mxu1 %vm804_vm3, %v14150_v33  ;;  %4814 = vmatpush1.bf16.msra.mxu1 %v14321_v38  ;;  %v4577_v33 = vrot.slane %v4575_v18, 1  ;;  %v12724_v18 = vld [vmem:[#allocation3 + $0x260] sm:$0xff] }
 0x2b0   : > { %4423 = vmatmul.mubr.bf16.vlgmr.msra.gmra.mrb[60].mxu0 %v14156_v1  ;;  %4815 = vmatprep.subr.bf16.mxu1 %v12746_v41  ;;  %v4748_v1 = vshrl.u32 %v4728_v40, 16  ;;  %v14525_v21 = vpack.c.bf16 %v14223_v3, %v12724_v18  ;;  %v4592_v3 = vshrl.u32 %v14466_v19, 16 }
 0x2b1   : > { %10251 = vmatprep.mubr.msk.bf16.mxu0 %vm804_vm3, %v14166_v11  ;;  %4639 = vmatpush1.bf16.msra.mxu0 %v14321_v38  ;;  %v4755_v11 = vshll.u32 %v14461_v36, 16  ;;  %v12720_v38 = vld [vmem:[#allocation3 + $0x1b8] sm:$0xff] }
 0x2b2   : > { %4640 = vmatprep.subr.bf16.mxu0 %v12746_v41 }
 0x2b3   : > { %4816 = vmatpush1.bf16.msra.mxu1 %v14333_v46  ;;  %v14481_v60 = vrot.slane %v4755_v11, 1 }
 0x2b4   : > { %4817 = vmatprep.subr.bf16.mxu1 %v12746_v41 }
 0x2b5   : > { %4641 = vmatpush1.bf16.msra.mxu0 %v14333_v46  ;;  %v12721_v46 = vld [vmem:[#allocation3 + $0x1c8] sm:$0xff]  ;;  %v4769_v36 = vor.u32 %v4767_v23, %v14481_v60 }
 0x2b6   : > { %4504 = vmatmul.mubr.bf16.gmra.mrb[72].mxu1 %v14193_v20  ;;  %4642 = vmatprep.subr.bf16.mxu0 %v12746_v41  ;;  %v4580_v20 = vshll.u32 %v14466_v19, 16 }
 0x2b7   : > { %10256 = vmatprep.mubr.msk.bf16.mxu1 %vm804_vm3, %v14201_v57  ;;  %4818 = vmatpush1.bf16.msra.mxu1 %v14345_v51  ;;  %v4753_v57 = vor.u32 %v4752_v43, %v4748_v1 }
 0x2b8   : > { %4431 = vmatmul.mubr.bf16.gmra.mrb[64].mxu0 %v14204_v54  ;;  %4819 = vmatprep.subr.bf16.mxu1 %v12746_v41  ;;  %v4713_v54 = vld [vmem:[#allocation3 + $0x230] sm:$0xff]  ;;  %v14486_v63 = vrot.slane %v4580_v20, 1  ;;  %v12727_v20 = vld [vmem:[#allocation3 + $0x298] sm:$0xff] }
 0x2b9   : > { %10252 = vmatprep.mubr.msk.bf16.mxu0 %vm804_vm3, %v14212_v58  ;;  %4643 = vmatpush1.bf16.msra.mxu0 %v14345_v51  ;;  %v4578_v58 = vor.u32 %v4577_v33, %v4573_v28  ;;  %v4727_v31 = vpack.c.bf16 %v4713_v54, %v4711_v5  ;;  %v14511_v51 = vpack.c.bf16 %v12721_v46, %v12720_v38  ;;  %v12725_v33 = vld [vmem:[#allocation3 + $0x1b0] sm:$0xff]  ;;  %v12726_v28 = vld [vmem:[#allocation3 + $0x288] sm:$0xff] }
 0x2ba   : > { %4644 = vmatprep.subr.bf16.mxu0 %v12746_v41  ;;  %v14536_v1 = vpack.c.bf16 %v14243_v25, %v12725_v33  ;;  %v4763_v25 = vshll.u32 %v14525_v21, 16  ;;  %v4594_v19 = vor.u32 %v4592_v3, %v14486_v63  ;;  %v12729_v5 = vld [vmem:[#allocation3 + $0x1e8] sm:$0xff] }
 0x2bb   : > { %4820 = vmatpush1.bf16.msra.mxu1 %v14357_v42  ;;  %v14498_v2 = vsel %vm3868_vm11, %v4578_v58, %v14486_v63  ;;  %v4736_v34 = vshrl.u32 %v4727_v31, 16  ;;  %v4596_v0 = vshll.u32 %v14511_v51, 16 }
 0x2bc   : > { %4821 = vmatprep.subr.bf16.mxu1 %v12746_v41  ;;  %v4588_v63 = vshll.u32 %v14536_v1, 16 }
 0x2bd   : > { %4645 = vmatpush1.bf16.msra.mxu0 %v14357_v42  ;;  %v12722_v42 = vld [vmem:[#allocation3 + $0x190] sm:$0xff]  ;;  %v4598_v11 = vrot.slane %v4596_v0, 1 }
 0x2be   : > { %4512 = vmatmul.mubr.bf16.gmra.mrb[76].mxu1 %v14239_v9  ;;  %4646 = vmatprep.subr.bf16.mxu0 %v12746_v41  ;;  %v14490_v9 = vsel %vm3868_vm11, %v4753_v57, %v14481_v60  ;;  %v14541_v57 = vpack.c.bf16 %v12727_v20, %v12726_v28  ;;  %v14552_v60 = vsel %vm3868_vm11, %v4769_v36, %v4773_v49  ;;  %v14656_v36 = vld [vmem:[%s16022_s3 + $0x118] sm:$0xff]   ;;  %v14669_v20 = vld [vmem:[%s16022_s3 + $0x120] sm:$0xff]  }
 0x2bf   : > { %10257 = vmatprep.mubr.msk.bf16.mxu1 %vm804_vm3, %v14241_v29  ;;  %4822 = vmatpush1.bf16.msra.mxu1 %v14369_v44  ;;  %v4536_v29 = vld [vmem:[#allocation3 + $0x170] sm:$0xfe] }
 0x2c0   : > { %4439 = vmatmul.mubr.bf16.gmra.mrb[68].mxu0 %v14256_v47  ;;  %4823 = vmatprep.subr.bf16.mxu1 %v12746_v41  ;;  %v4738_v47 = vshll.u32 %v4727_v31, 16  ;;  %v4787_v59 = vshll.u32 %v14541_v57, 16 }
 0x2c1   : > { %10253 = vmatprep.mubr.msk.bf16.mxu0 %vm804_vm3, %v14251_v17  ;;  %4647 = vmatpush1.bf16.msra.mxu0 %v14369_v44  ;;  %v4552_v17 = vpack.c.bf16 %v4538_v35, %v4536_v29  ;;  %v12723_v44 = vld [vmem:[#allocation3 + $0x1a0] sm:$0xff]  ;;  %v12728_v35 = vld [vmem:[#allocation3 + $0x1d8] sm:$0xff] }
 0x2c2   : > { %4648 = vmatprep.subr.bf16.mxu0 %v12746_v41  ;;  %v14554_v31 = vpack.c.bf16 %v12729_v5, %v12728_v35  ;;  %v14565_v29 = vld [vmem:[%s16022_s3 + $0xf8] sm:$0xff]   ;;  %v5262_v35 = vld [vmem:[#allocation3 + $0xe8] sm:$0xff] }
 0x2c3   : > { %4824 = vmatpush1.bf16.msra.mxu1 %v14381_v52  ;;  %v4563_v45 = vshll.u32 %v4552_v17, 16  ;;  %v5264_v5 = vld [vmem:[#allocation3 + $0xf8] sm:$0xff] }
 0x2c4   : > { %4825 = vmatprep.subr.bf16.mxu1 %v12746_v41  ;;  %v4619_v33 = vshrl.u32 %v14554_v31, 16 }
 0x2c5   : > { %4649 = vmatpush1.bf16.msra.mxu0 %v14381_v52  ;;  %v14514_v52 = vpack.c.bf16 %v12723_v44, %v12722_v42  ;;  %v4565_v26 = vrot.slane %v4563_v45, 1  ;;  %v4765_v45 = vrot.slane %v4763_v25, 1  ;;  %v4590_v42 = vrot.slane %v4588_v63, 1  ;;  %v5118_v63 = vld [vmem:[#allocation3 + $0x48] sm:$0xff] }
 0x2c6   : > { %4520 = vmatmul.mubr.bf16.gmra.mrb[80].mxu1 %v14293_v8  ;;  %4650 = vmatprep.subr.bf16.mxu0 %v12746_v41  ;;  %v12719_v8 = vld [vmem:[#allocation3 + $0x250] sm:$0xff] }
 0x2c7   : > { %4826 = vmatpush1.bf16.msra.mxu1 %v14393_v12  ;;  %10262 = vmatprep.mubr.msk.bf16.mxu1 %vm804_vm3, %v14490_v9  ;;  %v4568_v24 = vshll.u32 %v14514_v52, 16  ;;  %v4584_v46 = vshrl.u32 %v14514_v52, 16 }
 0x2c8   : > { %4447 = vmatmul.mubr.bf16.gmra.mrb[72].mxu0 %v14297_v22  ;;  %4827 = vmatprep.subr.bf16.mxu1 %v12746_v41  ;;  %v14508_v22 = vpack.c.bf16 %v12719_v8, %v12718_v32  ;;  %v14581_v32 = vpack.c.bf16 %v14227_v61, %v14225_v48  ;;  %v4608_v8 = vshrl.u32 %v14511_v51, 16  ;;  %v4558_v48 = vpack.c.bf16 %v14247_v30, %v14245_v15  ;;  %v14615_v30 = vld [vmem:[%s16022_s3 + $0x108] sm:$0xff]  }
 0x2c9   : > { %4651 = vmatpush1.bf16.msra.mxu0 %v14393_v12  ;;  %10258 = vmatprep.mubr.msk.bf16.mxu0 %vm804_vm3, %v14498_v2  ;;  %v4740_v12 = vrot.slane %v4738_v47, 1  ;;  %v4570_v54 = vrot.slane %v4568_v24, 1  ;;  %v4783_v47 = vshrl.u32 %v14505_v53, 16  ;;  %v4612_v53 = vshll.u32 %v14554_v31, 16 }
 0x2ca   : > { %4652 = vmatprep.subr.bf16.mxu0 %v12746_v41  ;;  %v4743_v40 = vshll.u32 %v14508_v22, 16  ;;  %v4759_v4 = vshrl.u32 %v14508_v22, 16  ;;  %v14591_v22 = vld [vmem:[%s16022_s3 + $0x100] sm:$0xff]   ;;  %v4610_v61 = vor.u32 %v4608_v8, %v4598_v11  ;;  %v4789_v51 = vrot.slane %v4787_v59, 1 }
 0x2cb   : > { %4828 = vmatpush1.bf16.msra.mxu1 %v14405_v55  ;;  %v4741_v13 = vor.u32 %v4740_v12, %v4736_v34  ;;  %v4785_v38 = vor.u32 %v4783_v47, %v4773_v49  ;;  %v4586_v12 = vor.u32 %v4584_v46, %v4570_v54  ;;  %v4779_v52 = vshll.u32 %v14581_v32, 16  ;;  %v5263_v46 = vld [vmem:[#allocation3 + $0xf0] sm:$0xff] }
 0x2cc   : > { %4829 = vmatprep.subr.bf16.mxu1 %v12746_v41  ;;  %v4745_v43 = vrot.slane %v4743_v40, 1  ;;  %v4604_v40 = vshll.u32 %v4558_v48, 16  ;;  %v4794_v49 = vshrl.u32 %v14541_v57, 16  ;;  %v4791_v28 = vshrl.u32 %v14581_v32, 16 }
 0x2cd   : > { %4653 = vmatpush1.bf16.msra.mxu0 %v14405_v55  ;;  %v4561_v55 = vshrl.u32 %v4552_v17, 16  ;;  %v14570_v17 = vsel %vm3868_vm11, %v4594_v19, %v4598_v11  ;;  %v14604_v34 = vsel %vm3868_vm11, %v4785_v38, %v4789_v51  ;;  %v14607_v15 = vsel %vm3868_vm11, %v4586_v12, %v4590_v42  ;;  %v14685_v19 = vld [vmem:[%s16022_s3 + $0x128] sm:$0xff]   ;;  %v5259_v12 = vld [vmem:[#allocation3 + $0xd0] sm:$0xfc] }
 0x2ce   : > { %4654 = vmatprep.subr.bf16.mxu0 %v12746_v41  ;;  %v14545_v58 = vsel %vm3868_vm11, %v4741_v13, %v4745_v43  ;;  %v4761_v44 = vor.u32 %v4759_v4, %v4745_v43  ;;  %v4781_v24 = vrot.slane %v4779_v52, 1  ;;  %v4600_v13 = vshrl.u32 %v14536_v1, 16  ;;  %v5122_v52 = vld [vmem:[#allocation3 + $0x68] sm:$0xff] }
 0x2cf   : > { %4830 = vmatpush1.bf16.msra.mxu1 %v14417_v14  ;;  %v4566_v56 = vor.u32 %v4565_v26, %v4561_v55  ;;  %v4614_v26 = vrot.slane %v4612_v53, 1  ;;  %v4775_v55 = vshrl.u32 %v14525_v21, 16  ;;  %v4606_v18 = vrot.slane %v4604_v40, 1 }
 0x2d0   : > { %4831 = vmatprep.subr.bf16.mxu1 %v12746_v41  ;;  %v14598_v7 = vsel %vm3868_vm11, %v4761_v44, %v4765_v45  ;;  %v4602_v21 = vor.u32 %v4600_v13, %v4590_v42  ;;  %v14641_v1 = vor.u32 %v4794_v49, %v4789_v51  ;;  %v4616_v57 = vshrl.u32 %v4558_v48, 16  ;;  %v5265_v42 = vld [vmem:[#allocation3 + $0x100] sm:$0xff]  ;;  %v5270_v48 = vld [vmem:[#allocation3 + $0x128] sm:$0xff]  ;;  %v5119_v51 = vld [vmem:[#allocation3 + $0x50] sm:$0xff] }
 0x2d1   : > { %4655 = vmatpush1.bf16.msra.mxu0 %v14417_v14  ;;  %v14533_v14 = vld [vmem:[%s16022_s3 + $0xf0] sm:$0xff]   ;;  %v14619_v0 = vsel %vm3868_vm11, %v4610_v61, %v4614_v26  ;;  %v4777_v23 = vor.u32 %v4775_v55, %v4765_v45  ;;  %v14648_v11 = vor.u32 %v4619_v33, %v4614_v26  ;;  %v5261_v44 = vld [vmem:[#allocation3 + $0xe0] sm:$0xff]  ;;  %v5124_v26 = vld [vmem:[#allocation3 + $0x78] sm:$0xff] }
 0x2d2   : > { %4656 = vmatprep.subr.bf16.mxu0 %v12746_v41  ;;  %v14646_v3 = vsel %vm3868_vm11, %v4602_v21, %v4606_v18  ;;  %v14675_v25 = vor.u32 %v4616_v57, %v4606_v18  ;;  %v5117_v61 = vld [vmem:[#allocation3 + $0x40] sm:$0xff]  ;;  %v5277_v40 = vpack.c.bf16 %v5261_v44, %v5259_v12  ;;  %v5136_v55 = vpack.c.bf16 %v5124_v26, %v5122_v52  ;;  %v5274_v33 = vld [vmem:[#allocation3 + $0x148] sm:$0xff]  ;;  %v14851_v44 = vld [vmem:[%s16022_s3 + $0x158] sm:$0xff]  }
 0x2d3   : > { %4832 = vmatpush1.bf16.msra.mxu1 %v14426_v16  ;;  %v14638_v43 = vsel %vm3868_vm11, %v4777_v23, %v4781_v24  ;;  %v5269_v23 = vld [vmem:[#allocation3 + $0x120] sm:$0xff]  ;;  %v5126_v57 = vld [vmem:[#allocation3 + $0x88] sm:$0xff] }
 0x2d4   : > { %5040 = vmatprep.subr.bf16.mxu1 %v12746_v41  ;;  %v14791_v21 = vld [vmem:[%s16022_s3 + $0x140] sm:$0xff]  }
 0x2d5   : > { %4657 = vmatpush1.bf16.msra.mxu0 %v14426_v16  ;;  %v14557_v16 = vsel %vm3868_vm11, %v4566_v56, %v4570_v54  ;;  %v14633_v56 = vld [vmem:[%s16022_s3 + $0x110] sm:$0xff]   ;;  %v14671_v54 = vor.u32 %v4791_v28, %v4781_v24  ;;  %vm16096_vm11 = vmmov %vm16090_vm0  ;;  %v14867_v52 = vld [vmem:[%s16022_s3 + $0x160] sm:$0xff]  }
 0x2d6   : > { %4846 = vmatmul.mubr.bf16.vlgmr.msra.gmra.mrb[84].mxu1 %v14545_v58  ;;  %4967 = vmatprep.subr.bf16.mxu0 %v12746_v41 }
 0x2d7   : > { %10263 = vmatprep.mubr.msk.bf16.mxu1 %vm804_vm3, %v14552_v60  ;;  %5041 = vmatpush1.bf16.msra.mxu1 %v14533_v14 }
 0x2d8   : > { %4671 = vmatmul.mubr.bf16.vlgmr.msra.gmra.mrb[76].mxu0 %v14557_v16  ;;  %5042 = vmatprep.subr.bf16.mxu1 %v12746_v41 }
 0x2d9   : > { %10259 = vmatprep.mubr.msk.bf16.mxu0 %vm804_vm3, %v14570_v17  ;;  %4968 = vmatpush1.bf16.msra.mxu0 %v14533_v14 }
 0x2da   : > { %4969 = vmatprep.subr.bf16.mxu0 %v12746_v41 }
 0x2db   : > { %5043 = vmatpush1.bf16.msra.mxu1 %v14565_v29 }
 0x2dc   : > { %5044 = vmatprep.subr.bf16.mxu1 %v12746_v41 }
 0x2dd   : > { %4970 = vmatpush1.bf16.msra.mxu0 %v14565_v29 }
 0x2de   : > { %4854 = vmatmul.mubr.bf16.gmra.mrb[88].mxu1 %v14598_v7  ;;  %4971 = vmatprep.subr.bf16.mxu0 %v12746_v41 }
 0x2df   : > { %10264 = vmatprep.mubr.msk.bf16.mxu1 %vm804_vm3, %v14604_v34  ;;  %5045 = vmatpush1.bf16.msra.mxu1 %v14591_v22 }
 0x2e0   : > { %4679 = vmatmul.mubr.bf16.gmra.mrb[80].mxu0 %v14607_v15  ;;  %5046 = vmatprep.subr.bf16.mxu1 %v12746_v41 }
 0x2e1   : > { %10260 = vmatprep.mubr.msk.bf16.mxu0 %vm804_vm3, %v14619_v0  ;;  %4972 = vmatpush1.bf16.msra.mxu0 %v14591_v22 }
 0x2e2   : > { %4973 = vmatprep.subr.bf16.mxu0 %v12746_v41 }
 0x2e3   : > { %5047 = vmatpush1.bf16.msra.mxu1 %v14615_v30 }
 0x2e4   : > { %5048 = vmatprep.subr.bf16.mxu1 %v12746_v41 }
 0x2e5   : > { %4974 = vmatpush1.bf16.msra.mxu0 %v14615_v30 }
 0x2e6   : > { %4862 = vmatmul.mubr.bf16.gmra.mrb[92].mxu1 %v14638_v43  ;;  %4975 = vmatprep.subr.bf16.mxu0 %v12746_v41 }
 0x2e7   : > { %10265 = vmatprep.mubr.msk.bf16.mxu1 %vm804_vm3, %v14641_v1  ;;  %5049 = vmatpush1.bf16.msra.mxu1 %v14633_v56 }
 0x2e8   : > { %4687 = vmatmul.mubr.bf16.gmra.mrb[84].mxu0 %v14646_v3  ;;  %5050 = vmatprep.subr.bf16.mxu1 %v12746_v41 }
 0x2e9   : > { %10261 = vmatprep.mubr.msk.bf16.mxu0 %vm804_vm3, %v14648_v11  ;;  %4976 = vmatpush1.bf16.msra.mxu0 %v14633_v56 }
 0x2ea   : > { %4977 = vmatprep.subr.bf16.mxu0 %v12746_v41 }
 0x2eb   : > { %5051 = vmatpush1.bf16.msra.mxu1 %v14656_v36 }
 0x2ec   : > { %5052 = vmatprep.subr.bf16.mxu1 %v12746_v41 }
 0x2ed   : > { %4978 = vmatpush1.bf16.msra.mxu0 %v14656_v36 }
 0x2ee   : > { %4870 = vmatmul.mubr.bf16.gmra.mrb[96].mxu1 %v14671_v54  ;;  %4979 = vmatprep.subr.bf16.mxu0 %v12746_v41 }
 0x2ef   : > { %5053 = vmatpush1.bf16.msra.mxu1 %v14669_v20  ;;  %10300 = vmatprep.mubr.msk.bf16.mxu1 %vm804_vm3, %v14490_v9  ;;  %v14697_v9 = vld [vmem:[%s16022_s3 + $0x130] sm:$0xff]  }
 0x2f0   : > { %4695 = vmatmul.mubr.bf16.gmra.mrb[88].mxu0 %v14675_v25  ;;  %5054 = vmatprep.subr.bf16.mxu1 %v12746_v41 }
 0x2f1   : > { %4980 = vmatpush1.bf16.msra.mxu0 %v14669_v20  ;;  %10296 = vmatprep.mubr.msk.bf16.mxu0 %vm804_vm3, %v14498_v2  ;;  %v14706_v2 = vld [vmem:[%s16022_s3 + $0x138] sm:$0xff]  }
 0x2f2   : > { %4981 = vmatprep.subr.bf16.mxu0 %v12746_v41 }
 0x2f3   : > { %5055 = vmatpush1.bf16.msra.mxu1 %v14685_v19 }
 0x2f4   : > { %5056 = vmatprep.subr.bf16.mxu1 %v12746_v41 }
 0x2f5   : > { %4982 = vmatpush1.bf16.msra.mxu0 %v14685_v19 }
 0x2f6   : > { %4983 = vmatprep.subr.bf16.mxu0 %v12746_v41 }
 0x2f7   : > { %5057 = vmatpush1.bf16.msra.mxu1 %v14697_v9 }
 0x2f8   : > { %5058 = vmatprep.subr.bf16.mxu1 %v12746_v41 }
 0x2f9   : > { %4984 = vmatpush1.bf16.msra.mxu0 %v14697_v9 }
 0x2fa   : > { %4985 = vmatprep.subr.bf16.mxu0 %v12746_v41 }
 0x2fb   : > { %5059 = vmatpush1.bf16.msra.mxu1 %v14706_v2 }
 0x2fc   : > { %5331 = vmatprep.subr.bf16.mxu1 %v12746_v41 }
 0x2fd   : > { %4986 = vmatpush1.bf16.msra.mxu0 %v14706_v2 }
 0x2fe   : > { %5073 = vmatmul.mubr.bf16.vlgmr.msra.gmra.mrb[68].mxu1 %v14545_v58  ;;  %5186 = vmatprep.subr.bf16.mxu0 %v12746_v41  ;;  %v5120_v58 = vld [vmem:[#allocation3 + $0x58] sm:$0xff] }
 0x2ff   : > { %10301 = vmatprep.mubr.msk.bf16.mxu1 %vm804_vm3, %v14552_v60  ;;  %5332 = vmatpush1.bf16.msra.mxu1 %v14533_v14  ;;  %v5260_v60 = vld [vmem:[#allocation3 + $0xd8] sm:$0xfc] }
 0x300   : > { %5000 = vmatmul.mubr.bf16.vlgmr.msra.gmra.mrb[60].mxu0 %v14557_v16  ;;  %5333 = vmatprep.subr.bf16.mxu1 %v12746_v41  ;;  %v5114_v16 = vld [vmem:[#allocation3 + $0x28] sm:$0xfc]  ;;  %v5278_v47 = vpack.c.bf16 %v5262_v35, %v5260_v60 }
 0x301   : > { %10297 = vmatprep.mubr.msk.bf16.mxu0 %vm804_vm3, %v14570_v17  ;;  %5187 = vmatpush1.bf16.msra.mxu0 %v14533_v14  ;;  %v5266_v14 = vld [vmem:[#allocation3 + $0x108] sm:$0xff]  ;;  %v5134_v17 = vpack.c.bf16 %v5120_v58, %v5118_v63  ;;  %v14829_v63 = vld [vmem:[%s16022_s3 + $0x150] sm:$0xff]  }
 0x302   : > { %5188 = vmatprep.subr.bf16.mxu0 %v12746_v41  ;;  %v5280_v31 = vpack.c.bf16 %v5266_v14, %v5264_v5  ;;  %v5300_v32 = vrot.slane %v5278_v47, 1 }
 0x303   : > { %5334 = vmatpush1.bf16.msra.mxu1 %v14565_v29  ;;  %v14757_v45 = vrot.slane %v5134_v17, 1  ;;  %v5276_v17 = vld [vmem:[#allocation3 + $0x158] sm:$0x1] }
 0x304   : > { %5335 = vmatprep.subr.bf16.mxu1 %v12746_v41  ;;  %v14753_v4 = vrot.slane %v5280_v31, 1 }
 0x305   : > { %5189 = vmatpush1.bf16.msra.mxu0 %v14565_v29  ;;  %v5116_v29 = vld [vmem:[#allocation3 + $0x38] sm:$0xff] }
 0x306   : > { %5081 = vmatmul.mubr.bf16.gmra.mrb[72].mxu1 %v14598_v7  ;;  %5190 = vmatprep.subr.bf16.mxu0 %v12746_v41  ;;  %v5132_v59 = vpack.c.bf16 %v5116_v29, %v5114_v16  ;;  %v14764_v53 = vsel %vm16088_vm13, %v5300_v32, %v14753_v4  ;;  %v5279_v7 = vpack.c.bf16 %v5265_v42, %v5263_v46  ;;  %v5271_v16 = vld [vmem:[#allocation3 + $0x130] sm:$0xff]  ;;  %v5130_v32 = vld [vmem:[#allocation3 + $0xa8] sm:$0x1]  ;;  %vm16103_vm13 = vmmov %vm16090_vm0 }
 0x307   : > { %10302 = vmatprep.mubr.msk.bf16.mxu1 %vm804_vm3, %v14604_v34  ;;  %5336 = vmatpush1.bf16.msra.mxu1 %v14591_v22  ;;  %v5115_v34 = vld [vmem:[#allocation3 + $0x30] sm:$0xff]  ;;  %v5286_v46 = vpack.c.bf16 %v5276_v17, %v5276_v17 }
 0x308   : > { %5008 = vmatmul.mubr.bf16.gmra.mrb[64].mxu0 %v14607_v15  ;;  %5337 = vmatprep.subr.bf16.mxu1 %v12746_v41  ;;  %v5155_v8 = vrot.slane %v5132_v59, 1  ;;  %v5298_v13 = vrot.slane %v5279_v7, 1  ;;  %v5125_v59 = vld [vmem:[#allocation3 + $0x80] sm:$0xff]  ;;  %v5275_v7 = vld [vmem:[#allocation3 + $0x150] sm:$0x1] }
 0x309   : > { %10298 = vmatprep.mubr.msk.bf16.mxu0 %vm804_vm3, %v14619_v0  ;;  %5191 = vmatpush1.bf16.msra.mxu0 %v14591_v22  ;;  %v5268_v22 = vld [vmem:[#allocation3 + $0x118] sm:$0xff]  ;;  %v5113_v0 = vld [vmem:[#allocation3 + $0x20] sm:$0xfc]  ;;  %v5313_v12 = vrot.slane %v5286_v46, 1 }
 0x30a   : > { %5192 = vmatprep.subr.bf16.mxu0 %v12746_v41  ;;  %v14772_v38 = vsel %vm16089_vm9, %v5155_v8, %v14757_v45  ;;  %v5282_v15 = vpack.c.bf16 %v5270_v48, %v5268_v22  ;;  %v5131_v24 = vpack.c.bf16 %v5115_v34, %v5113_v0  ;;  %v5137_v22 = vpack.c.bf16 %v14233_v37, %v5125_v59  ;;  %v5129_v34 = vld [vmem:[#allocation3 + $0xa0] sm:$0x1]  ;;  %vm16113_vm9 = vmmov %vm16090_vm0  ;;  %v12507_v59 = vld [vmem:[%s16024_s5 + $0x8] sm:$0xff]  }
 0x30b   : > { %5338 = vmatpush1.bf16.msra.mxu1 %v14615_v30 }
 0x30c   : > { %5339 = vmatprep.subr.bf16.mxu1 %v12746_v41  ;;  %v5305_v18 = vrot.slane %v5282_v15, 1 }
 0x30d   : > { %5193 = vmatpush1.bf16.msra.mxu0 %v14615_v30  ;;  %v5133_v30 = vpack.c.bf16 %v5119_v51, %v5117_v61  ;;  %v5140_v61 = vpack.c.bf16 %v5130_v32, %v5130_v32  ;;  %v12510_v32 = vld [vmem:[%s16024_s5 + $0x18] sm:$0xff]  }
 0x30e   : > { %5089 = vmatmul.mubr.bf16.gmra.mrb[76].mxu1 %v14638_v43  ;;  %5194 = vmatprep.subr.bf16.mxu0 %v12746_v41  ;;  %v5272_v43 = vld [vmem:[#allocation3 + $0x138] sm:$0xff] }
 0x30f   : > { %10303 = vmatprep.mubr.msk.bf16.mxu1 %vm804_vm3, %v14641_v1  ;;  %5340 = vmatpush1.bf16.msra.mxu1 %v14633_v56  ;;  %v5153_v49 = vrot.slane %v5133_v30, 1  ;;  %v5160_v1 = vrot.slane %v5136_v55, 1  ;;  %v5168_v26 = vrot.slane %v5140_v61, 1  ;;  %v5285_v30 = vpack.c.bf16 %v5275_v7, %v5275_v7  ;;  %v14888_v55 = vld [vmem:[%s16022_s3 + $0x168] sm:$0xff]  }
 0x310   : > { %5016 = vmatmul.mubr.bf16.gmra.mrb[68].mxu0 %v14646_v3  ;;  %5341 = vmatprep.subr.bf16.mxu1 %v12746_v41  ;;  %v5123_v3 = vld [vmem:[#allocation3 + $0x70] sm:$0xff] }
 0x311   : > { %10299 = vmatprep.mubr.msk.bf16.mxu0 %vm804_vm3, %v14648_v11  ;;  %5195 = vmatpush1.bf16.msra.mxu0 %v14633_v56  ;;  %v5297_v56 = vrot.slane %v5277_v40, 1  ;;  %v5267_v11 = vld [vmem:[#allocation3 + $0x110] sm:$0xff]  ;;  %v14818_v60 = vsel %vm16093_vm14, %v14757_v45, %v5160_v1  ;;  %v5283_v45 = vpack.c.bf16 %v14233_v37, %v5271_v16  ;;  %v5162_v37 = vrot.slane %v5137_v22, 1 }
 0x312   : > { %5196 = vmatprep.subr.bf16.mxu0 %v12746_v41  ;;  %vm5968_vm14 = vcmask 523264  }
 0x313   : > { %5342 = vmatpush1.bf16.msra.mxu1 %v14656_v36  ;;  %v14796_v28 = vsel %vm16090_vm0, %v5297_v56, %v5298_v13  ;;  %v5307_v51 = vrot.slane %v5283_v45, 1  ;;  %v12509_v45 = vld [vmem:[%s16024_s5 + $0x38] sm:$0xff]  }
 0x314   : > { %5343 = vmatprep.subr.bf16.mxu1 %v12746_v41 }
 0x315   : > { %5197 = vmatpush1.bf16.msra.mxu0 %v14656_v36  ;;  %v5152_v36 = vrot.slane %v5131_v24, 1  ;;  %v5139_v24 = vpack.c.bf16 %v5129_v34, %v5129_v34 }
 0x316   : > { %5097 = vmatmul.mubr.bf16.gmra.mrb[80].mxu1 %v14671_v54  ;;  %5198 = vmatprep.subr.bf16.mxu0 %v12746_v41  ;;  %v5128_v54 = vld [vmem:[#allocation3 + $0x98] sm:$0xff] }
 0x317   : > { %5344 = vmatpush1.bf16.msra.mxu1 %v14669_v20  ;;  %10308 = vmatprep.mubr.msk.bf16.mxu1 %vm804_vm3, %v14764_v53  ;;  %v14805_v14 = vsel %vm16092_vm8, %v5152_v36, %v5153_v49  ;;  %v5138_v35 = vpack.c.bf16 %v5128_v54, %v5126_v57  ;;  %v16107_v36 = vld [vmem:[#allocation12_spill] sm:$0xff]  ;;  %vm16116_vm8 = vmmov %vm16090_vm0 }
 0x318   : > { %5024 = vmatmul.mubr.bf16.gmra.mrb[72].mxu0 %v14675_v25  ;;  %5345 = vmatprep.subr.bf16.mxu1 %v12746_v41  ;;  %v14802_v25 = vsel %vm16091_vm4, %v14753_v4, %v5305_v18  ;;  %v5793_v57 = vld [vmem:[#allocation3 + $0x2b8] sm:$0x1]  ;;  %vm16115_vm4 = vmmov %vm16090_vm0 }
 0x319   : > { %5199 = vmatpush1.bf16.msra.mxu0 %v14669_v20  ;;  %10304 = vmatprep.mubr.msk.bf16.mxu0 %vm804_vm3, %v14772_v38  ;;  %v5281_v20 = vpack.c.bf16 %v5269_v23, %v5267_v11  ;;  %v5164_v47 = vrot.slane %v5138_v35, 1  ;;  %v5166_v23 = vrot.slane %v5139_v24, 1  ;;  %v16106_v11 = vld [vmem:[#allocation14_spill] sm:$0xff]  ;;  %v5803_v54 = vpack.c.bf16 %v5793_v57, %v5793_v57 }
 0x31a   : > { %5200 = vmatprep.subr.bf16.mxu0 %v12746_v41 }
 0x31b   : > { %5346 = vmatpush1.bf16.msra.mxu1 %v14685_v19  ;;  %v5303_v5 = vrot.slane %v5281_v20, 1  ;;  %v14856_v48 = vsel %vm16097_vm12, %v5160_v1, %v5164_v47  ;;  %v12502_v1 = vld [vmem:[%s16022_s3 + $0x188] sm:$0xff]   ;;  %v16109_v20 = vld [vmem:[#allocation8_spill] sm:$0xff] }
 0x31c   : > { %5347 = vmatprep.subr.bf16.mxu1 %v12746_v41 }
 0x31d   : > { %5201 = vmatpush1.bf16.msra.mxu0 %v14685_v19  ;;  %v5121_v19 = vld [vmem:[#allocation3 + $0x60] sm:$0xff]  ;;  %v14834_v4 = vsel %vm16094_vm15, %v5298_v13, %v5303_v5  ;;  %v14872_v15 = vsel %vm16098_vm10, %v5303_v5, %v5307_v51  ;;  %v14892_v13 = vsel %vm16101_vm5, %v5164_v47, %v5168_v26  ;;  %v16112_v5 = vld [vmem:[#allocation11_spill] sm:$0xff]  ;;  %vm5976_vm15 = vcmask 522240  }
 0x31e   : > { %5202 = vmatprep.subr.bf16.mxu0 %v12746_v41  ;;  %v5135_v58 = vpack.c.bf16 %v5123_v3, %v5121_v19  ;;  %v14993_v3 = vld [vmem:[#allocation3] sm:$0xff] }
 0x31f   : > { %5348 = vmatpush1.bf16.msra.mxu1 %v14697_v9  ;;  %v12503_v47 = vld [vmem:[%s16024_s5 + $0x20] sm:$0xff]  }
 0x320   : > { %5349 = vmatprep.subr.bf16.mxu1 %v12746_v41  ;;  %v5158_v29 = vrot.slane %v5135_v58, 1 }
 0x321   : > { %5203 = vmatpush1.bf16.msra.mxu0 %v14697_v9  ;;  %v5284_v9 = vpack.c.bf16 %v5274_v33, %v5272_v43  ;;  %v5167_v43 = vsel %vm16103_vm13, %v5162_v37, %v5166_v23  ;;  %v14916_v33 = vld [vmem:[%s16022_s3 + $0x178] sm:$0xff]  }
 0x322   : > { %5204 = vmatprep.subr.bf16.mxu0 %v12746_v41  ;;  %v14843_v42 = vsel %vm16096_vm11, %v5153_v49, %v5158_v29  ;;  %v14880_v0 = vsel %vm16100_vm7, %v5158_v29, %v5162_v37  ;;  %v14903_v49 = vld [vmem:[%s16022_s3 + $0x170] sm:$0xff]   ;;  %vm9857_vm11 = vcmask 0  }
 0x323   : > { %5350 = vmatpush1.bf16.msra.mxu1 %v14706_v2  ;;  %v5309_v31 = vrot.slane %v5284_v9, 1  ;;  %v16111_v9 = vld [vmem:[#allocation9_spill] sm:$0xff] }
 0x324   : > { %5558 = vmatprep.subr.bf16.mxu1 %v12746_v41 }
 0x325   : > { %5205 = vmatpush1.bf16.msra.mxu0 %v14706_v2  ;;  %v14813_v2 = vld [vmem:[%s16022_s3 + $0x148] sm:$0xff]   ;;  %v14840_v8 = vsel %vm16095_vm2, %v5305_v18, %v5309_v31  ;;  %v14877_v40 = vsel %vm16099_vm1, %v5309_v31, %v5313_v12  ;;  %v5311_v18 = vrot.slane %v5285_v30, 1  ;;  %vm9851_vm2 = vcmask 1040384  }
 0x326   : > { %5364 = vmatmul.mubr.bf16.vlgmr.msra.gmra.mrb[84].mxu1 %v14796_v28  ;;  %5485 = vmatprep.subr.bf16.mxu0 %v12746_v41 }
 0x327   : > { %10309 = vmatprep.mubr.msk.bf16.mxu1 %vm804_vm3, %v14802_v25  ;;  %5559 = vmatpush1.bf16.msra.mxu1 %v14791_v21  ;;  %v5312_v56 = vsel %vm16102_vm6, %v5307_v51, %v5311_v18 }
 0x328   : > { %5219 = vmatmul.mubr.bf16.vlgmr.msra.gmra.mrb[76].mxu0 %v14805_v14  ;;  %5560 = vmatprep.subr.bf16.mxu1 %v12746_v41 }
 0x329   : > { %10305 = vmatprep.mubr.msk.bf16.mxu0 %vm804_vm3, %v14818_v60  ;;  %5486 = vmatpush1.bf16.msra.mxu0 %v14791_v21 }
 0x32a   : > { %5487 = vmatprep.subr.bf16.mxu0 %v12746_v41 }
 0x32b   : > { %5561 = vmatpush1.bf16.msra.mxu1 %v14813_v2 }
 0x32c   : > { %5562 = vmatprep.subr.bf16.mxu1 %v12746_v41 }
 0x32d   : > { %5488 = vmatpush1.bf16.msra.mxu0 %v14813_v2 }
 0x32e   : > { %5372 = vmatmul.mubr.bf16.gmra.mrb[88].mxu1 %v14834_v4  ;;  %5489 = vmatprep.subr.bf16.mxu0 %v12746_v41 }
 0x32f   : > { %10310 = vmatprep.mubr.msk.bf16.mxu1 %vm804_vm3, %v14840_v8  ;;  %5563 = vmatpush1.bf16.msra.mxu1 %v14829_v63 }
 0x330   : > { %5227 = vmatmul.mubr.bf16.gmra.mrb[80].mxu0 %v14843_v42  ;;  %5564 = vmatprep.subr.bf16.mxu1 %v12746_v41 }
 0x331   : > { %10306 = vmatprep.mubr.msk.bf16.mxu0 %vm804_vm3, %v14856_v48  ;;  %5490 = vmatpush1.bf16.msra.mxu0 %v14829_v63 }
 0x332   : > { %5491 = vmatprep.subr.bf16.mxu0 %v12746_v41 }
 0x333   : > { %5565 = vmatpush1.bf16.msra.mxu1 %v14851_v44 }
 0x334   : > { %5566 = vmatprep.subr.bf16.mxu1 %v12746_v41 }
 0x335   : > { %5492 = vmatpush1.bf16.msra.mxu0 %v14851_v44 }
 0x336   : > { %5380 = vmatmul.mubr.bf16.gmra.mrb[92].mxu1 %v14872_v15  ;;  %5493 = vmatprep.subr.bf16.mxu0 %v12746_v41 }
 0x337   : > { %10311 = vmatprep.mubr.msk.bf16.mxu1 %vm804_vm3, %v14877_v40  ;;  %5567 = vmatpush1.bf16.msra.mxu1 %v14867_v52 }
 0x338   : > { %5235 = vmatmul.mubr.bf16.gmra.mrb[84].mxu0 %v14880_v0  ;;  %5568 = vmatprep.subr.bf16.mxu1 %v12746_v41 }
 0x339   : > { %10307 = vmatprep.mubr.msk.bf16.mxu0 %vm804_vm3, %v14892_v13  ;;  %5494 = vmatpush1.bf16.msra.mxu0 %v14867_v52 }
 0x33a   : > { %5495 = vmatprep.subr.bf16.mxu0 %v12746_v41 }
 0x33b   : > { %5569 = vmatpush1.bf16.msra.mxu1 %v14888_v55 }
 0x33c   : > { %5570 = vmatprep.subr.bf16.mxu1 %v12746_v41 }
 0x33d   : > { %5496 = vmatpush1.bf16.msra.mxu0 %v14888_v55 }
 0x33e   : > { %5388 = vmatmul.mubr.bf16.gmra.mrb[96].mxu1 %v5312_v56  ;;  %5497 = vmatprep.subr.bf16.mxu0 %v12746_v41 }
 0x33f   : > { %5571 = vmatpush1.bf16.msra.mxu1 %v14903_v49  ;;  %10346 = vmatprep.mubr.msk.bf16.mxu1 %vm804_vm3, %v14764_v53  ;;  %v12501_v53 = vld [vmem:[%s16022_s3 + $0x180] sm:$0xff]  }
 0x340   : > { %5243 = vmatmul.mubr.bf16.gmra.mrb[88].mxu0 %v5167_v43  ;;  %5572 = vmatprep.subr.bf16.mxu1 %v12746_v41 }
 0x341   : > { %5498 = vmatpush1.bf16.msra.mxu0 %v14903_v49  ;;  %10342 = vmatprep.mubr.msk.bf16.mxu0 %vm804_vm3, %v14772_v38  ;;  %v16104_v38 = vld [vmem:[#allocation10_spill] sm:$0xff] }
 0x342   : > { %5499 = vmatprep.subr.bf16.mxu0 %v12746_v41 }
 0x343   : > { %5573 = vmatpush1.bf16.msra.mxu1 %v14916_v33 }
 0x344   : > { %5574 = vmatprep.subr.bf16.mxu1 %v12746_v41 }
 0x345   : > { %5500 = vmatpush1.bf16.msra.mxu0 %v14916_v33 }
 0x346   : > { %5501 = vmatprep.subr.bf16.mxu0 %v12746_v41 }
 0x347   : > { %5575 = vmatpush1.bf16.msra.mxu1 %v12501_v53 }
 0x348   : > { %5576 = vmatprep.subr.bf16.mxu1 %v12746_v41 }
 0x349   : > { %5502 = vmatpush1.bf16.msra.mxu0 %v12501_v53 }
 0x34a   : > { %5503 = vmatprep.subr.bf16.mxu0 %v12746_v41 }
 0x34b   : > { %5577 = vmatpush1.bf16.msra.mxu1 %v12502_v1 }
 0x34c   : > { %5848 = vmatprep.subr.bf16.mxu1 %v12746_v41 }
 0x34d   : > { %5504 = vmatpush1.bf16.msra.mxu0 %v12502_v1 }
 0x34e   : > { %5591 = vmatmul.mubr.bf16.vlgmr.msra.gmra.mrb[68].mxu1 %v14796_v28  ;;  %5703 = vmatprep.subr.bf16.mxu0 %v12746_v41  ;;  %v16108_v28 = vld [vmem:[#allocation15_spill] sm:$0xff] }
 0x34f   : > { %10347 = vmatprep.mubr.msk.bf16.mxu1 %vm804_vm3, %v14802_v25  ;;  %5849 = vmatpush1.bf16.msra.mxu1 %v14791_v21  ;;  %v16110_v25 = vld [vmem:[#allocation13_spill] sm:$0xff] }
 0x350   : > { %5518 = vmatmul.mubr.bf16.vlgmr.msra.gmra.mrb[60].mxu0 %v14805_v14  ;;  %5850 = vmatprep.subr.bf16.mxu1 %v12746_v41  ;;  %v5830_v14 = vrot.slane %v5803_v54, 1 }
 0x351   : > { %10343 = vmatprep.mubr.msk.bf16.mxu0 %vm804_vm3, %v14818_v60  ;;  %5704 = vmatpush1.bf16.msra.mxu0 %v14791_v21  ;;  %v16105_v21 = vld [vmem:[#allocation6_spill] sm:$0xff]  ;;  %v5647_v60 = vld [vmem:[#allocation3 + $0x200] sm:$0x1] }
 0x352   : > { %5705 = vmatprep.subr.bf16.mxu0 %v12746_v41  ;;  %v5657_v31 = vpack.c.bf16 %v5647_v60, %v5647_v60 }
 0x353   : > { %5851 = vmatpush1.bf16.msra.mxu1 %v14813_v2 }
 0x354   : > { %5852 = vmatprep.subr.bf16.mxu1 %v12746_v41 }
 0x355   : > { %5706 = vmatpush1.bf16.msra.mxu0 %v14813_v2  ;;  %v5792_v2 = vld [vmem:[#allocation3 + $0x2b0] sm:$0x1] }
 0x356   : > { %5599 = vmatmul.mubr.bf16.gmra.mrb[72].mxu1 %v14834_v4  ;;  %5707 = vmatprep.subr.bf16.mxu0 %v12746_v41  ;;  %v5802_v35 = vpack.c.bf16 %v5792_v2, %v5792_v2  ;;  %v12508_v4 = vld [vmem:[%s16024_s5 + $0x10] sm:$0xff]  }
 0x357   : > { %10348 = vmatprep.mubr.msk.bf16.mxu1 %vm804_vm3, %v14840_v8  ;;  %5853 = vmatpush1.bf16.msra.mxu1 %v14829_v63 }
 0x358   : > { %5526 = vmatmul.mubr.bf16.gmra.mrb[64].mxu0 %v14843_v42  ;;  %5854 = vmatprep.subr.bf16.mxu1 %v12746_v41  ;;  %v5828_v29 = vrot.slane %v5802_v35, 1 }
 0x359   : > { %10344 = vmatprep.mubr.msk.bf16.mxu0 %vm804_vm3, %v14856_v48  ;;  %5708 = vmatpush1.bf16.msra.mxu0 %v14829_v63  ;;  %v5683_v63 = vrot.slane %v5657_v31, 1 }
 0x35a   : > { %5709 = vmatprep.subr.bf16.mxu0 %v12746_v41  ;;  %v5829_v17 = vsel %vm16115_vm4, %v14263_v50, %v5828_v29  ;;  %v12505_v50 = vld [vmem:[%s16024_s5] sm:$0xff]  }
 0x35b   : > { %5855 = vmatpush1.bf16.msra.mxu1 %v14851_v44 }
 0x35c   : > { %5856 = vmatprep.subr.bf16.mxu1 %v12746_v41 }
 0x35d   : > { %5710 = vmatpush1.bf16.msra.mxu0 %v14851_v44 }
 0x35e   : > { %5607 = vmatmul.mubr.bf16.gmra.mrb[76].mxu1 %v14872_v15  ;;  %5711 = vmatprep.subr.bf16.mxu0 %v12746_v41 }
 0x35f   : > { %10349 = vmatprep.mubr.msk.bf16.mxu1 %vm804_vm3, %v14877_v40  ;;  %5857 = vmatpush1.bf16.msra.mxu1 %v14867_v52 }
 0x360   : > { %5534 = vmatmul.mubr.bf16.gmra.mrb[68].mxu0 %v14880_v0  ;;  %5858 = vmatprep.subr.bf16.mxu1 %v12746_v41 }
 0x361   : > { %10345 = vmatprep.mubr.msk.bf16.mxu0 %vm804_vm3, %v14892_v13  ;;  %5712 = vmatpush1.bf16.msra.mxu0 %v14867_v52 }
 0x362   : > { %5713 = vmatprep.subr.bf16.mxu0 %v12746_v41 }
 0x363   : > { %5859 = vmatpush1.bf16.msra.mxu1 %v14888_v55 }
 0x364   : > { %5860 = vmatprep.subr.bf16.mxu1 %v12746_v41 }
 0x365   : > { %5714 = vmatpush1.bf16.msra.mxu0 %v14888_v55 }
 0x366   : > { %5615 = vmatmul.mubr.bf16.gmra.mrb[80].mxu1 %v5312_v56  ;;  %5715 = vmatprep.subr.bf16.mxu0 %v12746_v41 }
 0x367   : > { %5861 = vmatpush1.bf16.msra.mxu1 %v14903_v49  ;;  %10354 = vmatprep.mubr.msk.bf16.mxu1 %vm804_vm3, %v16104_v38 }
 0x368   : > { %5542 = vmatmul.mubr.bf16.gmra.mrb[72].mxu0 %v5167_v43  ;;  %5862 = vmatprep.subr.bf16.mxu1 %v12746_v41 }
 0x369   : > { %5716 = vmatpush1.bf16.msra.mxu0 %v14903_v49  ;;  %10350 = vmatprep.mubr.msk.bf16.mxu0 %vm804_vm3, %v16105_v21 }
 0x36a   : > { %5717 = vmatprep.subr.bf16.mxu0 %v12746_v41 }
 0x36b   : > { %5863 = vmatpush1.bf16.msra.mxu1 %v14916_v33 }
 0x36c   : > { %5864 = vmatprep.subr.bf16.mxu1 %v12746_v41 }
 0x36d   : > { %5718 = vmatpush1.bf16.msra.mxu0 %v14916_v33 }
 0x36e   : > { %5719 = vmatprep.subr.bf16.mxu0 %v12746_v41 }
 0x36f   : > { %5865 = vmatpush1.bf16.msra.mxu1 %v12501_v53 }
 0x370   : > { %5866 = vmatprep.subr.bf16.mxu1 %v12746_v41 }
 0x371   : > { %5720 = vmatpush1.bf16.msra.mxu0 %v12501_v53 }
 0x372   : > { %5721 = vmatprep.subr.bf16.mxu0 %v12746_v41  ;;  %v5648_v41 = vld [vmem:[#allocation3 + $0x208] sm:$0x1] }
 0x373   : > { %5867 = vmatpush1.bf16.msra.mxu1 %v12502_v1  ;;  %v5658_v19 = vpack.c.bf16 %v5648_v41, %v5648_v41 }
 0x374   : > { %11535 = vmatprep.subr.bf16.mxu1 %v14993_v3 }
 0x375   : > { %5722 = vmatpush1.bf16.msra.mxu0 %v12502_v1  ;;  %v5685_v58 = vrot.slane %v5658_v19, 1 }
 0x376   : > { %5881 = vmatmul.mubr.bf16.vlgmr.msra.gmra.mrb[84].mxu1 %v16106_v11  ;;  %11523 = vmatprep.subr.bf16.mxu0 %v14993_v3 }
 0x377   : > { %10355 = vmatprep.mubr.msk.bf16.mxu1 %vm804_vm3, %v16107_v36  ;;  %11536 = vmatpush3.bf16.msra.mxu1 %v12505_v50 }
 0x378   : > { %5736 = vmatmul.mubr.bf16.vlgmr.msra.gmra.mrb[76].mxu0 %v16108_v28  ;;  %11537 = vmatprep.subr.bf16.mxu1 %v14993_v3 }
 0x379   : > { %10351 = vmatprep.mubr.msk.bf16.mxu0 %vm804_vm3, %v16109_v20  ;;  %11524 = vmatpush3.bf16.msra.mxu0 %v12503_v47 }
 0x37a   : > { %11525 = vmatprep.subr.bf16.mxu0 %v14993_v3 }
 0x37b   : > { %11538 = vmatpush3.bf16.msra.mxu1 %v12507_v59 }
 0x37c   : > { %11539 = vmatprep.subr.bf16.mxu1 %v14993_v3 }
 0x37e   : > { %5889 = vmatmul.mubr.bf16.gmra.mrb[88].mxu1 %v14272_v27  ;;  %v5831_v27 = vsel %vm16113_vm9, %v16112_v5, %v5830_v14 }
 0x37f   : > { %10356 = vmatprep.mubr.msk.bf16.mxu1 %vm804_vm3, %v16110_v25  ;;  %11540 = vmatpush3.bf16.msra.mxu1 %v12508_v4 }
 0x380   : > { %5744 = vmatmul.mubr.bf16.gmra.mrb[80].mxu0 %v14284_v62  ;;  %v16114_v62 = vld [vmem:[#allocation7_spill] sm:$0xff]  ;;  %11541 = vmatprep.subr.bf16.mxu1 %v14993_v3 }
 0x381   : > { %10352 = vmatprep.mubr.msk.bf16.mxu0 %vm804_vm3, %v16111_v9  ;;  %v5686_v16 = vsel %vm16090_vm0, %v16114_v62, %v5685_v58 }
 0x383   : > { %11542 = vmatpush3.bf16.msra.mxu1 %v12510_v32 }
 0x384   : > { %11559 = vmatprep.subr.bf16.mxu1 %v14993_v3 }
 0x386   : > { %5897 = vmatmul.mubr.bf16.gmra.mrb[92].mxu1 %v14278_v6  ;;  %v5684_v6 = vsel %vm16116_vm8, %v14274_v39, %v5683_v63  ;;  %v12506_v39 = vld [vmem:[%s16024_s5 + $0x30] sm:$0xff]  }
 0x387   : > { %10357 = vmatprep.mubr.msk.bf16.mxu1 %vm804_vm3, %v5831_v27  ;;  %v15084_v27 = vld [vmem:[%s16023_s4] ss:$0 sm:$0xff] }
 0x388   : > { %5752 = vmatmul.mubr.bf16.gmra.mrb[84].mxu0 %v14289_v10  ;;  %v12504_v10 = vld [vmem:[%s16024_s5 + $0x28] sm:$0xff]  }
 0x389   : > { %10353 = vmatprep.mubr.msk.bf16.mxu0 %vm804_vm3, %v5686_v16  ;;  %11526 = vmatpush3.bf16.msra.mxu0 %v12504_v10  ;;  %vm12747_vm3 = vmmov 0  }
 0x38a   : > { %11527 = vmatprep.subr.bf16.mxu0 %v14993_v3 }
 0x38d   : > { %11528 = vmatpush3.bf16.msra.mxu0 %v12506_v39 }
 0x38e   : > { %5905 = vmatmul.mubr.bf16.gmra.mrb[96].mxu1 %v5829_v17  ;;  %11529 = vmatprep.subr.bf16.mxu0 %v14993_v3 }
 0x38f   : > { %11543 = vmatprep.mubr.msk.bf16.mxu1 %vm12747_vm3, %v14993_v3 }
 0x390   : > { %5760 = vmatmul.mubr.bf16.gmra.mrb[88].mxu0 %v5684_v6 }
 0x391   : > { %11530 = vmatpush3.bf16.msra.mxu0 %v12509_v45  ;;  %11531 = vmatprep.mubr.msk.bf16.mxu0 %vm12747_vm3, %v14993_v3 }
 0x392   : > { %11547 = vmatprep.subr.bf16.mxu0 %v14993_v3 }
 0x421   : > { %v5592_v8 = vpop.f32.mrb[68].mxu1 }
 0x422   : > { %v5594_v46 = vpop.f32.mrb[69].mxu1 }
 0x423   : > { %v5519_v42 = vpop.f32.mrb[60].mxu0  ;;  %v5595_v44 = vpop.f32.mrb[70].mxu1 }
 0x424   : > { %v5921_v22 = vmax.f32 %v5519_v42, %v5592_v8  ;;  %v5521_v48 = vpop.f32.mrb[61].mxu0  ;;  %v5597_v61 = vpop.f32.mrb[71].mxu1 }
 0x425   : > { %v5522_v51 = vpop.f32.mrb[62].mxu0 }
 0x426   : > { %v5922_v12 = vmax.f32 %v5522_v51, %v5595_v44  ;;  %v5524_v7 = vpop.f32.mrb[63].mxu0 }
 0x429   : > { %v5600_v37 = vpop.f32.mrb[72].mxu1 }
 0x42a   : > { %v5602_v52 = vpop.f32.mrb[73].mxu1 }
 0x42b   : > { %v5527_v26 = vpop.f32.mrb[64].mxu0  ;;  %v5603_v34 = vpop.f32.mrb[74].mxu1  ;;  %v12511_v52 = vld [vmem:[%s16024_s5 + $0x40] sm:$0xff]  }
 0x42c   : > { %v5923_v15 = vmax.f32 %v5527_v26, %v5600_v37  ;;  %v5529_v30 = vpop.f32.mrb[65].mxu0  ;;  %v5605_v40 = vpop.f32.mrb[75].mxu1  ;;  %v12512_v26 = vld [vmem:[%s16024_s5 + $0x60] sm:$0xff]  }
 0x42d   : > { %v5530_v0 = vpop.f32.mrb[66].mxu0 }
 0x42e   : > { %v5924_v55 = vmax.f32 %v5530_v0, %v5603_v34  ;;  %v5532_v24 = vpop.f32.mrb[67].mxu0 }
 0x431   : > { %v15057_v13 = vpop.f32.mrb[76].mxu1 }
 0x432   : > { %v5610_v18 = vpop.f32.mrb[77].mxu1 }
 0x433   : > { %v15059_v23 = vpop.f32.mrb[68].mxu0  ;;  %v15061_v49 = vpop.f32.mrb[78].mxu1 }
 0x434   : > { %v5925_v56 = vmax.f32 %v15059_v23, %v15057_v13  ;;  %v5537_v43 = vpop.f32.mrb[69].mxu0  ;;  %v5613_v33 = vpop.f32.mrb[79].mxu1 }
 0x435   : > { %v15065_v53 = vpop.f32.mrb[70].mxu0 }
 0x436   : > { %v5926_v1 = vmax.f32 %v15065_v53, %v15061_v49  ;;  %v5540_v38 = vpop.f32.mrb[71].mxu0  ;;  %v12515_v53 = vld [vmem:[%s16024_s5 + $0x50] sm:$0xff]  }
 0x439   : > { %v15069_v21 = vpop.f32.mrb[80].mxu1 }
 0x43a   : > { %v5618_v11 = vpop.f32.mrb[81].mxu1 }
 0x43b   : > { %v15071_v36 = vpop.f32.mrb[72].mxu0  ;;  %v15073_v28 = vpop.f32.mrb[82].mxu1 }
 0x43c   : > { %v5927_v20 = vmax.f32 %v15071_v36, %v15069_v21  ;;  %v5545_v57 = vpop.f32.mrb[73].mxu0  ;;  %v5621_v41 = vpop.f32.mrb[83].mxu1 }
 0x43d   : > { %v15077_v54 = vpop.f32.mrb[74].mxu0 }
 0x43e   : > { %v5928_v25 = vmax.f32 %v15077_v54, %v15073_v28  ;;  %v5548_v19 = vpop.f32.mrb[75].mxu0  ;;  %v12520_v28 = vld [vmem:[%s16024_s5 + $0xa0] sm:$0xff]  }
 0x43f   : > { %v12513_v19 = vld [vmem:[%s16024_s5 + $0x48] sm:$0xff]  }
 0x449   : > { %v5882_v9 = vpop.f32.mrb[84].mxu1 }
 0x44a   : > { %v5884_v14 = vpop.f32.mrb[85].mxu1 }
 0x44b   : > { %v5737_v2 = vpop.f32.mrb[76].mxu0  ;;  %v5885_v58 = vpop.f32.mrb[86].mxu1 }
 0x44c   : > { %v5929_v60 = vmax.f32 %v5737_v2, %v5882_v9  ;;  %v5739_v35 = vpop.f32.mrb[77].mxu0  ;;  %v5887_v5 = vpop.f32.mrb[87].mxu1  ;;  %v12514_v9 = vld [vmem:[%s16024_s5 + $0x68] sm:$0xff]  }
 0x44d   : > { %v5740_v31 = vpop.f32.mrb[78].mxu0 }
 0x44e   : > { %v5937_v62 = vmax.f32 %v5921_v22, %v5929_v60  ;;  %v5930_v16 = vmax.f32 %v5740_v31, %v5885_v58  ;;  %v5742_v29 = vpop.f32.mrb[79].mxu0 }
 0x450   : > { %v5952_v63 = vadd.f32 %v15084_v27, %v5937_v62  ;;  %v5938_v17 = vmax.f32 %v5922_v12, %v5930_v16 }
 0x451   : > { %v5890_v6 = vpop.f32.mrb[88].mxu1 }
 0x452   : > { %v5960_v47 = vmax.f32 %v5952_v63, 0.0  ;;  %v5953_v10 = vadd.f32 %v15084_v27, %v5938_v17  ;;  %v5892_v50 = vpop.f32.mrb[89].mxu1 }
 0x453   : > { %v5745_v39 = vpop.f32.mrb[80].mxu0  ;;  %v5893_v59 = vpop.f32.mrb[90].mxu1 }
 0x454   : > { %5969 = vst.msk [vmem:[#allocation4] sm:$0xff] %vm5968_vm14, %v5960_v47  ;;  %v5961_v4 = vmax.f32 %v5953_v10, 0.0  ;;  %v5931_v45 = vmax.f32 %v5745_v39, %v5890_v6  ;;  %v5747_v32 = vpop.f32.mrb[81].mxu0  ;;  %v5895_v8 = vpop.f32.mrb[91].mxu1  ;;  %v12517_v6 = vld [vmem:[%s16024_s5 + $0x58] sm:$0xff]  }
 0x455   : > { %v5748_v46 = vpop.f32.mrb[82].mxu0  ;;  %v12518_v47 = vld [vmem:[%s16024_s5 + $0x78] sm:$0xff]   ;;  %v12523_v32 = vld [vmem:[%s16024_s5 + $0x90] sm:$0xff]  }
 0x456   : > { %5970 = vst.msk [vmem:[#allocation4 + $0x8] sm:$0xff] %vm5968_vm14, %v5961_v4  ;;  %v5939_v42 = vmax.f32 %v5923_v15, %v5931_v45  ;;  %v5932_v44 = vmax.f32 %v5748_v46, %v5893_v59  ;;  %v5750_v22 = vpop.f32.mrb[83].mxu0  ;;  %v12519_v59 = vld [vmem:[%s16024_s5 + $0x80] sm:$0xff]   ;;  %v12522_v45 = vld [vmem:[%s16024_s5 + $0xa8] sm:$0xff]   ;;  %v12524_v8 = vld [vmem:[%s16024_s5 + $0xb0] sm:$0xff]  }
 0x457   : > { %v12525_v46 = vld [vmem:[%s16024_s5 + $0x98] sm:$0xff]  }
 0x458   : > { %v5954_v48 = vadd.f32 %v15084_v27, %v5939_v42  ;;  %v5940_v61 = vmax.f32 %v5924_v55, %v5932_v44  ;;  %v12526_v42 = vld [vmem:[%s16024_s5 + $0xb8] sm:$0xff]  }
 0x459   : > { %v5898_v51 = vpop.f32.mrb[92].mxu1 }
 0x45a   : > { %v5962_v12 = vmax.f32 %v5954_v48, 0.0  ;;  %v5955_v7 = vadd.f32 %v15084_v27, %v5940_v61  ;;  %v5900_v37 = vpop.f32.mrb[93].mxu1  ;;  %v12527_v48 = vld [vmem:[%s16024_s5 + $0xc0] sm:$0xff]  }
 0x45b   : > { %v5753_v34 = vpop.f32.mrb[84].mxu0  ;;  %v5901_v15 = vpop.f32.mrb[94].mxu1  ;;  %v5988_v30 = vld [vmem:[#allocation4 + $0x1] sm:$0x1]  ;;  %v5978_v40 = vld [vmem:[#allocation4] sm:$0x1] }
 0x45c   : > { %5971 = vst.msk [vmem:[#allocation4 + $0x10] sm:$0xff] %vm5968_vm14, %v5962_v12  ;;  %v5963_v0 = vmax.f32 %v5955_v7, 0.0  ;;  %v5933_v55 = vmax.f32 %v5753_v34, %v5898_v51  ;;  %v5755_v24 = vpop.f32.mrb[85].mxu0  ;;  %v5903_v18 = vpop.f32.mrb[95].mxu1  ;;  %v5989_v43 = vpack.c.bf16 %v5988_v30, %v5988_v30  ;;  %v5979_v33 = vpack.c.bf16 %v5978_v40, %v5978_v40  ;;  %v6133_v21 = vld [vmem:[#allocation4 + $0x2] sm:$0x1] }
 0x45d   : > { %v5756_v38 = vpop.f32.mrb[86].mxu0  ;;  %v6212_v36 = vld [vmem:[#allocation4 + $0x3] sm:$0x1]  ;;  %v6291_v44 = vld [vmem:[#allocation4 + $0x4] sm:$0x1]  ;;  %v12529_v7 = vld [vmem:[%s16024_s5 + $0xc8] sm:$0xff]  }
 0x45e   : > { %5972 = vst.msk [vmem:[#allocation4 + $0x18] sm:$0xff] %vm5968_vm14, %v5963_v0  ;;  %v5941_v11 = vmax.f32 %v5925_v56, %v5933_v55  ;;  %v5934_v57 = vmax.f32 %v5756_v38, %v5901_v15  ;;  %v5758_v41 = vpop.f32.mrb[87].mxu0  ;;  %11532 = vmatmul.mubr.msk.bf16.vlgmr.msra.gmra.mrb[92].mxu0 %vm5968_vm14, %v5989_v43  ;;  %11544 = vmatmul.mubr.msk.bf16.vlgmr.msra.gmra.mrb[100].mxu1 %vm5968_vm14, %v5979_v33  ;;  %v6370_v22 = vld [vmem:[#allocation4 + $0x5] sm:$0x1]  ;;  %v12530_v37 = vld [vmem:[%s16024_s5 + $0xe8] sm:$0xff]   ;;  %v12533_v34 = vld [vmem:[%s16024_s5 + $0xd8] sm:$0xff]  }
 0x45f   : > { %11548 = vmatpush3.bf16.msra.mxu0 %v12511_v52  ;;  %11560 = vmatpush3.bf16.msra.mxu1 %v12512_v26  ;;  %v6213_v4 = vpack.c.bf16 %v6212_v36, %v6212_v36  ;;  %v12528_v61 = vld [vmem:[%s16024_s5 + $0xe0] sm:$0xff]   ;;  %v6292_v51 = vpack.c.bf16 %v6291_v44, %v6291_v44  ;;  %v6371_v12 = vpack.c.bf16 %v6370_v22, %v6370_v22  ;;  %v12531_v52 = vld [vmem:[%s16024_s5 + $0xd0] sm:$0xff]   ;;  %v12534_v15 = vld [vmem:[%s16024_s5 + $0xf8] sm:$0xff]  }
 0x460   : > { %v5956_v14 = vadd.f32 %v15084_v27, %v5941_v11  ;;  %v5942_v13 = vmax.f32 %v5926_v1, %v5934_v57  ;;  %11549 = vmatprep.subr.bf16.mxu0 %v14993_v3  ;;  %11561 = vmatprep.subr.bf16.mxu1 %v14993_v3  ;;  %v12516_v1 = vld [vmem:[%s16024_s5 + $0x70] sm:$0xff]   ;;  %v6449_v30 = vld [vmem:[#allocation4 + $0x6] sm:$0x1]  ;;  %v6528_v40 = vld [vmem:[#allocation4 + $0x9] sm:$0x1] }
 0x461   : > { %v5906_v23 = vpop.f32.mrb[96].mxu1  ;;  %11555 = vmatprep.mubr.msk.bf16.mxu0 %vm12747_vm3, %v14993_v3  ;;  %11567 = vmatprep.mubr.msk.bf16.mxu1 %vm12747_vm3, %v14993_v3  ;;  %v12532_v26 = vld [vmem:[%s16024_s5 + $0xf0] sm:$0xff]   ;;  %v12535_v0 = vld [vmem:[%s16024_s5 + $0x100] sm:$0xff]   ;;  %v6450_v24 = vpack.c.bf16 %v6449_v30, %v6449_v30  ;;  %v6529_v18 = vpack.c.bf16 %v6528_v40, %v6528_v40  ;;  %v12537_v43 = vld [vmem:[%s16024_s5 + $0x108] sm:$0xff]  }
 0x462   : > { %v5964_v56 = vmax.f32 %v5956_v14, 0.0  ;;  %v5957_v2 = vadd.f32 %v15084_v27, %v5942_v13  ;;  %v5908_v58 = vpop.f32.mrb[97].mxu1  ;;  %v12536_v55 = vld [vmem:[%s16024_s5 + $0x120] sm:$0xff]   ;;  %v12538_v33 = vld [vmem:[%s16024_s5 + $0x128] sm:$0xff]   ;;  %v12539_v38 = vld [vmem:[%s16024_s5 + $0x110] sm:$0xff]  }
 0x463   : > { %11550 = vmatpush3.bf16.msra.mxu0 %v12513_v19  ;;  %11562 = vmatpush3.bf16.msra.mxu1 %v12514_v9  ;;  %v5761_v60 = vpop.f32.mrb[88].mxu0  ;;  %v5909_v49 = vpop.f32.mrb[98].mxu1  ;;  %v12540_v11 = vld [vmem:[%s16024_s5 + $0x130] sm:$0xff]   ;;  %v12541_v57 = vld [vmem:[%s16024_s5 + $0x118] sm:$0xff]   ;;  %v6607_v19 = vld [vmem:[#allocation4 + $0xa] sm:$0x1] }
 0x464   : > { %5973 = vst.msk [vmem:[#allocation4 + $0x20] sm:$0xff] %vm5968_vm14, %v5964_v56  ;;  %v5965_v35 = vmax.f32 %v5957_v2, 0.0  ;;  %v5935_v5 = vmax.f32 %v5761_v60, %v5906_v23  ;;  %v5763_v31 = vpop.f32.mrb[89].mxu0  ;;  %11551 = vmatprep.subr.bf16.mxu0 %v14993_v3  ;;  %11563 = vmatprep.subr.bf16.mxu1 %v14993_v3  ;;  %v5911_v62 = vpop.f32.mrb[99].mxu1  ;;  %v12542_v41 = vld [vmem:[%s16024_s5 + $0x138] sm:$0xff]   ;;  %v12543_v14 = vld [vmem:[%s16024_s5 + $0x140] sm:$0xff]   ;;  %v6608_v23 = vpack.c.bf16 %v6607_v19, %v6607_v19 }
 0x465   : > { %v5764_v16 = vpop.f32.mrb[90].mxu0  ;;  %v6686_v9 = vld [vmem:[#allocation4 + $0xb] sm:$0x1]  ;;  %v12544_v13 = vld [vmem:[%s16024_s5 + $0x160] sm:$0xff]   ;;  %v12547_v60 = vld [vmem:[%s16024_s5 + $0x150] sm:$0xff]  }
 0x466   : > { %5974 = vst.msk [vmem:[#allocation4 + $0x28] sm:$0xff] %vm5968_vm14, %v5965_v35  ;;  %v5943_v29 = vmax.f32 %v5927_v20, %v5935_v5  ;;  %v5936_v63 = vmax.f32 %v5764_v16, %v5909_v49  ;;  %v5766_v17 = vpop.f32.mrb[91].mxu0  ;;  %v6687_v56 = vpack.c.bf16 %v6686_v9, %v6686_v9  ;;  %v12545_v2 = vld [vmem:[%s16024_s5 + $0x148] sm:$0xff]   ;;  %v12548_v49 = vld [vmem:[%s16024_s5 + $0x170] sm:$0xff]   ;;  %v12551_v31 = vld [vmem:[%s16024_s5 + $0x180] sm:$0xff]  }
 0x467   : > { %11552 = vmatpush3.bf16.msra.mxu0 %v12515_v53  ;;  %11564 = vmatpush3.bf16.msra.mxu1 %v12516_v1  ;;  %v12546_v58 = vld [vmem:[%s16024_s5 + $0x168] sm:$0xff]   ;;  %v12549_v53 = vld [vmem:[%s16024_s5 + $0x158] sm:$0xff]   ;;  %v12552_v62 = vld [vmem:[%s16024_s5 + $0x1a0] sm:$0xff]  }
 0x468   : > { %v5958_v10 = vadd.f32 %v15084_v27, %v5943_v29  ;;  %v5944_v50 = vmax.f32 %v5928_v25, %v5936_v63  ;;  %11553 = vmatprep.subr.bf16.mxu0 %v14993_v3  ;;  %11565 = vmatprep.subr.bf16.mxu1 %v14993_v3  ;;  %v6134_v25 = vpack.c.bf16 %v6133_v21, %v6133_v21  ;;  %v12550_v1 = vld [vmem:[%s16024_s5 + $0x178] sm:$0xff]   ;;  %v6765_v35 = vld [vmem:[#allocation4 + $0xc] sm:$0x1]  ;;  %v6844_v5 = vld [vmem:[#allocation4 + $0xd] sm:$0x1] }
 0x469   : > { %v6766_v16 = vpack.c.bf16 %v6765_v35, %v6765_v35  ;;  %v6845_v29 = vpack.c.bf16 %v6844_v5, %v6844_v5  ;;  %v12553_v63 = vld [vmem:[%s16024_s5 + $0x188] sm:$0xff]   ;;  %v12568_v44 = vld [vmem:[%s16024_s5 + $0x220] sm:$0xff]  }
 0x46a   : > { %v5966_v20 = vmax.f32 %v5958_v10, 0.0  ;;  %v5959_v39 = vadd.f32 %v15084_v27, %v5944_v50  ;;  %v12521_v27 = vld [vmem:[%s16024_s5 + $0x88] sm:$0xff]   ;;  %v12557_v10 = vld [vmem:[%s16024_s5 + $0x198] sm:$0xff]   ;;  %v12576_v30 = vld [vmem:[%s16024_s5 + $0x260] sm:$0xff]  }
 0x46b   : > { %11554 = vmatpush3.bf16.msra.mxu0 %v12517_v6  ;;  %11566 = vmatpush3.bf16.msra.mxu1 %v12518_v47  ;;  %v12554_v17 = vld [vmem:[%s16024_s5 + $0x1a8] sm:$0xff]   ;;  %v12555_v6 = vld [vmem:[%s16024_s5 + $0x190] sm:$0xff]   ;;  %v12558_v50 = vld [vmem:[%s16024_s5 + $0x1b8] sm:$0xff]  }
 0x46c   : > { %5975 = vst.msk [vmem:[#allocation4 + $0x30] sm:$0xff] %vm5968_vm14, %v5966_v20  ;;  %v5967_v54 = vmax.f32 %v5959_v39, 0.0  ;;  %11571 = vmatprep.subr.bf16.mxu0 %v14993_v3  ;;  %11583 = vmatprep.subr.bf16.mxu1 %v14993_v3  ;;  %v12556_v47 = vld [vmem:[%s16024_s5 + $0x1b0] sm:$0xff]   ;;  %v6923_v21 = vld [vmem:[#allocation4 + $0xe] sm:$0x1]  ;;  %v12559_v20 = vld [vmem:[%s16024_s5 + $0x1c0] sm:$0xff]  }
 0x46d   : > { %v7002_v36 = vld [vmem:[#allocation4 + $0xf] sm:$0x1]  ;;  %v12560_v39 = vld [vmem:[%s16024_s5 + $0x1e0] sm:$0xff]  }
 0x46e   : > { %5977 = vst.msk [vmem:[#allocation4 + $0x38] sm:$0x7f] %vm5976_vm15, %v5967_v54  ;;  %11556 = vmatmul.mubr.msk.bf16.vlgmr.msra.gmra.mrb[96].mxu0 %vm5968_vm14, %v6134_v25  ;;  %11568 = vmatmul.mubr.msk.bf16.vlgmr.msra.gmra.mrb[104].mxu1 %vm5968_vm14, %v6213_v4  ;;  %v12561_v54 = vld [vmem:[%s16024_s5 + $0x1c8] sm:$0xff]   ;;  %v12563_v4 = vld [vmem:[%s16024_s5 + $0x1d0] sm:$0xff]   ;;  %v12584_v19 = vld [vmem:[%s16024_s5 + $0x2a0] sm:$0xff]  }
 0x46f   : > { %11572 = vmatpush3.bf16.msra.mxu0 %v12519_v59  ;;  %11584 = vmatpush3.bf16.msra.mxu1 %v12520_v28  ;;  %v6924_v59 = vpack.c.bf16 %v6923_v21, %v6923_v21  ;;  %v7003_v28 = vpack.c.bf16 %v7002_v36, %v7002_v36  ;;  %v12562_v25 = vld [vmem:[%s16024_s5 + $0x1e8] sm:$0xff]   ;;  %v12592_v35 = vld [vmem:[%s16024_s5 + $0x2e0] sm:$0xff]  }
 0x470   : > { %11573 = vmatprep.subr.bf16.mxu0 %v14993_v3  ;;  %11585 = vmatprep.subr.bf16.mxu1 %v14993_v3  ;;  %v12600_v21 = vld [vmem:[%s16024_s5 + $0x320] sm:$0xff]  }
 0x471   : > { %11579 = vmatprep.mubr.msk.bf16.mxu0 %vm12747_vm3, %v14993_v3  ;;  %11591 = vmatprep.mubr.msk.bf16.mxu1 %vm12747_vm3, %v14993_v3 }
 0x473   : > { %11574 = vmatpush3.bf16.msra.mxu0 %v12521_v27  ;;  %11586 = vmatpush3.bf16.msra.mxu1 %v12522_v45  ;;  %v12564_v27 = vld [vmem:[%s16024_s5 + $0x1f0] sm:$0xff]   ;;  %v12565_v45 = vld [vmem:[%s16024_s5 + $0x1d8] sm:$0xff]  }
 0x474   : > { %11575 = vmatprep.subr.bf16.mxu0 %v14993_v3  ;;  %11587 = vmatprep.subr.bf16.mxu1 %v14993_v3 }
 0x477   : > { %11576 = vmatpush3.bf16.msra.mxu0 %v12523_v32  ;;  %11588 = vmatpush3.bf16.msra.mxu1 %v12524_v8  ;;  %v12566_v32 = vld [vmem:[%s16024_s5 + $0x1f8] sm:$0xff]   ;;  %v7081_v8 = vld [vmem:[#allocation4 + $0x12] sm:$0x1] }
 0x478   : > { %11577 = vmatprep.subr.bf16.mxu0 %v14993_v3  ;;  %11589 = vmatprep.subr.bf16.mxu1 %v14993_v3  ;;  %v7082_v22 = vpack.c.bf16 %v7081_v8, %v7081_v8  ;;  %v12608_v8 = vld [vmem:[%s16024_s5 + $0x360] sm:$0xff]  }
 0x47b   : > { %11578 = vmatpush3.bf16.msra.mxu0 %v12525_v46  ;;  %11590 = vmatpush3.bf16.msra.mxu1 %v12526_v42  ;;  %v7160_v46 = vld [vmem:[#allocation4 + $0x13] sm:$0x1]  ;;  %v12567_v42 = vld [vmem:[%s16024_s5 + $0x200] sm:$0xff]  }
 0x47c   : > { %11595 = vmatprep.subr.bf16.mxu0 %v14993_v3  ;;  %11607 = vmatprep.subr.bf16.mxu1 %v14993_v3 }
 0x47e   : > { %11580 = vmatmul.mubr.msk.bf16.vlgmr.msra.gmra.mrb[100].mxu0 %vm5968_vm14, %v6292_v51  ;;  %11592 = vmatmul.mubr.msk.bf16.vlgmr.msra.gmra.mrb[108].mxu1 %vm5968_vm14, %v6371_v12  ;;  %v12570_v51 = vld [vmem:[%s16024_s5 + $0x228] sm:$0xff]   ;;  %v12571_v12 = vld [vmem:[%s16024_s5 + $0x210] sm:$0xff]  }
 0x47f   : > { %11596 = vmatpush3.bf16.msra.mxu0 %v12527_v48  ;;  %11608 = vmatpush3.bf16.msra.mxu1 %v12528_v61  ;;  %v7161_v48 = vpack.c.bf16 %v7160_v46, %v7160_v46  ;;  %v12569_v61 = vld [vmem:[%s16024_s5 + $0x208] sm:$0xff]  }
 0x480   : > { %11597 = vmatprep.subr.bf16.mxu0 %v14993_v3  ;;  %11609 = vmatprep.subr.bf16.mxu1 %v14993_v3 }
 0x481   : > { %11603 = vmatprep.mubr.msk.bf16.mxu0 %vm12747_vm3, %v14993_v3  ;;  %11615 = vmatprep.mubr.msk.bf16.mxu1 %vm12747_vm3, %v14993_v3 }
 0x483   : > { %11598 = vmatpush3.bf16.msra.mxu0 %v12529_v7  ;;  %11610 = vmatpush3.bf16.msra.mxu1 %v12530_v37  ;;  %v12572_v7 = vld [vmem:[%s16024_s5 + $0x230] sm:$0xff]   ;;  %v12573_v37 = vld [vmem:[%s16024_s5 + $0x218] sm:$0xff]  }
 0x484   : > { %11599 = vmatprep.subr.bf16.mxu0 %v14993_v3  ;;  %11611 = vmatprep.subr.bf16.mxu1 %v14993_v3 }
 0x487   : > { %11600 = vmatpush3.bf16.msra.mxu0 %v12531_v52  ;;  %11612 = vmatpush3.bf16.msra.mxu1 %v12532_v26  ;;  %v12574_v52 = vld [vmem:[%s16024_s5 + $0x238] sm:$0xff]   ;;  %v7239_v26 = vld [vmem:[#allocation4 + $0x14] sm:$0x1] }
 0x488   : > { %11601 = vmatprep.subr.bf16.mxu0 %v14993_v3  ;;  %11613 = vmatprep.subr.bf16.mxu1 %v14993_v3  ;;  %v7240_v40 = vpack.c.bf16 %v7239_v26, %v7239_v26  ;;  %v12616_v26 = vld [vmem:[%s16024_s5 + $0x3a0] sm:$0xff]  }
 0x48b   : > { %11602 = vmatpush3.bf16.msra.mxu0 %v12533_v34  ;;  %11614 = vmatpush3.bf16.msra.mxu1 %v12534_v15  ;;  %v7318_v34 = vld [vmem:[#allocation4 + $0x15] sm:$0x1]  ;;  %v12575_v15 = vld [vmem:[%s16024_s5 + $0x240] sm:$0xff]  }
 0x48c   : > { %11619 = vmatprep.subr.bf16.mxu0 %v14993_v3  ;;  %11631 = vmatprep.subr.bf16.mxu1 %v14993_v3 }
 0x48e   : > { %11604 = vmatmul.mubr.msk.bf16.vlgmr.msra.gmra.mrb[104].mxu0 %vm5968_vm14, %v6450_v24  ;;  %11616 = vmatmul.mubr.msk.bf16.vlgmr.msra.gmra.mrb[112].mxu1 %vm5968_vm14, %v6529_v18  ;;  %v12578_v24 = vld [vmem:[%s16024_s5 + $0x268] sm:$0xff]   ;;  %v12579_v18 = vld [vmem:[%s16024_s5 + $0x250] sm:$0xff]  }
 0x48f   : > { %11620 = vmatpush3.bf16.msra.mxu0 %v12535_v0  ;;  %11632 = vmatpush3.bf16.msra.mxu1 %v12536_v55  ;;  %v7319_v0 = vpack.c.bf16 %v7318_v34, %v7318_v34  ;;  %v12577_v55 = vld [vmem:[%s16024_s5 + $0x248] sm:$0xff]  }
 0x490   : > { %11621 = vmatprep.subr.bf16.mxu0 %v14993_v3  ;;  %11633 = vmatprep.subr.bf16.mxu1 %v14993_v3 }
 0x491   : > { %11627 = vmatprep.mubr.msk.bf16.mxu0 %vm12747_vm3, %v14993_v3  ;;  %11639 = vmatprep.mubr.msk.bf16.mxu1 %vm12747_vm3, %v14993_v3 }
 0x493   : > { %11622 = vmatpush3.bf16.msra.mxu0 %v12537_v43  ;;  %11634 = vmatpush3.bf16.msra.mxu1 %v12538_v33  ;;  %v12580_v43 = vld [vmem:[%s16024_s5 + $0x270] sm:$0xff]   ;;  %v12581_v33 = vld [vmem:[%s16024_s5 + $0x258] sm:$0xff]  }
 0x494   : > { %11623 = vmatprep.subr.bf16.mxu0 %v14993_v3  ;;  %11635 = vmatprep.subr.bf16.mxu1 %v14993_v3 }
 0x497   : > { %11624 = vmatpush3.bf16.msra.mxu0 %v12539_v38  ;;  %11636 = vmatpush3.bf16.msra.mxu1 %v12540_v11  ;;  %v12582_v38 = vld [vmem:[%s16024_s5 + $0x278] sm:$0xff]   ;;  %v7397_v11 = vld [vmem:[#allocation4 + $0x16] sm:$0x1] }
 0x498   : > { %11625 = vmatprep.subr.bf16.mxu0 %v14993_v3  ;;  %11637 = vmatprep.subr.bf16.mxu1 %v14993_v3  ;;  %v7398_v9 = vpack.c.bf16 %v7397_v11, %v7397_v11  ;;  %v12619_v11 = vld [vmem:[%s16024_s5 + $0x390] sm:$0xff]  }
 0x49b   : > { %11626 = vmatpush3.bf16.msra.mxu0 %v12541_v57  ;;  %11638 = vmatpush3.bf16.msra.mxu1 %v12542_v41  ;;  %v7476_v57 = vld [vmem:[#allocation4 + $0x17] sm:$0x1]  ;;  %v12583_v41 = vld [vmem:[%s16024_s5 + $0x280] sm:$0xff]  }
 0x49c   : > { %11643 = vmatprep.subr.bf16.mxu0 %v14993_v3  ;;  %11655 = vmatprep.subr.bf16.mxu1 %v14993_v3 }
 0x49e   : > { %11628 = vmatmul.mubr.msk.bf16.vlgmr.msra.gmra.mrb[108].mxu0 %vm5968_vm14, %v6608_v23  ;;  %11640 = vmatmul.mubr.msk.bf16.vlgmr.msra.gmra.mrb[116].mxu1 %vm5968_vm14, %v6687_v56  ;;  %v12586_v23 = vld [vmem:[%s16024_s5 + $0x2a8] sm:$0xff]   ;;  %v12587_v56 = vld [vmem:[%s16024_s5 + $0x290] sm:$0xff]  }
 0x49f   : > { %11644 = vmatpush3.bf16.msra.mxu0 %v12543_v14  ;;  %11656 = vmatpush3.bf16.msra.mxu1 %v12544_v13  ;;  %v7477_v14 = vpack.c.bf16 %v7476_v57, %v7476_v57  ;;  %v12585_v13 = vld [vmem:[%s16024_s5 + $0x288] sm:$0xff]   ;;  %v12620_v57 = vld [vmem:[%s16024_s5 + $0x3b0] sm:$0xff]  }
 0x4a0   : > { %11645 = vmatprep.subr.bf16.mxu0 %v14993_v3  ;;  %11657 = vmatprep.subr.bf16.mxu1 %v14993_v3 }
 0x4a1   : > { %11651 = vmatprep.mubr.msk.bf16.mxu0 %vm12747_vm3, %v14993_v3  ;;  %11663 = vmatprep.mubr.msk.bf16.mxu1 %vm12747_vm3, %v14993_v3 }
 0x4a3   : > { %11646 = vmatpush3.bf16.msra.mxu0 %v12545_v2  ;;  %11658 = vmatpush3.bf16.msra.mxu1 %v12546_v58  ;;  %v12588_v2 = vld [vmem:[%s16024_s5 + $0x2b0] sm:$0xff]   ;;  %v12589_v58 = vld [vmem:[%s16024_s5 + $0x298] sm:$0xff]  }
 0x4a4   : > { %11647 = vmatprep.subr.bf16.mxu0 %v14993_v3  ;;  %11659 = vmatprep.subr.bf16.mxu1 %v14993_v3 }
 0x4a7   : > { %11648 = vmatpush3.bf16.msra.mxu0 %v12547_v60  ;;  %11660 = vmatpush3.bf16.msra.mxu1 %v12548_v49  ;;  %v12590_v60 = vld [vmem:[%s16024_s5 + $0x2b8] sm:$0xff]  }
 0x4a8   : > { %11649 = vmatprep.subr.bf16.mxu0 %v14993_v3  ;;  %11661 = vmatprep.subr.bf16.mxu1 %v14993_v3  ;;  %v7555_v49 = vld [vmem:[#allocation4 + $0x18] sm:$0x1] }
 0x4a9   : > { %v7556_v5 = vpack.c.bf16 %v7555_v49, %v7555_v49  ;;  %v12625_v49 = vld [vmem:[%s16024_s5 + $0x3c8] sm:$0xff]  }
 0x4ab   : > { %11650 = vmatpush3.bf16.msra.mxu0 %v12549_v53  ;;  %11662 = vmatpush3.bf16.msra.mxu1 %v12550_v1  ;;  %v7634_v53 = vld [vmem:[#allocation4 + $0x1b] sm:$0x1]  ;;  %v12591_v1 = vld [vmem:[%s16024_s5 + $0x2c0] sm:$0xff]  }
 0x4ac   : > { %11667 = vmatprep.subr.bf16.mxu0 %v14993_v3  ;;  %11679 = vmatprep.subr.bf16.mxu1 %v14993_v3 }
 0x4ae   : > { %11652 = vmatmul.mubr.msk.bf16.vlgmr.msra.gmra.mrb[112].mxu0 %vm5968_vm14, %v6766_v16  ;;  %11664 = vmatmul.mubr.msk.bf16.vlgmr.msra.gmra.mrb[120].mxu1 %vm5968_vm14, %v6845_v29  ;;  %v12594_v16 = vld [vmem:[%s16024_s5 + $0x2e8] sm:$0xff]   ;;  %v12595_v29 = vld [vmem:[%s16024_s5 + $0x2d0] sm:$0xff]  }
 0x4af   : > { %11668 = vmatpush3.bf16.msra.mxu0 %v12551_v31  ;;  %11680 = vmatpush3.bf16.msra.mxu1 %v12552_v62  ;;  %v7635_v31 = vpack.c.bf16 %v7634_v53, %v7634_v53  ;;  %v12593_v62 = vld [vmem:[%s16024_s5 + $0x2c8] sm:$0xff]  }
 0x4b0   : > { %11669 = vmatprep.subr.bf16.mxu0 %v14993_v3  ;;  %11681 = vmatprep.subr.bf16.mxu1 %v14993_v3  ;;  %v12626_v53 = vld [vmem:[%s16024_s5 + $0x3e8] sm:$0xff]  }
 0x4b1   : > { %11675 = vmatprep.mubr.msk.bf16.mxu0 %vm12747_vm3, %v14993_v3  ;;  %11687 = vmatprep.mubr.msk.bf16.mxu1 %vm12747_vm3, %v14993_v3 }
 0x4b3   : > { %11670 = vmatpush3.bf16.msra.mxu0 %v12553_v63  ;;  %11682 = vmatpush3.bf16.msra.mxu1 %v12554_v17  ;;  %v12596_v63 = vld [vmem:[%s16024_s5 + $0x2f0] sm:$0xff]   ;;  %v15519_v17 = vld [vmem:[#allocation3] sm:$0xff] }
 0x4b4   : > { %11671 = vmatprep.subr.bf16.mxu0 %v14993_v3  ;;  %11683 = vmatprep.subr.bf16.mxu1 %v14993_v3 }
 0x4b7   : > { %11672 = vmatpush3.bf16.msra.mxu0 %v12555_v6  ;;  %11684 = vmatpush3.bf16.msra.mxu1 %v12556_v47  ;;  %v12598_v6 = vld [vmem:[%s16024_s5 + $0x2f8] sm:$0xff]  }
 0x4b8   : > { %11673 = vmatprep.subr.bf16.mxu0 %v14993_v3  ;;  %11685 = vmatprep.subr.bf16.mxu1 %v14993_v3  ;;  %v7713_v47 = vld [vmem:[#allocation4 + $0x1c] sm:$0x1] }
 0x4b9   : > { %v7714_v36 = vpack.c.bf16 %v7713_v47, %v7713_v47 }
 0x4bb   : > { %11674 = vmatpush3.bf16.msra.mxu0 %v12557_v10  ;;  %11686 = vmatpush3.bf16.msra.mxu1 %v12558_v50  ;;  %v7792_v10 = vld [vmem:[#allocation4 + $0x1d] sm:$0x1]  ;;  %v12599_v50 = vld [vmem:[%s16024_s5 + $0x300] sm:$0xff]  }
 0x4bc   : > { %11691 = vmatprep.subr.bf16.mxu0 %v14993_v3  ;;  %11703 = vmatprep.subr.bf16.mxu1 %v14993_v3 }
 0x4be   : > { %11676 = vmatmul.mubr.msk.bf16.vlgmr.msra.gmra.mrb[116].mxu0 %vm5968_vm14, %v6924_v59  ;;  %11688 = vmatmul.mubr.msk.bf16.vlgmr.msra.gmra.mrb[124].mxu1 %vm5968_vm14, %v7003_v28  ;;  %v12602_v59 = vld [vmem:[%s16024_s5 + $0x328] sm:$0xff]   ;;  %v12603_v28 = vld [vmem:[%s16024_s5 + $0x310] sm:$0xff]  }
 0x4bf   : > { %11692 = vmatpush3.bf16.msra.mxu0 %v12559_v20  ;;  %11704 = vmatpush3.bf16.msra.mxu1 %v12560_v39  ;;  %v7793_v20 = vpack.c.bf16 %v7792_v10, %v7792_v10  ;;  %v12601_v39 = vld [vmem:[%s16024_s5 + $0x308] sm:$0xff]  }
 0x4c0   : > { %11693 = vmatprep.subr.bf16.mxu0 %v14993_v3  ;;  %11705 = vmatprep.subr.bf16.mxu1 %v14993_v3 }
 0x4c1   : > { %11699 = vmatprep.mubr.msk.bf16.mxu0 %vm12747_vm3, %v14993_v3  ;;  %11711 = vmatprep.mubr.msk.bf16.mxu1 %vm12747_vm3, %v14993_v3 }
 0x4c3   : > { %11694 = vmatpush3.bf16.msra.mxu0 %v12561_v54  ;;  %11706 = vmatpush3.bf16.msra.mxu1 %v12562_v25  ;;  %v12604_v54 = vld [vmem:[%s16024_s5 + $0x330] sm:$0xff]   ;;  %v12605_v25 = vld [vmem:[%s16024_s5 + $0x318] sm:$0xff]  }
 0x4c4   : > { %11695 = vmatprep.subr.bf16.mxu0 %v14993_v3  ;;  %11707 = vmatprep.subr.bf16.mxu1 %v14993_v3 }
 0x4c7   : > { %11696 = vmatpush3.bf16.msra.mxu0 %v12563_v4  ;;  %11708 = vmatpush3.bf16.msra.mxu1 %v12564_v27  ;;  %v12606_v4 = vld [vmem:[%s16024_s5 + $0x338] sm:$0xff]  }
 0x4c8   : > { %11697 = vmatprep.subr.bf16.mxu0 %v14993_v3  ;;  %11709 = vmatprep.subr.bf16.mxu1 %v14993_v3  ;;  %v7871_v27 = vld [vmem:[#allocation4 + $0x1e] sm:$0x1] }
 0x4c9   : > { %v7872_v46 = vpack.c.bf16 %v7871_v27, %v7871_v27 }
 0x4cb   : > { %11698 = vmatpush3.bf16.msra.mxu0 %v12565_v45  ;;  %11710 = vmatpush3.bf16.msra.mxu1 %v12566_v32  ;;  %v7950_v45 = vld [vmem:[#allocation4 + $0x1f] sm:$0x1]  ;;  %v12607_v32 = vld [vmem:[%s16024_s5 + $0x340] sm:$0xff]  }
 0x4cc   : > { %11715 = vmatprep.subr.bf16.mxu0 %v14993_v3  ;;  %11727 = vmatprep.subr.bf16.mxu1 %v14993_v3 }
 0x4ce   : > { %11700 = vmatmul.mubr.msk.bf16.vlgmr.msra.gmra.mrb[120].mxu0 %vm5968_vm14, %v7082_v22  ;;  %11712 = vmatmul.mubr.msk.bf16.vlgmr.msra.gmra.mrb[128].mxu1 %vm5968_vm14, %v7161_v48  ;;  %v12610_v22 = vld [vmem:[%s16024_s5 + $0x368] sm:$0xff]   ;;  %v12611_v48 = vld [vmem:[%s16024_s5 + $0x350] sm:$0xff]  }
 0x4cf   : > { %11716 = vmatpush3.bf16.msra.mxu0 %v12567_v42  ;;  %11728 = vmatpush3.bf16.msra.mxu1 %v12568_v44  ;;  %v7951_v42 = vpack.c.bf16 %v7950_v45, %v7950_v45  ;;  %v12609_v44 = vld [vmem:[%s16024_s5 + $0x348] sm:$0xff]  }
 0x4d0   : > { %11717 = vmatprep.subr.bf16.mxu0 %v14993_v3  ;;  %11729 = vmatprep.subr.bf16.mxu1 %v14993_v3 }
 0x4d1   : > { %11723 = vmatprep.mubr.msk.bf16.mxu0 %vm12747_vm3, %v14993_v3  ;;  %11735 = vmatprep.mubr.msk.bf16.mxu1 %vm12747_vm3, %v14993_v3 }
 0x4d3   : > { %11718 = vmatpush3.bf16.msra.mxu0 %v12569_v61  ;;  %11730 = vmatpush3.bf16.msra.mxu1 %v12570_v51  ;;  %v12612_v61 = vld [vmem:[%s16024_s5 + $0x370] sm:$0xff]   ;;  %v12613_v51 = vld [vmem:[%s16024_s5 + $0x358] sm:$0xff]  }
 0x4d4   : > { %11719 = vmatprep.subr.bf16.mxu0 %v14993_v3  ;;  %11731 = vmatprep.subr.bf16.mxu1 %v14993_v3 }
 0x4d7   : > { %11720 = vmatpush3.bf16.msra.mxu0 %v12571_v12  ;;  %11732 = vmatpush3.bf16.msra.mxu1 %v12572_v7  ;;  %v12614_v12 = vld [vmem:[%s16024_s5 + $0x378] sm:$0xff]   ;;  %v8029_v7 = vld [vmem:[#allocation4 + $0x20] sm:$0x1] }
 0x4d8   : > { %11721 = vmatprep.subr.bf16.mxu0 %v14993_v3  ;;  %11733 = vmatprep.subr.bf16.mxu1 %v14993_v3  ;;  %v8030_v34 = vpack.c.bf16 %v8029_v7, %v8029_v7  ;;  %v12637_v7 = vld [vmem:[%s16024_s5 + $0x418] sm:$0xff]  }
 0x4db   : > { %11722 = vmatpush3.bf16.msra.mxu0 %v12573_v37  ;;  %11734 = vmatpush3.bf16.msra.mxu1 %v12574_v52  ;;  %v8108_v37 = vld [vmem:[#allocation4 + $0x21] sm:$0x1] }
 0x4dc   : > { %11739 = vmatprep.subr.bf16.mxu0 %v14993_v3  ;;  %11751 = vmatprep.subr.bf16.mxu1 %v14993_v3  ;;  %v12615_v52 = vld [vmem:[%s16024_s5 + $0x380] sm:$0xff]  }
 0x4de   : > { %11724 = vmatmul.mubr.msk.bf16.vlgmr.msra.gmra.mrb[124].mxu0 %vm5968_vm14, %v7240_v40  ;;  %11736 = vmatmul.mubr.msk.bf16.vlgmr.msra.gmra.mrb[132].mxu1 %vm5968_vm14, %v7319_v0  ;;  %v12618_v40 = vld [vmem:[%s16024_s5 + $0x3a8] sm:$0xff]  }
 0x4df   : > { %11740 = vmatpush3.bf16.msra.mxu0 %v12575_v15  ;;  %11752 = vmatpush3.bf16.msra.mxu1 %v12576_v30  ;;  %v8109_v15 = vpack.c.bf16 %v8108_v37, %v8108_v37  ;;  %v12617_v30 = vld [vmem:[%s16024_s5 + $0x388] sm:$0xff]   ;;  %v12638_v37 = vld [vmem:[%s16024_s5 + $0x438] sm:$0xff]  }
 0x4e0   : > { %11741 = vmatprep.subr.bf16.mxu0 %v14993_v3  ;;  %11753 = vmatprep.subr.bf16.mxu1 %v14993_v3 }
 0x4e1   : > { %11747 = vmatprep.mubr.msk.bf16.mxu0 %vm12747_vm3, %v14993_v3  ;;  %11759 = vmatprep.mubr.msk.bf16.mxu1 %vm12747_vm3, %v14993_v3 }
 0x4e3   : > { %11742 = vmatpush3.bf16.msra.mxu0 %v12577_v55  ;;  %11754 = vmatpush3.bf16.msra.mxu1 %v12578_v24 }
 0x4e4   : > { %11743 = vmatprep.subr.bf16.mxu0 %v14993_v3  ;;  %11755 = vmatprep.subr.bf16.mxu1 %v14993_v3 }
 0x4e7   : > { %11744 = vmatpush3.bf16.msra.mxu0 %v12579_v18  ;;  %11756 = vmatpush3.bf16.msra.mxu1 %v12580_v43 }
 0x4e8   : > { %11745 = vmatprep.subr.bf16.mxu0 %v14993_v3  ;;  %11757 = vmatprep.subr.bf16.mxu1 %v14993_v3 }
 0x4eb   : > { %11746 = vmatpush3.bf16.msra.mxu0 %v12581_v33  ;;  %11758 = vmatpush3.bf16.msra.mxu1 %v12582_v38 }
 0x4ec   : > { %11763 = vmatprep.subr.bf16.mxu0 %v14993_v3  ;;  %11775 = vmatprep.subr.bf16.mxu1 %v14993_v3 }
 0x4ee   : > { %11748 = vmatmul.mubr.msk.bf16.vlgmr.msra.gmra.mrb[128].mxu0 %vm5968_vm14, %v7398_v9  ;;  %11760 = vmatmul.mubr.msk.bf16.vlgmr.msra.gmra.mrb[136].mxu1 %vm5968_vm14, %v7477_v14  ;;  %v12621_v9 = vld [vmem:[%s16024_s5 + $0x398] sm:$0xff]  }
 0x4ef   : > { %11764 = vmatpush3.bf16.msra.mxu0 %v12583_v41  ;;  %11776 = vmatpush3.bf16.msra.mxu1 %v12584_v19  ;;  %v12622_v14 = vld [vmem:[%s16024_s5 + $0x3b8] sm:$0xff]  }
 0x4f0   : > { %11765 = vmatprep.subr.bf16.mxu0 %v14993_v3  ;;  %11777 = vmatprep.subr.bf16.mxu1 %v14993_v3 }
 0x4f1   : > { %11771 = vmatprep.mubr.msk.bf16.mxu0 %vm12747_vm3, %v14993_v3  ;;  %11783 = vmatprep.mubr.msk.bf16.mxu1 %vm12747_vm3, %v14993_v3 }
 0x4f3   : > { %11766 = vmatpush3.bf16.msra.mxu0 %v12585_v13  ;;  %11778 = vmatpush3.bf16.msra.mxu1 %v12586_v23  ;;  %v8187_v13 = vld [vmem:[#allocation4 + $0x24] sm:$0x1]  ;;  %v8266_v23 = vld [vmem:[#allocation4 + $0x25] sm:$0x1] }
 0x4f4   : > { %11767 = vmatprep.subr.bf16.mxu0 %v14993_v3  ;;  %11779 = vmatprep.subr.bf16.mxu1 %v14993_v3 }
 0x4f7   : > { %11768 = vmatpush3.bf16.msra.mxu0 %v12587_v56  ;;  %11780 = vmatpush3.bf16.msra.mxu1 %v12588_v2  ;;  %v12623_v56 = vld [vmem:[%s16024_s5 + $0x3c0] sm:$0xff]  }
 0x4f8   : > { %11769 = vmatprep.subr.bf16.mxu0 %v14993_v3  ;;  %11781 = vmatprep.subr.bf16.mxu1 %v14993_v3  ;;  %v12624_v2 = vld [vmem:[%s16024_s5 + $0x3e0] sm:$0xff]  }
 0x4fb   : > { %11770 = vmatpush3.bf16.msra.mxu0 %v12589_v58  ;;  %11782 = vmatpush3.bf16.msra.mxu1 %v12590_v60  ;;  %v8188_v58 = vpack.c.bf16 %v8187_v13, %v8187_v13  ;;  %v8267_v60 = vpack.c.bf16 %v8266_v23, %v8266_v23  ;;  %v12645_v23 = vld [vmem:[%s16024_s5 + $0x458] sm:$0xff]  }
 0x4fc   : > { %11787 = vmatprep.subr.bf16.mxu0 %v14993_v3  ;;  %11799 = vmatprep.subr.bf16.mxu1 %v14993_v3 }
 0x4fe   : > { %11772 = vmatmul.mubr.msk.bf16.vlgmr.msra.gmra.mrb[132].mxu0 %vm5968_vm14, %v7556_v5  ;;  %11784 = vmatmul.mubr.msk.bf16.vlgmr.msra.gmra.mrb[140].mxu1 %vm5968_vm14, %v7635_v31 }
 0x4ff   : > { %11788 = vmatpush3.bf16.msra.mxu0 %v12591_v1  ;;  %11800 = vmatpush3.bf16.msra.mxu1 %v12592_v35 }
 0x500   : > { %11789 = vmatprep.subr.bf16.mxu0 %v14993_v3  ;;  %11801 = vmatprep.subr.bf16.mxu1 %v14993_v3 }
 0x501   : > { %11795 = vmatprep.mubr.msk.bf16.mxu0 %vm12747_vm3, %v14993_v3  ;;  %11807 = vmatprep.mubr.msk.bf16.mxu1 %vm12747_vm3, %v14993_v3  ;;  %v12597_v3 = vld [vmem:[%s16024_s5 + $0x2d8] sm:$0xff]  }
 0x503   : > { %11790 = vmatpush3.bf16.msra.mxu0 %v12593_v62  ;;  %11802 = vmatpush3.bf16.msra.mxu1 %v12594_v16 }
 0x504   : > { %11791 = vmatprep.subr.bf16.mxu0 %v15519_v17  ;;  %11803 = vmatprep.subr.bf16.mxu1 %v15519_v17 }
 0x507   : > { %11792 = vmatpush3.bf16.msra.mxu0 %v12595_v29  ;;  %11804 = vmatpush3.bf16.msra.mxu1 %v12596_v63  ;;  %v12627_v63 = vld [vmem:[%s16024_s5 + $0x3d0] sm:$0xff]  }
 0x508   : > { %11793 = vmatprep.subr.bf16.mxu0 %v15519_v17  ;;  %11805 = vmatprep.subr.bf16.mxu1 %v15519_v17 }
 0x50b   : > { %11794 = vmatpush3.bf16.msra.mxu0 %v12597_v3  ;;  %11806 = vmatpush3.bf16.msra.mxu1 %v12598_v6  ;;  %v12628_v3 = vld [vmem:[%s16024_s5 + $0x3f0] sm:$0xff]  }
 0x50c   : > { %11811 = vmatprep.subr.bf16.mxu0 %v15519_v17  ;;  %11823 = vmatprep.subr.bf16.mxu1 %v15519_v17 }
 0x50e   : > { %11796 = vmatmul.mubr.msk.bf16.vlgmr.msra.gmra.mrb[136].mxu0 %vm5968_vm14, %v7714_v36  ;;  %11808 = vmatmul.mubr.msk.bf16.vlgmr.msra.gmra.mrb[144].mxu1 %vm5968_vm14, %v7793_v20  ;;  %v8345_v36 = vld [vmem:[#allocation4 + $0x26] sm:$0x1]  ;;  %v8424_v20 = vld [vmem:[#allocation4 + $0x27] sm:$0x1] }
 0x50f   : > { %11812 = vmatpush3.bf16.msra.mxu0 %v12599_v50  ;;  %11824 = vmatpush3.bf16.msra.mxu1 %v12600_v21  ;;  %v12629_v50 = vld [vmem:[%s16024_s5 + $0x3d8] sm:$0xff]  }
 0x510   : > { %11813 = vmatprep.subr.bf16.mxu0 %v15519_v17  ;;  %11825 = vmatprep.subr.bf16.mxu1 %v15519_v17  ;;  %v12630_v21 = vld [vmem:[%s16024_s5 + $0x3f8] sm:$0xff]  }
 0x511   : > { %11819 = vmatprep.mubr.msk.bf16.mxu0 %vm12747_vm3, %v15519_v17  ;;  %11831 = vmatprep.mubr.msk.bf16.mxu1 %vm12747_vm3, %v15519_v17 }
 0x513   : > { %11814 = vmatpush3.bf16.msra.mxu0 %v12601_v39  ;;  %11826 = vmatpush3.bf16.msra.mxu1 %v12602_v59  ;;  %v12631_v39 = vld [vmem:[%s16024_s5 + $0x400] sm:$0xff]  }
 0x514   : > { %11815 = vmatprep.subr.bf16.mxu0 %v15519_v17  ;;  %11827 = vmatprep.subr.bf16.mxu1 %v15519_v17  ;;  %v12632_v59 = vld [vmem:[%s16024_s5 + $0x420] sm:$0xff]  }
 0x517   : > { %11816 = vmatpush3.bf16.msra.mxu0 %v12603_v28  ;;  %11828 = vmatpush3.bf16.msra.mxu1 %v12604_v54  ;;  %v8346_v28 = vpack.c.bf16 %v8345_v36, %v8345_v36  ;;  %v8425_v54 = vpack.c.bf16 %v8424_v20, %v8424_v20  ;;  %v12653_v20 = vld [vmem:[%s16024_s5 + $0x498] sm:$0xff]  }
 0x518   : > { %11817 = vmatprep.subr.bf16.mxu0 %v15519_v17  ;;  %11829 = vmatprep.subr.bf16.mxu1 %v15519_v17 }
 0x51b   : > { %11818 = vmatpush3.bf16.msra.mxu0 %v12605_v25  ;;  %11830 = vmatpush3.bf16.msra.mxu1 %v12606_v4  ;;  %v12633_v25 = vld [vmem:[%s16024_s5 + $0x408] sm:$0xff]  }
 0x51c   : > { %11835 = vmatprep.subr.bf16.mxu0 %v15519_v17  ;;  %11847 = vmatprep.subr.bf16.mxu1 %v15519_v17  ;;  %v12634_v4 = vld [vmem:[%s16024_s5 + $0x428] sm:$0xff]  }
 0x51e   : > { %11820 = vmatmul.mubr.msk.bf16.vlgmr.msra.gmra.mrb[140].mxu0 %vm5968_vm14, %v7872_v46  ;;  %11832 = vmatmul.mubr.msk.bf16.vlgmr.msra.gmra.mrb[148].mxu1 %vm5968_vm14, %v7951_v42 }
 0x51f   : > { %11836 = vmatpush3.bf16.msra.mxu0 %v12607_v32  ;;  %11848 = vmatpush3.bf16.msra.mxu1 %v12608_v8 }
 0x520   : > { %11837 = vmatprep.subr.bf16.mxu0 %v15519_v17  ;;  %11849 = vmatprep.subr.bf16.mxu1 %v15519_v17 }
 0x521   : > { %11843 = vmatprep.mubr.msk.bf16.mxu0 %vm12747_vm3, %v15519_v17  ;;  %11855 = vmatprep.mubr.msk.bf16.mxu1 %vm12747_vm3, %v15519_v17 }
 0x523   : > { %11838 = vmatpush3.bf16.msra.mxu0 %v12609_v44  ;;  %11850 = vmatpush3.bf16.msra.mxu1 %v12610_v22  ;;  %v12635_v22 = vld [vmem:[%s16024_s5 + $0x410] sm:$0xff]  }
 0x524   : > { %11839 = vmatprep.subr.bf16.mxu0 %v15519_v17  ;;  %11851 = vmatprep.subr.bf16.mxu1 %v15519_v17 }
 0x527   : > { %11840 = vmatpush3.bf16.msra.mxu0 %v12611_v48  ;;  %11852 = vmatpush3.bf16.msra.mxu1 %v12612_v61  ;;  %v12636_v48 = vld [vmem:[%s16024_s5 + $0x430] sm:$0xff]  }
 0x528   : > { %11841 = vmatprep.subr.bf16.mxu0 %v15519_v17  ;;  %11853 = vmatprep.subr.bf16.mxu1 %v15519_v17 }
 0x52b   : > { %11842 = vmatpush3.bf16.msra.mxu0 %v12613_v51  ;;  %11854 = vmatpush3.bf16.msra.mxu1 %v12614_v12 }
 0x52c   : > { %11859 = vmatprep.subr.bf16.mxu0 %v15519_v17  ;;  %11871 = vmatprep.subr.bf16.mxu1 %v15519_v17 }
 0x52e   : > { %11844 = vmatmul.mubr.msk.bf16.vlgmr.msra.gmra.mrb[144].mxu0 %vm5968_vm14, %v8030_v34  ;;  %11856 = vmatmul.mubr.msk.bf16.vlgmr.msra.gmra.mrb[152].mxu1 %vm5968_vm14, %v8109_v15  ;;  %v12639_v34 = vld [vmem:[%s16024_s5 + $0x440] sm:$0xff]  }
 0x52f   : > { %11860 = vmatpush3.bf16.msra.mxu0 %v12615_v52  ;;  %11872 = vmatpush3.bf16.msra.mxu1 %v12616_v26  ;;  %v8503_v52 = vld [vmem:[#allocation4 + $0x28] sm:$0x1]  ;;  %v8582_v26 = vld [vmem:[#allocation4 + $0x29] sm:$0x1]  ;;  %v12640_v15 = vld [vmem:[%s16024_s5 + $0x460] sm:$0xff]  }
 0x530   : > { %11861 = vmatprep.subr.bf16.mxu0 %v15519_v17  ;;  %11873 = vmatprep.subr.bf16.mxu1 %v15519_v17 }
 0x531   : > { %v6060_v0 = vpop.f32.mrb[92].mxu0  ;;  %v6127_v55 = vpop.f32.mrb[100].mxu1  ;;  %11867 = vmatprep.mubr.msk.bf16.mxu0 %vm12747_vm3, %v15519_v17  ;;  %11879 = vmatprep.mubr.msk.bf16.mxu1 %vm12747_vm3, %v15519_v17 }
 0x532   : > { %v6128_v24 = vadd.f32 %v6127_v55, %v6060_v0  ;;  %v11533_v18 = vpop.f32.mrb[93].mxu0  ;;  %v11545_v43 = vpop.f32.mrb[101].mxu1  ;;  %v12641_v0 = vld [vmem:[%s16024_s5 + $0x448] sm:$0xff]  }
 0x533   : > { %11862 = vmatpush3.bf16.msra.mxu0 %v12617_v30  ;;  %11874 = vmatpush3.bf16.msra.mxu1 %v12618_v40  ;;  %v6063_v33 = vpop.f32.mrb[94].mxu0  ;;  %v6130_v38 = vpop.f32.mrb[102].mxu1  ;;  %v8504_v30 = vpack.c.bf16 %v8503_v52, %v8503_v52  ;;  %v8583_v40 = vpack.c.bf16 %v8582_v26, %v8582_v26  ;;  %v12642_v55 = vld [vmem:[%s16024_s5 + $0x468] sm:$0xff]   ;;  %v12661_v26 = vld [vmem:[%s16024_s5 + $0x4d8] sm:$0xff]  }
 0x534   : > { %v11534_v41 = vpop.f32.mrb[95].mxu0  ;;  %v11546_v19 = vpop.f32.mrb[103].mxu1  ;;  %11863 = vmatprep.subr.bf16.mxu0 %v15519_v17  ;;  %11875 = vmatprep.subr.bf16.mxu1 %v15519_v17 }
 0x535   : > { %v12643_v41 = vld [vmem:[%s16024_s5 + $0x450] sm:$0xff]  }
 0x536   : > { %v12644_v19 = vld [vmem:[%s16024_s5 + $0x470] sm:$0xff]  }
 0x537   : > { %11864 = vmatpush3.bf16.msra.mxu0 %v12619_v11  ;;  %11876 = vmatpush3.bf16.msra.mxu1 %v12620_v57 }
 0x538   : > { %11865 = vmatprep.subr.bf16.mxu0 %v15519_v17  ;;  %11877 = vmatprep.subr.bf16.mxu1 %v15519_v17 }
 0x53b   : > { %11866 = vmatpush3.bf16.msra.mxu0 %v12621_v9  ;;  %11878 = vmatpush3.bf16.msra.mxu1 %v12622_v14 }
 0x53c   : > { %11883 = vmatprep.subr.bf16.mxu0 %v15519_v17  ;;  %11895 = vmatprep.subr.bf16.mxu1 %v15519_v17 }
 0x53e   : > { %11868 = vmatmul.mubr.msk.bf16.vlgmr.msra.gmra.mrb[148].mxu0 %vm5968_vm14, %v8188_v58  ;;  %11880 = vmatmul.mubr.msk.bf16.vlgmr.msra.gmra.mrb[156].mxu1 %vm5968_vm14, %v8267_v60  ;;  %v8740_v58 = vld [vmem:[#allocation4 + $0x2d] sm:$0x1]  ;;  %v12647_v60 = vld [vmem:[%s16024_s5 + $0x480] sm:$0xff]  }
 0x53f   : > { %11884 = vmatpush3.bf16.msra.mxu0 %v12623_v56  ;;  %11896 = vmatpush3.bf16.msra.mxu1 %v12624_v2  ;;  %v12646_v56 = vld [vmem:[%s16024_s5 + $0x478] sm:$0xff]   ;;  %v8661_v2 = vld [vmem:[#allocation4 + $0x2a] sm:$0x1] }
 0x540   : > { %11885 = vmatprep.subr.bf16.mxu0 %v15519_v17  ;;  %11897 = vmatprep.subr.bf16.mxu1 %v15519_v17 }
 0x541   : > { %v6205_v1 = vpop.f32.mrb[96].mxu0  ;;  %v6284_v35 = vpop.f32.mrb[104].mxu1  ;;  %11891 = vmatprep.mubr.msk.bf16.mxu0 %vm12747_vm3, %v15519_v17  ;;  %11903 = vmatprep.mubr.msk.bf16.mxu1 %vm12747_vm3, %v15519_v17 }
 0x542   : > { %v6211_v5 = vadd.f32 %v6205_v1, %v6128_v24  ;;  %v11557_v31 = vpop.f32.mrb[97].mxu0  ;;  %v11569_v62 = vpop.f32.mrb[105].mxu1  ;;  %v8741_v1 = vpack.c.bf16 %v8740_v58, %v8740_v58  ;;  %v12669_v58 = vld [vmem:[%s16024_s5 + $0x518] sm:$0xff]  }
 0x543   : > { %v6208_v16 = vpop.f32.mrb[98].mxu0  ;;  %v6287_v29 = vpop.f32.mrb[106].mxu1  ;;  %11886 = vmatpush3.bf16.msra.mxu0 %v12625_v49  ;;  %11898 = vmatpush3.bf16.msra.mxu1 %v12626_v53  ;;  %v12648_v49 = vld [vmem:[%s16024_s5 + $0x4a0] sm:$0xff]   ;;  %v8662_v53 = vpack.c.bf16 %v8661_v2, %v8661_v2 }
 0x544   : > { %v6290_v6 = vadd.f32 %v6284_v35, %v6211_v5  ;;  %v11558_v47 = vpop.f32.mrb[99].mxu0  ;;  %v11570_v10 = vpop.f32.mrb[107].mxu1  ;;  %11887 = vmatprep.subr.bf16.mxu0 %v15519_v17  ;;  %11899 = vmatprep.subr.bf16.mxu1 %v15519_v17  ;;  %v12649_v35 = vld [vmem:[%s16024_s5 + $0x488] sm:$0xff]  }
 0x545   : > { %v12650_v5 = vld [vmem:[%s16024_s5 + $0x4a8] sm:$0xff]   ;;  %v12651_v47 = vld [vmem:[%s16024_s5 + $0x490] sm:$0xff]  }
 0x546   : > { %v12652_v10 = vld [vmem:[%s16024_s5 + $0x4b0] sm:$0xff]  }
 0x547   : > { %11888 = vmatpush3.bf16.msra.mxu0 %v12627_v63  ;;  %11900 = vmatpush3.bf16.msra.mxu1 %v12628_v3 }
 0x548   : > { %11889 = vmatprep.subr.bf16.mxu0 %v15519_v17  ;;  %11901 = vmatprep.subr.bf16.mxu1 %v15519_v17 }
 0x54b   : > { %11890 = vmatpush3.bf16.msra.mxu0 %v12629_v50  ;;  %11902 = vmatpush3.bf16.msra.mxu1 %v12630_v21 }
 0x54c   : > { %11907 = vmatprep.subr.bf16.mxu0 %v15519_v17  ;;  %11919 = vmatprep.subr.bf16.mxu1 %v15519_v17 }
 0x54e   : > { %11892 = vmatmul.mubr.msk.bf16.vlgmr.msra.gmra.mrb[152].mxu0 %vm5968_vm14, %v8346_v28  ;;  %11904 = vmatmul.mubr.msk.bf16.vlgmr.msra.gmra.mrb[160].mxu1 %vm5968_vm14, %v8425_v54  ;;  %v8898_v28 = vld [vmem:[#allocation4 + $0x2f] sm:$0x1]  ;;  %v12655_v54 = vld [vmem:[%s16024_s5 + $0x4c0] sm:$0xff]  }
 0x54f   : > { %11908 = vmatpush3.bf16.msra.mxu0 %v12631_v39  ;;  %11920 = vmatpush3.bf16.msra.mxu1 %v12632_v59  ;;  %v12654_v39 = vld [vmem:[%s16024_s5 + $0x4b8] sm:$0xff]   ;;  %v8819_v59 = vld [vmem:[#allocation4 + $0x2e] sm:$0x1] }
 0x550   : > { %11909 = vmatprep.subr.bf16.mxu0 %v15519_v17  ;;  %11921 = vmatprep.subr.bf16.mxu1 %v15519_v17 }
 0x551   : > { %v6363_v27 = vpop.f32.mrb[100].mxu0  ;;  %v6442_v45 = vpop.f32.mrb[108].mxu1  ;;  %11915 = vmatprep.mubr.msk.bf16.mxu0 %vm12747_vm3, %v15519_v17  ;;  %11927 = vmatprep.mubr.msk.bf16.mxu1 %vm12747_vm3, %v15519_v17 }
 0x552   : > { %v6369_v32 = vadd.f32 %v6363_v27, %v6290_v6  ;;  %v11581_v8 = vpop.f32.mrb[101].mxu0  ;;  %v11593_v46 = vpop.f32.mrb[109].mxu1  ;;  %v8899_v27 = vpack.c.bf16 %v8898_v28, %v8898_v28  ;;  %v12677_v28 = vld [vmem:[%s16024_s5 + $0x558] sm:$0xff]  }
 0x553   : > { %v6366_v42 = vpop.f32.mrb[102].mxu0  ;;  %v6445_v44 = vpop.f32.mrb[110].mxu1  ;;  %11910 = vmatpush3.bf16.msra.mxu0 %v12633_v25  ;;  %11922 = vmatpush3.bf16.msra.mxu1 %v12634_v4  ;;  %v12656_v25 = vld [vmem:[%s16024_s5 + $0x4e0] sm:$0xff]   ;;  %v8820_v4 = vpack.c.bf16 %v8819_v59, %v8819_v59 }
 0x554   : > { %v6448_v61 = vadd.f32 %v6442_v45, %v6369_v32  ;;  %v11582_v51 = vpop.f32.mrb[103].mxu0  ;;  %v11594_v12 = vpop.f32.mrb[111].mxu1  ;;  %11911 = vmatprep.subr.bf16.mxu0 %v15519_v17  ;;  %11923 = vmatprep.subr.bf16.mxu1 %v15519_v17  ;;  %v12657_v45 = vld [vmem:[%s16024_s5 + $0x4c8] sm:$0xff]  }
 0x555   : > { %v12658_v32 = vld [vmem:[%s16024_s5 + $0x4e8] sm:$0xff]   ;;  %v12659_v51 = vld [vmem:[%s16024_s5 + $0x4d0] sm:$0xff]  }
 0x556   : > { %v12660_v12 = vld [vmem:[%s16024_s5 + $0x4f0] sm:$0xff]  }
 0x557   : > { %11912 = vmatpush3.bf16.msra.mxu0 %v12635_v22  ;;  %11924 = vmatpush3.bf16.msra.mxu1 %v12636_v48 }
 0x558   : > { %11913 = vmatprep.subr.bf16.mxu0 %v15519_v17  ;;  %11925 = vmatprep.subr.bf16.mxu1 %v15519_v17 }
 0x55b   : > { %11914 = vmatpush3.bf16.msra.mxu0 %v12637_v7  ;;  %11926 = vmatpush3.bf16.msra.mxu1 %v12638_v37 }
 0x55c   : > { %11931 = vmatprep.subr.bf16.mxu0 %v15519_v17  ;;  %11943 = vmatprep.subr.bf16.mxu1 %v15519_v17 }
 0x55e   : > { %11916 = vmatmul.mubr.msk.bf16.vlgmr.msra.gmra.mrb[156].mxu0 %vm5968_vm14, %v8504_v30  ;;  %11928 = vmatmul.mubr.msk.bf16.vlgmr.msra.gmra.mrb[164].mxu1 %vm5968_vm14, %v8583_v40  ;;  %v9056_v30 = vld [vmem:[#allocation4 + $0x31] sm:$0x1]  ;;  %v12663_v40 = vld [vmem:[%s16024_s5 + $0x500] sm:$0xff]  }
 0x55f   : > { %11932 = vmatpush3.bf16.msra.mxu0 %v12639_v34  ;;  %11944 = vmatpush3.bf16.msra.mxu1 %v12640_v15  ;;  %v12662_v34 = vld [vmem:[%s16024_s5 + $0x4f8] sm:$0xff]   ;;  %v8977_v15 = vld [vmem:[#allocation4 + $0x30] sm:$0x1] }
 0x560   : > { %11933 = vmatprep.subr.bf16.mxu0 %v15519_v17  ;;  %11945 = vmatprep.subr.bf16.mxu1 %v15519_v17 }
 0x561   : > { %v6521_v24 = vpop.f32.mrb[104].mxu0  ;;  %v6600_v18 = vpop.f32.mrb[112].mxu1  ;;  %11939 = vmatprep.mubr.msk.bf16.mxu0 %vm12747_vm3, %v15519_v17  ;;  %11951 = vmatprep.mubr.msk.bf16.mxu1 %vm12747_vm3, %v15519_v17 }
 0x562   : > { %v6527_v43 = vadd.f32 %v6521_v24, %v6448_v61  ;;  %v11605_v33 = vpop.f32.mrb[105].mxu0  ;;  %v11617_v38 = vpop.f32.mrb[113].mxu1  ;;  %v9057_v24 = vpack.c.bf16 %v9056_v30, %v9056_v30  ;;  %v12685_v30 = vld [vmem:[%s16024_s5 + $0x598] sm:$0xff]  }
 0x563   : > { %v6524_v11 = vpop.f32.mrb[106].mxu0  ;;  %v6603_v57 = vpop.f32.mrb[114].mxu1  ;;  %11934 = vmatpush3.bf16.msra.mxu0 %v12641_v0  ;;  %11946 = vmatpush3.bf16.msra.mxu1 %v12642_v55  ;;  %v12664_v0 = vld [vmem:[%s16024_s5 + $0x520] sm:$0xff]   ;;  %v8978_v55 = vpack.c.bf16 %v8977_v15, %v8977_v15 }
 0x564   : > { %v6606_v9 = vadd.f32 %v6600_v18, %v6527_v43  ;;  %v11606_v14 = vpop.f32.mrb[107].mxu0  ;;  %v11618_v13 = vpop.f32.mrb[115].mxu1  ;;  %11935 = vmatprep.subr.bf16.mxu0 %v15519_v17  ;;  %11947 = vmatprep.subr.bf16.mxu1 %v15519_v17  ;;  %v12665_v18 = vld [vmem:[%s16024_s5 + $0x508] sm:$0xff]  }
 0x565   : > { %v12666_v43 = vld [vmem:[%s16024_s5 + $0x528] sm:$0xff]   ;;  %v12667_v14 = vld [vmem:[%s16024_s5 + $0x510] sm:$0xff]  }
 0x566   : > { %v12668_v13 = vld [vmem:[%s16024_s5 + $0x530] sm:$0xff]  }
 0x567   : > { %11936 = vmatpush3.bf16.msra.mxu0 %v12643_v41  ;;  %11948 = vmatpush3.bf16.msra.mxu1 %v12644_v19 }
 0x568   : > { %11937 = vmatprep.subr.bf16.mxu0 %v15519_v17  ;;  %11949 = vmatprep.subr.bf16.mxu1 %v15519_v17 }
 0x56b   : > { %11938 = vmatpush3.bf16.msra.mxu0 %v12645_v23  ;;  %11950 = vmatpush3.bf16.msra.mxu1 %v12646_v56 }
 0x56c   : > { %11955 = vmatprep.subr.bf16.mxu0 %v15519_v17  ;;  %11967 = vmatprep.subr.bf16.mxu1 %v15519_v17 }
 0x56e   : > { %11940 = vmatmul.mubr.msk.bf16.vlgmr.msra.gmra.mrb[160].mxu0 %vm5968_vm14, %v8662_v53  ;;  %11952 = vmatmul.mubr.msk.bf16.vlgmr.msra.gmra.mrb[168].mxu1 %vm5968_vm14, %v8741_v1  ;;  %v9214_v53 = vld [vmem:[#allocation4 + $0x33] sm:$0x1]  ;;  %v12671_v1 = vld [vmem:[%s16024_s5 + $0x540] sm:$0xff]  }
 0x56f   : > { %11956 = vmatpush3.bf16.msra.mxu0 %v12647_v60  ;;  %11968 = vmatpush3.bf16.msra.mxu1 %v12648_v49  ;;  %v12670_v60 = vld [vmem:[%s16024_s5 + $0x538] sm:$0xff]   ;;  %v9135_v49 = vld [vmem:[#allocation4 + $0x32] sm:$0x1] }
 0x570   : > { %11957 = vmatprep.subr.bf16.mxu0 %v15519_v17  ;;  %11969 = vmatprep.subr.bf16.mxu1 %v15519_v17 }
 0x571   : > { %v6679_v31 = vpop.f32.mrb[108].mxu0  ;;  %v6758_v62 = vpop.f32.mrb[116].mxu1  ;;  %11963 = vmatprep.mubr.msk.bf16.mxu0 %vm12747_vm3, %v15519_v17  ;;  %11975 = vmatprep.mubr.msk.bf16.mxu1 %vm12747_vm3, %v15519_v17 }
 0x572   : > { %v6685_v16 = vadd.f32 %v6679_v31, %v6606_v9  ;;  %v11629_v29 = vpop.f32.mrb[109].mxu0  ;;  %v11641_v63 = vpop.f32.mrb[117].mxu1  ;;  %v9215_v31 = vpack.c.bf16 %v9214_v53, %v9214_v53  ;;  %v12693_v53 = vld [vmem:[%s16024_s5 + $0x5d8] sm:$0xff]  }
 0x573   : > { %v6682_v3 = vpop.f32.mrb[110].mxu0  ;;  %v6761_v6 = vpop.f32.mrb[118].mxu1  ;;  %11958 = vmatpush3.bf16.msra.mxu0 %v12649_v35  ;;  %11970 = vmatpush3.bf16.msra.mxu1 %v12650_v5  ;;  %v12672_v35 = vld [vmem:[%s16024_s5 + $0x560] sm:$0xff]   ;;  %v9136_v5 = vpack.c.bf16 %v9135_v49, %v9135_v49 }
 0x574   : > { %v6764_v50 = vadd.f32 %v6758_v62, %v6685_v16  ;;  %v11630_v21 = vpop.f32.mrb[111].mxu0  ;;  %v11642_v36 = vpop.f32.mrb[119].mxu1  ;;  %11959 = vmatprep.subr.bf16.mxu0 %v15519_v17  ;;  %11971 = vmatprep.subr.bf16.mxu1 %v15519_v17  ;;  %v12673_v62 = vld [vmem:[%s16024_s5 + $0x548] sm:$0xff]  }
 0x575   : > { %v12674_v16 = vld [vmem:[%s16024_s5 + $0x568] sm:$0xff]   ;;  %v12675_v21 = vld [vmem:[%s16024_s5 + $0x550] sm:$0xff]  }
 0x576   : > { %v12676_v36 = vld [vmem:[%s16024_s5 + $0x570] sm:$0xff]  }
 0x577   : > { %11960 = vmatpush3.bf16.msra.mxu0 %v12651_v47  ;;  %11972 = vmatpush3.bf16.msra.mxu1 %v12652_v10 }
 0x578   : > { %11961 = vmatprep.subr.bf16.mxu0 %v15519_v17  ;;  %11973 = vmatprep.subr.bf16.mxu1 %v15519_v17 }
 0x57b   : > { %11962 = vmatpush3.bf16.msra.mxu0 %v12653_v20  ;;  %11974 = vmatpush3.bf16.msra.mxu1 %v12654_v39 }
 0x57c   : > { %11979 = vmatprep.subr.bf16.mxu0 %v15519_v17  ;;  %11991 = vmatprep.subr.bf16.mxu1 %v15519_v17 }
 0x57e   : > { %11964 = vmatmul.mubr.msk.bf16.vlgmr.msra.gmra.mrb[164].mxu0 %vm5968_vm14, %v8820_v4  ;;  %11976 = vmatmul.mubr.msk.bf16.vlgmr.msra.gmra.mrb[172].mxu1 %vm5968_vm14, %v8899_v27  ;;  %v9372_v4 = vld [vmem:[#allocation4 + $0x37] sm:$0x1]  ;;  %v12679_v27 = vld [vmem:[%s16024_s5 + $0x580] sm:$0xff]  }
 0x57f   : > { %11980 = vmatpush3.bf16.msra.mxu0 %v12655_v54  ;;  %11992 = vmatpush3.bf16.msra.mxu1 %v12656_v25  ;;  %v12678_v54 = vld [vmem:[%s16024_s5 + $0x578] sm:$0xff]   ;;  %v9293_v25 = vld [vmem:[#allocation4 + $0x36] sm:$0x1] }
 0x580   : > { %11981 = vmatprep.subr.bf16.mxu0 %v15519_v17  ;;  %11993 = vmatprep.subr.bf16.mxu1 %v15519_v17 }
 0x581   : > { %v6837_v8 = vpop.f32.mrb[112].mxu0  ;;  %v6916_v46 = vpop.f32.mrb[120].mxu1  ;;  %11987 = vmatprep.mubr.msk.bf16.mxu0 %vm12747_vm3, %v15519_v17  ;;  %11999 = vmatprep.mubr.msk.bf16.mxu1 %vm12747_vm3, %v15519_v17 }
 0x582   : > { %v6843_v42 = vadd.f32 %v6837_v8, %v6764_v50  ;;  %v11653_v44 = vpop.f32.mrb[113].mxu0  ;;  %v11665_v22 = vpop.f32.mrb[121].mxu1  ;;  %v9373_v8 = vpack.c.bf16 %v9372_v4, %v9372_v4 }
 0x583   : > { %v6840_v48 = vpop.f32.mrb[114].mxu0  ;;  %v6919_v61 = vpop.f32.mrb[122].mxu1  ;;  %11982 = vmatpush3.bf16.msra.mxu0 %v12657_v45  ;;  %11994 = vmatpush3.bf16.msra.mxu1 %v12658_v32  ;;  %v12680_v45 = vld [vmem:[%s16024_s5 + $0x5a0] sm:$0xff]   ;;  %v9294_v32 = vpack.c.bf16 %v9293_v25, %v9293_v25 }
 0x584   : > { %v6922_v7 = vadd.f32 %v6916_v46, %v6843_v42  ;;  %v11654_v37 = vpop.f32.mrb[115].mxu0  ;;  %v11666_v52 = vpop.f32.mrb[123].mxu1  ;;  %11983 = vmatprep.subr.bf16.mxu0 %v15519_v17  ;;  %11995 = vmatprep.subr.bf16.mxu1 %v15519_v17  ;;  %v12681_v46 = vld [vmem:[%s16024_s5 + $0x588] sm:$0xff]  }
 0x585   : > { %v12682_v42 = vld [vmem:[%s16024_s5 + $0x5a8] sm:$0xff]   ;;  %v12683_v37 = vld [vmem:[%s16024_s5 + $0x590] sm:$0xff]  }
 0x586   : > { %v12684_v52 = vld [vmem:[%s16024_s5 + $0x5b0] sm:$0xff]  }
 0x587   : > { %11984 = vmatpush3.bf16.msra.mxu0 %v12659_v51  ;;  %11996 = vmatpush3.bf16.msra.mxu1 %v12660_v12 }
 0x588   : > { %11985 = vmatprep.subr.bf16.mxu0 %v15519_v17  ;;  %11997 = vmatprep.subr.bf16.mxu1 %v15519_v17 }
 0x58b   : > { %11986 = vmatpush3.bf16.msra.mxu0 %v12661_v26  ;;  %11998 = vmatpush3.bf16.msra.mxu1 %v12662_v34 }
 0x58c   : > { %12003 = vmatprep.subr.bf16.mxu0 %v15519_v17  ;;  %12015 = vmatprep.subr.bf16.mxu1 %v15519_v17 }
 0x58e   : > { %11988 = vmatmul.mubr.msk.bf16.vlgmr.msra.gmra.mrb[168].mxu0 %vm5968_vm14, %v8978_v55  ;;  %12000 = vmatmul.mubr.msk.bf16.vlgmr.msra.gmra.mrb[176].mxu1 %vm5968_vm14, %v9057_v24  ;;  %v9530_v55 = vld [vmem:[#allocation4 + $0x39] sm:$0x1]  ;;  %v12687_v24 = vld [vmem:[%s16024_s5 + $0x5c0] sm:$0xff]  }
 0x58f   : > { %12004 = vmatpush3.bf16.msra.mxu0 %v12663_v40  ;;  %12016 = vmatpush3.bf16.msra.mxu1 %v12664_v0  ;;  %v12686_v40 = vld [vmem:[%s16024_s5 + $0x5b8] sm:$0xff]  }
 0x590   : > { %12005 = vmatprep.subr.bf16.mxu0 %v15519_v17  ;;  %12017 = vmatprep.subr.bf16.mxu1 %v15519_v17  ;;  %v9451_v0 = vld [vmem:[#allocation4 + $0x38] sm:$0x1] }
 0x591   : > { %v6995_v33 = vpop.f32.mrb[116].mxu0  ;;  %v7074_v38 = vpop.f32.mrb[124].mxu1  ;;  %12011 = vmatprep.mubr.msk.bf16.mxu0 %vm12747_vm3, %v15519_v17  ;;  %12023 = vmatprep.mubr.msk.bf16.mxu1 %vm12747_vm3, %v15519_v17 }
 0x592   : > { %v7001_v11 = vadd.f32 %v6995_v33, %v6922_v7  ;;  %v11677_v57 = vpop.f32.mrb[117].mxu0  ;;  %v11689_v41 = vpop.f32.mrb[125].mxu1  ;;  %v9531_v33 = vpack.c.bf16 %v9530_v55, %v9530_v55 }
 0x593   : > { %v6998_v19 = vpop.f32.mrb[118].mxu0  ;;  %v7077_v9 = vpop.f32.mrb[126].mxu1  ;;  %12006 = vmatpush3.bf16.msra.mxu0 %v12665_v18  ;;  %12018 = vmatpush3.bf16.msra.mxu1 %v12666_v43  ;;  %v12688_v18 = vld [vmem:[%s16024_s5 + $0x5e0] sm:$0xff]   ;;  %v9452_v43 = vpack.c.bf16 %v9451_v0, %v9451_v0 }
 0x594   : > { %v7080_v23 = vadd.f32 %v7074_v38, %v7001_v11  ;;  %v11678_v56 = vpop.f32.mrb[119].mxu0  ;;  %v11690_v2 = vpop.f32.mrb[127].mxu1  ;;  %12007 = vmatprep.subr.bf16.mxu0 %v15519_v17  ;;  %12019 = vmatprep.subr.bf16.mxu1 %v15519_v17  ;;  %v12689_v38 = vld [vmem:[%s16024_s5 + $0x5c8] sm:$0xff]  }
 0x595   : > { %v12690_v11 = vld [vmem:[%s16024_s5 + $0x5e8] sm:$0xff]   ;;  %v12691_v56 = vld [vmem:[%s16024_s5 + $0x5d0] sm:$0xff]  }
 0x596   : > { %v12692_v2 = vld [vmem:[%s16024_s5 + $0x5f0] sm:$0xff]  }
 0x597   : > { %12008 = vmatpush3.bf16.msra.mxu0 %v12667_v14  ;;  %12020 = vmatpush3.bf16.msra.mxu1 %v12668_v13 }
 0x598   : > { %12009 = vmatprep.subr.bf16.mxu0 %v15519_v17  ;;  %12021 = vmatprep.subr.bf16.mxu1 %v15519_v17 }
 0x59b   : > { %12010 = vmatpush3.bf16.msra.mxu0 %v12669_v58  ;;  %12022 = vmatpush3.bf16.msra.mxu1 %v12670_v60 }
 0x59c   : > { %12027 = vmatprep.subr.bf16.mxu0 %v15519_v17  ;;  %12039 = vmatprep.subr.bf16.mxu1 %v15519_v17 }
 0x59e   : > { %12012 = vmatmul.mubr.msk.bf16.vlgmr.msra.gmra.mrb[172].mxu0 %vm5968_vm14, %v9136_v5  ;;  %12024 = vmatmul.mubr.msk.bf16.vlgmr.msra.gmra.mrb[180].mxu1 %vm5968_vm14, %v9215_v31  ;;  %v9688_v5 = vld [vmem:[#allocation4 + $0x3b] sm:$0x1]  ;;  %v12695_v31 = vld [vmem:[%s16024_s5 + $0x600] sm:$0xff]  }
 0x59f   : > { %12028 = vmatpush3.bf16.msra.mxu0 %v12671_v1  ;;  %12040 = vmatpush3.bf16.msra.mxu1 %v12672_v35  ;;  %v12694_v1 = vld [vmem:[%s16024_s5 + $0x5f8] sm:$0xff]  }
 0x5a0   : > { %12029 = vmatprep.subr.bf16.mxu0 %v15519_v17  ;;  %12041 = vmatprep.subr.bf16.mxu1 %v15519_v17  ;;  %v9609_v35 = vld [vmem:[#allocation4 + $0x3a] sm:$0x1] }
 0x5a1   : > { %v7153_v29 = vpop.f32.mrb[120].mxu0  ;;  %v7232_v63 = vpop.f32.mrb[128].mxu1  ;;  %12035 = vmatprep.mubr.msk.bf16.mxu0 %vm12747_vm3, %v15519_v17  ;;  %12047 = vmatprep.mubr.msk.bf16.mxu1 %vm12747_vm3, %v15519_v17 }
 0x5a2   : > { %v7159_v3 = vadd.f32 %v7153_v29, %v7080_v23  ;;  %v11701_v6 = vpop.f32.mrb[121].mxu0  ;;  %v11713_v47 = vpop.f32.mrb[129].mxu1  ;;  %v12696_v29 = vld [vmem:[%s16024_s5 + $0x608] sm:$0xff]  }
 0x5a3   : > { %v7156_v10 = vpop.f32.mrb[122].mxu0  ;;  %v7235_v50 = vpop.f32.mrb[130].mxu1  ;;  %12030 = vmatpush3.bf16.msra.mxu0 %v12673_v62  ;;  %12042 = vmatpush3.bf16.msra.mxu1 %v12674_v16  ;;  %v9610_v62 = vpack.c.bf16 %v9609_v35, %v9609_v35  ;;  %v9689_v16 = vpack.c.bf16 %v9688_v5, %v9688_v5 }
 0x5a4   : > { %v7238_v20 = vadd.f32 %v7232_v63, %v7159_v3  ;;  %v11702_v39 = vpop.f32.mrb[123].mxu0  ;;  %v11714_v59 = vpop.f32.mrb[131].mxu1  ;;  %12031 = vmatprep.subr.bf16.mxu0 %v15519_v17  ;;  %12043 = vmatprep.subr.bf16.mxu1 %v15519_v17 }
 0x5a7   : > { %12032 = vmatpush3.bf16.msra.mxu0 %v12675_v21  ;;  %12044 = vmatpush3.bf16.msra.mxu1 %v12676_v36  ;;  %v12697_v36 = vld [vmem:[%s16024_s5 + $0x610] sm:$0xff]  }
 0x5a8   : > { %12033 = vmatprep.subr.bf16.mxu0 %v15519_v17  ;;  %12045 = vmatprep.subr.bf16.mxu1 %v15519_v17 }
 0x5ab   : > { %12034 = vmatpush3.bf16.msra.mxu0 %v12677_v28  ;;  %12046 = vmatpush3.bf16.msra.mxu1 %v12678_v54  ;;  %v12732_v28 = vld [vmem:[#allocation3] sm:$0xff]  ;;  %v9767_v54 = vld [vmem:[#allocation4 + $0x3c] sm:$0x1] }
 0x5ac   : > { %12051 = vmatprep.subr.bf16.mxu0 %v15519_v17  ;;  %12063 = vmatprep.subr.bf16.mxu1 %v15519_v17  ;;  %v9768_v25 = vpack.c.bf16 %v9767_v54, %v9767_v54 }
 0x5ae   : > { %12036 = vmatmul.mubr.msk.bf16.vlgmr.msra.gmra.mrb[176].mxu0 %vm5968_vm14, %v9294_v32  ;;  %12048 = vmatmul.mubr.msk.bf16.vlgmr.msra.gmra.mrb[184].mxu1 %vm5968_vm14, %v9373_v8 }
 0x5af   : > { %12052 = vmatpush3.bf16.msra.mxu0 %v12679_v27  ;;  %12064 = vmatpush3.bf16.msra.mxu1 %v12680_v45 }
 0x5b0   : > { %12053 = vmatprep.subr.bf16.mxu0 %v15519_v17  ;;  %12065 = vmatprep.subr.bf16.mxu1 %v15519_v17 }
 0x5b1   : > { %v7311_v44 = vpop.f32.mrb[124].mxu0  ;;  %v7390_v22 = vpop.f32.mrb[132].mxu1  ;;  %12059 = vmatprep.mubr.msk.bf16.mxu0 %vm12747_vm3, %v15519_v17  ;;  %12071 = vmatprep.mubr.msk.bf16.mxu1 %vm12747_vm3, %v15519_v17 }
 0x5b2   : > { %v7317_v48 = vadd.f32 %v7311_v44, %v7238_v20  ;;  %v11725_v61 = vpop.f32.mrb[125].mxu0  ;;  %v11737_v51 = vpop.f32.mrb[133].mxu1 }
 0x5b3   : > { %v7314_v12 = vpop.f32.mrb[126].mxu0  ;;  %v7393_v7 = vpop.f32.mrb[134].mxu1  ;;  %12054 = vmatpush3.bf16.msra.mxu0 %v12681_v46  ;;  %12066 = vmatpush3.bf16.msra.mxu1 %v12682_v42 }
 0x5b4   : > { %v7396_v26 = vadd.f32 %v7390_v22, %v7317_v48  ;;  %v11726_v34 = vpop.f32.mrb[127].mxu0  ;;  %v11738_v15 = vpop.f32.mrb[135].mxu1  ;;  %12055 = vmatprep.subr.bf16.mxu0 %v15519_v17  ;;  %12067 = vmatprep.subr.bf16.mxu1 %v15519_v17 }
 0x5b7   : > { %12056 = vmatpush3.bf16.msra.mxu0 %v12683_v37  ;;  %12068 = vmatpush3.bf16.msra.mxu1 %v12684_v52 }
 0x5b8   : > { %12057 = vmatprep.subr.bf16.mxu0 %v15519_v17  ;;  %12069 = vmatprep.subr.bf16.mxu1 %v15519_v17 }
 0x5bb   : > { %12058 = vmatpush3.bf16.msra.mxu0 %v12685_v30  ;;  %12070 = vmatpush3.bf16.msra.mxu1 %v12686_v40 }
 0x5bc   : > { %12075 = vmatprep.subr.bf16.mxu0 %v15519_v17  ;;  %12087 = vmatprep.subr.bf16.mxu1 %v15519_v17 }
 0x5be   : > { %12060 = vmatmul.mubr.msk.bf16.vlgmr.msra.gmra.mrb[180].mxu0 %vm5968_vm14, %v9452_v43  ;;  %12072 = vmatmul.mubr.msk.bf16.vlgmr.msra.gmra.mrb[188].mxu1 %vm5968_vm14, %v9531_v33 }
 0x5bf   : > { %12076 = vmatpush3.bf16.msra.mxu0 %v12687_v24  ;;  %12088 = vmatpush3.bf16.msra.mxu1 %v12688_v18 }
 0x5c0   : > { %12077 = vmatprep.subr.bf16.mxu0 %v15519_v17  ;;  %12089 = vmatprep.subr.bf16.mxu1 %v15519_v17 }
 0x5c1   : > { %v7469_v57 = vpop.f32.mrb[128].mxu0  ;;  %v7548_v41 = vpop.f32.mrb[136].mxu1  ;;  %12083 = vmatprep.mubr.msk.bf16.mxu0 %vm12747_vm3, %v15519_v17  ;;  %12095 = vmatprep.mubr.msk.bf16.mxu1 %vm12747_vm3, %v15519_v17 }
 0x5c2   : > { %v7475_v19 = vadd.f32 %v7469_v57, %v7396_v26  ;;  %v11749_v9 = vpop.f32.mrb[129].mxu0  ;;  %v11761_v14 = vpop.f32.mrb[137].mxu1 }
 0x5c3   : > { %v7472_v13 = vpop.f32.mrb[130].mxu0  ;;  %v7551_v23 = vpop.f32.mrb[138].mxu1  ;;  %12078 = vmatpush3.bf16.msra.mxu0 %v12689_v38  ;;  %12090 = vmatpush3.bf16.msra.mxu1 %v12690_v11 }
 0x5c4   : > { %v7554_v58 = vadd.f32 %v7548_v41, %v7475_v19  ;;  %v11750_v60 = vpop.f32.mrb[131].mxu0  ;;  %v11762_v49 = vpop.f32.mrb[139].mxu1  ;;  %12079 = vmatprep.subr.bf16.mxu0 %v15519_v17  ;;  %12091 = vmatprep.subr.bf16.mxu1 %v15519_v17 }
 0x5c7   : > { %12080 = vmatpush3.bf16.msra.mxu0 %v12691_v56  ;;  %12092 = vmatpush3.bf16.msra.mxu1 %v12692_v2 }
 0x5c8   : > { %12081 = vmatprep.subr.bf16.mxu0 %v15519_v17  ;;  %12093 = vmatprep.subr.bf16.mxu1 %v15519_v17 }
 0x5cb   : > { %12082 = vmatpush3.bf16.msra.mxu0 %v12693_v53  ;;  %12094 = vmatpush3.bf16.msra.mxu1 %v12694_v1 }
 0x5cc   : > { %12099 = vmatprep.subr.bf16.mxu0 %v15519_v17 }
 0x5ce   : > { %12084 = vmatmul.mubr.msk.bf16.vlgmr.msra.gmra.mrb[184].mxu0 %vm5968_vm14, %v9610_v62  ;;  %12096 = vmatmul.mubr.msk.bf16.vlgmr.msra.gmra.mrb[192].mxu1 %vm5968_vm14, %v9689_v16 }
 0x5cf   : > { %12100 = vmatpush3.bf16.msra.mxu0 %v12695_v31  ;;  %12107 = vmatprep.mubr.msk.bf16.mxu0 %vm12747_vm3, %v15519_v17 }
 0x5d0   : > { %12101 = vmatprep.subr.bf16.mxu0 %v15519_v17  ;;  %v12698_v17 = vld [vmem:[%s16024_s5 + $0x618] sm:$0xff]  }
 0x5d1   : > { %v7627_v63 = vpop.f32.mrb[132].mxu0  ;;  %v7706_v3 = vpop.f32.mrb[140].mxu1 }
 0x5d2   : > { %v7633_v6 = vadd.f32 %v7627_v63, %v7554_v58  ;;  %v11773_v47 = vpop.f32.mrb[133].mxu0  ;;  %v11785_v10 = vpop.f32.mrb[141].mxu1 }
 0x5d3   : > { %v7630_v50 = vpop.f32.mrb[134].mxu0  ;;  %v7709_v21 = vpop.f32.mrb[142].mxu1  ;;  %12102 = vmatpush3.bf16.msra.mxu0 %v12696_v29 }
 0x5d4   : > { %v7712_v20 = vadd.f32 %v7706_v3, %v7633_v6  ;;  %v11774_v39 = vpop.f32.mrb[135].mxu0  ;;  %v11786_v59 = vpop.f32.mrb[143].mxu1  ;;  %12103 = vmatprep.subr.bf16.mxu0 %v12732_v28 }
 0x5d7   : > { %12104 = vmatpush3.bf16.msra.mxu0 %v12697_v36 }
 0x5d8   : > { %12105 = vmatprep.subr.bf16.mxu0 %v12732_v28 }
 0x5db   : > { %12106 = vmatpush3.bf16.msra.mxu0 %v12698_v17 }
 0x5de   : > { %12108 = vmatmul.mubr.msk.bf16.vlgmr.msra.gmra.mrb[188].mxu0 %vm5968_vm14, %v9768_v25 }
 0x5e1   : > { %v7785_v4 = vpop.f32.mrb[136].mxu0  ;;  %v7864_v27 = vpop.f32.mrb[144].mxu1 }
 0x5e2   : > { %v7791_v45 = vadd.f32 %v7785_v4, %v7712_v20  ;;  %v11797_v32 = vpop.f32.mrb[137].mxu0  ;;  %v11809_v8 = vpop.f32.mrb[145].mxu1 }
 0x5e3   : > { %v7788_v46 = vpop.f32.mrb[138].mxu0  ;;  %v7867_v42 = vpop.f32.mrb[146].mxu1 }
 0x5e4   : > { %v7870_v44 = vadd.f32 %v7864_v27, %v7791_v45  ;;  %v11798_v22 = vpop.f32.mrb[139].mxu0  ;;  %v11810_v48 = vpop.f32.mrb[147].mxu1 }
 0x5f1   : > { %v7943_v61 = vpop.f32.mrb[140].mxu0  ;;  %v8022_v51 = vpop.f32.mrb[148].mxu1 }
 0x5f2   : > { %v7949_v12 = vadd.f32 %v7943_v61, %v7870_v44  ;;  %v11821_v7 = vpop.f32.mrb[141].mxu0  ;;  %v11833_v37 = vpop.f32.mrb[149].mxu1 }
 0x5f3   : > { %v7946_v52 = vpop.f32.mrb[142].mxu0  ;;  %v8025_v26 = vpop.f32.mrb[150].mxu1 }
 0x5f4   : > { %v8028_v34 = vadd.f32 %v8022_v51, %v7949_v12  ;;  %v11822_v15 = vpop.f32.mrb[143].mxu0  ;;  %v11834_v30 = vpop.f32.mrb[151].mxu1 }
 0x601   : > { %v8101_v40 = vpop.f32.mrb[144].mxu0  ;;  %v8180_v0 = vpop.f32.mrb[152].mxu1 }
 0x602   : > { %v8107_v55 = vadd.f32 %v8101_v40, %v8028_v34  ;;  %v11845_v24 = vpop.f32.mrb[145].mxu0  ;;  %v11857_v18 = vpop.f32.mrb[153].mxu1 }
 0x603   : > { %v8104_v43 = vpop.f32.mrb[146].mxu0  ;;  %v8183_v33 = vpop.f32.mrb[154].mxu1 }
 0x604   : > { %v8186_v38 = vadd.f32 %v8180_v0, %v8107_v55  ;;  %v11846_v11 = vpop.f32.mrb[147].mxu0  ;;  %v11858_v57 = vpop.f32.mrb[155].mxu1 }
 0x611   : > { %v8259_v41 = vpop.f32.mrb[148].mxu0  ;;  %v8338_v19 = vpop.f32.mrb[156].mxu1 }
 0x612   : > { %v8265_v9 = vadd.f32 %v8259_v41, %v8186_v38  ;;  %v11869_v14 = vpop.f32.mrb[149].mxu0  ;;  %v11881_v13 = vpop.f32.mrb[157].mxu1 }
 0x613   : > { %v8262_v23 = vpop.f32.mrb[150].mxu0  ;;  %v8341_v56 = vpop.f32.mrb[158].mxu1 }
 0x614   : > { %v8344_v2 = vadd.f32 %v8338_v19, %v8265_v9  ;;  %v11870_v58 = vpop.f32.mrb[151].mxu0  ;;  %v11882_v60 = vpop.f32.mrb[159].mxu1 }
 0x621   : > { %v8417_v49 = vpop.f32.mrb[152].mxu0  ;;  %v8496_v53 = vpop.f32.mrb[160].mxu1 }
 0x622   : > { %v8423_v1 = vadd.f32 %v8417_v49, %v8344_v2  ;;  %v11893_v35 = vpop.f32.mrb[153].mxu0  ;;  %v11905_v5 = vpop.f32.mrb[161].mxu1 }
 0x623   : > { %v8420_v31 = vpop.f32.mrb[154].mxu0  ;;  %v8499_v62 = vpop.f32.mrb[162].mxu1 }
 0x624   : > { %v8502_v16 = vadd.f32 %v8496_v53, %v8423_v1  ;;  %v11894_v29 = vpop.f32.mrb[155].mxu0  ;;  %v11906_v63 = vpop.f32.mrb[163].mxu1 }
 0x631   : > { %v8575_v3 = vpop.f32.mrb[156].mxu0  ;;  %v8654_v6 = vpop.f32.mrb[164].mxu1 }
 0x632   : > { %v8581_v47 = vadd.f32 %v8575_v3, %v8502_v16  ;;  %v11917_v10 = vpop.f32.mrb[157].mxu0  ;;  %v11929_v50 = vpop.f32.mrb[165].mxu1 }
 0x633   : > { %v8578_v21 = vpop.f32.mrb[158].mxu0  ;;  %v8657_v36 = vpop.f32.mrb[166].mxu1 }
 0x634   : > { %v8660_v20 = vadd.f32 %v8654_v6, %v8581_v47  ;;  %v11918_v39 = vpop.f32.mrb[159].mxu0  ;;  %v11930_v59 = vpop.f32.mrb[167].mxu1 }
 0x641   : > { %v8733_v28 = vpop.f32.mrb[160].mxu0  ;;  %v8812_v17 = vpop.f32.mrb[168].mxu1 }
 0x642   : > { %v8739_v54 = vadd.f32 %v8733_v28, %v8660_v20  ;;  %v11941_v25 = vpop.f32.mrb[161].mxu0  ;;  %v11953_v4 = vpop.f32.mrb[169].mxu1 }
 0x643   : > { %v8736_v27 = vpop.f32.mrb[162].mxu0  ;;  %v8815_v45 = vpop.f32.mrb[170].mxu1 }
 0x644   : > { %v8818_v32 = vadd.f32 %v8812_v17, %v8739_v54  ;;  %v11942_v8 = vpop.f32.mrb[163].mxu0  ;;  %v11954_v46 = vpop.f32.mrb[171].mxu1 }
 0x651   : > { %v8891_v42 = vpop.f32.mrb[164].mxu0  ;;  %v8970_v44 = vpop.f32.mrb[172].mxu1 }
 0x652   : > { %v8897_v22 = vadd.f32 %v8891_v42, %v8818_v32  ;;  %v11965_v48 = vpop.f32.mrb[165].mxu0  ;;  %v11977_v61 = vpop.f32.mrb[173].mxu1  ;;  %v9846_v32 = vld [vmem:[%s16025_s6] sm:$0x1] }
 0x653   : > { %v8894_v51 = vpop.f32.mrb[166].mxu0  ;;  %v8973_v12 = vpop.f32.mrb[174].mxu1  ;;  %v9849_v48 = vld [vmem:[%s16026_s7] sm:$0x1] }
 0x654   : > { %v8976_v7 = vadd.f32 %v8970_v44, %v8897_v22  ;;  %v11966_v37 = vpop.f32.mrb[167].mxu0  ;;  %v11978_v52 = vpop.f32.mrb[175].mxu1 }
 0x661   : > { %v9049_v26 = vpop.f32.mrb[168].mxu0  ;;  %v9128_v34 = vpop.f32.mrb[176].mxu1 }
 0x662   : > { %v9055_v15 = vadd.f32 %v9049_v26, %v8976_v7  ;;  %v11989_v30 = vpop.f32.mrb[169].mxu0  ;;  %v12001_v40 = vpop.f32.mrb[177].mxu1  ;;  %v9855_v7 = vld [vmem:[#allocation5] sm:$0x1] }
 0x663   : > { %v9052_v0 = vpop.f32.mrb[170].mxu0  ;;  %v9131_v55 = vpop.f32.mrb[178].mxu1 }
 0x664   : > { %v9134_v24 = vadd.f32 %v9128_v34, %v9055_v15  ;;  %v11990_v18 = vpop.f32.mrb[171].mxu0  ;;  %v12002_v43 = vpop.f32.mrb[179].mxu1 }
 0x671   : > { %v9207_v33 = vpop.f32.mrb[172].mxu0  ;;  %v9286_v38 = vpop.f32.mrb[180].mxu1 }
 0x672   : > { %v9213_v11 = vadd.f32 %v9207_v33, %v9134_v24  ;;  %v12013_v57 = vpop.f32.mrb[173].mxu0  ;;  %v12025_v41 = vpop.f32.mrb[181].mxu1 }
 0x673   : > { %v9210_v19 = vpop.f32.mrb[174].mxu0  ;;  %v9289_v9 = vpop.f32.mrb[182].mxu1 }
 0x674   : > { %v9292_v14 = vadd.f32 %v9286_v38, %v9213_v11  ;;  %v12014_v13 = vpop.f32.mrb[175].mxu0  ;;  %v12026_v23 = vpop.f32.mrb[183].mxu1 }
 0x681   : > { %v9365_v56 = vpop.f32.mrb[176].mxu0  ;;  %v9444_v2 = vpop.f32.mrb[184].mxu1 }
 0x682   : > { %v9371_v58 = vadd.f32 %v9365_v56, %v9292_v14  ;;  %v12037_v60 = vpop.f32.mrb[177].mxu0  ;;  %v12049_v49 = vpop.f32.mrb[185].mxu1 }
 0x683   : > { %v9368_v53 = vpop.f32.mrb[178].mxu0  ;;  %v9447_v1 = vpop.f32.mrb[186].mxu1 }
 0x684   : > { %v9450_v35 = vadd.f32 %v9444_v2, %v9371_v58  ;;  %v12038_v5 = vpop.f32.mrb[179].mxu0  ;;  %v12050_v31 = vpop.f32.mrb[187].mxu1 }
 0x691   : > { %v9523_v62 = vpop.f32.mrb[180].mxu0  ;;  %v9602_v16 = vpop.f32.mrb[188].mxu1 }
 0x692   : > { %v9529_v29 = vadd.f32 %v9523_v62, %v9450_v35  ;;  %v12061_v63 = vpop.f32.mrb[181].mxu0  ;;  %v12073_v3 = vpop.f32.mrb[189].mxu1 }
 0x693   : > { %v9526_v6 = vpop.f32.mrb[182].mxu0  ;;  %v9605_v47 = vpop.f32.mrb[190].mxu1 }
 0x694   : > { %v9608_v10 = vadd.f32 %v9602_v16, %v9529_v29  ;;  %v12062_v50 = vpop.f32.mrb[183].mxu0  ;;  %v12074_v21 = vpop.f32.mrb[191].mxu1 }
 0x6a1   : > { %v9681_v36 = vpop.f32.mrb[184].mxu0  ;;  %v9760_v20 = vpop.f32.mrb[192].mxu1 }
 0x6a2   : > { %v9687_v39 = vadd.f32 %v9681_v36, %v9608_v10  ;;  %v12085_v59 = vpop.f32.mrb[185].mxu0  ;;  %v12097_v28 = vpop.f32.mrb[193].mxu1 }
 0x6a3   : > { %v9684_v17 = vpop.f32.mrb[186].mxu0  ;;  %v9763_v54 = vpop.f32.mrb[194].mxu1 }
 0x6a4   : > { %v9766_v25 = vadd.f32 %v9760_v20, %v9687_v39  ;;  %v12086_v4 = vpop.f32.mrb[187].mxu0  ;;  %v12098_v27 = vpop.f32.mrb[195].mxu1 }
 0x6b1   : > { %v9839_v45 = vpop.f32.mrb[188].mxu0 }
 0x6b2   : > { %v9845_v8 = vadd.f32 %v9839_v45, %v9766_v25  ;;  %v12109_v46 = vpop.f32.mrb[189].mxu0 }
 0x6b3   : > { %v9842_v42 = vpop.f32.mrb[190].mxu0 }
 0x6b4   : > { %v9847_v44 = vadd.f32 %v9846_v32, %v9845_v8  ;;  %v12110_v22 = vpop.f32.mrb[191].mxu0 }
 0x6b6   : > { %v9848_v61 = vmax.f32 %v9847_v44, 0.0 }
 0x6b8   : > { %v9850_v51 = vmul.f32 %v9849_v48, %v9848_v61 }
 0x6ba   : > { %v9852_v12 = vsel %vm9851_vm2, %v9850_v51, 0.0 }
 0x6bb   : > { %9853 = vadd.xlane.f32.xlu0 %v9852_v12 }
 0x748   : > { %v9854_v37 = vpop.xlane.xlu0 %9853 }
 0x749   : > { %v9856_v52 = vadd.f32 %v9855_v7, %v9854_v37 }
 0x74b   : > { %9858 = vst.msk [vmem:[%s330_s22] sm:$0x1] %vm9857_vm11, %v9856_v52 }
 0x74c PF: > { %s21_s11 = sadd.s32 1, %s12739_s11  }
 0x74d   : > { %p18_p4 = scmp.ge.s32.totalorder %s21_s11, 4  }
 0x74f   :  { %20 = sbr.rel (!%p18_p4) target bundleno = 3 (0x3), region = 159 }

</bundles_post_ra>
